<compile_context>
chip_gen: v7x
topology: tpu7x:2x2x1
jax: 0.10.0
libtpu: 0.0.40
codegen_flags: <defaults>
</compile_context>

<pallas_src>
import functools

import jax
import jax.numpy as jnp
from jax import lax
from jax.experimental import pallas as pl
from jax.experimental.pallas import tpu as pltpu

BN_EPS = 1e-5
LANE = 128


def _round_up(x, m):
    return (x + m - 1) // m * m


def _pick_batch_block(n, max_nb=8):
    """Largest divisor of n that is <= max_nb (images per grid step)."""
    for nb in range(min(n, max_nb), 0, -1):
        if n % nb == 0:
            return nb
    return 1


# ----------------------------- Pallas kernels ------------------------------ #

def _zero_halo(pad_s):
    """Zero only the 1-element spatial halo ring of a (NB, Hp, Wp, C) scratch."""
    nb, hp, wp, c = pad_s.shape
    dt = pad_s.dtype
    pad_s[:, 0:1, :, :] = jnp.zeros((nb, 1, wp, c), dt)
    pad_s[:, hp - 1:hp, :, :] = jnp.zeros((nb, 1, wp, c), dt)
    pad_s[:, :, 0:1, :] = jnp.zeros((nb, hp, 1, c), dt)
    pad_s[:, :, wp - 1:wp, :] = jnp.zeros((nb, hp, 1, c), dt)


def _conv3x3(pad_s, b, wflat_ref, H, W, C):
    """3x3 'SAME' conv for image b from a zero-haloed bf16 scratch ref.

    pad_s:     (NB, H+2, W+2, C) bf16 scratch ref (zero halo ring).
    wflat_ref: (9*C, Cout) bf16 ref, rows ordered (dy, dx, c).
    returns    (H*W, Cout) float32.

    Taps are sliced straight off the ref (no full-scratch load).  No
    (H*W, 9C) im2col slab is materialized: the 3 dx taps are lane-concatenated
    once, and the 3 dy taps become 3 accumulated MXU matmuls with K = 3C.
    """
    acat = jnp.concatenate(
        [pad_s[b, :, dx:dx + W, :] for dx in range(3)], axis=-1)   # (H+2, W, 3C)
    acc = None
    for dy in range(3):
        a_dy = acat[dy:dy + H].reshape(H * W, 3 * C)
        w_dy = wflat_ref[dy * 3 * C:(dy + 1) * 3 * C, :]
        part = jnp.dot(a_dy, w_dy, preferred_element_type=jnp.float32)
        acc = part if acc is None else acc + part
    return acc


def _resblock_kernel(identity, x_ref, w1_ref, s1_ref, b1_ref,
                     w2_ref, s2_ref, b2_ref, *rest):
    """Fused conv1+BN1+ReLU+conv2+BN2+shortcut+ReLU for NB images per step."""
    if identity:
        out_ref, xpad_s, h1pad_s = rest
        wsc_ref = ssc_ref = bsc_ref = None
    else:
        wsc_ref, ssc_ref, bsc_ref, out_ref, xpad_s, h1pad_s = rest

    nb, H, W, cout_p = out_ref.shape
    cin_p = x_ref.shape[-1]

    # Only the halo ring is zeroed; interiors are fully overwritten below.
    _zero_halo(xpad_s)
    _zero_halo(h1pad_s)

    # Spatial halo of x is built in VMEM (input arrives unpadded from HBM).
    xpad_s[:, 1:H + 1, 1:W + 1, :] = x_ref[...]

    for b in range(nb):                                   # static unroll, nb <= 8
        # conv1 -> BN1(+bias folded) -> ReLU   (f32 epilogue)
        acc1 = _conv3x3(xpad_s, b, w1_ref, H, W, cin_p)
        h1 = jnp.maximum(acc1 * s1_ref[...] + b1_ref[...], 0.0)
        h1pad_s[b, 1:H + 1, 1:W + 1, :] = (
            h1.reshape(H, W, cout_p).astype(h1pad_s.dtype))

        # conv2 -> BN2(+bias folded); h1 never leaves VMEM.
        acc2 = _conv3x3(h1pad_s, b, w2_ref, H, W, cout_p)
        main = acc2 * s2_ref[...] + b2_ref[...]

        # shortcut: reads the unpadded x block (no offset-1 interior slice).
        x_flat = x_ref[b].reshape(H * W, cin_p)
        if identity:
            res = x_flat.astype(jnp.float32)
        else:
            res = jnp.dot(x_flat, wsc_ref[...],
                          preferred_element_type=jnp.float32)
            res = res * ssc_ref[...] + bsc_ref[...]

        out = jnp.maximum(main + res, 0.0)
        out_ref[b] = out.reshape(H, W, cout_p).astype(out_ref.dtype)


# ------------------------------ Wrapper (glue) ------------------------------ #

def _vmem_bytes(nb, H, W, cin_p, cout_p, weight_bytes):
    """Rough per-step VMEM footprint (bytes) for the vmem_limit hint."""
    hp = H + 2
    scratch = 2 * nb * (hp) * (W + 2) * (cin_p + cout_p)               # bf16 halos
    io = 2 * 2 * nb * H * W * cin_p + 2 * 2 * nb * H * W * cout_p      # dbl-buffered bf16 in/out
    temps = 2 * hp * W * 3 * max(cin_p, cout_p) + 3 * 4 * H * W * cout_p
    return scratch + io + 2 * weight_bytes + temps


@functools.partial(jax.jit, static_argnames=("cout",))
def residual_block_forward(x_nchw, folded, *, cout):
    x = jnp.transpose(x_nchw, (0, 2, 3, 1))                            # NCHW -> NHWC
    N, H, W, cin = x.shape
    cin_p = folded["w1"].shape[0] // 9
    cout_p = folded["w1"].shape[1]
    Hp, Wp = H + 2, W + 2

    # Lane-dense channels + bf16 cast, fused with the layout transpose.  The
    # spatial halo is built in-kernel, so a padded activation copy never
    # round-trips HBM.
    x = jnp.pad(x, ((0, 0), (0, 0), (0, 0), (0, cin_p - cin))).astype(jnp.bfloat16)

    nb = _pick_batch_block(N)                      # NB images per grid step
    identity = "wsc" not in folded

    def const_spec(arr):
        nd = arr.ndim
        return pl.BlockSpec(arr.shape, lambda n, _nd=nd: (0,) * _nd)

    operands = [x, folded["w1"], folded["s1"], folded["b1"],
                folded["w2"], folded["s2"], folded["b2"]]
    in_specs = [pl.BlockSpec((nb, H, W, cin_p), lambda n: (n, 0, 0, 0))]
    in_specs += [const_spec(a) for a in operands[1:]]
    if not identity:
        operands += [folded["wsc"], folded["ssc"], folded["bsc"]]
        in_specs += [const_spec(folded["wsc"]), const_spec(folded["ssc"]),
                     const_spec(folded["bsc"])]

    weight_bytes = sum(int(a.size) * a.dtype.itemsize for a in operands[1:])
    est = _vmem_bytes(nb, H, W, cin_p, cout_p, weight_bytes)
    vmem_limit = int(min(56 * 1024 * 1024,
                         max(32 * 1024 * 1024, (3 * est) // 2)))

    out_nhwc = pl.pallas_call(
        functools.partial(_resblock_kernel, identity),
        grid=(N // nb,),                      # halo never crosses a batch tile
        in_specs=in_specs,
        out_specs=pl.BlockSpec((nb, H, W, cout_p), lambda n: (n, 0, 0, 0)),
        out_shape=jax.ShapeDtypeStruct((N, H, W, cout_p), jnp.bfloat16),
        scratch_shapes=[pltpu.VMEM((nb, Hp, Wp, cin_p), jnp.bfloat16),
                        pltpu.VMEM((nb, Hp, Wp, cout_p), jnp.bfloat16)],
        compiler_params=pltpu.CompilerParams(
            dimension_semantics=("parallel",),          # megacore on v7x
            vmem_limit_bytes=vmem_limit),
    )(*operands)

    out = out_nhwc[..., :cout].astype(jnp.float32)      # drop padded lanes
    return jnp.transpose(out, (0, 3, 1, 2))             # back to NCHW


# --------------------------- params / reference ----------------------------- #

def _fold(conv_bias, bn_params):
    g, b, m, v = bn_params
    scale = g / jnp.sqrt(v + BN_EPS)
    bias = b + scale * (conv_bias - m)
    return scale, bias


def prepare_folded(raw, cin, cout):
    """Fold BN+bias into per-channel scale/bias; pad channels to 128 lanes;
    flatten conv weights to (9*Cin_p, Cout_p) rows ordered (dy, dx, c)."""
    cin_p = _round_up(cin, LANE)
    cout_p = _round_up(cout, LANE)

    def pad_w(w, ci, co, ci_p, co_p):
        w = jnp.pad(w, ((0, 0), (0, 0), (0, ci_p - ci), (0, co_p - co)))
        return w.reshape(9 * ci_p, co_p).astype(jnp.bfloat16)

    def pad_vec(v, cp):
        return jnp.pad(v, (0, cp - v.shape[0])).astype(jnp.float32).reshape(1, cp)

    s1, b1 = _fold(raw["b1"], raw["bn1"])
    s2, b2 = _fold(raw["b2"], raw["bn2"])
    folded = {
        "w1": pad_w(raw["w1"], cin, cout, cin_p, cout_p),
        "s1": pad_vec(s1, cout_p), "b1": pad_vec(b1, cout_p),
        "w2": pad_w(raw["w2"], cout, cout, cout_p, cout_p),
        "s2": pad_vec(s2, cout_p), "b2": pad_vec(b2, cout_p),
    }
    if "wsc" in raw:
        ssc, bsc = _fold(raw["bsc"], raw["bnsc"])
        wsc = raw["wsc"].reshape(cin, cout)
        wsc = jnp.pad(wsc, ((0, cin_p - cin), (0, cout_p - cout)))
        folded["wsc"] = wsc.astype(jnp.bfloat16)
        folded["ssc"] = pad_vec(ssc, cout_p)
        folded["bsc"] = pad_vec(bsc, cout_p)
    return folded


def init_params(key, cin, cout):
    ks = list(jax.random.split(key, 9))

    def uni(k, shape, bound):
        return jax.random.uniform(k, shape, jnp.float32, -bound, bound)

    def bn_init(k):
        k1, k2, k3, k4 = jax.random.split(k, 4)
        g = 1.0 + 0.1 * jax.random.normal(k1, (cout,), jnp.float32)
        b = 0.1 * jax.random.normal(k2, (cout,), jnp.float32)
        m = 0.1 * jax.random.normal(k3, (cout,), jnp.float32)
        v = jax.random.uniform(k4, (cout,), jnp.float32, 0.5, 1.5)
        return (g, b, m, v)

    bnd1 = 1.0 / (cin * 9) ** 0.5
    bnd2 = 1.0 / (cout * 9) ** 0.5
    raw = {
        "w1": uni(ks[0], (3, 3, cin, cout), bnd1),   # HWIO
        "b1": uni(ks[1], (cout,), bnd1),
        "bn1": bn_init(ks[2]),
        "w2": uni(ks[3], (3, 3, cout, cout), bnd2),
        "b2": uni(ks[4], (cout,), bnd2),
        "bn2": bn_init(ks[5]),
    }
    if cin != cout:
        bnds = 1.0 / cin ** 0.5
        raw["wsc"] = uni(ks[6], (1, 1, cin, cout), bnds)
        raw["bsc"] = uni(ks[7], (cout,), bnds)
        raw["bnsc"] = bn_init(ks[8])

    return raw, prepare_folded(raw, cin, cout)


def reference_forward(x_nchw, raw):
    """Pure-JAX/XLA reference (eval-mode BN), for correctness checking."""
    x = jnp.transpose(x_nchw, (0, 2, 3, 1)).astype(jnp.float32)

    def conv(y, w, b, pad):
        out = lax.conv_general_dilated(
            y, w, (1, 1), pad,
            dimension_numbers=("NHWC", "HWIO", "NHWC"),
            precision=lax.Precision.HIGHEST)
        return out + b

    def bn(y, p):
        g, b, m, v = p
        return (y - m) / jnp.sqrt(v + BN_EPS) * g + b

    out = conv(x, raw["w1"], raw["b1"], "SAME")
    out = jnp.maximum(bn(out, raw["bn1"]), 0.0)
    out = conv(out, raw["w2"], raw["b2"], "SAME")
    out = bn(out, raw["bn2"])
    if "wsc" in raw:
        res = conv(x, raw["wsc"], raw["bsc"], "VALID")
        res = bn(res, raw["bnsc"])
    else:
        res = x
    out = jnp.maximum(out + res, 0.0)
    return jnp.transpose(out, (0, 3, 1, 2))


# ---------------------------------- main ------------------------------------ #

if __name__ == "__main__":
    key = jax.random.PRNGKey(0)
    k_x, k_p, k_x2, k_p2 = jax.random.split(key, 4)

    # 1) Projection-shortcut case (in_channels != out_channels)
    N, Cin, Cout, H, W = 2, 4, 8, 16, 16
    x = jax.random.normal(k_x, (N, Cin, H, W), jnp.float32)   # PyTorch NCHW input
    raw, folded = init_params(k_p, Cin, Cout)

    out = jax.block_until_ready(residual_block_forward(x, folded, cout=Cout))
    ref = reference_forward(x, raw)
    assert out.shape == (N, Cout, H, W), out.shape
    assert jnp.allclose(out, ref, rtol=5e-2, atol=5e-2), \
        float(jnp.max(jnp.abs(out - ref)))

    # 2) Identity-shortcut case (in_channels == out_channels): no projection matmul
    x2 = jax.random.normal(k_x2, (N, Cout, H, W), jnp.float32)
    raw2, folded2 = init_params(k_p2, Cout, Cout)

    out2 = jax.block_until_ready(residual_block_forward(x2, folded2, cout=Cout))
    ref2 = reference_forward(x2, raw2)
    assert out2.shape == (N, Cout, H, W), out2.shape
    assert jnp.allclose(out2, ref2, rtol=5e-2, atol=5e-2), \
        float(jnp.max(jnp.abs(out2 - ref2)))

    print("KERNEL_OK")
</pallas_src>

<mosaic_0001>
module attributes {stable_mosaic.version = 11 : i64} {
  func.func @_resblock_kernel(%arg0: i32, %arg1: memref<2x16x16x128xbf16, #tpu.memory_space<vmem>>, %arg2: memref<1152x128xbf16, #tpu.memory_space<vmem>>, %arg3: memref<1x128xf32, #tpu.memory_space<vmem>>, %arg4: memref<1x128xf32, #tpu.memory_space<vmem>>, %arg5: memref<1152x128xbf16, #tpu.memory_space<vmem>>, %arg6: memref<1x128xf32, #tpu.memory_space<vmem>>, %arg7: memref<1x128xf32, #tpu.memory_space<vmem>>, %arg8: memref<128x128xbf16, #tpu.memory_space<vmem>>, %arg9: memref<1x128xf32, #tpu.memory_space<vmem>>, %arg10: memref<1x128xf32, #tpu.memory_space<vmem>>, %arg11: memref<2x16x16x128xbf16, #tpu.memory_space<vmem>>, %arg12: memref<2x18x18x128xbf16, #tpu.memory_space<vmem>>, %arg13: memref<2x18x18x128xbf16, #tpu.memory_space<vmem>>) attributes {dimension_semantics = [#tpu.dimension_semantics<parallel>], iteration_bounds = array<i64: 1>, scalar_prefetch = 0 : i64, scratch_operands = 2 : i64, tpu.core_type = #tpu.core_type<tc>, window_params = [{transform_indices = @transform_0, window_bounds = array<i64: 2, 16, 16, 128>}, {pipeline_mode = #tpu.pipeline_mode<synchronous>, transform_indices = @transform_1, window_bounds = array<i64: 1152, 128>}, {pipeline_mode = #tpu.pipeline_mode<synchronous>, transform_indices = @transform_2, window_bounds = array<i64: 1, 128>}, {pipeline_mode = #tpu.pipeline_mode<synchronous>, transform_indices = @transform_3, window_bounds = array<i64: 1, 128>}, {pipeline_mode = #tpu.pipeline_mode<synchronous>, transform_indices = @transform_4, window_bounds = array<i64: 1152, 128>}, {pipeline_mode = #tpu.pipeline_mode<synchronous>, transform_indices = @transform_5, window_bounds = array<i64: 1, 128>}, {pipeline_mode = #tpu.pipeline_mode<synchronous>, transform_indices = @transform_6, window_bounds = array<i64: 1, 128>}, {pipeline_mode = #tpu.pipeline_mode<synchronous>, transform_indices = @transform_7, window_bounds = array<i64: 128, 128>}, {pipeline_mode = #tpu.pipeline_mode<synchronous>, transform_indices = @transform_8, window_bounds = array<i64: 1, 128>}, {pipeline_mode = #tpu.pipeline_mode<synchronous>, transform_indices = @transform_9, window_bounds = array<i64: 1, 128>}, {transform_indices = @transform_10, window_bounds = array<i64: 2, 16, 16, 128>}]} {
    %cst = arith.constant 0.000000e+00 : bf16
    %0 = vector.broadcast %cst : bf16 to vector<2x1x18x128xbf16>
    %c0 = arith.constant 0 : index
    %c0_0 = arith.constant 0 : index
    %c0_1 = arith.constant 0 : index
    %c0_2 = arith.constant 0 : index
    %1 = vector.load %arg12[%c0, %c0_0, %c0_1, %c0_2] : memref<2x18x18x128xbf16, #tpu.memory_space<vmem>>, vector<2x1x18x128xbf16>
    tpu.vector_store %arg12[%c0, %c0_0, %c0_1, %c0_2], %0 {strides = array<i32>} : memref<2x18x18x128xbf16, #tpu.memory_space<vmem>>, vector<2x1x18x128xbf16>,
    %cst_3 = arith.constant 0.000000e+00 : bf16
    %2 = vector.broadcast %cst_3 : bf16 to vector<2x1x18x128xbf16>
    %c0_4 = arith.constant 0 : index
    %c17 = arith.constant 17 : index
    %c0_5 = arith.constant 0 : index
    %c0_6 = arith.constant 0 : index
    %3 = vector.load %arg12[%c0_4, %c17, %c0_5, %c0_6] : memref<2x18x18x128xbf16, #tpu.memory_space<vmem>>, vector<2x1x18x128xbf16>
    tpu.vector_store %arg12[%c0_4, %c17, %c0_5, %c0_6], %2 {strides = array<i32>} : memref<2x18x18x128xbf16, #tpu.memory_space<vmem>>, vector<2x1x18x128xbf16>,
    %cst_7 = arith.constant 0.000000e+00 : bf16
    %4 = vector.broadcast %cst_7 : bf16 to vector<2x18x1x128xbf16>
    %c0_8 = arith.constant 0 : index
    %c0_9 = arith.constant 0 : index
    %c0_10 = arith.constant 0 : index
    %c0_11 = arith.constant 0 : index
    %5 = vector.load %arg12[%c0_8, %c0_9, %c0_10, %c0_11] : memref<2x18x18x128xbf16, #tpu.memory_space<vmem>>, vector<2x18x1x128xbf16>
    tpu.vector_store %arg12[%c0_8, %c0_9, %c0_10, %c0_11], %4 {strides = array<i32>} : memref<2x18x18x128xbf16, #tpu.memory_space<vmem>>, vector<2x18x1x128xbf16>,
    %cst_12 = arith.constant 0.000000e+00 : bf16
    %6 = vector.broadcast %cst_12 : bf16 to vector<2x18x1x128xbf16>
    %c0_13 = arith.constant 0 : index
    %c0_14 = arith.constant 0 : index
    %c17_15 = arith.constant 17 : index
    %c0_16 = arith.constant 0 : index
    %7 = vector.load %arg12[%c0_13, %c0_14, %c17_15, %c0_16] : memref<2x18x18x128xbf16, #tpu.memory_space<vmem>>, vector<2x18x1x128xbf16>
    tpu.vector_store %arg12[%c0_13, %c0_14, %c17_15, %c0_16], %6 {strides = array<i32>} : memref<2x18x18x128xbf16, #tpu.memory_space<vmem>>, vector<2x18x1x128xbf16>,
    %cst_17 = arith.constant 0.000000e+00 : bf16
    %8 = vector.broadcast %cst_17 : bf16 to vector<2x1x18x128xbf16>
    %c0_18 = arith.constant 0 : index
    %c0_19 = arith.constant 0 : index
    %c0_20 = arith.constant 0 : index
    %c0_21 = arith.constant 0 : index
    %9 = vector.load %arg13[%c0_18, %c0_19, %c0_20, %c0_21] : memref<2x18x18x128xbf16, #tpu.memory_space<vmem>>, vector<2x1x18x128xbf16>
    tpu.vector_store %arg13[%c0_18, %c0_19, %c0_20, %c0_21], %8 {strides = array<i32>} : memref<2x18x18x128xbf16, #tpu.memory_space<vmem>>, vector<2x1x18x128xbf16>,
    %cst_22 = arith.constant 0.000000e+00 : bf16
    %10 = vector.broadcast %cst_22 : bf16 to vector<2x1x18x128xbf16>
    %c0_23 = arith.constant 0 : index
    %c17_24 = arith.constant 17 : index
    %c0_25 = arith.constant 0 : index
    %c0_26 = arith.constant 0 : index
    %11 = vector.load %arg13[%c0_23, %c17_24, %c0_25, %c0_26] : memref<2x18x18x128xbf16, #tpu.memory_space<vmem>>, vector<2x1x18x128xbf16>
    tpu.vector_store %arg13[%c0_23, %c17_24, %c0_25, %c0_26], %10 {strides = array<i32>} : memref<2x18x18x128xbf16, #tpu.memory_space<vmem>>, vector<2x1x18x128xbf16>,
    %cst_27 = arith.constant 0.000000e+00 : bf16
    %12 = vector.broadcast %cst_27 : bf16 to vector<2x18x1x128xbf16>
    %c0_28 = arith.constant 0 : index
    %c0_29 = arith.constant 0 : index
    %c0_30 = arith.constant 0 : index
    %c0_31 = arith.constant 0 : index
    %13 = vector.load %arg13[%c0_28, %c0_29, %c0_30, %c0_31] : memref<2x18x18x128xbf16, #tpu.memory_space<vmem>>, vector<2x18x1x128xbf16>
    tpu.vector_store %arg13[%c0_28, %c0_29, %c0_30, %c0_31], %12 {strides = array<i32>} : memref<2x18x18x128xbf16, #tpu.memory_space<vmem>>, vector<2x18x1x128xbf16>,
    %cst_32 = arith.constant 0.000000e+00 : bf16
    %14 = vector.broadcast %cst_32 : bf16 to vector<2x18x1x128xbf16>
    %c0_33 = arith.constant 0 : index
    %c0_34 = arith.constant 0 : index
    %c17_35 = arith.constant 17 : index
    %c0_36 = arith.constant 0 : index
    %15 = vector.load %arg13[%c0_33, %c0_34, %c17_35, %c0_36] : memref<2x18x18x128xbf16, #tpu.memory_space<vmem>>, vector<2x18x1x128xbf16>
    tpu.vector_store %arg13[%c0_33, %c0_34, %c17_35, %c0_36], %14 {strides = array<i32>} : memref<2x18x18x128xbf16, #tpu.memory_space<vmem>>, vector<2x18x1x128xbf16>,
    %c0_37 = arith.constant 0 : index
    %c0_38 = arith.constant 0 : index
    %c0_39 = arith.constant 0 : index
    %c0_40 = arith.constant 0 : index
    %16 = vector.load %arg1[%c0_37, %c0_38, %c0_39, %c0_40] : memref<2x16x16x128xbf16, #tpu.memory_space<vmem>>, vector<2x16x16x128xbf16>
    %c0_41 = arith.constant 0 : index
    %c1 = arith.constant 1 : index
    %c1_42 = arith.constant 1 : index
    %c0_43 = arith.constant 0 : index
    %17 = vector.load %arg12[%c0_41, %c1, %c1_42, %c0_43] : memref<2x18x18x128xbf16, #tpu.memory_space<vmem>>, vector<2x16x16x128xbf16>
    tpu.vector_store %arg12[%c0_41, %c1, %c1_42, %c0_43], %16 {strides = array<i32>} : memref<2x18x18x128xbf16, #tpu.memory_space<vmem>>, vector<2x16x16x128xbf16>,
    %c0_44 = arith.constant 0 : index
    %c0_45 = arith.constant 0 : index
    %c0_46 = arith.constant 0 : index
    %c0_47 = arith.constant 0 : index
    %18 = vector.load %arg12[%c0_44, %c0_45, %c0_46, %c0_47] : memref<2x18x18x128xbf16, #tpu.memory_space<vmem>>, vector<1x18x16x128xbf16>
    %19 = vector.shape_cast %18 : vector<1x18x16x128xbf16> to vector<18x16x128xbf16>
    %c0_48 = arith.constant 0 : index
    %c0_49 = arith.constant 0 : index
    %c1_50 = arith.constant 1 : index
    %c0_51 = arith.constant 0 : index
    %20 = vector.load %arg12[%c0_48, %c0_49, %c1_50, %c0_51] : memref<2x18x18x128xbf16, #tpu.memory_space<vmem>>, vector<1x18x16x128xbf16>
    %21 = vector.shape_cast %20 : vector<1x18x16x128xbf16> to vector<18x16x128xbf16>
    %c0_52 = arith.constant 0 : index
    %c0_53 = arith.constant 0 : index
    %c2 = arith.constant 2 : index
    %c0_54 = arith.constant 0 : index
    %22 = vector.load %arg12[%c0_52, %c0_53, %c2, %c0_54] : memref<2x18x18x128xbf16, #tpu.memory_space<vmem>>, vector<1x18x16x128xbf16>
    %23 = vector.shape_cast %22 : vector<1x18x16x128xbf16> to vector<18x16x128xbf16>
    %24 = tpu.concatenate %19, %21, %23 in 2 : vector<18x16x128xbf16>, vector<18x16x128xbf16>, vector<18x16x128xbf16> -> vector<18x16x384xbf16>
    %25 = vector.extract_strided_slice %24 {offsets = [0, 0, 0], sizes = [16, 16, 384], strides = [1, 1, 1]} : vector<18x16x384xbf16> to vector<16x16x384xbf16>
    %26 = vector.shape_cast %25 : vector<16x16x384xbf16> to vector<256x384xbf16>
    %c0_55 = arith.constant 0 : index
    %c0_56 = arith.constant 0 : index
    %27 = vector.load %arg2[%c0_55, %c0_56] : memref<1152x128xbf16, #tpu.memory_space<vmem>>, vector<384x128xbf16>
    %cst_57 = arith.constant dense<0.000000e+00> : vector<256x128xf32>
    %28 = tpu.matmul %26, %27, %cst_57 {dimension_numbers = #tpu.dot_dimension_numbers<[1], [0], [0], [1], [0, 0, 1, 1], [], []>} : vector<256x384xbf16>, vector<384x128xbf16>, vector<256x128xf32> -> vector<256x128xf32>
    %29 = vector.extract_strided_slice %24 {offsets = [1, 0, 0], sizes = [16, 16, 384], strides = [1, 1, 1]} : vector<18x16x384xbf16> to vector<16x16x384xbf16>
    %30 = vector.shape_cast %29 : vector<16x16x384xbf16> to vector<256x384xbf16>
    %c384 = arith.constant 384 : index
    %c0_58 = arith.constant 0 : index
    %31 = vector.load %arg2[%c384, %c0_58] : memref<1152x128xbf16, #tpu.memory_space<vmem>>, vector<384x128xbf16>
    %cst_59 = arith.constant dense<0.000000e+00> : vector<256x128xf32>
    %32 = tpu.matmul %30, %31, %cst_59 {dimension_numbers = #tpu.dot_dimension_numbers<[1], [0], [0], [1], [0, 0, 1, 1], [], []>} : vector<256x384xbf16>, vector<384x128xbf16>, vector<256x128xf32> -> vector<256x128xf32>
    %33 = arith.addf %28, %32 : vector<256x128xf32>
    %34 = vector.extract_strided_slice %24 {offsets = [2, 0, 0], sizes = [16, 16, 384], strides = [1, 1, 1]} : vector<18x16x384xbf16> to vector<16x16x384xbf16>
    %35 = vector.shape_cast %34 : vector<16x16x384xbf16> to vector<256x384xbf16>
    %c768 = arith.constant 768 : index
    %c0_60 = arith.constant 0 : index
    %36 = vector.load %arg2[%c768, %c0_60] : memref<1152x128xbf16, #tpu.memory_space<vmem>>, vector<384x128xbf16>
    %cst_61 = arith.constant dense<0.000000e+00> : vector<256x128xf32>
    %37 = tpu.matmul %35, %36, %cst_61 {dimension_numbers = #tpu.dot_dimension_numbers<[1], [0], [0], [1], [0, 0, 1, 1], [], []>} : vector<256x384xbf16>, vector<384x128xbf16>, vector<256x128xf32> -> vector<256x128xf32>
    %38 = arith.addf %33, %37 : vector<256x128xf32>
    %c0_62 = arith.constant 0 : index
    %c0_63 = arith.constant 0 : index
    %39 = vector.load %arg3[%c0_62, %c0_63] : memref<1x128xf32, #tpu.memory_space<vmem>>, vector<1x128xf32>
    %40 = vector.broadcast %39 : vector<1x128xf32> to vector<256x128xf32>
    %41 = arith.mulf %38, %40 : vector<256x128xf32>
    %c0_64 = arith.constant 0 : index
    %c0_65 = arith.constant 0 : index
    %42 = vector.load %arg4[%c0_64, %c0_65] : memref<1x128xf32, #tpu.memory_space<vmem>>, vector<1x128xf32>
    %43 = vector.broadcast %42 : vector<1x128xf32> to vector<256x128xf32>
    %44 = arith.addf %41, %43 : vector<256x128xf32>
    %cst_66 = arith.constant 0.000000e+00 : f32
    %45 = vector.broadcast %cst_66 : f32 to vector<256x128xf32>
    %46 = arith.maximumf %44, %45 : vector<256x128xf32>
    %47 = vector.shape_cast %46 : vector<256x128xf32> to vector<16x16x128xf32>
    %48 = arith.truncf %47 : vector<16x16x128xf32> to vector<16x16x128xbf16>
    %c0_67 = arith.constant 0 : index
    %c1_68 = arith.constant 1 : index
    %c1_69 = arith.constant 1 : index
    %c0_70 = arith.constant 0 : index
    %49 = vector.load %arg13[%c0_67, %c1_68, %c1_69, %c0_70] : memref<2x18x18x128xbf16, #tpu.memory_space<vmem>>, vector<1x16x16x128xbf16>
    %50 = vector.shape_cast %49 : vector<1x16x16x128xbf16> to vector<16x16x128xbf16>
    %51 = vector.shape_cast %48 : vector<16x16x128xbf16> to vector<1x16x16x128xbf16>
    tpu.vector_store %arg13[%c0_67, %c1_68, %c1_69, %c0_70], %51 {strides = array<i32>} : memref<2x18x18x128xbf16, #tpu.memory_space<vmem>>, vector<1x16x16x128xbf16>,
    %c0_71 = arith.constant 0 : index
    %c0_72 = arith.constant 0 : index
    %c0_73 = arith.constant 0 : index
    %c0_74 = arith.constant 0 : index
    %52 = vector.load %arg13[%c0_71, %c0_72, %c0_73, %c0_74] : memref<2x18x18x128xbf16, #tpu.memory_space<vmem>>, vector<1x18x16x128xbf16>
    %53 = vector.shape_cast %52 : vector<1x18x16x128xbf16> to vector<18x16x128xbf16>
    %c0_75 = arith.constant 0 : index
    %c0_76 = arith.constant 0 : index
    %c1_77 = arith.constant 1 : index
    %c0_78 = arith.constant 0 : index
    %54 = vector.load %arg13[%c0_75, %c0_76, %c1_77, %c0_78] : memref<2x18x18x128xbf16, #tpu.memory_space<vmem>>, vector<1x18x16x128xbf16>
    %55 = vector.shape_cast %54 : vector<1x18x16x128xbf16> to vector<18x16x128xbf16>
    %c0_79 = arith.constant 0 : index
    %c0_80 = arith.constant 0 : index
    %c2_81 = arith.constant 2 : index
    %c0_82 = arith.constant 0 : index
    %56 = vector.load %arg13[%c0_79, %c0_80, %c2_81, %c0_82] : memref<2x18x18x128xbf16, #tpu.memory_space<vmem>>, vector<1x18x16x128xbf16>
    %57 = vector.shape_cast %56 : vector<1x18x16x128xbf16> to vector<18x16x128xbf16>
    %58 = tpu.concatenate %53, %55, %57 in 2 : vector<18x16x128xbf16>, vector<18x16x128xbf16>, vector<18x16x128xbf16> -> vector<18x16x384xbf16>
    %59 = vector.extract_strided_slice %58 {offsets = [0, 0, 0], sizes = [16, 16, 384], strides = [1, 1, 1]} : vector<18x16x384xbf16> to vector<16x16x384xbf16>
    %60 = vector.shape_cast %59 : vector<16x16x384xbf16> to vector<256x384xbf16>
    %c0_83 = arith.constant 0 : index
    %c0_84 = arith.constant 0 : index
    %61 = vector.load %arg5[%c0_83, %c0_84] : memref<1152x128xbf16, #tpu.memory_space<vmem>>, vector<384x128xbf16>
    %cst_85 = arith.constant dense<0.000000e+00> : vector<256x128xf32>
    %62 = tpu.matmul %60, %61, %cst_85 {dimension_numbers = #tpu.dot_dimension_numbers<[1], [0], [0], [1], [0, 0, 1, 1], [], []>} : vector<256x384xbf16>, vector<384x128xbf16>, vector<256x128xf32> -> vector<256x128xf32>
    %63 = vector.extract_strided_slice %58 {offsets = [1, 0, 0], sizes = [16, 16, 384], strides = [1, 1, 1]} : vector<18x16x384xbf16> to vector<16x16x384xbf16>
    %64 = vector.shape_cast %63 : vector<16x16x384xbf16> to vector<256x384xbf16>
    %c384_86 = arith.constant 384 : index
    %c0_87 = arith.constant 0 : index
    %65 = vector.load %arg5[%c384_86, %c0_87] : memref<1152x128xbf16, #tpu.memory_space<vmem>>, vector<384x128xbf16>
    %cst_88 = arith.constant dense<0.000000e+00> : vector<256x128xf32>
    %66 = tpu.matmul %64, %65, %cst_88 {dimension_numbers = #tpu.dot_dimension_numbers<[1], [0], [0], [1], [0, 0, 1, 1], [], []>} : vector<256x384xbf16>, vector<384x128xbf16>, vector<256x128xf32> -> vector<256x128xf32>
    %67 = arith.addf %62, %66 : vector<256x128xf32>
    %68 = vector.extract_strided_slice %58 {offsets = [2, 0, 0], sizes = [16, 16, 384], strides = [1, 1, 1]} : vector<18x16x384xbf16> to vector<16x16x384xbf16>
    %69 = vector.shape_cast %68 : vector<16x16x384xbf16> to vector<256x384xbf16>
    %c768_89 = arith.constant 768 : index
    %c0_90 = arith.constant 0 : index
    %70 = vector.load %arg5[%c768_89, %c0_90] : memref<1152x128xbf16, #tpu.memory_space<vmem>>, vector<384x128xbf16>
    %cst_91 = arith.constant dense<0.000000e+00> : vector<256x128xf32>
    %71 = tpu.matmul %69, %70, %cst_91 {dimension_numbers = #tpu.dot_dimension_numbers<[1], [0], [0], [1], [0, 0, 1, 1], [], []>} : vector<256x384xbf16>, vector<384x128xbf16>, vector<256x128xf32> -> vector<256x128xf32>
    %72 = arith.addf %67, %71 : vector<256x128xf32>
    %c0_92 = arith.constant 0 : index
    %c0_93 = arith.constant 0 : index
    %73 = vector.load %arg6[%c0_92, %c0_93] : memref<1x128xf32, #tpu.memory_space<vmem>>, vector<1x128xf32>
    %74 = vector.broadcast %73 : vector<1x128xf32> to vector<256x128xf32>
    %75 = arith.mulf %72, %74 : vector<256x128xf32>
    %c0_94 = arith.constant 0 : index
    %c0_95 = arith.constant 0 : index
    %76 = vector.load %arg7[%c0_94, %c0_95] : memref<1x128xf32, #tpu.memory_space<vmem>>, vector<1x128xf32>
    %77 = vector.broadcast %76 : vector<1x128xf32> to vector<256x128xf32>
    %78 = arith.addf %75, %77 : vector<256x128xf32>
    %c0_96 = arith.constant 0 : index
    %c0_97 = arith.constant 0 : index
    %c0_98 = arith.constant 0 : index
    %c0_99 = arith.constant 0 : index
    %79 = vector.load %arg1[%c0_96, %c0_97, %c0_98, %c0_99] : memref<2x16x16x128xbf16, #tpu.memory_space<vmem>>, vector<1x16x16x128xbf16>
    %80 = vector.shape_cast %79 : vector<1x16x16x128xbf16> to vector<16x16x128xbf16>
    %81 = vector.shape_cast %80 : vector<16x16x128xbf16> to vector<256x128xbf16>
    %c0_100 = arith.constant 0 : index
    %c0_101 = arith.constant 0 : index
    %82 = vector.load %arg8[%c0_100, %c0_101] : memref<128x128xbf16, #tpu.memory_space<vmem>>, vector<128x128xbf16>
    %cst_102 = arith.constant dense<0.000000e+00> : vector<256x128xf32>
    %83 = tpu.matmul %81, %82, %cst_102 {dimension_numbers = #tpu.dot_dimension_numbers<[1], [0], [0], [1], [0, 0, 1, 1], [], []>} : vector<256x128xbf16>, vector<128x128xbf16>, vector<256x128xf32> -> vector<256x128xf32>
    %c0_103 = arith.constant 0 : index
    %c0_104 = arith.constant 0 : index
    %84 = vector.load %arg9[%c0_103, %c0_104] : memref<1x128xf32, #tpu.memory_space<vmem>>, vector<1x128xf32>
    %85 = vector.broadcast %84 : vector<1x128xf32> to vector<256x128xf32>
    %86 = arith.mulf %83, %85 : vector<256x128xf32>
    %c0_105 = arith.constant 0 : index
    %c0_106 = arith.constant 0 : index
    %87 = vector.load %arg10[%c0_105, %c0_106] : memref<1x128xf32, #tpu.memory_space<vmem>>, vector<1x128xf32>
    %88 = vector.broadcast %87 : vector<1x128xf32> to vector<256x128xf32>
    %89 = arith.addf %86, %88 : vector<256x128xf32>
    %90 = arith.addf %78, %89 : vector<256x128xf32>
    %cst_107 = arith.constant 0.000000e+00 : f32
    %91 = vector.broadcast %cst_107 : f32 to vector<256x128xf32>
    %92 = arith.maximumf %90, %91 : vector<256x128xf32>
    %93 = vector.shape_cast %92 : vector<256x128xf32> to vector<16x16x128xf32>
    %94 = arith.truncf %93 : vector<16x16x128xf32> to vector<16x16x128xbf16>
    %c0_108 = arith.constant 0 : index
    %c0_109 = arith.constant 0 : index
    %c0_110 = arith.constant 0 : index
    %c0_111 = arith.constant 0 : index
    %95 = vector.load %arg11[%c0_108, %c0_109, %c0_110, %c0_111] : memref<2x16x16x128xbf16, #tpu.memory_space<vmem>>, vector<1x16x16x128xbf16>
    %96 = vector.shape_cast %95 : vector<1x16x16x128xbf16> to vector<16x16x128xbf16>
    %97 = vector.shape_cast %94 : vector<16x16x128xbf16> to vector<1x16x16x128xbf16>
    tpu.vector_store %arg11[%c0_108, %c0_109, %c0_110, %c0_111], %97 {strides = array<i32>} : memref<2x16x16x128xbf16, #tpu.memory_space<vmem>>, vector<1x16x16x128xbf16>,
    %c1_112 = arith.constant 1 : index
    %c0_113 = arith.constant 0 : index
    %c0_114 = arith.constant 0 : index
    %c0_115 = arith.constant 0 : index
    %98 = vector.load %arg12[%c1_112, %c0_113, %c0_114, %c0_115] : memref<2x18x18x128xbf16, #tpu.memory_space<vmem>>, vector<1x18x16x128xbf16>
    %99 = vector.shape_cast %98 : vector<1x18x16x128xbf16> to vector<18x16x128xbf16>
    %c1_116 = arith.constant 1 : index
    %c0_117 = arith.constant 0 : index
    %c1_118 = arith.constant 1 : index
    %c0_119 = arith.constant 0 : index
    %100 = vector.load %arg12[%c1_116, %c0_117, %c1_118, %c0_119] : memref<2x18x18x128xbf16, #tpu.memory_space<vmem>>, vector<1x18x16x128xbf16>
    %101 = vector.shape_cast %100 : vector<1x18x16x128xbf16> to vector<18x16x128xbf16>
    %c1_120 = arith.constant 1 : index
    %c0_121 = arith.constant 0 : index
    %c2_122 = arith.constant 2 : index
    %c0_123 = arith.constant 0 : index
    %102 = vector.load %arg12[%c1_120, %c0_121, %c2_122, %c0_123] : memref<2x18x18x128xbf16, #tpu.memory_space<vmem>>, vector<1x18x16x128xbf16>
    %103 = vector.shape_cast %102 : vector<1x18x16x128xbf16> to vector<18x16x128xbf16>
    %104 = tpu.concatenate %99, %101, %103 in 2 : vector<18x16x128xbf16>, vector<18x16x128xbf16>, vector<18x16x128xbf16> -> vector<18x16x384xbf16>
    %105 = vector.extract_strided_slice %104 {offsets = [0, 0, 0], sizes = [16, 16, 384], strides = [1, 1, 1]} : vector<18x16x384xbf16> to vector<16x16x384xbf16>
    %106 = vector.shape_cast %105 : vector<16x16x384xbf16> to vector<256x384xbf16>
    %c0_124 = arith.constant 0 : index
    %c0_125 = arith.constant 0 : index
    %107 = vector.load %arg2[%c0_124, %c0_125] : memref<1152x128xbf16, #tpu.memory_space<vmem>>, vector<384x128xbf16>
    %cst_126 = arith.constant dense<0.000000e+00> : vector<256x128xf32>
    %108 = tpu.matmul %106, %107, %cst_126 {dimension_numbers = #tpu.dot_dimension_numbers<[1], [0], [0], [1], [0, 0, 1, 1], [], []>} : vector<256x384xbf16>, vector<384x128xbf16>, vector<256x128xf32> -> vector<256x128xf32>
    %109 = vector.extract_strided_slice %104 {offsets = [1, 0, 0], sizes = [16, 16, 384], strides = [1, 1, 1]} : vector<18x16x384xbf16> to vector<16x16x384xbf16>
    %110 = vector.shape_cast %109 : vector<16x16x384xbf16> to vector<256x384xbf16>
    %c384_127 = arith.constant 384 : index
    %c0_128 = arith.constant 0 : index
    %111 = vector.load %arg2[%c384_127, %c0_128] : memref<1152x128xbf16, #tpu.memory_space<vmem>>, vector<384x128xbf16>
    %cst_129 = arith.constant dense<0.000000e+00> : vector<256x128xf32>
    %112 = tpu.matmul %110, %111, %cst_129 {dimension_numbers = #tpu.dot_dimension_numbers<[1], [0], [0], [1], [0, 0, 1, 1], [], []>} : vector<256x384xbf16>, vector<384x128xbf16>, vector<256x128xf32> -> vector<256x128xf32>
    %113 = arith.addf %108, %112 : vector<256x128xf32>
    %114 = vector.extract_strided_slice %104 {offsets = [2, 0, 0], sizes = [16, 16, 384], strides = [1, 1, 1]} : vector<18x16x384xbf16> to vector<16x16x384xbf16>
    %115 = vector.shape_cast %114 : vector<16x16x384xbf16> to vector<256x384xbf16>
    %c768_130 = arith.constant 768 : index
    %c0_131 = arith.constant 0 : index
    %116 = vector.load %arg2[%c768_130, %c0_131] : memref<1152x128xbf16, #tpu.memory_space<vmem>>, vector<384x128xbf16>
    %cst_132 = arith.constant dense<0.000000e+00> : vector<256x128xf32>
    %117 = tpu.matmul %115, %116, %cst_132 {dimension_numbers = #tpu.dot_dimension_numbers<[1], [0], [0], [1], [0, 0, 1, 1], [], []>} : vector<256x384xbf16>, vector<384x128xbf16>, vector<256x128xf32> -> vector<256x128xf32>
    %118 = arith.addf %113, %117 : vector<256x128xf32>
    %c0_133 = arith.constant 0 : index
    %c0_134 = arith.constant 0 : index
    %119 = vector.load %arg3[%c0_133, %c0_134] : memref<1x128xf32, #tpu.memory_space<vmem>>, vector<1x128xf32>
    %120 = vector.broadcast %119 : vector<1x128xf32> to vector<256x128xf32>
    %121 = arith.mulf %118, %120 : vector<256x128xf32>
    %c0_135 = arith.constant 0 : index
    %c0_136 = arith.constant 0 : index
    %122 = vector.load %arg4[%c0_135, %c0_136] : memref<1x128xf32, #tpu.memory_space<vmem>>, vector<1x128xf32>
    %123 = vector.broadcast %122 : vector<1x128xf32> to vector<256x128xf32>
    %124 = arith.addf %121, %123 : vector<256x128xf32>
    %cst_137 = arith.constant 0.000000e+00 : f32
    %125 = vector.broadcast %cst_137 : f32 to vector<256x128xf32>
    %126 = arith.maximumf %124, %125 : vector<256x128xf32>
    %127 = vector.shape_cast %126 : vector<256x128xf32> to vector<16x16x128xf32>
    %128 = arith.truncf %127 : vector<16x16x128xf32> to vector<16x16x128xbf16>
    %c1_138 = arith.constant 1 : index
    %c1_139 = arith.constant 1 : index
    %c1_140 = arith.constant 1 : index
    %c0_141 = arith.constant 0 : index
    %129 = vector.load %arg13[%c1_138, %c1_139, %c1_140, %c0_141] : memref<2x18x18x128xbf16, #tpu.memory_space<vmem>>, vector<1x16x16x128xbf16>
    %130 = vector.shape_cast %129 : vector<1x16x16x128xbf16> to vector<16x16x128xbf16>
    %131 = vector.shape_cast %128 : vector<16x16x128xbf16> to vector<1x16x16x128xbf16>
    tpu.vector_store %arg13[%c1_138, %c1_139, %c1_140, %c0_141], %131 {strides = array<i32>} : memref<2x18x18x128xbf16, #tpu.memory_space<vmem>>, vector<1x16x16x128xbf16>,
    %c1_142 = arith.constant 1 : index
    %c0_143 = arith.constant 0 : index
    %c0_144 = arith.constant 0 : index
    %c0_145 = arith.constant 0 : index
    %132 = vector.load %arg13[%c1_142, %c0_143, %c0_144, %c0_145] : memref<2x18x18x128xbf16, #tpu.memory_space<vmem>>, vector<1x18x16x128xbf16>
    %133 = vector.shape_cast %132 : vector<1x18x16x128xbf16> to vector<18x16x128xbf16>
    %c1_146 = arith.constant 1 : index
    %c0_147 = arith.constant 0 : index
    %c1_148 = arith.constant 1 : index
    %c0_149 = arith.constant 0 : index
    %134 = vector.load %arg13[%c1_146, %c0_147, %c1_148, %c0_149] : memref<2x18x18x128xbf16, #tpu.memory_space<vmem>>, vector<1x18x16x128xbf16>
    %135 = vector.shape_cast %134 : vector<1x18x16x128xbf16> to vector<18x16x128xbf16>
    %c1_150 = arith.constant 1 : index
    %c0_151 = arith.constant 0 : index
    %c2_152 = arith.constant 2 : index
    %c0_153 = arith.constant 0 : index
    %136 = vector.load %arg13[%c1_150, %c0_151, %c2_152, %c0_153] : memref<2x18x18x128xbf16, #tpu.memory_space<vmem>>, vector<1x18x16x128xbf16>
    %137 = vector.shape_cast %136 : vector<1x18x16x128xbf16> to vector<18x16x128xbf16>
    %138 = tpu.concatenate %133, %135, %137 in 2 : vector<18x16x128xbf16>, vector<18x16x128xbf16>, vector<18x16x128xbf16> -> vector<18x16x384xbf16>
    %139 = vector.extract_strided_slice %138 {offsets = [0, 0, 0], sizes = [16, 16, 384], strides = [1, 1, 1]} : vector<18x16x384xbf16> to vector<16x16x384xbf16>
    %140 = vector.shape_cast %139 : vector<16x16x384xbf16> to vector<256x384xbf16>
    %c0_154 = arith.constant 0 : index
    %c0_155 = arith.constant 0 : index
    %141 = vector.load %arg5[%c0_154, %c0_155] : memref<1152x128xbf16, #tpu.memory_space<vmem>>, vector<384x128xbf16>
    %cst_156 = arith.constant dense<0.000000e+00> : vector<256x128xf32>
    %142 = tpu.matmul %140, %141, %cst_156 {dimension_numbers = #tpu.dot_dimension_numbers<[1], [0], [0], [1], [0, 0, 1, 1], [], []>} : vector<256x384xbf16>, vector<384x128xbf16>, vector<256x128xf32> -> vector<256x128xf32>
    %143 = vector.extract_strided_slice %138 {offsets = [1, 0, 0], sizes = [16, 16, 384], strides = [1, 1, 1]} : vector<18x16x384xbf16> to vector<16x16x384xbf16>
    %144 = vector.shape_cast %143 : vector<16x16x384xbf16> to vector<256x384xbf16>
    %c384_157 = arith.constant 384 : index
    %c0_158 = arith.constant 0 : index
    %145 = vector.load %arg5[%c384_157, %c0_158] : memref<1152x128xbf16, #tpu.memory_space<vmem>>, vector<384x128xbf16>
    %cst_159 = arith.constant dense<0.000000e+00> : vector<256x128xf32>
    %146 = tpu.matmul %144, %145, %cst_159 {dimension_numbers = #tpu.dot_dimension_numbers<[1], [0], [0], [1], [0, 0, 1, 1], [], []>} : vector<256x384xbf16>, vector<384x128xbf16>, vector<256x128xf32> -> vector<256x128xf32>
    %147 = arith.addf %142, %146 : vector<256x128xf32>
    %148 = vector.extract_strided_slice %138 {offsets = [2, 0, 0], sizes = [16, 16, 384], strides = [1, 1, 1]} : vector<18x16x384xbf16> to vector<16x16x384xbf16>
    %149 = vector.shape_cast %148 : vector<16x16x384xbf16> to vector<256x384xbf16>
    %c768_160 = arith.constant 768 : index
    %c0_161 = arith.constant 0 : index
    %150 = vector.load %arg5[%c768_160, %c0_161] : memref<1152x128xbf16, #tpu.memory_space<vmem>>, vector<384x128xbf16>
    %cst_162 = arith.constant dense<0.000000e+00> : vector<256x128xf32>
    %151 = tpu.matmul %149, %150, %cst_162 {dimension_numbers = #tpu.dot_dimension_numbers<[1], [0], [0], [1], [0, 0, 1, 1], [], []>} : vector<256x384xbf16>, vector<384x128xbf16>, vector<256x128xf32> -> vector<256x128xf32>
    %152 = arith.addf %147, %151 : vector<256x128xf32>
    %c0_163 = arith.constant 0 : index
    %c0_164 = arith.constant 0 : index
    %153 = vector.load %arg6[%c0_163, %c0_164] : memref<1x128xf32, #tpu.memory_space<vmem>>, vector<1x128xf32>
    %154 = vector.broadcast %153 : vector<1x128xf32> to vector<256x128xf32>
    %155 = arith.mulf %152, %154 : vector<256x128xf32>
    %c0_165 = arith.constant 0 : index
    %c0_166 = arith.constant 0 : index
    %156 = vector.load %arg7[%c0_165, %c0_166] : memref<1x128xf32, #tpu.memory_space<vmem>>, vector<1x128xf32>
    %157 = vector.broadcast %156 : vector<1x128xf32> to vector<256x128xf32>
    %158 = arith.addf %155, %157 : vector<256x128xf32>
    %c1_167 = arith.constant 1 : index
    %c0_168 = arith.constant 0 : index
    %c0_169 = arith.constant 0 : index
    %c0_170 = arith.constant 0 : index
    %159 = vector.load %arg1[%c1_167, %c0_168, %c0_169, %c0_170] : memref<2x16x16x128xbf16, #tpu.memory_space<vmem>>, vector<1x16x16x128xbf16>
    %160 = vector.shape_cast %159 : vector<1x16x16x128xbf16> to vector<16x16x128xbf16>
    %161 = vector.shape_cast %160 : vector<16x16x128xbf16> to vector<256x128xbf16>
    %c0_171 = arith.constant 0 : index
    %c0_172 = arith.constant 0 : index
    %162 = vector.load %arg8[%c0_171, %c0_172] : memref<128x128xbf16, #tpu.memory_space<vmem>>, vector<128x128xbf16>
    %cst_173 = arith.constant dense<0.000000e+00> : vector<256x128xf32>
    %163 = tpu.matmul %161, %162, %cst_173 {dimension_numbers = #tpu.dot_dimension_numbers<[1], [0], [0], [1], [0, 0, 1, 1], [], []>} : vector<256x128xbf16>, vector<128x128xbf16>, vector<256x128xf32> -> vector<256x128xf32>
    %c0_174 = arith.constant 0 : index
    %c0_175 = arith.constant 0 : index
    %164 = vector.load %arg9[%c0_174, %c0_175] : memref<1x128xf32, #tpu.memory_space<vmem>>, vector<1x128xf32>
    %165 = vector.broadcast %164 : vector<1x128xf32> to vector<256x128xf32>
    %166 = arith.mulf %163, %165 : vector<256x128xf32>
    %c0_176 = arith.constant 0 : index
    %c0_177 = arith.constant 0 : index
    %167 = vector.load %arg10[%c0_176, %c0_177] : memref<1x128xf32, #tpu.memory_space<vmem>>, vector<1x128xf32>
    %168 = vector.broadcast %167 : vector<1x128xf32> to vector<256x128xf32>
    %169 = arith.addf %166, %168 : vector<256x128xf32>
    %170 = arith.addf %158, %169 : vector<256x128xf32>
    %cst_178 = arith.constant 0.000000e+00 : f32
    %171 = vector.broadcast %cst_178 : f32 to vector<256x128xf32>
    %172 = arith.maximumf %170, %171 : vector<256x128xf32>
    %173 = vector.shape_cast %172 : vector<256x128xf32> to vector<16x16x128xf32>
    %174 = arith.truncf %173 : vector<16x16x128xf32> to vector<16x16x128xbf16>
    %c1_179 = arith.constant 1 : index
    %c0_180 = arith.constant 0 : index
    %c0_181 = arith.constant 0 : index
    %c0_182 = arith.constant 0 : index
    %175 = vector.load %arg11[%c1_179, %c0_180, %c0_181, %c0_182] : memref<2x16x16x128xbf16, #tpu.memory_space<vmem>>, vector<1x16x16x128xbf16>
    %176 = vector.shape_cast %175 : vector<1x16x16x128xbf16> to vector<16x16x128xbf16>
    %177 = vector.shape_cast %174 : vector<16x16x128xbf16> to vector<1x16x16x128xbf16>
    tpu.vector_store %arg11[%c1_179, %c0_180, %c0_181, %c0_182], %177 {strides = array<i32>} : memref<2x16x16x128xbf16, #tpu.memory_space<vmem>>, vector<1x16x16x128xbf16>,
    return
  }
  func.func @transform_0(%arg0: i32) -> (i32, i32, i32, i32) {
    %c0_i32 = arith.constant 0 : i32
    %c0_i32_0 = arith.constant 0 : i32
    %c0_i32_1 = arith.constant 0 : i32
    %c0_i32_2 = arith.constant 0 : i32
    return %arg0, %c0_i32, %c0_i32_0, %c0_i32_1 : i32, i32, i32, i32
  }
  func.func @transform_1(%arg0: i32) -> (i32, i32) {
    %c0_i32 = arith.constant 0 : i32
    %c0_i32_0 = arith.constant 0 : i32
    %c0_i32_1 = arith.constant 0 : i32
    return %c0_i32, %c0_i32_0 : i32, i32
  }
  func.func @transform_2(%arg0: i32) -> (i32, i32) {
    %c0_i32 = arith.constant 0 : i32
    %c0_i32_0 = arith.constant 0 : i32
    %c0_i32_1 = arith.constant 0 : i32
    return %c0_i32, %c0_i32_0 : i32, i32
  }
  func.func @transform_3(%arg0: i32) -> (i32, i32) {
    %c0_i32 = arith.constant 0 : i32
    %c0_i32_0 = arith.constant 0 : i32
    %c0_i32_1 = arith.constant 0 : i32
    return %c0_i32, %c0_i32_0 : i32, i32
  }
  func.func @transform_4(%arg0: i32) -> (i32, i32) {
    %c0_i32 = arith.constant 0 : i32
    %c0_i32_0 = arith.constant 0 : i32
    %c0_i32_1 = arith.constant 0 : i32
    return %c0_i32, %c0_i32_0 : i32, i32
  }
  func.func @transform_5(%arg0: i32) -> (i32, i32) {
    %c0_i32 = arith.constant 0 : i32
    %c0_i32_0 = arith.constant 0 : i32
    %c0_i32_1 = arith.constant 0 : i32
    return %c0_i32, %c0_i32_0 : i32, i32
  }
  func.func @transform_6(%arg0: i32) -> (i32, i32) {
    %c0_i32 = arith.constant 0 : i32
    %c0_i32_0 = arith.constant 0 : i32
    %c0_i32_1 = arith.constant 0 : i32
    return %c0_i32, %c0_i32_0 : i32, i32
  }
  func.func @transform_7(%arg0: i32) -> (i32, i32) {
    %c0_i32 = arith.constant 0 : i32
    %c0_i32_0 = arith.constant 0 : i32
    %c0_i32_1 = arith.constant 0 : i32
    return %c0_i32, %c0_i32_0 : i32, i32
  }
  func.func @transform_8(%arg0: i32) -> (i32, i32) {
    %c0_i32 = arith.constant 0 : i32
    %c0_i32_0 = arith.constant 0 : i32
    %c0_i32_1 = arith.constant 0 : i32
    return %c0_i32, %c0_i32_0 : i32, i32
  }
  func.func @transform_9(%arg0: i32) -> (i32, i32) {
    %c0_i32 = arith.constant 0 : i32
    %c0_i32_0 = arith.constant 0 : i32
    %c0_i32_1 = arith.constant 0 : i32
    return %c0_i32, %c0_i32_0 : i32, i32
  }
  func.func @transform_10(%arg0: i32) -> (i32, i32, i32, i32) {
    %c0_i32 = arith.constant 0 : i32
    %c0_i32_0 = arith.constant 0 : i32
    %c0_i32_1 = arith.constant 0 : i32
    %c0_i32_2 = arith.constant 0 : i32
    return %arg0, %c0_i32, %c0_i32_0, %c0_i32_1 : i32, i32, i32, i32
  }
}

</mosaic_0001>

<bundles_post_ra>
// kernel: residual_block_forward.1
= control target key start
LH: loop header
LB: loop body
LE: loop exit
PB: predicated region body
PF: predicated region fallthrough
CT: control target
= control target key end

     0   :  { %15 = vsyncpa [#allocation5], 0  ;;  %s17561_s13 = smov [#allocation4]   ;;  %s22393_s0 = inlined_call_operand.vmem [shape: bf16[2,16,16,128], index: 0, kind: input, shape index: {}]   ;;  %s22394_s1 = inlined_call_operand.vmem [shape: bf16[1152,128], index: 1, kind: input, shape index: {}]   ;;  %s22395_s2 = inlined_call_operand.vmem [shape: f32[1,128], index: 2, kind: input, shape index: {}]   ;;  %s22396_s3 = inlined_call_operand.vmem [shape: f32[1,128], index: 3, kind: input, shape index: {}]   ;;  %s22397_s4 = inlined_call_operand.hbm [shape: bf16[1152,128], index: 4, kind: input, shape index: {}]   ;;  %s22398_s5 = inlined_call_operand.vmem [shape: f32[1,128], index: 5, kind: input, shape index: {}]   ;;  %s22399_s6 = inlined_call_operand.vmem [shape: f32[1,128], index: 6, kind: input, shape index: {}]   ;;  %s22400_s7 = inlined_call_operand.vmem [shape: bf16[128,128], index: 7, kind: input, shape index: {}]   ;;  %s22401_s8 = inlined_call_operand.vmem [shape: f32[1,128], index: 8, kind: input, shape index: {}]   ;;  %s22402_s9 = inlined_call_operand.vmem [shape: f32[1,128], index: 9, kind: input, shape index: {}]   ;;  %s22403_s10 = inlined_call_operand.vmem [shape: bf16[2,16,16,128], index: 10, kind: output, shape index: {}]  }
   0x1   :  { %s29_s14 = sshll.u32 %s17561_s13, 4  ;;  %s17537_s17 = scalar_lea.hbm %s22397_s4, 9216  ;;  %s30_s14 = int_to_ptr.vmem [resolvable:$true] %s29_s14 }
   0x2   :  { %p17538_p0 = scmp.ne.s32.totalorder %s22397_s4, %s17537_s17  ;;  %p17541_p1 = scmp.lt.u32.totalorder %s17537_s17, %s22397_s4 }
   0x4   :  { %p17543_p2 = pnand %p17541_p1, %p17538_p0 }
   0x6   :  { %17546 = shalt.err (!%p17543_p2)
}
   0x7   :  { %s17547_s22 = scalar_lea.vmem %s30_s14, 9216  ;;  %p17552_p4 = scmp.lt.s32.totalorder %s30_s14, %s30_s14 }
   0x8   :  { %p17548_p3 = scmp.ne.s32.totalorder %s30_s14, %s17547_s22  ;;  %p17553_p5 = scmp.lt.s32.totalorder %s17547_s22, %s17547_s22 }
   0xa   :  { %p17554_p6 = por %p17553_p5, %p17552_p4 }
   0xc   :  { %p17555_p7 = pnand %p17554_p6, %p17548_p3 }
   0xe   :  { %17558 = shalt.err (!%p17555_p7)
}
   0xf   :  { %s17562_s23 = smov 64   ;;  %s17563_s24 = smov 4  }
  0x10   :  { %35 = dma.hbm_to_vmem [thread:$0]  %s22397_s4, 9216, %s30_s14, [#allocation5], %s17562_s23, %s17562_s23, %s17563_s24  }
  0x11   :  { %17559 = dma.done.wait [#allocation5], 9216  }
  0x12   :  { %17560 = vsyncadd [#allocation5], 4294958080  ;;  %v16960_v0 = vld [vmem:[%s22394_s1 + $0x100] sm:$0xff]   ;;  %v16962_v2 = vld [vmem:[%s22394_s1 + $0x108] sm:$0xff]   ;;  %vm64_vm0 = vsmask.f32 256 }
  0x13   :  { %v16961_v1 = vld [vmem:[%s22394_s1 + $0xc0] sm:$0xff]   ;;  %16300 = vmatprep.subr.bf16.mxu1 %v16960_v0  ;;  %13948 = vmatprep.subr.bf16.mxu0 %v16960_v0  ;;  %v16963_v3 = vld [vmem:[%s22394_s1 + $0xc8] sm:$0xff]   ;;  %v16964_v4 = vld [vmem:[%s22394_s1 + $0x110] sm:$0xff]   ;;  %vm63_vm1 = vcmask 1040384   ;;  %v22488_v7 = vmov 0  ;;  %v22491_v10 = vmov 0 }
  0x14   :  { %16308 = vmatpush3.bf16.msra.mxu1 %v16961_v1  ;;  %13949 = vmatpush3.bf16.msra.mxu0 %v16961_v1  ;;  %v16965_v5 = vld [vmem:[%s22394_s1 + $0xd0] sm:$0xff]   ;;  %v16966_v6 = vld [vmem:[%s22394_s1 + $0x118] sm:$0xff]   ;;  %vm17654_vm2 = vmand %vm63_vm1, %vm64_vm0  ;;  %vm174_vm3 = vsmask.f32 7938  ;;  %vm577_vm5 = vsmask.f32 4368 }
  0x15   :  { %16301 = vmatprep.subr.bf16.mxu1 %v16962_v2  ;;  %13950 = vmatprep.subr.bf16.mxu0 %v16962_v2  ;;  %v22489_v7 = vsel %vm17654_vm2, 4294967295, %v22488_v7  ;;  %v16967_v8 = vld [vmem:[%s22394_s1 + $0xd8] sm:$0xff]   ;;  %v16968_v9 = vld [vmem:[%s22394_s1 + $0x120] sm:$0xff]   ;;  %vm17665_vm4 = vmand %vm63_vm1, %vm174_vm3  ;;  %vm1220_vm6 = vcmask 1043456   ;;  %v22494_v32 = vmov 0  ;;  %v22497_v41 = vmov 0 }
  0x16   :  { %22490 = vst [vmem:[#allocation7_spill] sm:$0xff] %v22489_v7  ;;  %v22492_v10 = vsel %vm17665_vm4, 4294967295, %v22491_v10  ;;  %v16969_v11 = vld [vmem:[%s22394_s1 + $0xe0] sm:$0xff]   ;;  %v16970_v12 = vld [vmem:[%s22394_s1 + $0x128] sm:$0xff]   ;;  %v203_v14 = vld [vmem:[#allocation2 + $0x74] sm:$0x1] }
  0x17   :  { %22493 = vst [vmem:[#allocation8_spill] sm:$0xff] %v22492_v10  ;;  %v93_v13 = vld [vmem:[#allocation2 + $0x6c] sm:$0x1]  ;;  %v529_v15 = vld [vmem:[%s22393_s0 + $0x40] sm:$0xf]  ;;  %v204_v17 = vsel %vm17665_vm4, 0, %v203_v14  ;;  %vm17700_vm7 = vmor %vm64_vm0, %vm577_vm5 }
  0x18   :  { %16309 = vmatpush3.bf16.msra.mxu1 %v16963_v3  ;;  %13951 = vmatpush3.bf16.msra.mxu0 %v16963_v3  ;;  %v94_v16 = vsel %vm17654_vm2, 0, %v93_v13  ;;  %v530_v18 = vld [vmem:[%s22393_s0 + $0x44] sm:$0xf]  ;;  %v716_v19 = vshrl.u32 %v529_v15, 16  ;;  %v719_v20 = vshll.u32 %v529_v15, 16  ;;  %v16971_v23 = vld [vmem:[%s22394_s1 + $0xe8] sm:$0xff]   ;;  %vm17712_vm8 = vmand %vm1220_vm6, %vm174_vm3 }
  0x19   :  { %16302 = vmatprep.subr.bf16.mxu1 %v16964_v4  ;;  %13952 = vmatprep.subr.bf16.mxu0 %v16964_v4  ;;  %95 = vst [vmem:[#allocation2 + $0x6c] sm:$0x1] %v94_v16  ;;  %205 = vst [vmem:[#allocation2 + $0x74] sm:$0x1] %v204_v17  ;;  %v724_v21 = vshrl.u32 %v530_v18, 16  ;;  %v727_v22 = vshll.u32 %v530_v18, 16 }
  0x1a   :  { %v718_v24 = vrot.slane %v716_v19, 7  ;;  %v96_v25 = vld [vmem:[#allocation2 + $0x78] sm:$0x1]  ;;  %v206_v26 = vld [vmem:[#allocation2 + $0x80] sm:$0x1]  ;;  %v16972_v27 = vld [vmem:[%s22394_s1 + $0x130] sm:$0xff]  }
  0x1b   :  { %v726_v28 = vrot.slane %v724_v21, 7  ;;  %v97_v29 = vsel %vm17654_vm2, 0, %v96_v25  ;;  %v207_v30 = vsel %vm17665_vm4, 0, %v206_v26  ;;  %v531_v31 = vld [vmem:[%s22393_s0 + $0x48] sm:$0xf]  ;;  %v22495_v32 = vsel %vm17700_vm7, 4294967295, %v22494_v32 }
  0x1c   :  { %16310 = vmatpush3.bf16.msra.mxu1 %v16965_v5  ;;  %13953 = vmatpush3.bf16.msra.mxu0 %v16965_v5  ;;  %22496 = vst [vmem:[#allocation9_spill] sm:$0xff] %v22495_v32  ;;  %v721_v33 = vor.u32 %v719_v20, %v718_v24  ;;  %v722_v34 = vrot.slane %v718_v24, 4  ;;  %98 = vst [vmem:[#allocation2 + $0x78] sm:$0x1] %v97_v29  ;;  %v532_v35 = vld [vmem:[%s22393_s0 + $0x4c] sm:$0xf] }
  0x1d   :  { %16303 = vmatprep.subr.bf16.mxu1 %v16966_v6  ;;  %13954 = vmatprep.subr.bf16.mxu0 %v16966_v6  ;;  %208 = vst [vmem:[#allocation2 + $0x80] sm:$0x1] %v207_v30  ;;  %v733_v36 = vshrl.u32 %v531_v31, 16  ;;  %v736_v37 = vshll.u32 %v531_v31, 16  ;;  %v16973_v38 = vld [vmem:[%s22394_s1 + $0xf0] sm:$0xff]   ;;  %v729_v39 = vor.u32 %v727_v22, %v726_v28  ;;  %v731_v40 = vrot.slane %v726_v28, 4 }
  0x1e   :  { %v22498_v41 = vsel %vm17712_vm8, 4294967295, %v22497_v41  ;;  %v741_v42 = vshrl.u32 %v532_v35, 16  ;;  %v744_v43 = vshll.u32 %v532_v35, 16  ;;  %v16974_v44 = vld [vmem:[%s22394_s1 + $0x138] sm:$0xff]   ;;  %v99_v46 = vld [vmem:[#allocation2 + $0x84] sm:$0x1] }
  0x1f   :  { %22499 = vst [vmem:[#allocation10_spill] sm:$0xff] %v22498_v41  ;;  %v735_v45 = vrot.slane %v733_v36, 7  ;;  %v730_v47 = vsel %vm17700_vm7, %v722_v34, %v729_v39  ;;  %v100_v49 = vsel %vm17654_vm2, 0, %v99_v46  ;;  %v209_v50 = vld [vmem:[#allocation2 + $0x8c] sm:$0x1]  ;;  %v16975_v52 = vld [vmem:[%s22394_s1 + $0xf8] sm:$0xff]  }
  0x20   :  { %16311 = vmatpush3.bf16.msra.mxu1 %v16967_v8  ;;  %13955 = vmatpush3.bf16.msra.mxu0 %v16967_v8  ;;  %v743_v48 = vrot.slane %v741_v42, 7  ;;  %v533_v51 = vld [vmem:[%s22393_s0 + $0x50] sm:$0xf]  ;;  %v1278_v53 = vld [vmem:[#allocation2 + $0x6c] sm:$0xf]  ;;  %v210_v57 = vsel %vm17665_vm4, 0, %v209_v50 }
  0x21   :  { %16304 = vmatprep.subr.bf16.mxu1 %v16968_v9  ;;  %13956 = vmatprep.subr.bf16.mxu0 %v16968_v9  ;;  %1281 = vst [vmem:[#allocation2 + $0x70] sm:$0xf] %v730_v47  ;;  %v1282_v54 = vld [vmem:[#allocation2 + $0x74] sm:$0x1]  ;;  %v738_v55 = vor.u32 %v736_v37, %v735_v45  ;;  %v739_v56 = vrot.slane %v735_v45, 4  ;;  %v1279_v58 = vsel %vm17712_vm8, %v721_v33, %v1278_v53  ;;  %v17738_v60 = vld [vmem:[%s22394_s1 + $0x140] sm:$0xff]  }
  0x22   :  { %101 = vst [vmem:[#allocation2 + $0x84] sm:$0x1] %v100_v49  ;;  %v1283_v59 = vsel %vm17654_vm2, %v731_v40, %v1282_v54  ;;  %v746_v61 = vor.u32 %v744_v43, %v743_v48  ;;  %v748_v62 = vrot.slane %v743_v48, 4  ;;  %211 = vst [vmem:[#allocation2 + $0x8c] sm:$0x1] %v210_v57  ;;  %v750_v0 = vshrl.u32 %v533_v51, 16 }
  0x23   :  { %v534_v63 = vld [vmem:[%s22393_s0 + $0x54] sm:$0xf]  ;;  %1280 = vst [vmem:[#allocation2 + $0x6c] sm:$0xf] %v1279_v58  ;;  %1284 = vst [vmem:[#allocation2 + $0x74] sm:$0x1] %v1283_v59 }
  0x24   :  { %16312 = vmatpush3.bf16.msra.mxu1 %v16969_v11  ;;  %13957 = vmatpush3.bf16.msra.mxu0 %v16969_v11  ;;  %v753_v1 = vshll.u32 %v533_v51, 16  ;;  %v758_v2 = vshrl.u32 %v534_v63, 16  ;;  %v761_v3 = vshll.u32 %v534_v63, 16  ;;  %v747_v4 = vsel %vm17700_vm7, %v739_v56, %v746_v61  ;;  %v1285_v5 = vld [vmem:[#allocation2 + $0x78] sm:$0xf] }
  0x25   :  { %16305 = vmatprep.subr.bf16.mxu1 %v16970_v12  ;;  %13958 = vmatprep.subr.bf16.mxu0 %v16970_v12  ;;  %v1289_v6 = vld [vmem:[#allocation2 + $0x80] sm:$0x1]  ;;  %v102_v8 = vld [vmem:[#allocation2 + $0x90] sm:$0x1]  ;;  %v1286_v9 = vsel %vm17712_vm8, %v738_v55, %v1285_v5  ;;  %1288 = vst [vmem:[#allocation2 + $0x7c] sm:$0xf] %v747_v4 }
  0x26   :  { %v1290_v11 = vsel %vm17654_vm2, %v748_v62, %v1289_v6  ;;  %v752_v12 = vrot.slane %v750_v0, 7  ;;  %v760_v13 = vrot.slane %v758_v2, 7  ;;  %v212_v14 = vld [vmem:[#allocation2 + $0x98] sm:$0x1]  ;;  %1287 = vst [vmem:[#allocation2 + $0x78] sm:$0xf] %v1286_v9 }
  0x27   :  { %v535_v15 = vld [vmem:[%s22393_s0 + $0x58] sm:$0xf]  ;;  %1291 = vst [vmem:[#allocation2 + $0x80] sm:$0x1] %v1290_v11  ;;  %v103_v16 = vsel %vm17654_vm2, 0, %v102_v8  ;;  %v213_v17 = vsel %vm17665_vm4, 0, %v212_v14 }
  0x28   :  { %16313 = vmatpush3.bf16.msra.mxu1 %v16971_v23  ;;  %13959 = vmatpush3.bf16.msra.mxu0 %v16971_v23  ;;  %v536_v18 = vld [vmem:[%s22393_s0 + $0x5c] sm:$0xf]  ;;  %v767_v19 = vshrl.u32 %v535_v15, 16  ;;  %v770_v20 = vshll.u32 %v535_v15, 16  ;;  %v755_v21 = vor.u32 %v753_v1, %v752_v12  ;;  %v756_v22 = vrot.slane %v752_v12, 4 }
  0x29   :  { %16306 = vmatprep.subr.bf16.mxu1 %v16972_v27  ;;  %13960 = vmatprep.subr.bf16.mxu0 %v16972_v27  ;;  %v763_v23 = vor.u32 %v761_v3, %v760_v13  ;;  %v765_v24 = vrot.slane %v760_v13, 4  ;;  %104 = vst [vmem:[#allocation2 + $0x90] sm:$0x1] %v103_v16  ;;  %214 = vst [vmem:[#allocation2 + $0x98] sm:$0x1] %v213_v17  ;;  %v775_v28 = vshrl.u32 %v536_v18, 16 }
  0x2a   :  { %v1465_v25 = vld [vmem:[#allocation2 + $0x70] sm:$0xf]  ;;  %vm1680_vm9 = vsmask.f32 7424  ;;  %v1292_v26 = vld [vmem:[#allocation2 + $0x84] sm:$0xf] }
  0x2b   :  { %v769_v27 = vrot.slane %v767_v19, 7  ;;  %v764_v29 = vsel %vm17700_vm7, %v756_v22, %v763_v23  ;;  %v1293_v30 = vsel %vm17712_vm8, %v755_v21, %v1292_v26  ;;  %v1296_v31 = vld [vmem:[#allocation2 + $0x8c] sm:$0x1]  ;;  %v778_v33 = vshll.u32 %v536_v18, 16  ;;  %v105_v34 = vld [vmem:[#allocation2 + $0x9c] sm:$0x1] }
  0x2c   :  { %16314 = vmatpush3.bf16.msra.mxu1 %v16973_v38  ;;  %13961 = vmatpush3.bf16.msra.mxu0 %v16973_v38  ;;  %v1464_v35 = vld [vmem:[#allocation2 + $0x6c] sm:$0xf]  ;;  %1294 = vst [vmem:[#allocation2 + $0x84] sm:$0xf] %v1293_v30  ;;  %1295 = vst [vmem:[#allocation2 + $0x88] sm:$0xf] %v764_v29  ;;  %v1297_v36 = vsel %vm17654_vm2, %v765_v24, %v1296_v31 }
  0x2d   :  { %16307 = vmatprep.subr.bf16.mxu1 %v16974_v44  ;;  %13962 = vmatprep.subr.bf16.mxu0 %v16974_v44  ;;  %v773_v37 = vrot.slane %v769_v27, 4  ;;  %v777_v38 = vrot.slane %v775_v28, 7  ;;  %v17766_v39 = vcombine.low %v1464_v35, %v1465_v25  ;;  %v16977_v40 = vld [vmem:[#allocation2 + $0x74] ss:$0 sps:$4 sm:$0x11]   ;;  %v106_v42 = vsel %vm17654_vm2, 0, %v105_v34 }
  0x2e   :  { %1298 = vst [vmem:[#allocation2 + $0x8c] sm:$0x1] %v1297_v36  ;;  %v215_v43 = vld [vmem:[#allocation2 + $0xa4] sm:$0x1]  ;;  %v1467_v44 = vld [vmem:[#allocation2 + $0x7c] sm:$0xf]  ;;  %v772_v45 = vor.u32 %v770_v20, %v769_v27 }
  0x2f   :  { %v780_v46 = vor.u32 %v778_v33, %v777_v38  ;;  %v782_v47 = vrot.slane %v777_v38, 4  ;;  %107 = vst [vmem:[#allocation2 + $0x9c] sm:$0x1] %v106_v42  ;;  %v216_v48 = vsel %vm17665_vm4, 0, %v215_v43  ;;  %v537_v49 = vld [vmem:[%s22393_s0 + $0x60] sm:$0xf] }
  0x30   :  { %16315 = vmatpush3.bf16.msra.mxu1 %v16975_v52  ;;  %13963 = vmatpush3.bf16.msra.mxu0 %v16975_v52  ;;  %v1790_v50 = vshrl.u32 %v17766_v39, 16  ;;  %v1792_v51 = vshll.u32 %v17766_v39, 16  ;;  %v1797_v52 = vshll.u32 %v16977_v40, 16  ;;  %v1466_v53 = vld [vmem:[#allocation2 + $0x78] sm:$0xf]  ;;  %v784_v54 = vshrl.u32 %v537_v49, 16 }
  0x31   :  { %15628 = vmatprep.subr.bf16.mxu1 %v17738_v60  ;;  %217 = vst [vmem:[#allocation2 + $0xa4] sm:$0x1] %v216_v48  ;;  %v17777_v55 = vcombine.low %v1466_v53, %v1467_v44  ;;  %v16980_v56 = vld [vmem:[#allocation2 + $0x80] ss:$0 sps:$4 sm:$0x11]   ;;  %v781_v57 = vsel %vm17700_vm7, %v773_v37, %v780_v46  ;;  %v787_v58 = vshll.u32 %v537_v49, 16 }
  0x32   :  { %v1794_v59 = vrot.slane %v1792_v51, 1  ;;  %v1799_v61 = vrot.slane %v1797_v52, 1  ;;  %v1299_v62 = vld [vmem:[#allocation2 + $0x90] sm:$0xf]  ;;  %1302 = vst [vmem:[#allocation2 + $0x94] sm:$0xf] %v781_v57 }
  0x33   :  { %v1303_v63 = vld [vmem:[#allocation2 + $0x98] sm:$0x1]  ;;  %v1802_v0 = vshrl.u32 %v17777_v55, 16  ;;  %v1804_v1 = vshll.u32 %v17777_v55, 16  ;;  %v1809_v2 = vshll.u32 %v16980_v56, 16  ;;  %v1300_v3 = vsel %vm17712_vm8, %v772_v45, %v1299_v62  ;;  %v16981_v18 = vld [vmem:[%s22394_s1 + $0x148] sm:$0xff]  }
  0x34   :  { %v538_v4 = vld [vmem:[%s22393_s0 + $0x64] sm:$0xf]  ;;  %v1795_v5 = vor.u32 %v1794_v59, %v1790_v50  ;;  %v1469_v8 = vld [vmem:[#allocation2 + $0x88] sm:$0xf]  ;;  %1301 = vst [vmem:[#allocation2 + $0x90] sm:$0xf] %v1300_v3  ;;  %v1304_v9 = vsel %vm17654_vm2, %v782_v47, %v1303_v63 }
  0x35   :  { %v1468_v6 = vld [vmem:[#allocation2 + $0x84] sm:$0xf]  ;;  %v786_v11 = vrot.slane %v784_v54, 7  ;;  %v792_v12 = vshrl.u32 %v538_v4, 16  ;;  %v1806_v13 = vrot.slane %v1804_v1, 1  ;;  %v1811_v14 = vrot.slane %v1809_v2, 1 }
  0x36   :  { %v17790_v15 = vcombine.low %v1468_v6, %v1469_v8  ;;  %1305 = vst [vmem:[#allocation2 + $0x98] sm:$0x1] %v1304_v9  ;;  %v795_v16 = vshll.u32 %v538_v4, 16  ;;  %v17793_v17 = vsel %vm1680_vm9, %v1795_v5, %v1799_v61  ;;  %v16983_v19 = vld [vmem:[#allocation2 + $0x8c] ss:$0 sps:$4 sm:$0x11]  }
  0x37   :  { %v789_v20 = vor.u32 %v787_v58, %v786_v11  ;;  %v790_v21 = vrot.slane %v786_v11, 4  ;;  %v794_v22 = vrot.slane %v792_v12, 7  ;;  %2378 = vmatprep.mubr.bf16.mxu1 %v17793_v17  ;;  %v1807_v23 = vor.u32 %v1806_v13, %v1802_v0  ;;  %v1306_v26 = vld [vmem:[#allocation2 + $0x9c] sm:$0xf]  ;;  %v16984_v35 = vld [vmem:[%s22394_s1 + $0x150] sm:$0xff]   ;;  %v16990_v6 = vld [vmem:[%s22394_s1 + $0x160] sm:$0xff]  }
  0x38   :  { %v1814_v24 = vshrl.u32 %v17790_v15, 16  ;;  %v1816_v25 = vshll.u32 %v17790_v15, 16  ;;  %v1310_v27 = vld [vmem:[#allocation2 + $0xa4] sm:$0x1]  ;;  %2379 = vmatmul.mubr.bf16.vlgmr.msra.gmra.mrb[0].mxu1 %v17766_v39  ;;  %v1821_v28 = vshll.u32 %v16983_v19, 16  ;;  %v16987_v62 = vld [vmem:[%s22394_s1 + $0x158] sm:$0xff]  }
  0x39   :  { %v797_v29 = vor.u32 %v795_v16, %v794_v22  ;;  %v799_v30 = vrot.slane %v794_v22, 4  ;;  %v1307_v31 = vsel %vm17712_vm8, %v789_v20, %v1306_v26  ;;  %15629 = vmatpush3.bf16.msra.mxu1 %v17738_v60  ;;  %v17806_v33 = vsel %vm1680_vm9, %v1807_v23, %v1811_v14  ;;  %v1471_v36 = vld [vmem:[#allocation2 + $0x94] sm:$0xf]  ;;  %v108_v37 = vld [vmem:[#allocation2 + $0xa8] sm:$0x1] }
  0x3a   :  { %v1818_v34 = vrot.slane %v1816_v25, 1  ;;  %1308 = vst [vmem:[#allocation2 + $0x9c] sm:$0xf] %v1307_v31  ;;  %2386 = vmatprep.mubr.bf16.mxu1 %v17806_v33  ;;  %15630 = vmatprep.subr.bf16.mxu1 %v16981_v18  ;;  %v1823_v38 = vrot.slane %v1821_v28, 1  ;;  %v109_v42 = vsel %vm17654_vm2, 0, %v108_v37  ;;  %vm1969_vm10 = vcmask 1046528  }
  0x3b   :  { %v798_v40 = vsel %vm17700_vm7, %v790_v21, %v797_v29  ;;  %v1311_v60 = vsel %vm17654_vm2, %v799_v30, %v1310_v27  ;;  %v218_v43 = vld [vmem:[#allocation2 + $0xb0] sm:$0x1]  ;;  %v539_v44 = vld [vmem:[%s22393_s0 + $0x68] sm:$0xf]  ;;  %110 = vst [vmem:[#allocation2 + $0xa8] sm:$0x1] %v109_v42 }
  0x3c   :  { %v1819_v45 = vor.u32 %v1818_v34, %v1814_v24  ;;  %v1470_v46 = vld [vmem:[#allocation2 + $0x90] sm:$0xf]  ;;  %1309 = vst [vmem:[#allocation2 + $0xa0] sm:$0xf] %v798_v40  ;;  %1312 = vst [vmem:[#allocation2 + $0xa4] sm:$0x1] %v1311_v60 }
  0x3d   :  { %v219_v47 = vsel %vm17665_vm4, 0, %v218_v43  ;;  %v540_v48 = vld [vmem:[%s22393_s0 + $0x6c] sm:$0xf]  ;;  %v801_v49 = vshrl.u32 %v539_v44, 16  ;;  %v17826_v50 = vcombine.low %v1470_v46, %v1471_v36  ;;  %v804_v52 = vshll.u32 %v539_v44, 16  ;;  %15631 = vmatpush3.bf16.msra.mxu1 %v16981_v18 }
  0x3e   :  { %v16986_v51 = vld [vmem:[#allocation2 + $0x98] ss:$0 sps:$4 sm:$0x11]   ;;  %220 = vst [vmem:[#allocation2 + $0xb0] sm:$0x1] %v219_v47  ;;  %v809_v54 = vshrl.u32 %v540_v48, 16  ;;  %v17829_v57 = vsel %vm1680_vm9, %v1819_v45, %v1823_v38  ;;  %15632 = vmatprep.subr.bf16.mxu1 %v16984_v35 }
  0x3f   :  { %v803_v53 = vrot.slane %v801_v49, 7  ;;  %v812_v56 = vshll.u32 %v540_v48, 16  ;;  %v1826_v58 = vshrl.u32 %v17826_v50, 16  ;;  %v1828_v59 = vshll.u32 %v17826_v50, 16  ;;  %v111_v2 = vld [vmem:[#allocation2 + $0xb4] sm:$0x1] }
  0x40   :  { %v1833_v61 = vshll.u32 %v16986_v51, 16  ;;  %v811_v1 = vrot.slane %v809_v54, 7  ;;  %v221_v3 = vld [vmem:[#allocation2 + $0xbc] sm:$0x1]  ;;  %2387 = vmatmul.mubr.bf16.gmra.mrb[4].mxu1 %v17777_v55  ;;  %v112_v8 = vsel %vm17654_vm2, 0, %v111_v2  ;;  %v16993_v38 = vld [vmem:[%s22394_s1 + $0x168] sm:$0xff]  }
  0x41   :  { %v806_v63 = vor.u32 %v804_v52, %v803_v53  ;;  %v807_v0 = vrot.slane %v803_v53, 4  ;;  %v1830_v4 = vrot.slane %v1828_v59, 1  ;;  %v1472_v5 = vld [vmem:[#allocation2 + $0x9c] sm:$0xf]  ;;  %v222_v9 = vsel %vm17665_vm4, 0, %v221_v3  ;;  %2394 = vmatprep.mubr.bf16.mxu1 %v17829_v57  ;;  %15633 = vmatpush3.bf16.msra.mxu1 %v16984_v35  ;;  %v16996_v54 = vld [vmem:[%s22394_s1 + $0x170] sm:$0xff]  }
  0x42   :  { %v1835_v11 = vrot.slane %v1833_v61, 1  ;;  %v814_v12 = vor.u32 %v812_v56, %v811_v1  ;;  %v816_v13 = vrot.slane %v811_v1, 4  ;;  %113 = vst [vmem:[#allocation2 + $0xb4] sm:$0x1] %v112_v8  ;;  %223 = vst [vmem:[#allocation2 + $0xbc] sm:$0x1] %v222_v9  ;;  %15634 = vmatprep.subr.bf16.mxu1 %v16987_v62 }
  0x43   :  { %v541_v14 = vld [vmem:[%s22393_s0 + $0x70] sm:$0xf]  ;;  %v542_v16 = vld [vmem:[%s22393_s0 + $0x74] sm:$0xf]  ;;  %v1831_v18 = vor.u32 %v1830_v4, %v1826_v58  ;;  %v1473_v19 = vld [vmem:[#allocation2 + $0xa0] sm:$0xf] }
  0x44   :  { %v1313_v20 = vld [vmem:[#allocation2 + $0xa8] sm:$0xf]  ;;  %v17851_v21 = vcombine.low %v1472_v5, %v1473_v19  ;;  %v16989_v22 = vld [vmem:[#allocation2 + $0xa4] ss:$0 sps:$4 sm:$0x11]   ;;  %v815_v23 = vsel %vm17700_vm7, %v807_v0, %v814_v12  ;;  %v818_v26 = vshrl.u32 %v541_v14, 16 }
  0x45   :  { %v1314_v24 = vsel %vm17712_vm8, %v806_v63, %v1313_v20  ;;  %v1317_v25 = vld [vmem:[#allocation2 + $0xb0] sm:$0x1]  ;;  %1316 = vst [vmem:[#allocation2 + $0xac] sm:$0xf] %v815_v23  ;;  %v821_v28 = vshll.u32 %v541_v14, 16  ;;  %v826_v29 = vshrl.u32 %v542_v16, 16  ;;  %15635 = vmatpush3.bf16.msra.mxu1 %v16987_v62  ;;  %v17862_v37 = vsel %vm1680_vm9, %v1831_v18, %v1835_v11 }
  0x46   :  { %1315 = vst [vmem:[#allocation2 + $0xa8] sm:$0xf] %v1314_v24  ;;  %v1318_v27 = vsel %vm17654_vm2, %v816_v13, %v1317_v25  ;;  %v1838_v30 = vshrl.u32 %v17851_v21, 16  ;;  %v1840_v31 = vshll.u32 %v17851_v21, 16  ;;  %v1845_v34 = vshll.u32 %v16989_v22, 16  ;;  %15636 = vmatprep.subr.bf16.mxu1 %v16990_v6 }
  0x47   :  { %1319 = vst [vmem:[#allocation2 + $0xb0] sm:$0x1] %v1318_v27  ;;  %v820_v35 = vrot.slane %v818_v26, 7  ;;  %v114_v36 = vld [vmem:[#allocation2 + $0xc0] sm:$0x1]  ;;  %v828_v40 = vrot.slane %v826_v29, 7 }
  0x48   :  { %v829_v60 = vshll.u32 %v542_v16, 16  ;;  %v115_v42 = vsel %vm17654_vm2, 0, %v114_v36  ;;  %v224_v43 = vld [vmem:[#allocation2 + $0xc8] sm:$0x1]  ;;  %v1842_v44 = vrot.slane %v1840_v31, 1  ;;  %v1847_v45 = vrot.slane %v1845_v34, 1  ;;  %2395 = vmatmul.mubr.bf16.gmra.mrb[8].mxu1 %v17790_v15 }
  0x49   :  { %v823_v46 = vor.u32 %v821_v28, %v820_v35  ;;  %v824_v47 = vrot.slane %v820_v35, 4  ;;  %116 = vst [vmem:[#allocation2 + $0xc0] sm:$0x1] %v115_v42  ;;  %v543_v48 = vld [vmem:[%s22393_s0 + $0x78] sm:$0xf]  ;;  %v833_v51 = vrot.slane %v828_v40, 4  ;;  %2402 = vmatprep.mubr.bf16.mxu1 %v17862_v37  ;;  %15637 = vmatpush3.bf16.msra.mxu1 %v16990_v6 }
  0x4a   :  { %v831_v49 = vor.u32 %v829_v60, %v828_v40  ;;  %v1320_v52 = vld [vmem:[#allocation2 + $0xb4] sm:$0xf]  ;;  %v1324_v53 = vld [vmem:[#allocation2 + $0xbc] sm:$0x1]  ;;  %v225_v56 = vsel %vm17665_vm4, 0, %v224_v43  ;;  %v1843_v58 = vor.u32 %v1842_v44, %v1838_v30  ;;  %v835_v62 = vshrl.u32 %v543_v48, 16  ;;  %15638 = vmatprep.subr.bf16.mxu1 %v16993_v38 }
  0x4b   :  { %v1321_v59 = vsel %vm17712_vm8, %v823_v46, %v1320_v52  ;;  %226 = vst [vmem:[#allocation2 + $0xc8] sm:$0x1] %v225_v56  ;;  %v544_v61 = vld [vmem:[%s22393_s0 + $0x7c] sm:$0xf]  ;;  %v838_v63 = vshll.u32 %v543_v48, 16  ;;  %v1325_v1 = vsel %vm17654_vm2, %v833_v51, %v1324_v53  ;;  %v17035_v42 = vld [vmem:[%s22394_s1 + $0x1c0] sm:$0xff]  }
  0x4c   :  { %v832_v0 = vsel %vm17700_vm7, %v824_v47, %v831_v49  ;;  %1322 = vst [vmem:[#allocation2 + $0xb4] sm:$0xf] %v1321_v59  ;;  %v843_v2 = vshrl.u32 %v544_v61, 16  ;;  %v846_v3 = vshll.u32 %v544_v61, 16  ;;  %v69_v4 = vld [vmem:[#allocation2 + $0xc] sm:$0x1]  ;;  %v17893_v14 = vsel %vm1680_vm9, %v1843_v58, %v1847_v45  ;;  %14220 = vmatprep.subr.bf16.mxu0 %v17035_v42 }
  0x4d   :  { %v1474_v5 = vld [vmem:[#allocation2 + $0xa8] sm:$0xf]  ;;  %v1475_v6 = vld [vmem:[#allocation2 + $0xac] sm:$0xf]  ;;  %1323 = vst [vmem:[#allocation2 + $0xb8] sm:$0xf] %v832_v0  ;;  %15639 = vmatpush3.bf16.msra.mxu1 %v16993_v38 }
  0x4e   :  { %1326 = vst [vmem:[#allocation2 + $0xbc] sm:$0x1] %v1325_v1  ;;  %v837_v8 = vrot.slane %v835_v62, 7  ;;  %v70_v9 = vsel %vm17654_vm2, 0, %v69_v4  ;;  %v17890_v11 = vcombine.low %v1474_v5, %v1475_v6  ;;  %v845_v13 = vrot.slane %v843_v2, 7  ;;  %15640 = vmatprep.subr.bf16.mxu1 %v16996_v54  ;;  %v16999_v27 = vld [vmem:[%s22394_s1 + $0x178] sm:$0xff]  }
  0x4f   :  { %v16992_v12 = vld [vmem:[#allocation2 + $0xb0] ss:$0 sps:$4 sm:$0x11]   ;;  %71 = vst [vmem:[#allocation2 + $0xc] sm:$0x1] %v70_v9  ;;  %v17006_v48 = vld [vmem:[%s22394_s1 + $0x40] sm:$0xff]  }
  0x50   :  { %v840_v16 = vor.u32 %v838_v63, %v837_v8  ;;  %v841_v18 = vrot.slane %v837_v8, 4  ;;  %v179_v19 = vld [vmem:[#allocation2 + $0x14] sm:$0x1]  ;;  %v513_v20 = vld [vmem:[%s22393_s0] sm:$0xf]  ;;  %v1850_v22 = vshrl.u32 %v17890_v11, 16  ;;  %v848_v25 = vor.u32 %v846_v3, %v845_v13  ;;  %2403 = vmatmul.mubr.bf16.gmra.mrb[12].mxu1 %v17826_v50 }
  0x51   :  { %v1852_v23 = vshll.u32 %v17890_v11, 16  ;;  %v1857_v24 = vshll.u32 %v16992_v12, 16  ;;  %v1327_v26 = vld [vmem:[#allocation2 + $0xc0] sm:$0xf]  ;;  %v850_v28 = vrot.slane %v845_v13, 4  ;;  %v180_v30 = vsel %vm17665_vm4, 0, %v179_v19  ;;  %2410 = vmatprep.mubr.bf16.mxu1 %v17893_v14  ;;  %15641 = vmatpush3.bf16.msra.mxu1 %v16996_v54 }
  0x52   :  { %v1328_v29 = vsel %vm17712_vm8, %v840_v16, %v1327_v26  ;;  %v514_v31 = vld [vmem:[%s22393_s0 + $0x4] sm:$0xf]  ;;  %v580_v34 = vshrl.u32 %v513_v20, 16  ;;  %v849_v38 = vsel %vm17700_vm7, %v841_v18, %v848_v25  ;;  %v1331_v40 = vld [vmem:[#allocation2 + $0xc8] sm:$0x1]  ;;  %v583_v60 = vshll.u32 %v513_v20, 16  ;;  %15642 = vmatprep.subr.bf16.mxu1 %v16999_v27 }
  0x53   :  { %v1854_v35 = vrot.slane %v1852_v23, 1  ;;  %v1859_v36 = vrot.slane %v1857_v24, 1  ;;  %1329 = vst [vmem:[#allocation2 + $0xc0] sm:$0xf] %v1328_v29  ;;  %181 = vst [vmem:[#allocation2 + $0x14] sm:$0x1] %v180_v30  ;;  %v1332_v44 = vsel %vm17654_vm2, %v850_v28, %v1331_v40 }
  0x54   :  { %v1476_v43 = vld [vmem:[#allocation2 + $0xb4] sm:$0xf]  ;;  %1330 = vst [vmem:[#allocation2 + $0xc4] sm:$0xf] %v849_v38  ;;  %v582_v45 = vrot.slane %v580_v34, 7  ;;  %v588_v46 = vshrl.u32 %v514_v31, 16 }
  0x55   :  { %v591_v47 = vshll.u32 %v514_v31, 16  ;;  %v1855_v49 = vor.u32 %v1854_v35, %v1850_v22  ;;  %v1477_v51 = vld [vmem:[#allocation2 + $0xb8] sm:$0xf]  ;;  %1333 = vst [vmem:[#allocation2 + $0xc8] sm:$0x1] %v1332_v44  ;;  %15643 = vmatpush3.bf16.msra.mxu1 %v16999_v27 }
  0x56   :  { %v72_v52 = vld [vmem:[#allocation2 + $0x18] sm:$0x1]  ;;  %v17922_v53 = vcombine.low %v1476_v43, %v1477_v51  ;;  %v16995_v54 = vld [vmem:[#allocation2 + $0xbc] ss:$0 sps:$4 sm:$0x11]   ;;  %v585_v56 = vor.u32 %v583_v60, %v582_v45  ;;  %v586_v58 = vrot.slane %v582_v45, 4  ;;  %14084 = vmatprep.subr.bf16.mxu1 %v17006_v48 }
  0x57   :  { %v590_v59 = vrot.slane %v588_v46, 7  ;;  %v17925_v61 = vsel %vm1680_vm9, %v1855_v49, %v1859_v36  ;;  %v1222_v62 = vld [vmem:[#allocation2 + $0xc] sm:$0xf]  ;;  %v73_v63 = vsel %vm17654_vm2, 0, %v72_v52  ;;  %v182_v0 = vld [vmem:[#allocation2 + $0x20] sm:$0x1] }
  0x58   :  { %v1862_v1 = vshrl.u32 %v17922_v53, 16  ;;  %v1864_v2 = vshll.u32 %v17922_v53, 16  ;;  %v1869_v3 = vshll.u32 %v16995_v54, 16  ;;  %74 = vst [vmem:[#allocation2 + $0x18] sm:$0x1] %v73_v63  ;;  %v1223_v8 = vsel %vm17712_vm8, %v585_v56, %v1222_v62  ;;  %2411 = vmatmul.mubr.bf16.gmra.mrb[16].mxu1 %v17851_v21 }
  0x59   :  { %v593_v4 = vor.u32 %v591_v47, %v590_v59  ;;  %v515_v5 = vld [vmem:[%s22393_s0 + $0x8] sm:$0xf]  ;;  %v595_v6 = vrot.slane %v590_v59, 4  ;;  %v183_v9 = vsel %vm17665_vm4, 0, %v182_v0  ;;  %v516_v12 = vld [vmem:[%s22393_s0 + $0xc] sm:$0xf]  ;;  %2418 = vmatprep.mubr.bf16.mxu1 %v17925_v61 }
  0x5a   :  { %v597_v13 = vshrl.u32 %v515_v5, 16  ;;  %v1866_v16 = vrot.slane %v1864_v2, 1  ;;  %v1871_v18 = vrot.slane %v1869_v3, 1  ;;  %v1478_v19 = vld [vmem:[#allocation2 + $0xc0] sm:$0xf]  ;;  %v600_v26 = vshll.u32 %v515_v5, 16 }
  0x5b   :  { %v594_v20 = vsel %vm17700_vm7, %v586_v58, %v593_v4  ;;  %1224 = vst [vmem:[#allocation2 + $0xc] sm:$0xf] %v1223_v8  ;;  %v1226_v22 = vld [vmem:[#allocation2 + $0x14] sm:$0x1]  ;;  %184 = vst [vmem:[#allocation2 + $0x20] sm:$0x1] %v183_v9 }
  0x5c   :  { %v1479_v23 = vld [vmem:[#allocation2 + $0xc4] sm:$0xf]  ;;  %1225 = vst [vmem:[#allocation2 + $0x10] sm:$0xf] %v594_v20  ;;  %v1227_v24 = vsel %vm17654_vm2, %v595_v6, %v1226_v22  ;;  %v599_v25 = vrot.slane %v597_v13, 7  ;;  %v605_v27 = vshrl.u32 %v516_v12, 16  ;;  %v1867_v31 = vor.u32 %v1866_v16, %v1862_v1 }
  0x5d   :  { %v17947_v28 = vcombine.low %v1478_v19, %v1479_v23  ;;  %v16998_v29 = vld [vmem:[#allocation2 + $0xc8] ss:$0 sps:$4 sm:$0x11]   ;;  %1228 = vst [vmem:[#allocation2 + $0x14] sm:$0x1] %v1227_v24  ;;  %v608_v30 = vshll.u32 %v516_v12, 16 }
  0x5e   :  { %v602_v34 = vor.u32 %v600_v26, %v599_v25  ;;  %v603_v35 = vrot.slane %v599_v25, 4  ;;  %v607_v36 = vrot.slane %v605_v27, 7  ;;  %v1881_v45 = vshll.u32 %v16998_v29, 16  ;;  %v75_v47 = vld [vmem:[#allocation2 + $0x24] sm:$0x1] }
  0x5f   :  { %v1876_v38 = vshll.u32 %v17947_v28, 16  ;;  %v1874_v40 = vshrl.u32 %v17947_v28, 16  ;;  %v1229_v43 = vld [vmem:[#allocation2 + $0x18] sm:$0xf]  ;;  %v185_v48 = vld [vmem:[#allocation2 + $0x2c] sm:$0x1]  ;;  %v17954_v49 = vsel %vm1680_vm9, %v1867_v31, %v1871_v18 }
  0x60   :  { %v610_v60 = vor.u32 %v608_v30, %v607_v36  ;;  %v612_v42 = vrot.slane %v607_v36, 4  ;;  %v1230_v46 = vsel %vm17712_vm8, %v602_v34, %v1229_v43  ;;  %v76_v62 = vsel %vm17654_vm2, 0, %v75_v47  ;;  %v517_v0 = vld [vmem:[%s22393_s0 + $0x10] sm:$0xf]  ;;  %2419 = vmatmul.mubr.bf16.gmra.mrb[20].mxu1 %v17890_v11  ;;  %v518_v8 = vld [vmem:[%s22393_s0 + $0x14] sm:$0xf] }
  0x61   :  { %v1878_v44 = vrot.slane %v1876_v38, 1  ;;  %1231 = vst [vmem:[#allocation2 + $0x18] sm:$0xf] %v1230_v46  ;;  %v186_v63 = vsel %vm17665_vm4, 0, %v185_v48  ;;  %77 = vst [vmem:[#allocation2 + $0x24] sm:$0x1] %v76_v62  ;;  %2426 = vmatprep.mubr.bf16.mxu1 %v17954_v49 }
  0x62   :  { %v1448_v51 = vld [vmem:[#allocation2 + $0xc] sm:$0xf]  ;;  %v611_v54 = vsel %vm17700_vm7, %v603_v35, %v610_v60  ;;  %v1233_v56 = vld [vmem:[#allocation2 + $0x20] sm:$0x1]  ;;  %187 = vst [vmem:[#allocation2 + $0x2c] sm:$0x1] %v186_v63 }
  0x63   :  { %v1501_v52 = vld [vmem:[#allocation2 + $0xc] sm:$0xe]  ;;  %v1449_v58 = vld [vmem:[#allocation2 + $0x10] sm:$0xf]  ;;  %1232 = vst [vmem:[#allocation2 + $0x1c] sm:$0xf] %v611_v54  ;;  %v1234_v59 = vsel %vm17654_vm2, %v612_v42, %v1233_v56  ;;  %v1879_v5 = vor.u32 %v1878_v44, %v1874_v40 }
  0x64   :  { %v17968_v1 = vcombine.low %v1448_v51, %v1449_v58  ;;  %v17970_v2 = vld [vmem:[#allocation2 + $0x14] ss:$0 sps:$4 sm:$0x11]   ;;  %v12910_v3 = vcombine.low %v1501_v52, %v1449_v58  ;;  %1235 = vst [vmem:[#allocation2 + $0x20] sm:$0x1] %v1234_v59  ;;  %v614_v4 = vshrl.u32 %v517_v0, 16 }
  0x65   :  { %v1883_v6 = vrot.slane %v1881_v45, 1  ;;  %v617_v9 = vshll.u32 %v517_v0, 16  ;;  %v78_v12 = vld [vmem:[#allocation2 + $0x30] sm:$0x1]  ;;  %v188_v18 = vld [vmem:[#allocation2 + $0x38] sm:$0x1] }
  0x66   :  { %v1694_v13 = vshrl.u32 %v17968_v1, 16  ;;  %v1696_v16 = vshll.u32 %v17968_v1, 16  ;;  %v1973_v19 = vrot.slane %v12910_v3, 1  ;;  %v1701_v20 = vshll.u32 %v17970_v2, 16  ;;  %v519_v24 = vld [vmem:[%s22393_s0 + $0x18] sm:$0xf] }
  0x67   :  { %v616_v22 = vrot.slane %v614_v4, 7  ;;  %v622_v23 = vshrl.u32 %v518_v8, 16  ;;  %v625_v26 = vshll.u32 %v518_v8, 16  ;;  %v79_v27 = vsel %vm17654_vm2, 0, %v78_v12  ;;  %v520_v30 = vld [vmem:[%s22393_s0 + $0x1c] sm:$0xf] }
  0x68   :  { %v1698_v25 = vrot.slane %v1696_v16, 1  ;;  %v189_v29 = vsel %vm17665_vm4, 0, %v188_v18  ;;  %v17990_v31 = vsel %vm1680_vm9, %v1879_v5, %v1883_v6  ;;  %v1450_v34 = vld [vmem:[#allocation2 + $0x18] sm:$0xf]  ;;  %v1703_v36 = vrot.slane %v1701_v20, 1  ;;  %v17036_v52 = vld [vmem:[%s22394_s1 + $0x180] sm:$0xff]   ;;  %2427 = vmatmul.mubr.bf16.gmra.mrb[24].mxu1 %v17922_v53 }
  0x69   :  { %v1502_v35 = vld [vmem:[#allocation2 + $0x18] sm:$0xe]  ;;  %v619_v38 = vor.u32 %v617_v9, %v616_v22  ;;  %v620_v40 = vrot.slane %v616_v22, 4  ;;  %80 = vst [vmem:[#allocation2 + $0x30] sm:$0x1] %v79_v27  ;;  %v624_v43 = vrot.slane %v622_v23, 7  ;;  %2434 = vmatprep.mubr.bf16.mxu1 %v17990_v31 }
  0x6a   :  { %190 = vst [vmem:[#allocation2 + $0x38] sm:$0x1] %v189_v29  ;;  %v1451_v60 = vld [vmem:[#allocation2 + $0x1c] sm:$0xf]  ;;  %v1699_v42 = vor.u32 %v1698_v25, %v1694_v13  ;;  %v631_v44 = vshrl.u32 %v519_v24, 16  ;;  %v634_v45 = vshll.u32 %v519_v24, 16 }
  0x6b   :  { %v1974_v46 = vrot.slane %v17970_v2, 1  ;;  %v17993_v47 = vcombine.low %v1450_v34, %v1451_v60  ;;  %v12911_v48 = vcombine.low %v1502_v35, %v1451_v60  ;;  %v639_v51 = vshrl.u32 %v520_v30, 16  ;;  %v17037_v54 = vld [vmem:[%s22394_s1 + $0x1c8] sm:$0xff]   ;;  %v1236_v62 = vld [vmem:[#allocation2 + $0x24] sm:$0xf]  ;;  %v17043_v13 = vld [vmem:[%s22394_s1 + $0x1d0] sm:$0xff]  }
  0x6c   :  { %v18003_v56 = vsel %vm1680_vm9, %v1699_v42, %v1703_v36  ;;  %v627_v58 = vor.u32 %v625_v26, %v624_v43  ;;  %v629_v59 = vrot.slane %v624_v43, 4  ;;  %v1240_v63 = vld [vmem:[#allocation2 + $0x2c] sm:$0x1]  ;;  %v633_v0 = vrot.slane %v631_v44, 7  ;;  %v81_v35 = vld [vmem:[#allocation2 + $0x3c] sm:$0x1] }
  0x6d   :  { %v18006_v2 = vld [vmem:[#allocation2 + $0x20] ss:$0 sps:$4 sm:$0x11]   ;;  %2314 = vmatprep.mubr.bf16.mxu0 %v18003_v56  ;;  %v1237_v3 = vsel %vm17712_vm8, %v619_v38, %v1236_v62  ;;  %v641_v4 = vrot.slane %v639_v51, 7  ;;  %v17039_v5 = vld [vmem:[%s22394_s1 + $0x188] sm:$0xff]   ;;  %v18014_v6 = vrot.slane %v12911_v48, 1  ;;  %v18028_v27 = vsel %vm1969_vm10, %v1973_v19, %v1974_v46 }
  0x6e   :  { %2315 = vmatmul.mubr.bf16.vlgmr.msra.gmra.mrb[0].mxu0 %v17968_v1  ;;  %v628_v8 = vsel %vm17700_vm7, %v620_v40, %v627_v58  ;;  %1238 = vst [vmem:[#allocation2 + $0x24] sm:$0xf] %v1237_v3  ;;  %v1241_v9 = vsel %vm17654_vm2, %v629_v59, %v1240_v63  ;;  %v636_v12 = vor.u32 %v634_v45, %v633_v0  ;;  %v637_v16 = vrot.slane %v633_v0, 4  ;;  %v191_v36 = vld [vmem:[#allocation2 + $0x44] sm:$0x1]  ;;  %v17044_v40 = vld [vmem:[%s22394_s1 + $0x190] sm:$0xff]  }
  0x6f   :  { %1239 = vst [vmem:[#allocation2 + $0x28] sm:$0xf] %v628_v8  ;;  %1242 = vst [vmem:[#allocation2 + $0x2c] sm:$0x1] %v1241_v9  ;;  %v642_v18 = vshll.u32 %v520_v30, 16  ;;  %v646_v20 = vrot.slane %v641_v4, 4  ;;  %14221 = vmatpush3.bf16.msra.mxu0 %v17036_v52 }
  0x70   :  { %v1706_v22 = vshrl.u32 %v17993_v47, 16  ;;  %v1243_v23 = vld [vmem:[#allocation2 + $0x30] sm:$0xf]  ;;  %v1708_v25 = vshll.u32 %v17993_v47, 16  ;;  %v1713_v26 = vshll.u32 %v18006_v2, 16  ;;  %14222 = vmatprep.subr.bf16.mxu0 %v17037_v54  ;;  %v82_v42 = vsel %vm17654_vm2, 0, %v81_v35  ;;  %2435 = vmatmul.mubr.bf16.gmra.mrb[28].mxu1 %v17947_v28 }
  0x71   :  { %v1247_v24 = vld [vmem:[#allocation2 + $0x38] sm:$0x1]  ;;  %v644_v29 = vor.u32 %v642_v18, %v641_v4  ;;  %v1244_v34 = vsel %vm17712_vm8, %v636_v12, %v1243_v23  ;;  %v521_v38 = vld [vmem:[%s22393_s0 + $0x20] sm:$0xf]  ;;  %v192_v43 = vsel %vm17665_vm4, 0, %v191_v36  ;;  %15644 = vmatprep.mubr.bf16.mxu1 %v18028_v27  ;;  %v1977_v3 = vrot.slane %v18006_v2, 1 }
  0x72   :  { %v1248_v30 = vsel %vm17654_vm2, %v646_v20, %v1247_v24  ;;  %1245 = vst [vmem:[#allocation2 + $0x30] sm:$0xf] %v1244_v34  ;;  %v1710_v19 = vrot.slane %v1708_v25, 1  ;;  %v1715_v60 = vrot.slane %v1713_v26, 1  ;;  %v522_v44 = vld [vmem:[%s22393_s0 + $0x24] sm:$0xf] }
  0x73   :  { %1249 = vst [vmem:[#allocation2 + $0x38] sm:$0x1] %v1248_v30  ;;  %v645_v45 = vsel %vm17700_vm7, %v637_v16, %v644_v29  ;;  %83 = vst [vmem:[#allocation2 + $0x3c] sm:$0x1] %v82_v42  ;;  %v648_v46 = vshrl.u32 %v521_v38, 16  ;;  %v651_v48 = vshll.u32 %v521_v38, 16  ;;  %14223 = vmatpush3.bf16.msra.mxu0 %v17039_v5  ;;  %v18085_v36 = vsel %vm1969_vm10, %v18014_v6, %v1977_v3 }
  0x74   :  { %193 = vst [vmem:[#allocation2 + $0x44] sm:$0x1] %v192_v43  ;;  %v656_v51 = vshrl.u32 %v522_v44, 16  ;;  %v84_v52 = vld [vmem:[#allocation2 + $0x48] sm:$0x1]  ;;  %v17045_v54 = vld [vmem:[%s22394_s1 + $0x1d8] sm:$0xff]   ;;  %v1711_v58 = vor.u32 %v1710_v19, %v1706_v22  ;;  %14224 = vmatprep.subr.bf16.mxu0 %v17043_v13 }
  0x75   :  { %1246 = vst [vmem:[#allocation2 + $0x34] sm:$0xf] %v645_v45  ;;  %v659_v59 = vshll.u32 %v522_v44, 16  ;;  %v85_v62 = vsel %vm17654_vm2, 0, %v84_v52  ;;  %v194_v63 = vld [vmem:[#allocation2 + $0x50] sm:$0x1] }
  0x76   :  { %v523_v0 = vld [vmem:[%s22393_s0 + $0x28] sm:$0xf]  ;;  %v1503_v4 = vld [vmem:[#allocation2 + $0x24] sm:$0xe]  ;;  %v650_v5 = vrot.slane %v648_v46, 7  ;;  %v658_v8 = vrot.slane %v656_v51, 7  ;;  %v18064_v16 = vsel %vm1680_vm9, %v1711_v58, %v1715_v60 }
  0x77   :  { %86 = vst [vmem:[#allocation2 + $0x48] sm:$0x1] %v85_v62  ;;  %v17047_v9 = vld [vmem:[%s22394_s1 + $0x198] sm:$0xff]   ;;  %v1453_v12 = vld [vmem:[#allocation2 + $0x28] sm:$0xf]  ;;  %v195_v18 = vsel %vm17665_vm4, 0, %v194_v63  ;;  %2322 = vmatprep.mubr.bf16.mxu0 %v18064_v16  ;;  %14225 = vmatpush3.bf16.msra.mxu0 %v17044_v40 }
  0x78   :  { %v665_v13 = vshrl.u32 %v523_v0, 16  ;;  %v17051_v2 = vld [vmem:[%s22394_s1 + $0x1e0] sm:$0xff]   ;;  %v18074_v23 = vld [vmem:[#allocation2 + $0x2c] ss:$0 sps:$4 sm:$0x11]   ;;  %v12912_v24 = vcombine.low %v1503_v4, %v1453_v12  ;;  %v654_v25 = vrot.slane %v650_v5, 4  ;;  %2323 = vmatmul.mubr.bf16.gmra.mrb[4].mxu0 %v17993_v47  ;;  %v653_v26 = vor.u32 %v651_v48, %v650_v5  ;;  %14226 = vmatprep.subr.bf16.mxu0 %v17045_v54 }
  0x79   :  { %v17007_v20 = vld [vmem:[%s22394_s1] sm:$0xff]   ;;  %196 = vst [vmem:[#allocation2 + $0x50] sm:$0x1] %v195_v18  ;;  %v661_v29 = vor.u32 %v659_v59, %v658_v8  ;;  %v524_v34 = vld [vmem:[%s22393_s0 + $0x2c] sm:$0xf]  ;;  %v668_v35 = vshll.u32 %v523_v0, 16  ;;  %15645 = vmatmul.mubr.bf16.vlgmr.msra.gmra.mrb[32].mxu1 %v18085_v36 }
  0x7a   :  { %v1452_v22 = vld [vmem:[#allocation2 + $0x24] sm:$0xf]  ;;  %v18081_v30 = vrot.slane %v665_v13, 7  ;;  %v1979_v38 = vrot.slane %v12912_v24, 1  ;;  %v1980_v19 = vrot.slane %v18074_v23, 1  ;;  %v17014_v40 = vld [vmem:[%s22394_s1 + $0x48] sm:$0xff]   ;;  %14085 = vmatpush3.bf16.msra.mxu1 %v17007_v20 }
  0x7b   :  { %v663_v60 = vrot.slane %v658_v8, 4  ;;  %v18091_v42 = vcombine.low %v1452_v22, %v1453_v12  ;;  %v1454_v43 = vld [vmem:[#allocation2 + $0x30] sm:$0xf]  ;;  %v18093_v45 = vld [vmem:[#allocation2 + $0x38] ss:$0 sps:$4 sm:$0x11]   ;;  %v662_v46 = vsel %vm17700_vm7, %v654_v25, %v661_v29  ;;  %14227 = vmatpush3.bf16.msra.mxu0 %v17047_v9  ;;  %14086 = vmatprep.subr.bf16.mxu1 %v17014_v40 }
  0x7c   :  { %v1504_v44 = vld [vmem:[#allocation2 + $0x30] sm:$0xe]  ;;  %v670_v6 = vor.u32 %v668_v35, %v18081_v30  ;;  %v17052_v48 = vld [vmem:[%s22394_s1 + $0x1a0] sm:$0xff]   ;;  %v18102_v51 = vsel %vm1969_vm10, %v1979_v38, %v1980_v19  ;;  %v1455_v52 = vld [vmem:[#allocation2 + $0x34] sm:$0xf]  ;;  %v1983_v63 = vrot.slane %v18093_v45, 1  ;;  %14228 = vmatprep.subr.bf16.mxu0 %v17051_v2 }
  0x7d   :  { %v17015_v54 = vld [vmem:[%s22394_s1 + $0x8] sm:$0xff]   ;;  %v1250_v58 = vld [vmem:[#allocation2 + $0x3c] sm:$0xf]  ;;  %1253 = vst [vmem:[#allocation2 + $0x40] sm:$0xf] %v662_v46  ;;  %v12913_v62 = vcombine.low %v1504_v44, %v1455_v52  ;;  %v17022_v4 = vld [vmem:[%s22394_s1 + $0x50] sm:$0xff]   ;;  %15648 = vmatprep.mubr.bf16.mxu1 %v18102_v51  ;;  %v18125_v25 = vcombine.low %v1454_v43, %v1455_v52 }
  0x7e   :  { %v1254_v59 = vld [vmem:[#allocation2 + $0x44] sm:$0x1]  ;;  %v1251_v0 = vsel %vm17712_vm8, %v653_v26, %v1250_v58  ;;  %v1257_v3 = vld [vmem:[#allocation2 + $0x48] sm:$0xf]  ;;  %v673_v9 = vshrl.u32 %v524_v34, 16  ;;  %v676_v12 = vshll.u32 %v524_v34, 16  ;;  %14087 = vmatpush3.bf16.msra.mxu1 %v17015_v54 }
  0x7f   :  { %v17053_v5 = vld [vmem:[%s22394_s1 + $0x1e8] sm:$0xff]   ;;  %1252 = vst [vmem:[#allocation2 + $0x3c] sm:$0xf] %v1251_v0  ;;  %v1255_v8 = vsel %vm17654_vm2, %v663_v60, %v1254_v59  ;;  %v1258_v18 = vsel %vm17712_vm8, %v670_v6, %v1257_v3  ;;  %v1982_v13 = vrot.slane %v12913_v62, 1  ;;  %v1718_v22 = vshrl.u32 %v18091_v42, 16  ;;  %14229 = vmatpush3.bf16.msra.mxu0 %v17052_v48  ;;  %v17023_v46 = vld [vmem:[%s22394_s1 + $0x10] sm:$0xff]   ;;  %14088 = vmatprep.subr.bf16.mxu1 %v17022_v4 }
  0x80   :  { %1256 = vst [vmem:[#allocation2 + $0x44] sm:$0x1] %v1255_v8  ;;  %1259 = vst [vmem:[#allocation2 + $0x48] sm:$0xf] %v1258_v18  ;;  %v1261_v2 = vld [vmem:[#allocation2 + $0x50] sm:$0x1]  ;;  %14230 = vmatprep.subr.bf16.mxu0 %v17053_v5 }
  0x81   :  { %v1720_v20 = vshll.u32 %v18091_v42, 16  ;;  %v1725_v24 = vshll.u32 %v18074_v23, 16  ;;  %v671_v26 = vrot.slane %v18081_v30, 4  ;;  %v675_v29 = vrot.slane %v673_v9, 7  ;;  %v87_v34 = vld [vmem:[#allocation2 + $0x54] sm:$0x1] }
  0x82   :  { %v197_v35 = vld [vmem:[#allocation2 + $0x5c] sm:$0x1]  ;;  %v18129_v38 = vsel %vm1969_vm10, %v1982_v13, %v1983_v63  ;;  %v88_v60 = vsel %vm17654_vm2, 0, %v87_v34  ;;  %v525_v23 = vld [vmem:[%s22393_s0 + $0x30] sm:$0xf]  ;;  %v17055_v30 = vld [vmem:[%s22394_s1 + $0x1a8] sm:$0xff]   ;;  %14089 = vmatpush3.bf16.msra.mxu1 %v17023_v46 }
  0x83   :  { %v1722_v19 = vrot.slane %v1720_v20, 1  ;;  %v1727_v40 = vrot.slane %v1725_v24, 1  ;;  %v678_v43 = vor.u32 %v676_v12, %v675_v29  ;;  %v680_v44 = vrot.slane %v675_v29, 4  ;;  %89 = vst [vmem:[#allocation2 + $0x54] sm:$0x1] %v88_v60  ;;  %v17030_v0 = vld [vmem:[%s22394_s1 + $0x58] sm:$0xff]   ;;  %14231 = vmatpush3.bf16.msra.mxu0 %v17055_v30  ;;  %15649 = vmatmul.mubr.bf16.gmra.mrb[36].mxu1 %v18129_v38 }
  0x84   :  { %v198_v6 = vsel %vm17665_vm4, 0, %v197_v35  ;;  %v526_v48 = vld [vmem:[%s22393_s0 + $0x34] sm:$0xf]  ;;  %v682_v52 = vshrl.u32 %v525_v23, 16  ;;  %v18147_v58 = vld [vmem:[#allocation2 + $0x40] sm:$0xf]  ;;  %14090 = vmatprep.subr.bf16.mxu1 %v17030_v0 }
  0x85   :  { %v1723_v59 = vor.u32 %v1722_v19, %v1718_v22  ;;  %199 = vst [vmem:[#allocation2 + $0x5c] sm:$0x1] %v198_v6  ;;  %v685_v54 = vshll.u32 %v525_v23, 16  ;;  %v690_v62 = vshrl.u32 %v526_v48, 16  ;;  %v693_v63 = vshll.u32 %v526_v48, 16  ;;  %v17033_v23 = vld [vmem:[%s22394_s1 + $0x60] sm:$0xff]  }
  0x86   :  { %v679_v3 = vsel %vm17700_vm7, %v671_v26, %v678_v43  ;;  %v1262_v5 = vsel %vm17654_vm2, %v680_v44, %v1261_v2  ;;  %v684_v8 = vrot.slane %v682_v52, 7  ;;  %v90_v9 = vld [vmem:[#allocation2 + $0x60] sm:$0x1]  ;;  %v200_v12 = vld [vmem:[#allocation2 + $0x68] sm:$0x1]  ;;  %v1732_v20 = vshll.u32 %v18125_v25, 16 }
  0x87   :  { %v1505_v4 = vld [vmem:[#allocation2 + $0x3c] sm:$0xe]  ;;  %1260 = vst [vmem:[#allocation2 + $0x4c] sm:$0xf] %v679_v3  ;;  %1263 = vst [vmem:[#allocation2 + $0x50] sm:$0x1] %v1262_v5  ;;  %v18158_v18 = vsel %vm1680_vm9, %v1723_v59, %v1727_v40 }
  0x88   :  { %v692_v13 = vrot.slane %v690_v62, 7  ;;  %v91_v22 = vsel %vm17654_vm2, 0, %v90_v9  ;;  %v17031_v2 = vld [vmem:[%s22394_s1 + $0x18] sm:$0xff]   ;;  %v18166_v24 = vld [vmem:[#allocation2 + $0x44] ss:$0 sps:$4 sm:$0x11]   ;;  %v12914_v26 = vcombine.low %v1505_v4, %v18147_v58  ;;  %2330 = vmatprep.mubr.bf16.mxu0 %v18158_v18  ;;  %v687_v29 = vor.u32 %v685_v54, %v684_v8 }
  0x89   :  { %v688_v34 = vrot.slane %v684_v8, 4  ;;  %92 = vst [vmem:[#allocation2 + $0x60] sm:$0x1] %v91_v22  ;;  %2331 = vmatmul.mubr.bf16.gmra.mrb[8].mxu0 %v18091_v42  ;;  %v201_v40 = vsel %vm17665_vm4, 0, %v200_v12  ;;  %v1730_v60 = vshrl.u32 %v18125_v25, 16  ;;  %v1986_v44 = vrot.slane %v18166_v24, 1  ;;  %14091 = vmatpush3.bf16.msra.mxu1 %v17031_v2 }
  0x8a   :  { %v695_v35 = vor.u32 %v693_v63, %v692_v13  ;;  %v697_v19 = vrot.slane %v692_v13, 4  ;;  %v1456_v30 = vld [vmem:[#allocation2 + $0x3c] sm:$0xf]  ;;  %v1985_v43 = vrot.slane %v12914_v26, 1  ;;  %v1506_v46 = vld [vmem:[#allocation2 + $0x48] sm:$0xe]  ;;  %14092 = vmatprep.subr.bf16.mxu1 %v17033_v23 }
  0x8b   :  { %202 = vst [vmem:[#allocation2 + $0x68] sm:$0x1] %v201_v40  ;;  %v527_v6 = vld [vmem:[%s22393_s0 + $0x38] sm:$0xf]  ;;  %v528_v48 = vld [vmem:[%s22393_s0 + $0x3c] sm:$0xf] }
  0x8c   :  { %v17034_v52 = vld [vmem:[%s22394_s1 + $0x20] sm:$0xff]   ;;  %v696_v59 = vsel %vm17700_vm7, %v688_v34, %v695_v35  ;;  %v1264_v54 = vld [vmem:[#allocation2 + $0x54] sm:$0xf]  ;;  %v699_v62 = vshrl.u32 %v527_v6, 16  ;;  %v702_v63 = vshll.u32 %v527_v6, 16  ;;  %v707_v0 = vshrl.u32 %v528_v48, 16 }
  0x8d   :  { %v17041_v3 = vld [vmem:[%s22394_s1 + $0x68] sm:$0xff]   ;;  %v17059_v5 = vld [vmem:[%s22394_s1 + $0x1f0] sm:$0xff]   ;;  %v18196_v8 = vsel %vm1969_vm10, %v1985_v43, %v1986_v44  ;;  %v1265_v9 = vsel %vm17712_vm8, %v687_v29, %v1264_v54  ;;  %1267 = vst [vmem:[#allocation2 + $0x58] sm:$0xf] %v696_v59  ;;  %v1268_v12 = vld [vmem:[#allocation2 + $0x5c] sm:$0x1]  ;;  %14093 = vmatpush3.bf16.msra.mxu1 %v17034_v52 }
  0x8e   :  { %v710_v4 = vshll.u32 %v528_v48, 16  ;;  %v1734_v13 = vrot.slane %v1732_v20, 1  ;;  %15652 = vmatprep.mubr.bf16.mxu1 %v18196_v8  ;;  %1266 = vst [vmem:[#allocation2 + $0x54] sm:$0xf] %v1265_v9  ;;  %v1269_v22 = vsel %vm17654_vm2, %v697_v19, %v1268_v12  ;;  %v701_v26 = vrot.slane %v699_v62, 7  ;;  %v17060_v29 = vld [vmem:[%s22394_s1 + $0x1b0] sm:$0xff]   ;;  %14232 = vmatprep.subr.bf16.mxu0 %v17059_v5 }
  0x8f   :  { %v709_v34 = vrot.slane %v707_v0, 7  ;;  %v1737_v35 = vshll.u32 %v18093_v45, 16  ;;  %v1459_v40 = vld [vmem:[#allocation2 + $0x4c] sm:$0xf]  ;;  %1270 = vst [vmem:[#allocation2 + $0x5c] sm:$0x1] %v1269_v22  ;;  %v18208_v20 = vcombine.low %v1456_v30, %v18147_v58  ;;  %14233 = vmatpush3.bf16.msra.mxu0 %v17060_v29  ;;  %14094 = vmatprep.subr.bf16.mxu1 %v17041_v3 }
  0x90   :  { %v1735_v43 = vor.u32 %v1734_v13, %v1730_v60  ;;  %v18210_v2 = vld [vmem:[#allocation2 + $0x50] ss:$0 sps:$4 sm:$0x11]   ;;  %v12915_v44 = vcombine.low %v1506_v46, %v1459_v40  ;;  %v704_v19 = vor.u32 %v702_v63, %v701_v26  ;;  %v705_v6 = vrot.slane %v701_v26, 4  ;;  %v1271_v48 = vld [vmem:[#allocation2 + $0x60] sm:$0xf] }
  0x91   :  { %v712_v45 = vor.u32 %v710_v4, %v709_v34  ;;  %v714_v23 = vrot.slane %v709_v34, 4  ;;  %v1739_v59 = vrot.slane %v1737_v35, 1  ;;  %v17042_v54 = vld [vmem:[%s22394_s1 + $0x28] sm:$0xff]   ;;  %v17049_v58 = vld [vmem:[%s22394_s1 + $0x70] sm:$0xff]   ;;  %v1989_v30 = vrot.slane %v18210_v2, 1  ;;  %v17061_v26 = vld [vmem:[%s22394_s1 + $0x1f8] sm:$0xff]  }
  0x92   :  { %v1988_v60 = vrot.slane %v12915_v44, 1  ;;  %v1272_v46 = vsel %vm17712_vm8, %v704_v19, %v1271_v48  ;;  %v1275_v62 = vld [vmem:[#allocation2 + $0x68] sm:$0x1]  ;;  %v1509_v63 = vld [vmem:[#allocation2 + $0x6c] sm:$0xe]  ;;  %v1742_v13 = vshrl.u32 %v18208_v20, 16  ;;  %14095 = vmatpush3.bf16.msra.mxu1 %v17042_v54  ;;  %14234 = vmatprep.subr.bf16.mxu0 %v17061_v26 }
  0x93   :  { %v713_v52 = vsel %vm17700_vm7, %v705_v6, %v712_v45  ;;  %1273 = vst [vmem:[#allocation2 + $0x60] sm:$0xf] %v1272_v46  ;;  %v1276_v0 = vsel %vm17654_vm2, %v714_v23, %v1275_v62  ;;  %v18226_v5 = vsel %vm1680_vm9, %v1735_v43, %v1739_v59  ;;  %v17511_v3 = vld [vmem:[#allocation2 + $0x74] ss:$0 sps:$4 sm:$0x11]   ;;  %v1744_v22 = vshll.u32 %v18208_v20, 16  ;;  %14096 = vmatprep.subr.bf16.mxu1 %v17049_v58 }
  0x94   :  { %v18229_v9 = vsel %vm1969_vm10, %v1988_v60, %v1989_v30  ;;  %v18231_v12 = vld [vmem:[#allocation2 + $0x58] sm:$0xf]  ;;  %1274 = vst [vmem:[#allocation2 + $0x64] sm:$0xf] %v713_v52  ;;  %1277 = vst [vmem:[#allocation2 + $0x68] sm:$0x1] %v1276_v0  ;;  %2338 = vmatprep.mubr.bf16.mxu0 %v18226_v5 }
  0x95   :  { %v1998_v4 = vrot.slane %v17511_v3, 1  ;;  %v1458_v34 = vld [vmem:[#allocation2 + $0x48] sm:$0xf]  ;;  %15653 = vmatmul.mubr.bf16.gmra.mrb[40].mxu1 %v18229_v9  ;;  %v1507_v35 = vld [vmem:[#allocation2 + $0x54] sm:$0xe]  ;;  %2339 = vmatmul.mubr.bf16.gmra.mrb[12].mxu0 %v18125_v25  ;;  %v1749_v29 = vshll.u32 %v18166_v24, 16 }
  0x96   :  { %v17050_v43 = vld [vmem:[%s22394_s1 + $0x30] sm:$0xff]   ;;  %v18245_v44 = vld [vmem:[#allocation2 + $0x5c] ss:$0 sps:$4 sm:$0x11]   ;;  %v12916_v19 = vcombine.low %v1507_v35, %v18231_v12  ;;  %v1746_v45 = vrot.slane %v1744_v22, 1  ;;  %v18251_v24 = vcombine.low %v1458_v34, %v1459_v40 }
  0x97   :  { %v17512_v6 = vld [vmem:[#allocation2 + $0x70] sm:$0xf]  ;;  %v1751_v23 = vrot.slane %v1749_v29, 1  ;;  %v17057_v59 = vld [vmem:[%s22394_s1 + $0x78] sm:$0xff]   ;;  %v1992_v30 = vrot.slane %v18245_v44, 1  ;;  %14097 = vmatpush3.bf16.msra.mxu1 %v17050_v43  ;;  %v1761_v43 = vshll.u32 %v18210_v2, 16 }
  0x98   :  { %v12918_v48 = vcombine.low %v1509_v63, %v17512_v6  ;;  %v1991_v60 = vrot.slane %v12916_v19, 1  ;;  %v1510_v46 = vld [vmem:[#allocation2 + $0x78] sm:$0xe]  ;;  %v1747_v62 = vor.u32 %v1746_v45, %v1742_v13  ;;  %v1511_v3 = vld [vmem:[#allocation2 + $0x84] sm:$0xe]  ;;  %v1754_v40 = vshrl.u32 %v18251_v24, 16  ;;  %14098 = vmatprep.subr.bf16.mxu1 %v17057_v59 }
  0x99   :  { %v17058_v63 = vld [vmem:[%s22394_s1 + $0x38] sm:$0xff]   ;;  %v1756_v34 = vshll.u32 %v18251_v24, 16  ;;  %v1460_v35 = vld [vmem:[#allocation2 + $0x54] sm:$0xf] }
  0x9a   :  { %v18258_v54 = vsel %vm1969_vm10, %v1991_v60, %v1992_v30  ;;  %v1508_v52 = vld [vmem:[#allocation2 + $0x60] sm:$0xe]  ;;  %v1997_v58 = vrot.slane %v12918_v48, 1  ;;  %v18261_v0 = vsel %vm1680_vm9, %v1747_v62, %v1751_v23  ;;  %v17513_v29 = vld [vmem:[#allocation2 + $0x7c] sm:$0xf]  ;;  %v18279_v32 = vcombine.low %v1460_v35, %v18231_v12 }
  0x9b   :  { %15656 = vmatprep.mubr.bf16.mxu1 %v18258_v54  ;;  %v1463_v22 = vld [vmem:[#allocation2 + $0x64] sm:$0xf]  ;;  %2346 = vmatprep.mubr.bf16.mxu0 %v18261_v0  ;;  %v18266_v13 = vld [vmem:[#allocation2 + $0x68] ss:$0 sps:$4 sm:$0x11]   ;;  %v12919_v19 = vcombine.low %v1510_v46, %v17513_v29  ;;  %v1758_v62 = vrot.slane %v1756_v34, 1 }
  0x9c   :  { %v12917_v26 = vcombine.low %v1508_v52, %v1463_v22  ;;  %v17514_v6 = vld [vmem:[#allocation2 + $0x80] ss:$0 sps:$4 sm:$0x11]   ;;  %v1995_v23 = vrot.slane %v18266_v13, 1  ;;  %v17515_v60 = vld [vmem:[#allocation2 + $0x88] sm:$0xf]  ;;  %14099 = vmatpush3.bf16.msra.mxu1 %v17058_v63  ;;  %v18276_v52 = vsel %vm1969_vm10, %v1997_v58, %v1998_v4 }
  0x9d   :  { %v2001_v48 = vrot.slane %v17514_v6, 1  ;;  %2347 = vmatmul.mubr.bf16.gmra.mrb[16].mxu0 %v18208_v20  ;;  %v12920_v30 = vcombine.low %v1511_v3, %v17515_v60  ;;  %v17064_v59 = vld [vmem:[%s22394_s1 + $0x1b8] sm:$0xff]   ;;  %22500 = vst [vmem:[#allocation11_spill] sm:$0xff] %v18276_v52  ;;  %v17516_v46 = vld [vmem:[#allocation2 + $0x8c] ss:$0 sps:$4 sm:$0x11]   ;;  %v1759_v3 = vor.u32 %v1758_v62, %v1754_v40 }
  0x9e   :  { %v1994_v45 = vrot.slane %v12917_v26, 1  ;;  %v2004_v29 = vrot.slane %v17516_v46, 1  ;;  %v1763_v6 = vrot.slane %v1761_v43, 1  ;;  %v1512_v26 = vld [vmem:[#allocation2 + $0x90] sm:$0xe]  ;;  %14235 = vmatpush3.bf16.msra.mxu0 %v17064_v59  ;;  %v2000_v34 = vrot.slane %v12919_v19, 1 }
  0x9f   :  { %v1462_v63 = vld [vmem:[#allocation2 + $0x60] sm:$0xf]  ;;  %v2003_v4 = vrot.slane %v12920_v30, 1  ;;  %v1513_v12 = vld [vmem:[#allocation2 + $0x9c] sm:$0xe]  ;;  %v1768_v40 = vshll.u32 %v18279_v32, 16 }
  0xa0   :  { %v18282_v2 = vsel %vm1969_vm10, %v1994_v45, %v1995_v23  ;;  %v18287_v58 = vsel %vm1680_vm9, %v1759_v3, %v1763_v6  ;;  %v17517_v35 = vld [vmem:[#allocation2 + $0x94] sm:$0xf]  ;;  %v1766_v45 = vshrl.u32 %v18279_v32, 16  ;;  %v1773_v23 = vshll.u32 %v18245_v44, 16  ;;  %v18296_v60 = vld [vmem:[%s22394_s1 + $0x80] sm:$0xff]  }
  0xa1   :  { %15657 = vmatmul.mubr.bf16.gmra.mrb[44].mxu1 %v18282_v2  ;;  %2354 = vmatprep.mubr.bf16.mxu0 %v18287_v58  ;;  %v12921_v43 = vcombine.low %v1512_v26, %v17517_v35  ;;  %v17518_v19 = vld [vmem:[#allocation2 + $0x98] ss:$0 sps:$4 sm:$0x11]   ;;  %v18299_v62 = vcombine.low %v1462_v63, %v1463_v22  ;;  %v18302_v59 = vsel %vm1969_vm10, %v2000_v34, %v2001_v48  ;;  %v1770_v46 = vrot.slane %v1768_v40, 1  ;;  %v17519_v26 = vld [vmem:[#allocation2 + $0xa0] sm:$0xf] }
  0xa2   :  { %15660 = vmatprep.mubr.bf16.mxu1 %v18276_v52  ;;  %v2007_v30 = vrot.slane %v17518_v19, 1  ;;  %v1775_v6 = vrot.slane %v1773_v23, 1  ;;  %15676 = vmatprep.subr.bf16.mxu1 %v18296_v60  ;;  %v18306_v44 = vsel %vm1969_vm10, %v2003_v4, %v2004_v29  ;;  %v12922_v3 = vcombine.low %v1513_v12, %v17519_v26  ;;  %v17520_v41 = vld [vmem:[#allocation2 + $0xa4] ss:$0 sps:$4 sm:$0x11]  }
  0xa3   :  { %v2006_v35 = vrot.slane %v12921_v43, 1  ;;  %v2010_v52 = vrot.slane %v17520_v41, 1  ;;  %v1771_v19 = vor.u32 %v1770_v46, %v1766_v45  ;;  %v1514_v22 = vld [vmem:[#allocation2 + $0xa8] sm:$0xe]  ;;  %v1515_v63 = vld [vmem:[#allocation2 + $0xb4] sm:$0xe] }
  0xa4   :  { %v1778_v34 = vshrl.u32 %v18299_v62, 16  ;;  %v1780_v29 = vshll.u32 %v18299_v62, 16  ;;  %v2009_v4 = vrot.slane %v12922_v3, 1  ;;  %v1785_v12 = vshll.u32 %v18266_v13, 16  ;;  %v17521_v43 = vld [vmem:[#allocation2 + $0xac] sm:$0xf] }
  0xa5   :  { %2355 = vmatmul.mubr.bf16.gmra.mrb[20].mxu0 %v18251_v24  ;;  %v18311_v48 = vsel %vm1680_vm9, %v1771_v19, %v1775_v6  ;;  %v12923_v45 = vcombine.low %v1514_v22, %v17521_v43  ;;  %v18319_v23 = vsel %vm1969_vm10, %v2006_v35, %v2007_v30  ;;  %v17564_v6 = vmov 0   ;;  %v17522_v30 = vld [vmem:[#allocation2 + $0xb8] sm:$0xf]  ;;  %v17523_v19 = vld [vmem:[#allocation2 + $0xb0] ss:$0 sps:$4 sm:$0x11]  }
  0xa6   :  { %2362 = vmatprep.mubr.bf16.mxu0 %v18311_v48  ;;  %v1782_v41 = vrot.slane %v1780_v29, 1  ;;  %v1787_v40 = vrot.slane %v1785_v12, 1  ;;  %50 = vst [vmem:[#allocation2] sm:$0xf] %v17564_v6  ;;  %51 = vst [vmem:[#allocation2 + $0x4] sm:$0xf] %v17564_v6  ;;  %v18322_v13 = vsel %vm1969_vm10, %v2009_v4, %v2010_v52  ;;  %v12924_v26 = vcombine.low %v1515_v63, %v17522_v30 }
  0xa7   :  { %52 = vst [vmem:[#allocation2 + $0x8] sm:$0x1] %v17564_v6  ;;  %53 = vst [vmem:[#allocation2 + $0xd8] sm:$0xf] %v17564_v6  ;;  %v2012_v35 = vrot.slane %v12923_v45, 1  ;;  %v2013_v22 = vrot.slane %v17523_v19, 1 }
  0xa8   :  { %v1783_v46 = vor.u32 %v1782_v41, %v1778_v34  ;;  %54 = vst [vmem:[#allocation2 + $0xdc] sm:$0xf] %v17564_v6  ;;  %55 = vst [vmem:[#allocation2 + $0xe0] sm:$0x1] %v17564_v6  ;;  %v1516_v34 = vld [vmem:[#allocation2 + $0xc0] sm:$0xe] }
  0xa9   :  { %15661 = vmatmul.mubr.bf16.gmra.mrb[48].mxu1 %v18302_v59  ;;  %57 = vst [vmem:[#allocation2 + $0xcc] sm:$0xf] %v17564_v6  ;;  %58 = vst [vmem:[#allocation2 + $0xd0] sm:$0xf] %v17564_v6  ;;  %v2015_v29 = vrot.slane %v12924_v26, 1 }
  0xaa   :  { %15664 = vmatprep.mubr.bf16.mxu1 %v18306_v44  ;;  %59 = vst [vmem:[#allocation2 + $0xd4] sm:$0x1] %v17564_v6  ;;  %60 = vst [vmem:[#allocation2 + $0x1a4] sm:$0xf] %v17564_v6  ;;  %v18325_v3 = vsel %vm1680_vm9, %v1783_v46, %v1787_v40  ;;  %v17525_v52 = vld [vmem:[#allocation2 + $0xc4] sm:$0xf]  ;;  %v18332_v40 = vsel %vm1969_vm10, %v2012_v35, %v2013_v22 }
  0xab   :  { %61 = vst [vmem:[#allocation2 + $0x1a8] sm:$0xf] %v17564_v6  ;;  %62 = vst [vmem:[#allocation2 + $0x1ac] sm:$0x1] %v17564_v6  ;;  %v12925_v4 = vcombine.low %v1516_v34, %v17525_v52 }
  0xac   :  { %284 = vst [vmem:[#allocation3] sm:$0xf] %v17564_v6  ;;  %285 = vst [vmem:[#allocation3 + $0x4] sm:$0xf] %v17564_v6 }
  0xad   :  { %2363 = vmatmul.mubr.bf16.gmra.mrb[24].mxu0 %v18279_v32  ;;  %286 = vst [vmem:[#allocation3 + $0x8] sm:$0x1] %v17564_v6  ;;  %287 = vst [vmem:[#allocation3 + $0xd8] sm:$0xf] %v17564_v6  ;;  %v66_v63 = vld [vmem:[#allocation2] sm:$0x1] }
  0xae   :  { %288 = vst [vmem:[#allocation3 + $0xdc] sm:$0xf] %v17564_v6  ;;  %289 = vst [vmem:[#allocation3 + $0xe0] sm:$0x1] %v17564_v6  ;;  %2370 = vmatprep.mubr.bf16.mxu0 %v18325_v3  ;;  %v176_v43 = vld [vmem:[#allocation2 + $0x8] sm:$0x1] }
  0xaf   :  { %291 = vst [vmem:[#allocation3 + $0xcc] sm:$0xf] %v17564_v6  ;;  %292 = vst [vmem:[#allocation3 + $0xd0] sm:$0xf] %v17564_v6  ;;  %v67_v45 = vsel %vm17654_vm2, 0, %v66_v63  ;;  %v177_v46 = vsel %vm17665_vm4, 0, %v176_v43 }
  0xb0   :  { %293 = vst [vmem:[#allocation3 + $0xd4] sm:$0x1] %v17564_v6  ;;  %294 = vst [vmem:[#allocation3 + $0x1a4] sm:$0xf] %v17564_v6  ;;  %v117_v30 = vld [vmem:[#allocation2 + $0xcc] sm:$0x1] }
  0xb1   :  { %295 = vst [vmem:[#allocation3 + $0x1a8] sm:$0xf] %v17564_v6  ;;  %296 = vst [vmem:[#allocation3 + $0x1ac] sm:$0x1] %v17564_v6  ;;  %15665 = vmatmul.mubr.bf16.gmra.mrb[52].mxu1 %v18319_v23  ;;  %v227_v26 = vld [vmem:[#allocation2 + $0xd4] sm:$0x1] }
  0xb2   :  { %15668 = vmatprep.mubr.bf16.mxu1 %v18322_v13  ;;  %v17524_v12 = vld [vmem:[#allocation2 + $0xbc] ss:$0 sps:$4 sm:$0x11]   ;;  %68 = vst [vmem:[#allocation2] sm:$0x1] %v67_v45  ;;  %v2018_v19 = vrot.slane %v12925_v4, 1 }
  0xb3   :  { %v2016_v41 = vrot.slane %v17524_v12, 1  ;;  %178 = vst [vmem:[#allocation2 + $0x8] sm:$0x1] %v177_v46  ;;  %v17526_v35 = vld [vmem:[#allocation2 + $0xc8] ss:$0 sps:$4 sm:$0x11]  }
  0xb4   :  { %v2019_v22 = vrot.slane %v17526_v35, 1  ;;  %v118_v34 = vsel %vm17654_vm2, 0, %v117_v30  ;;  %v228_v12 = vsel %vm17665_vm4, 0, %v227_v26  ;;  %v1447_v52 = vld [vmem:[#allocation2 + $0x4] sm:$0xf] }
  0xb5   :  { %2371 = vmatmul.mubr.bf16.gmra.mrb[28].mxu0 %v18299_v62  ;;  %v18340_v6 = vsel %vm1969_vm10, %v2015_v29, %v2016_v41  ;;  %119 = vst [vmem:[#allocation2 + $0xcc] sm:$0x1] %v118_v34  ;;  %229 = vst [vmem:[#allocation2 + $0xd4] sm:$0x1] %v228_v12  ;;  %v1500_v35 = vld [vmem:[#allocation2] sm:$0xe] }
  0xb6   :  { %3294 = vmatprep.mubr.bf16.mxu0 %v18064_v16  ;;  %v18350_v29 = vsel %vm1969_vm10, %v2018_v19, %v2019_v22  ;;  %v12909_v34 = vcombine.low %v1500_v35, %v1447_v52  ;;  %v17066_v19 = vld [vmem:[%s22394_s1 + $0x88] sm:$0xff]  }
  0xb7   :  { %22501 = vst [vmem:[#allocation12_spill] sm:$0xff] %v18350_v29 }
  0xb8   :  { %v1970_v22 = vrot.slane %v12909_v34, 1 }
  0xb9   :  { %15669 = vmatmul.mubr.bf16.gmra.mrb[56].mxu1 %v18332_v40  ;;  %v1446_v41 = vld [vmem:[#allocation2] sm:$0xf] }
  0xba   :  { %15672 = vmatprep.mubr.bf16.mxu1 %v18340_v6  ;;  %v12873_v4 = vcombine.low %v1446_v41, %v1447_v52  ;;  %v17063_v63 = vld [vmem:[#allocation2 + $0x8] ss:$0 sps:$4 sm:$0x11]   ;;  %v17067_v52 = vld [vmem:[%s22394_s1 + $0x90] sm:$0xff]  }
  0xbb   :  { %v1689_v46 = vshll.u32 %v17063_v63, 16  ;;  %v1971_v12 = vrot.slane %v17063_v63, 1 }
  0xbc   :  { %v1682_v43 = vshrl.u32 %v12873_v4, 16  ;;  %v1684_v45 = vshll.u32 %v12873_v4, 16 }
  0xbd   :  { %3295 = vmatmul.mubr.bf16.vlgmr.msra.gmra.mrb[32].mxu0 %v17993_v47  ;;  %v1691_v26 = vrot.slane %v1689_v46, 1 }
  0xbe   :  { %3302 = vmatprep.mubr.bf16.mxu0 %v18158_v18  ;;  %v1686_v30 = vrot.slane %v1684_v45, 1 }
  0xc0   :  { %v1687_v10 = vor.u32 %v1686_v30, %v1682_v43 }
  0xc1   :  { %15673 = vmatmul.mubr.bf16.gmra.mrb[60].mxu1 %v18350_v29  ;;  %v18361_v29 = vsel %vm1969_vm10, %v1970_v22, %v1971_v12 }
  0xc2   :  { %v1692_v41 = vsel %vm1680_vm9, %v1687_v10, %v1691_v26  ;;  %v17068_v10 = vld [vmem:[%s22394_s1 + $0x98] sm:$0xff]  }
  0xc3   :  { %2780 = vmatprep.mubr.bf16.mxu1 %v1692_v41 }
  0xc5   :  { %3303 = vmatmul.mubr.bf16.gmra.mrb[36].mxu0 %v18091_v42 }
  0xc6   :  { %3310 = vmatprep.mubr.bf16.mxu0 %v18226_v5 }
  0xc9   :  { %2781 = vmatmul.mubr.bf16.vlgmr.msra.gmra.mrb[64].mxu1 %v12873_v4  ;;  %v17069_v4 = vld [vmem:[%s22394_s1 + $0xa0] sm:$0xff]  }
  0xca   :  { %15677 = vmatpush3.bf16.msra.mxu1 %v18296_v60  ;;  %2788 = vmatprep.mubr.bf16.mxu1 %v18003_v56  ;;  %v17070_v56 = vld [vmem:[%s22394_s1 + $0xa8] sm:$0xff]  }
  0xcb   :  { %15678 = vmatprep.subr.bf16.mxu1 %v17066_v19 }
  0xcd   :  { %3311 = vmatmul.mubr.bf16.gmra.mrb[40].mxu0 %v18125_v25 }
  0xce   :  { %15679 = vmatpush3.bf16.msra.mxu1 %v17066_v19  ;;  %3318 = vmatprep.mubr.bf16.mxu0 %v18261_v0 }
  0xcf   :  { %15680 = vmatprep.subr.bf16.mxu1 %v17067_v52 }
  0xd1   :  { %2789 = vmatmul.mubr.bf16.gmra.mrb[68].mxu1 %v17968_v1  ;;  %v17071_v1 = vld [vmem:[%s22394_s1 + $0xb0] sm:$0xff]  }
  0xd2   :  { %2796 = vmatprep.mubr.bf16.mxu1 %v18064_v16  ;;  %15681 = vmatpush3.bf16.msra.mxu1 %v17067_v52  ;;  %v17072_v16 = vld [vmem:[%s22394_s1 + $0xb8] sm:$0xff]  }
  0xd3   :  { %15682 = vmatprep.subr.bf16.mxu1 %v17068_v10 }
  0xd5   :  { %3319 = vmatmul.mubr.bf16.gmra.mrb[44].mxu0 %v18208_v20 }
  0xd6   :  { %3326 = vmatprep.mubr.bf16.mxu0 %v18287_v58  ;;  %15683 = vmatpush3.bf16.msra.mxu1 %v17068_v10 }
  0xd7   :  { %15684 = vmatprep.subr.bf16.mxu1 %v17069_v4 }
  0xd9   :  { %2797 = vmatmul.mubr.bf16.gmra.mrb[72].mxu1 %v17993_v47  ;;  %v18397_v47 = vld [vmem:[%s22394_s1 + $0x200] sm:$0xff]  }
  0xda   :  { %2804 = vmatprep.mubr.bf16.mxu1 %v18158_v18  ;;  %15685 = vmatpush3.bf16.msra.mxu1 %v17069_v4  ;;  %v1481_v18 = vld [vmem:[#allocation2 + $0xd0] sm:$0xf] }
  0xdb   :  { %15686 = vmatprep.subr.bf16.mxu1 %v17070_v56 }
  0xdd   :  { %3327 = vmatmul.mubr.bf16.gmra.mrb[48].mxu0 %v18251_v24 }
  0xde   :  { %3334 = vmatprep.mubr.bf16.mxu0 %v18311_v48  ;;  %15687 = vmatpush3.bf16.msra.mxu1 %v17070_v56 }
  0xdf   :  { %15688 = vmatprep.subr.bf16.mxu1 %v17071_v1 }
  0xe1   :  { %2805 = vmatmul.mubr.bf16.gmra.mrb[76].mxu1 %v18091_v42 }
  0xe2   :  { %2812 = vmatprep.mubr.bf16.mxu1 %v18226_v5  ;;  %15689 = vmatpush3.bf16.msra.mxu1 %v17071_v1 }
  0xe3   :  { %15690 = vmatprep.subr.bf16.mxu1 %v17072_v16 }
  0xe5   :  { %3335 = vmatmul.mubr.bf16.gmra.mrb[52].mxu0 %v18279_v32 }
  0xe6   :  { %3342 = vmatprep.mubr.bf16.mxu0 %v18325_v3  ;;  %15691 = vmatpush3.bf16.msra.mxu1 %v17072_v16 }
  0xe7   :  { %15724 = vmatprep.subr.bf16.mxu1 %v18397_v47 }
  0xe9   :  { %2813 = vmatmul.mubr.bf16.gmra.mrb[80].mxu1 %v18125_v25  ;;  %v1480_v25 = vld [vmem:[#allocation2 + $0xcc] sm:$0xf] }
  0xea   :  { %2820 = vmatprep.mubr.bf16.mxu1 %v18261_v0  ;;  %v17074_v0 = vld [vmem:[#allocation2 + $0xd4] ss:$0 sps:$4 sm:$0x11]  }
  0xeb   :  { %v1893_v43 = vshll.u32 %v17074_v0, 16 }
  0xed   :  { %3343 = vmatmul.mubr.bf16.gmra.mrb[56].mxu0 %v18299_v62  ;;  %v1895_v34 = vrot.slane %v1893_v43, 1 }
  0xee   :  { %3350 = vmatprep.mubr.bf16.mxu0 %v17793_v17 }
  0xf1   :  { %2821 = vmatmul.mubr.bf16.gmra.mrb[84].mxu1 %v18208_v20 }
  0xf2   :  { %2828 = vmatprep.mubr.bf16.mxu1 %v18287_v58 }
  0xf5   :  { %3351 = vmatmul.mubr.bf16.gmra.mrb[60].mxu0 %v17766_v39 }
  0xf6   :  { %3358 = vmatprep.mubr.bf16.mxu0 %v17806_v33 }
  0xf9   :  { %2829 = vmatmul.mubr.bf16.gmra.mrb[88].mxu1 %v18251_v24 }
  0xfa   :  { %2836 = vmatprep.mubr.bf16.mxu1 %v18311_v48 }
  0xfd   :  { %3359 = vmatmul.mubr.bf16.gmra.mrb[64].mxu0 %v17777_v55 }
  0xfe   :  { %3366 = vmatprep.mubr.bf16.mxu0 %v17829_v57 }
 0x101   :  { %2837 = vmatmul.mubr.bf16.gmra.mrb[92].mxu1 %v18279_v32 }
 0x102   :  { %2844 = vmatprep.mubr.bf16.mxu1 %v18325_v3 }
 0x105   :  { %3367 = vmatmul.mubr.bf16.gmra.mrb[68].mxu0 %v17790_v15 }
 0x106   :  { %3374 = vmatprep.mubr.bf16.mxu0 %v17862_v37 }
 0x109   :  { %2845 = vmatmul.mubr.bf16.gmra.mrb[96].mxu1 %v18299_v62 }
 0x10a   :  { %2852 = vmatprep.mubr.bf16.mxu1 %v17793_v17 }
 0x10b   :  { %v14012_v42 = vpop.f32.mrb[0].mxu1 }
 0x10c   :  { %v14013_v32 = vpop.f32.mrb[1].mxu1 }
 0x10d   :  { %3375 = vmatmul.mubr.bf16.gmra.mrb[72].mxu0 %v17826_v50  ;;  %v18425_v20 = vadd.f32 %v14013_v32, %v14012_v42  ;;  %v14015_v5 = vpop.f32.mrb[2].mxu1 }
 0x10e   :  { %3382 = vmatprep.mubr.bf16.mxu0 %v17893_v14  ;;  %v14016_v24 = vpop.f32.mrb[3].mxu1 }
 0x10f   :  { %v18429_v17 = vadd.f32 %v14016_v24, %v14015_v5 }
 0x111   :  { %2853 = vmatmul.mubr.bf16.gmra.mrb[100].mxu1 %v17766_v39  ;;  %v12890_v39 = vcombine.low %v1480_v25, %v1481_v18 }
 0x112   :  { %2860 = vmatprep.mubr.bf16.mxu1 %v17806_v33 }
 0x113   :  { %v14018_v33 = vpop.f32.mrb[4].mxu1  ;;  %v1886_v60 = vshrl.u32 %v12890_v39, 16  ;;  %v1888_v3 = vshll.u32 %v12890_v39, 16 }
 0x114   :  { %v14019_v58 = vpop.f32.mrb[5].mxu1 }
 0x115   :  { %3383 = vmatmul.mubr.bf16.gmra.mrb[76].mxu0 %v17851_v21  ;;  %v18433_v62 = vadd.f32 %v14019_v58, %v14018_v33  ;;  %v14021_v48 = vpop.f32.mrb[6].mxu1  ;;  %v17077_v58 = vld [vmem:[%s22394_s1 + $0x208] sm:$0xff]  }
 0x116   :  { %3390 = vmatprep.mubr.bf16.mxu0 %v17925_v61  ;;  %v14022_v63 = vpop.f32.mrb[7].mxu1 }
 0x117   :  { %v18437_v45 = vadd.f32 %v14022_v63, %v14021_v48  ;;  %v17078_v63 = vld [vmem:[%s22394_s1 + $0x210] sm:$0xff]  }
 0x119   :  { %2861 = vmatmul.mubr.bf16.gmra.mrb[104].mxu1 %v17777_v55 }
 0x11a   :  { %2868 = vmatprep.mubr.bf16.mxu1 %v17829_v57  ;;  %v1890_v57 = vrot.slane %v1888_v3, 1 }
 0x11b   :  { %v14024_v55 = vpop.f32.mrb[8].mxu1 }
 0x11c   :  { %v14025_v46 = vpop.f32.mrb[9].mxu1  ;;  %v1891_v19 = vor.u32 %v1890_v57, %v1886_v60 }
 0x11d   :  { %3391 = vmatmul.mubr.bf16.gmra.mrb[80].mxu0 %v17890_v11  ;;  %v18441_v30 = vadd.f32 %v14025_v46, %v14024_v55  ;;  %v14027_v26 = vpop.f32.mrb[10].mxu1 }
 0x11e   :  { %3398 = vmatprep.mubr.bf16.mxu0 %v17954_v49  ;;  %v14028_v35 = vpop.f32.mrb[11].mxu1 }
 0x11f   :  { %v18445_v12 = vadd.f32 %v14028_v35, %v14027_v26 }
 0x121   :  { %2869 = vmatmul.mubr.bf16.gmra.mrb[108].mxu1 %v17790_v15 }
 0x122   :  { %2876 = vmatprep.mubr.bf16.mxu1 %v17862_v37  ;;  %v1896_v37 = vsel %vm1680_vm9, %v1891_v19, %v1895_v34 }
 0x123   :  { %v14030_v15 = vpop.f32.mrb[12].mxu1 }
 0x124   :  { %v14031_v22 = vpop.f32.mrb[13].mxu1 }
 0x125   :  { %3399 = vmatmul.mubr.bf16.gmra.mrb[84].mxu0 %v17922_v53  ;;  %v18450_v41 = vadd.f32 %v14031_v22, %v14030_v15  ;;  %v14033_v52 = vpop.f32.mrb[14].mxu1  ;;  %v17080_v15 = vld [vmem:[%s22394_s1 + $0x220] sm:$0xff]  }
 0x126   :  { %3406 = vmatprep.mubr.bf16.mxu0 %v17990_v31  ;;  %v14034_v10 = vpop.f32.mrb[15].mxu1 }
 0x127   :  { %v18453_v31 = vadd.f32 %v14034_v10, %v14033_v52  ;;  %v17081_v52 = vld [vmem:[%s22394_s1 + $0x228] sm:$0xff]   ;;  %v17082_v10 = vld [vmem:[%s22394_s1 + $0x230] sm:$0xff]  }
 0x129   :  { %2877 = vmatmul.mubr.bf16.gmra.mrb[112].mxu1 %v17826_v50 }
 0x12a   :  { %2884 = vmatprep.mubr.bf16.mxu1 %v17893_v14 }
 0x12b   :  { %v14036_v50 = vpop.f32.mrb[16].mxu1 }
 0x12c   :  { %v14037_v4 = vpop.f32.mrb[17].mxu1 }
 0x12d   :  { %3407 = vmatmul.mubr.bf16.gmra.mrb[88].mxu0 %v17947_v28  ;;  %v18457_v14 = vadd.f32 %v14037_v4, %v14036_v50  ;;  %v14039_v56 = vpop.f32.mrb[18].mxu1 }
 0x12e   :  { %3414 = vmatprep.mubr.bf16.mxu0 %v1896_v37  ;;  %v14040_v1 = vpop.f32.mrb[19].mxu1 }
 0x12f   :  { %v18459_v16 = vadd.f32 %v14040_v1, %v14039_v56  ;;  %v17083_v56 = vld [vmem:[%s22394_s1 + $0x238] sm:$0xff]  }
 0x131   :  { %2885 = vmatmul.mubr.bf16.gmra.mrb[116].mxu1 %v17851_v21 }
 0x132   :  { %2892 = vmatprep.mubr.bf16.mxu1 %v17925_v61 }
 0x133   :  { %v14042_v28 = vpop.f32.mrb[20].mxu1 }
 0x134   :  { %v14043_v42 = vpop.f32.mrb[21].mxu1 }
 0x135   :  { %3415 = vmatmul.mubr.bf16.gmra.mrb[92].mxu0 %v12890_v39  ;;  %v18463_v32 = vadd.f32 %v14043_v42, %v14042_v28  ;;  %v14045_v21 = vpop.f32.mrb[22].mxu1 }
 0x136   :  { %v14046_v25 = vpop.f32.mrb[23].mxu1 }
 0x137   :  { %v18465_v61 = vadd.f32 %v14046_v25, %v14045_v21 }
 0x139   :  { %2893 = vmatmul.mubr.bf16.gmra.mrb[120].mxu1 %v17890_v11 }
 0x13a   :  { %2900 = vmatprep.mubr.bf16.mxu1 %v17954_v49 }
 0x13b   :  { %v14048_v18 = vpop.f32.mrb[24].mxu1 }
 0x13c   :  { %v14049_v5 = vpop.f32.mrb[25].mxu1 }
 0x13d   :  { %v18469_v24 = vadd.f32 %v14049_v5, %v14048_v18  ;;  %v14051_v0 = vpop.f32.mrb[26].mxu1  ;;  %v22502_v18 = vld [vmem:[#allocation11_spill] sm:$0xff] }
 0x13e   :  { %v14052_v39 = vpop.f32.mrb[27].mxu1 }
 0x13f   :  { %v18471_v33 = vadd.f32 %v14052_v39, %v14051_v0 }
 0x141   :  { %2901 = vmatmul.mubr.bf16.gmra.mrb[124].mxu1 %v17922_v53  ;;  %v13964_v11 = vpop.f32.mrb[0].mxu0 }
 0x142   :  { %15692 = vmatprep.mubr.bf16.mxu1 %v18361_v29  ;;  %v13965_v49 = vpop.f32.mrb[1].mxu0 }
 0x143   :  { %v18476_v60 = vadd.f32 %v13965_v49, %v13964_v11  ;;  %v13967_v48 = vpop.f32.mrb[2].mxu0  ;;  %v14054_v3 = vpop.f32.mrb[28].mxu1 }
 0x144   :  { %v13968_v53 = vpop.f32.mrb[3].mxu0  ;;  %v14055_v43 = vpop.f32.mrb[29].mxu1 }
 0x145   :  { %v18479_v29 = vadd.f32 %v13968_v53, %v13967_v48  ;;  %v18486_v55 = vadd.f32 %v14055_v43, %v14054_v3  ;;  %v14057_v57 = vpop.f32.mrb[30].mxu1 }
 0x146   :  { %v14058_v46 = vpop.f32.mrb[31].mxu1 }
 0x147   :  { %v18488_v26 = vadd.f32 %v14058_v46, %v14057_v57 }
 0x149   :  { %15693 = vmatmul.mubr.bf16.vlgmr.msra.gmra.mrb[32].mxu1 %v18028_v27  ;;  %v17079_v27 = vld [vmem:[%s22394_s1 + $0x218] sm:$0xff]  }
 0x14a   :  { %15725 = vmatpush3.bf16.msra.mxu1 %v18397_v47  ;;  %15696 = vmatprep.mubr.bf16.mxu1 %v18085_v36 }
 0x14b   :  { %15726 = vmatprep.subr.bf16.mxu1 %v17077_v58  ;;  %v13970_v47 = vpop.f32.mrb[4].mxu0 }
 0x14c   :  { %v13971_v35 = vpop.f32.mrb[5].mxu0 }
 0x14d   :  { %v18494_v34 = vadd.f32 %v13971_v35, %v13970_v47  ;;  %v13973_v19 = vpop.f32.mrb[6].mxu0 }
 0x14e   :  { %15727 = vmatpush3.bf16.msra.mxu1 %v17077_v58  ;;  %v13974_v37 = vpop.f32.mrb[7].mxu0 }
 0x14f   :  { %15728 = vmatprep.subr.bf16.mxu1 %v17078_v63  ;;  %v18500_v22 = vadd.f32 %v13974_v37, %v13973_v19 }
 0x151   :  { %15697 = vmatmul.mubr.bf16.gmra.mrb[36].mxu1 %v18102_v51 }
 0x152   :  { %15700 = vmatprep.mubr.bf16.mxu1 %v18129_v38  ;;  %15729 = vmatpush3.bf16.msra.mxu1 %v17078_v63 }
 0x153   :  { %15730 = vmatprep.subr.bf16.mxu1 %v17079_v27 }
 0x156   :  { %15731 = vmatpush3.bf16.msra.mxu1 %v17079_v27 }
 0x157   :  { %15732 = vmatprep.subr.bf16.mxu1 %v17080_v15 }
 0x159   :  { %15701 = vmatmul.mubr.bf16.gmra.mrb[40].mxu1 %v18196_v8 }
 0x15a   :  { %15704 = vmatprep.mubr.bf16.mxu1 %v18229_v9  ;;  %15733 = vmatpush3.bf16.msra.mxu1 %v17080_v15 }
 0x15b   :  { %15734 = vmatprep.subr.bf16.mxu1 %v17081_v52 }
 0x15c   :  { %v13976_v50 = vpop.f32.mrb[8].mxu0 }
 0x15d   :  { %v13977_v4 = vpop.f32.mrb[9].mxu0 }
 0x15e   :  { %15735 = vmatpush3.bf16.msra.mxu1 %v17081_v52  ;;  %v18513_v1 = vadd.f32 %v13977_v4, %v13976_v50  ;;  %v13979_v28 = vpop.f32.mrb[10].mxu0 }
 0x15f   :  { %15736 = vmatprep.subr.bf16.mxu1 %v17082_v10  ;;  %v13980_v42 = vpop.f32.mrb[11].mxu0 }
 0x160   :  { %v18516_v21 = vadd.f32 %v13980_v42, %v13979_v28 }
 0x161   :  { %15705 = vmatmul.mubr.bf16.gmra.mrb[44].mxu1 %v18258_v54 }
 0x162   :  { %15708 = vmatprep.mubr.bf16.mxu1 %v18282_v2  ;;  %15737 = vmatpush3.bf16.msra.mxu1 %v17082_v10 }
 0x163   :  { %15738 = vmatprep.subr.bf16.mxu1 %v17083_v56 }
 0x166   :  { %15739 = vmatpush3.bf16.msra.mxu1 %v17083_v56 }
 0x168   :  { %v13982_v25 = vpop.f32.mrb[12].mxu0 }
 0x169   :  { %15709 = vmatmul.mubr.bf16.gmra.mrb[48].mxu1 %v22502_v18  ;;  %v13983_v5 = vpop.f32.mrb[13].mxu0 }
 0x16a   :  { %15712 = vmatprep.mubr.bf16.mxu1 %v18302_v59  ;;  %v18521_v0 = vadd.f32 %v13983_v5, %v13982_v25  ;;  %v13985_v11 = vpop.f32.mrb[14].mxu0 }
 0x16b   :  { %v13986_v39 = vpop.f32.mrb[15].mxu0 }
 0x16c   :  { %v18523_v49 = vadd.f32 %v13986_v39, %v13985_v11 }
 0x170   :  { %v13988_v58 = vpop.f32.mrb[16].mxu0 }
 0x171   :  { %15713 = vmatmul.mubr.bf16.gmra.mrb[52].mxu1 %v18306_v44  ;;  %v13989_v48 = vpop.f32.mrb[17].mxu0 }
 0x172   :  { %15716 = vmatprep.mubr.bf16.mxu1 %v18319_v23  ;;  %v18527_v53 = vadd.f32 %v13989_v48, %v13988_v58  ;;  %v13991_v3 = vpop.f32.mrb[18].mxu0 }
 0x173   :  { %v13992_v63 = vpop.f32.mrb[19].mxu0 }
 0x174   :  { %v18529_v43 = vadd.f32 %v13992_v63, %v13991_v3 }
 0x178   :  { %v13994_v57 = vpop.f32.mrb[20].mxu0 }
 0x179   :  { %15717 = vmatmul.mubr.bf16.gmra.mrb[56].mxu1 %v18322_v13  ;;  %v13995_v46 = vpop.f32.mrb[21].mxu0 }
 0x17a   :  { %15720 = vmatprep.mubr.bf16.mxu1 %v18332_v40  ;;  %v18533_v27 = vadd.f32 %v13995_v46, %v13994_v57  ;;  %v13997_v47 = vpop.f32.mrb[22].mxu0 }
 0x17b   :  { %v13998_v35 = vpop.f32.mrb[23].mxu0 }
 0x17c   :  { %v18535_v19 = vadd.f32 %v13998_v35, %v13997_v47  ;;  %v17085_v47 = vld [vmem:[#allocation4 + $0x140] sm:$0xff]   ;;  %v17086_v35 = vld [vmem:[#allocation4 + $0x148] sm:$0xff]  }
 0x17d   :  { %15772 = vmatprep.subr.bf16.mxu1 %v17085_v47 }
 0x180   :  { %v14000_v15 = vpop.f32.mrb[24].mxu0 }
 0x181   :  { %15721 = vmatmul.mubr.bf16.gmra.mrb[60].mxu1 %v18340_v6  ;;  %v14001_v37 = vpop.f32.mrb[25].mxu0 }
 0x182   :  { %15740 = vmatprep.mubr.bf16.mxu1 %v18085_v36  ;;  %v18539_v52 = vadd.f32 %v14001_v37, %v14000_v15  ;;  %v14003_v10 = vpop.f32.mrb[26].mxu0  ;;  %v303_v37 = vld [vmem:[#allocation3 + $0x18] sm:$0x1] }
 0x183   :  { %v14004_v50 = vpop.f32.mrb[27].mxu0 }
 0x184   :  { %v18541_v4 = vadd.f32 %v14004_v50, %v14003_v10 }
 0x188   :  { %v14006_v56 = vpop.f32.mrb[28].mxu0 }
 0x189   :  { %15741 = vmatmul.mubr.bf16.vlgmr.msra.gmra.mrb[32].mxu1 %v18102_v51  ;;  %v14007_v28 = vpop.f32.mrb[29].mxu0 }
 0x18a   :  { %15744 = vmatprep.mubr.bf16.mxu1 %v18129_v38  ;;  %v18545_v42 = vadd.f32 %v14007_v28, %v14006_v56  ;;  %v14009_v25 = vpop.f32.mrb[30].mxu0  ;;  %15773 = vmatpush3.bf16.msra.mxu1 %v17085_v47  ;;  %v17088_v47 = vld [vmem:[#allocation4 + $0x158] sm:$0xff]  }
 0x18b   :  { %v14010_v5 = vpop.f32.mrb[31].mxu0  ;;  %15774 = vmatprep.subr.bf16.mxu1 %v17086_v35 }
 0x18c   :  { %v18547_v11 = vadd.f32 %v14010_v5, %v14009_v25 }
 0x18e   :  { %15775 = vmatpush3.bf16.msra.mxu1 %v17086_v35 }
 0x190   :  { %v14236_v39 = vpop.f32.mrb[32].mxu0 }
 0x191   :  { %15745 = vmatmul.mubr.bf16.gmra.mrb[36].mxu1 %v18196_v8  ;;  %v14237_v36 = vpop.f32.mrb[33].mxu0 }
 0x192   :  { %15748 = vmatprep.mubr.bf16.mxu1 %v18229_v9  ;;  %v14238_v58 = vadd.f32 %v14237_v36, %v14236_v39  ;;  %v14239_v48 = vpop.f32.mrb[34].mxu0  ;;  %v304_v9 = vsel %vm17654_vm2, 0, %v303_v37 }
 0x193   :  { %v14240_v3 = vpop.f32.mrb[35].mxu0  ;;  %305 = vst [vmem:[#allocation3 + $0x18] sm:$0x1] %v304_v9 }
 0x194   :  { %v14241_v63 = vadd.f32 %v14240_v3, %v14239_v48 }
 0x198   :  { %v14242_v51 = vpop.f32.mrb[36].mxu0 }
 0x199   :  { %15749 = vmatmul.mubr.bf16.gmra.mrb[40].mxu1 %v18258_v54  ;;  %v14243_v38 = vpop.f32.mrb[37].mxu0 }
 0x19a   :  { %15752 = vmatprep.mubr.bf16.mxu1 %v18282_v2  ;;  %v14244_v57 = vadd.f32 %v14243_v38, %v14242_v51  ;;  %v14245_v46 = vpop.f32.mrb[38].mxu0  ;;  %v17087_v2 = vld [vmem:[#allocation4 + $0x150] sm:$0xff]  }
 0x19b   :  { %v14246_v15 = vpop.f32.mrb[39].mxu0  ;;  %15776 = vmatprep.subr.bf16.mxu1 %v17087_v2 }
 0x19c   :  { %v14100_v8 = vpop.f32.mrb[64].mxu1  ;;  %v14247_v10 = vadd.f32 %v14246_v15, %v14245_v46  ;;  %15777 = vmatpush3.bf16.msra.mxu1 %v17087_v2 }
 0x19d   :  { %v14101_v50 = vpop.f32.mrb[65].mxu1  ;;  %15778 = vmatprep.subr.bf16.mxu1 %v17088_v47 }
 0x19e   :  { %v14102_v56 = vadd.f32 %v14101_v50, %v14100_v8  ;;  %v14103_v54 = vpop.f32.mrb[66].mxu1 }
 0x19f   :  { %v14104_v28 = vpop.f32.mrb[67].mxu1 }
 0x1a0   :  { %v16319_v25 = vadd.f32 %v14102_v56, %v18476_v60  ;;  %v14105_v5 = vadd.f32 %v14104_v28, %v14103_v54  ;;  %v14248_v39 = vpop.f32.mrb[40].mxu0  ;;  %15779 = vmatpush3.bf16.msra.mxu1 %v17088_v47 }
 0x1a1   :  { %15753 = vmatmul.mubr.bf16.gmra.mrb[44].mxu1 %v22502_v18  ;;  %v14249_v36 = vpop.f32.mrb[41].mxu0 }
 0x1a2   :  { %v16325_v48 = vadd.f32 %v14105_v5, %v18479_v29  ;;  %15756 = vmatprep.mubr.bf16.mxu1 %v18302_v59  ;;  %v14250_v3 = vadd.f32 %v14249_v36, %v14248_v39  ;;  %v14251_v51 = vpop.f32.mrb[42].mxu0  ;;  %v18559_v38 = vadd.f32 %v16319_v25, %v14238_v58 }
 0x1a3   :  { %v14252_v46 = vpop.f32.mrb[43].mxu0 }
 0x1a4   :  { %v14106_v15 = vpop.f32.mrb[68].mxu1  ;;  %v14253_v37 = vadd.f32 %v14252_v46, %v14251_v51  ;;  %v18561_v60 = vadd.f32 %v16325_v48, %v14241_v63 }
 0x1a5   :  { %v14107_v8 = vpop.f32.mrb[69].mxu1 }
 0x1a6   :  { %v14108_v9 = vadd.f32 %v14107_v8, %v14106_v15  ;;  %v14109_v18 = vpop.f32.mrb[70].mxu1  ;;  %v1517_v8 = vld [vmem:[#allocation2 + $0xcc] sm:$0xe] }
 0x1a7   :  { %v14110_v50 = vpop.f32.mrb[71].mxu1 }
 0x1a8   :  { %v16316_v59 = vadd.f32 %v14108_v9, %v18494_v34  ;;  %v14111_v29 = vadd.f32 %v14110_v50, %v14109_v18  ;;  %v14254_v56 = vpop.f32.mrb[44].mxu0 }
 0x1a9   :  { %15757 = vmatmul.mubr.bf16.gmra.mrb[48].mxu1 %v18306_v44  ;;  %v14255_v58 = vpop.f32.mrb[45].mxu0 }
 0x1aa   :  { %v16322_v35 = vadd.f32 %v14111_v29, %v18500_v22  ;;  %15760 = vmatprep.mubr.bf16.mxu1 %v18319_v23  ;;  %v14256_v54 = vadd.f32 %v14255_v58, %v14254_v56  ;;  %v14257_v63 = vpop.f32.mrb[46].mxu0  ;;  %v18567_v28 = vadd.f32 %v16316_v59, %v14244_v57  ;;  %v17527_v29 = vld [vmem:[#allocation2 + $0xd0] sm:$0xf] }
 0x1ab   :  { %v14258_v25 = vpop.f32.mrb[47].mxu0  ;;  %v12926_v56 = vcombine.low %v1517_v8, %v17527_v29 }
 0x1ac   :  { %v14112_v2 = vpop.f32.mrb[72].mxu1  ;;  %v14259_v5 = vadd.f32 %v14258_v25, %v14257_v63  ;;  %v18569_v39 = vadd.f32 %v16322_v35, %v14247_v10 }
 0x1ad   :  { %v14113_v34 = vpop.f32.mrb[73].mxu1  ;;  %v2021_v25 = vrot.slane %v12926_v56, 1 }
 0x1ae   :  { %v14114_v36 = vadd.f32 %v14113_v34, %v14112_v2  ;;  %v14115_v48 = vpop.f32.mrb[74].mxu1  ;;  %v22503_v34 = vld [vmem:[#allocation12_spill] sm:$0xff] }
 0x1af   :  { %v14116_v51 = vpop.f32.mrb[75].mxu1 }
 0x1b0   :  { %v16331_v44 = vadd.f32 %v14114_v36, %v18513_v1  ;;  %v14117_v46 = vadd.f32 %v14116_v51, %v14115_v48  ;;  %v14260_v22 = vpop.f32.mrb[48].mxu0 }
 0x1b1   :  { %15761 = vmatmul.mubr.bf16.gmra.mrb[52].mxu1 %v18322_v13  ;;  %v14261_v23 = vpop.f32.mrb[49].mxu0 }
 0x1b2   :  { %v16337_v47 = vadd.f32 %v14117_v46, %v18516_v21  ;;  %15764 = vmatprep.mubr.bf16.mxu1 %v18332_v40  ;;  %v14262_v57 = vadd.f32 %v14261_v23, %v14260_v22  ;;  %v14263_v15 = vpop.f32.mrb[50].mxu0  ;;  %v18575_v10 = vadd.f32 %v16331_v44, %v14250_v3 }
 0x1b3   :  { %v14264_v9 = vpop.f32.mrb[51].mxu0 }
 0x1b4   :  { %v14118_v18 = vpop.f32.mrb[76].mxu1  ;;  %v14265_v50 = vadd.f32 %v14264_v9, %v14263_v15  ;;  %v18577_v59 = vadd.f32 %v16337_v47, %v14253_v37  ;;  %v17528_v37 = vld [vmem:[#allocation2 + $0xd4] ss:$0 sps:$4 sm:$0x11]  }
 0x1b5   :  { %v14119_v1 = vpop.f32.mrb[77].mxu1  ;;  %v2022_v36 = vrot.slane %v17528_v37, 1 }
 0x1b6   :  { %v14120_v58 = vadd.f32 %v14119_v1, %v14118_v18  ;;  %v14121_v13 = vpop.f32.mrb[78].mxu1 }
 0x1b7   :  { %v14122_v35 = vpop.f32.mrb[79].mxu1  ;;  %v2023_v8 = vsel %vm1969_vm10, %v2021_v25, %v2022_v36 }
 0x1b8   :  { %v16328_v21 = vadd.f32 %v14120_v58, %v18521_v0  ;;  %v14123_v63 = vadd.f32 %v14122_v35, %v14121_v13  ;;  %v14266_v40 = vpop.f32.mrb[52].mxu0 }
 0x1b9   :  { %15765 = vmatmul.mubr.bf16.gmra.mrb[56].mxu1 %v18340_v6  ;;  %v14267_v3 = vpop.f32.mrb[53].mxu0 }
 0x1ba   :  { %v16334_v2 = vadd.f32 %v14123_v63, %v18523_v49  ;;  %15768 = vmatprep.mubr.bf16.mxu1 %v22503_v34  ;;  %v14268_v48 = vadd.f32 %v14267_v3, %v14266_v40  ;;  %v14269_v51 = vpop.f32.mrb[54].mxu0  ;;  %v18583_v44 = vadd.f32 %v16328_v21, %v14256_v54 }
 0x1bb   :  { %v14270_v46 = vpop.f32.mrb[55].mxu0 }
 0x1bc   :  { %v14124_v22 = vpop.f32.mrb[80].mxu1  ;;  %v14271_v23 = vadd.f32 %v14270_v46, %v14269_v51  ;;  %v18585_v0 = vadd.f32 %v16334_v2, %v14259_v5 }
 0x1bd   :  { %v14125_v47 = vpop.f32.mrb[81].mxu1 }
 0x1be   :  { %v14126_v15 = vadd.f32 %v14125_v47, %v14124_v22  ;;  %v14127_v6 = vpop.f32.mrb[82].mxu1 }
 0x1bf   :  { %v14128_v9 = vpop.f32.mrb[83].mxu1 }
 0x1c0   :  { %v16343_v49 = vadd.f32 %v14126_v15, %v18527_v53  ;;  %v14129_v18 = vadd.f32 %v14128_v9, %v14127_v6  ;;  %v14272_v1 = vpop.f32.mrb[56].mxu0 }
 0x1c1   :  { %15769 = vmatmul.mubr.bf16.gmra.mrb[60].mxu1 %v2023_v8  ;;  %v14273_v29 = vpop.f32.mrb[57].mxu0 }
 0x1c2   :  { %v16349_v54 = vadd.f32 %v14129_v18, %v18529_v43  ;;  %v14274_v56 = vadd.f32 %v14273_v29, %v14272_v1  ;;  %v14275_v58 = vpop.f32.mrb[58].mxu0  ;;  %v18590_v13 = vadd.f32 %v16343_v49, %v14262_v57 }
 0x1c3   :  { %v14276_v5 = vpop.f32.mrb[59].mxu0 }
 0x1c4   :  { %v14130_v35 = vpop.f32.mrb[84].mxu1  ;;  %v14277_v21 = vadd.f32 %v14276_v5, %v14275_v58  ;;  %v18592_v63 = vadd.f32 %v16349_v54, %v14265_v50 }
 0x1c5   :  { %v14131_v40 = vpop.f32.mrb[85].mxu1 }
 0x1c6   :  { %v14132_v25 = vadd.f32 %v14131_v40, %v14130_v35  ;;  %v14133_v3 = vpop.f32.mrb[86].mxu1 }
 0x1c7   :  { %v14134_v2 = vpop.f32.mrb[87].mxu1 }
 0x1c8   :  { %v16340_v53 = vadd.f32 %v14132_v25, %v18533_v27  ;;  %v14135_v34 = vadd.f32 %v14134_v2, %v14133_v3  ;;  %v14278_v37 = vpop.f32.mrb[60].mxu0 }
 0x1c9   :  { %v14279_v36 = vpop.f32.mrb[61].mxu0 }
 0x1ca   :  { %v16346_v43 = vadd.f32 %v14135_v34, %v18535_v19  ;;  %v14280_v51 = vadd.f32 %v14279_v36, %v14278_v37  ;;  %v14281_v46 = vpop.f32.mrb[62].mxu0  ;;  %v18596_v57 = vadd.f32 %v16340_v53, %v14268_v48 }
 0x1cb   :  { %v14282_v22 = vpop.f32.mrb[63].mxu0 }
 0x1cc   :  { %v14136_v47 = vpop.f32.mrb[88].mxu1  ;;  %v14283_v15 = vadd.f32 %v14282_v22, %v14281_v46  ;;  %v18598_v50 = vadd.f32 %v16346_v43, %v14271_v23 }
 0x1cd   :  { %v14137_v6 = vpop.f32.mrb[89].mxu1 }
 0x1ce   :  { %v14138_v8 = vadd.f32 %v14137_v6, %v14136_v47  ;;  %v14139_v9 = vpop.f32.mrb[90].mxu1 }
 0x1cf   :  { %v14140_v49 = vpop.f32.mrb[91].mxu1 }
 0x1d0   :  { %v16355_v27 = vadd.f32 %v14138_v8, %v18539_v52  ;;  %v14141_v18 = vadd.f32 %v14140_v49, %v14139_v9  ;;  %v14284_v1 = vpop.f32.mrb[64].mxu0 }
 0x1d1   :  { %v14285_v29 = vpop.f32.mrb[65].mxu0 }
 0x1d2   :  { %v16361_v19 = vadd.f32 %v14141_v18, %v18541_v4  ;;  %v14286_v54 = vadd.f32 %v14285_v29, %v14284_v1  ;;  %v14287_v58 = vpop.f32.mrb[66].mxu0  ;;  %v18602_v48 = vadd.f32 %v16355_v27, %v14274_v56 }
 0x1d3   :  { %v14288_v5 = vpop.f32.mrb[67].mxu0 }
 0x1d4   :  { %v14142_v35 = vpop.f32.mrb[92].mxu1  ;;  %v14289_v40 = vadd.f32 %v14288_v5, %v14287_v58  ;;  %v18604_v23 = vadd.f32 %v16361_v19, %v14277_v21  ;;  %v17090_v19 = vld [vmem:[#allocation4 + $0x100] sm:$0xff]  }
 0x1d5   :  { %v14143_v25 = vpop.f32.mrb[93].mxu1  ;;  %v17091_v5 = vld [vmem:[#allocation4 + $0xc0] sm:$0xff]   ;;  %14356 = vmatprep.subr.bf16.mxu0 %v17090_v19 }
 0x1d6   :  { %v14144_v3 = vadd.f32 %v14143_v25, %v14142_v35  ;;  %v14145_v2 = vpop.f32.mrb[94].mxu1  ;;  %14357 = vmatpush3.bf16.msra.mxu0 %v17091_v5  ;;  %v306_v5 = vld [vmem:[#allocation3 + $0x24] sm:$0x1] }
 0x1d7   :  { %v14146_v53 = vpop.f32.mrb[95].mxu1 }
 0x1d8   :  { %v16352_v52 = vadd.f32 %v14144_v3, %v18545_v42  ;;  %v14147_v34 = vadd.f32 %v14146_v53, %v14145_v2  ;;  %v14290_v37 = vpop.f32.mrb[68].mxu0  ;;  %v300_v2 = vld [vmem:[#allocation3 + $0xc] sm:$0x1] }
 0x1d9   :  { %v14291_v36 = vpop.f32.mrb[69].mxu0 }
 0x1da   :  { %v16358_v4 = vadd.f32 %v14147_v34, %v18547_v11  ;;  %v14292_v43 = vadd.f32 %v14291_v36, %v14290_v37  ;;  %v14293_v46 = vpop.f32.mrb[70].mxu0  ;;  %v18608_v56 = vadd.f32 %v16352_v52, %v14280_v51  ;;  %v301_v52 = vsel %vm17654_vm2, 0, %v300_v2  ;;  %v411_v34 = vld [vmem:[#allocation3 + $0x20] sm:$0x1] }
 0x1db   :  { %v14294_v22 = vpop.f32.mrb[71].mxu0  ;;  %302 = vst [vmem:[#allocation3 + $0xc] sm:$0x1] %v301_v52 }
 0x1dc   :  { %v14148_v47 = vpop.f32.mrb[96].mxu1  ;;  %v14295_v6 = vadd.f32 %v14294_v22, %v14293_v46  ;;  %v18610_v21 = vadd.f32 %v16358_v4, %v14283_v15  ;;  %v408_v4 = vld [vmem:[#allocation3 + $0x14] sm:$0x1] }
 0x1dd   :  { %v14149_v8 = vpop.f32.mrb[97].mxu1  ;;  %v409_v22 = vsel %vm17665_vm4, 0, %v408_v4  ;;  %v17094_v4 = vld [vmem:[#allocation4 + $0xc8] sm:$0xff]  }
 0x1de   :  { %v14150_v9 = vadd.f32 %v14149_v8, %v14148_v47  ;;  %v14151_v49 = vpop.f32.mrb[98].mxu1  ;;  %410 = vst [vmem:[#allocation3 + $0x14] sm:$0x1] %v409_v22 }
 0x1df   :  { %v14152_v27 = vpop.f32.mrb[99].mxu1 }
 0x1e0   :  { %v16367_v42 = vadd.f32 %v14150_v9, %v18425_v20  ;;  %v14153_v18 = vadd.f32 %v14152_v27, %v14151_v49  ;;  %v14296_v1 = vpop.f32.mrb[72].mxu0 }
 0x1e1   :  { %v14297_v29 = vpop.f32.mrb[73].mxu0 }
 0x1e2   :  { %v16373_v11 = vadd.f32 %v14153_v18, %v18429_v17  ;;  %v14298_v58 = vadd.f32 %v14297_v29, %v14296_v1  ;;  %v14299_v51 = vpop.f32.mrb[74].mxu0  ;;  %v18614_v35 = vadd.f32 %v16367_v42, %v14286_v54  ;;  %v412_v54 = vsel %vm17665_vm4, 0, %v411_v34  ;;  %v309_v29 = vld [vmem:[#allocation3 + $0x30] sm:$0x1] }
 0x1e3   :  { %v14300_v25 = vpop.f32.mrb[75].mxu0  ;;  %413 = vst [vmem:[#allocation3 + $0x20] sm:$0x1] %v412_v54 }
 0x1e4   :  { %v14154_v15 = vpop.f32.mrb[100].mxu1  ;;  %v14301_v3 = vadd.f32 %v14300_v25, %v14299_v51  ;;  %v18616_v53 = vadd.f32 %v16373_v11, %v14289_v40  ;;  %v310_v51 = vsel %vm17654_vm2, 0, %v309_v29 }
 0x1e5   :  { %v14155_v20 = vpop.f32.mrb[101].mxu1  ;;  %311 = vst [vmem:[#allocation3 + $0x30] sm:$0x1] %v310_v51 }
 0x1e6   :  { %v14156_v37 = vadd.f32 %v14155_v20, %v14154_v15  ;;  %v14157_v17 = vpop.f32.mrb[102].mxu1  ;;  %v17089_v15 = vld [vmem:[#allocation4 + $0x160] sm:$0xff]  }
 0x1e7   :  { %v14158_v46 = vpop.f32.mrb[103].mxu1  ;;  %15780 = vmatprep.subr.bf16.mxu1 %v17089_v15 }
 0x1e8   :  { %v16364_v40 = vadd.f32 %v14156_v37, %v18433_v62  ;;  %v14159_v47 = vadd.f32 %v14158_v46, %v14157_v17  ;;  %v14302_v8 = vpop.f32.mrb[76].mxu0  ;;  %v17092_v37 = vld [vmem:[#allocation4 + $0x108] sm:$0xff]   ;;  %15781 = vmatpush3.bf16.msra.mxu1 %v17089_v15 }
 0x1e9   :  { %v14303_v9 = vpop.f32.mrb[77].mxu0  ;;  %14358 = vmatprep.subr.bf16.mxu0 %v17092_v37 }
 0x1ea   :  { %v16370_v49 = vadd.f32 %v14159_v47, %v18437_v45  ;;  %v14304_v27 = vadd.f32 %v14303_v9, %v14302_v8  ;;  %v14305_v42 = vpop.f32.mrb[78].mxu0  ;;  %v18626_v18 = vadd.f32 %v16364_v40, %v14292_v43  ;;  %v307_v45 = vsel %vm17654_vm2, 0, %v306_v5  ;;  %v417_v43 = vld [vmem:[#allocation3 + $0x38] sm:$0x1]  ;;  %14359 = vmatpush3.bf16.msra.mxu0 %v17094_v4 }
 0x1eb   :  { %v14306_v1 = vpop.f32.mrb[79].mxu0  ;;  %308 = vst [vmem:[#allocation3 + $0x24] sm:$0x1] %v307_v45  ;;  %v418_v34 = vsel %vm17665_vm4, 0, %v417_v43 }
 0x1ec   :  { %v14160_v19 = vpop.f32.mrb[104].mxu1  ;;  %v14307_v11 = vadd.f32 %v14306_v1, %v14305_v42  ;;  %v18630_v25 = vadd.f32 %v16370_v49, %v14295_v6  ;;  %419 = vst [vmem:[#allocation3 + $0x38] sm:$0x1] %v418_v34  ;;  %v17095_v49 = vld [vmem:[#allocation4 + $0x110] sm:$0xff]  }
 0x1ed   :  { %v14161_v62 = vpop.f32.mrb[105].mxu1  ;;  %14360 = vmatprep.subr.bf16.mxu0 %v17095_v49  ;;  %v315_v49 = vld [vmem:[#allocation3 + $0x48] sm:$0x1] }
 0x1ee   :  { %v14162_v2 = vadd.f32 %v14161_v62, %v14160_v19  ;;  %v14163_v20 = vpop.f32.mrb[106].mxu1  ;;  %v17097_v62 = vld [vmem:[#allocation4 + $0x118] sm:$0xff]  }
 0x1ef   :  { %v14164_v52 = vpop.f32.mrb[107].mxu1 }
 0x1f0   :  { %v16379_v17 = vadd.f32 %v14162_v2, %v18441_v30  ;;  %v14165_v6 = vadd.f32 %v14164_v52, %v14163_v20  ;;  %v14308_v54 = vpop.f32.mrb[80].mxu0  ;;  %v17096_v30 = vld [vmem:[#allocation4 + $0xd0] sm:$0xff]   ;;  %v414_v2 = vld [vmem:[#allocation3 + $0x2c] sm:$0x1] }
 0x1f1   :  { %v14309_v46 = vpop.f32.mrb[81].mxu0  ;;  %14361 = vmatpush3.bf16.msra.mxu0 %v17096_v30  ;;  %v17099_v20 = vld [vmem:[#allocation4 + $0xd8] sm:$0xff]   ;;  %v415_v52 = vsel %vm17665_vm4, 0, %v414_v2  ;;  %v312_v30 = vld [vmem:[#allocation3 + $0x3c] sm:$0x1] }
 0x1f2   :  { %v16385_v22 = vadd.f32 %v14165_v6, %v18445_v12  ;;  %v18638_v40 = vadd.f32 %v14309_v46, %v14308_v54  ;;  %v14311_v47 = vpop.f32.mrb[82].mxu0  ;;  %v18640_v8 = vadd.f32 %v16379_v17, %v14298_v58  ;;  %14362 = vmatprep.subr.bf16.mxu0 %v17097_v62  ;;  %416 = vst [vmem:[#allocation3 + $0x2c] sm:$0x1] %v415_v52  ;;  %v17100_v54 = vld [vmem:[#allocation4 + $0x120] sm:$0xff]  }
 0x1f3   :  { %v14312_v9 = vpop.f32.mrb[83].mxu0 }
 0x1f4   :  { %v14166_v42 = vpop.f32.mrb[108].mxu1  ;;  %v18642_v1 = vadd.f32 %v14312_v9, %v14311_v47  ;;  %v18644_v29 = vadd.f32 %v16385_v22, %v14301_v3  ;;  %v17101_v22 = vld [vmem:[#allocation4 + $0xe0] sm:$0xff]  }
 0x1f5   :  { %v14167_v19 = vpop.f32.mrb[109].mxu1  ;;  %14363 = vmatpush3.bf16.msra.mxu0 %v17099_v20 }
 0x1f6   :  { %v14168_v51 = vadd.f32 %v14167_v19, %v14166_v42  ;;  %v14169_v5 = vpop.f32.mrb[110].mxu1  ;;  %14364 = vmatprep.subr.bf16.mxu0 %v17100_v54 }
 0x1f7   :  { %v14170_v12 = vpop.f32.mrb[111].mxu1 }
 0x1f8   :  { %v16376_v15 = vadd.f32 %v14168_v51, %v18450_v41  ;;  %v14171_v45 = vadd.f32 %v14170_v12, %v14169_v5  ;;  %v14314_v58 = vpop.f32.mrb[84].mxu0  ;;  %v17093_v41 = vld [vmem:[#allocation4 + $0x168] sm:$0xff]   ;;  %v313_v51 = vsel %vm17654_vm2, 0, %v312_v30  ;;  %v423_v5 = vld [vmem:[#allocation3 + $0x50] sm:$0x1] }
 0x1f9   :  { %v14315_v43 = vpop.f32.mrb[85].mxu0  ;;  %15782 = vmatprep.subr.bf16.mxu1 %v17093_v41  ;;  %14365 = vmatpush3.bf16.msra.mxu0 %v17101_v22  ;;  %314 = vst [vmem:[#allocation3 + $0x3c] sm:$0x1] %v313_v51 }
 0x1fa   :  { %v16382_v3 = vadd.f32 %v14171_v45, %v18453_v31  ;;  %v18650_v34 = vadd.f32 %v14315_v43, %v14314_v58  ;;  %v14317_v37 = vpop.f32.mrb[86].mxu0  ;;  %v18652_v17 = vadd.f32 %v16376_v15, %v14304_v27  ;;  %15783 = vmatpush3.bf16.msra.mxu1 %v17093_v41  ;;  %v316_v27 = vsel %vm17654_vm2, 0, %v315_v49  ;;  %v420_v58 = vld [vmem:[#allocation3 + $0x44] sm:$0x1]  ;;  %v321_v49 = vld [vmem:[#allocation3 + $0x60] sm:$0x1] }
 0x1fb   :  { %v14318_v6 = vpop.f32.mrb[87].mxu0  ;;  %317 = vst [vmem:[#allocation3 + $0x48] sm:$0x1] %v316_v27  ;;  %v424_v45 = vsel %vm17665_vm4, 0, %v423_v5  ;;  %v421_v20 = vsel %vm17665_vm4, 0, %v420_v58 }
 0x1fc   :  { %v14172_v4 = vpop.f32.mrb[112].mxu1  ;;  %v18654_v46 = vadd.f32 %v14318_v6, %v14317_v37  ;;  %v18656_v47 = vadd.f32 %v16382_v3, %v14307_v11  ;;  %v17098_v11 = vld [vmem:[#allocation4 + $0x170] sm:$0xff]   ;;  %425 = vst [vmem:[#allocation3 + $0x50] sm:$0x1] %v424_v45  ;;  %422 = vst [vmem:[#allocation3 + $0x44] sm:$0x1] %v421_v20 }
 0x1fd   :  { %v14173_v9 = vpop.f32.mrb[113].mxu1  ;;  %15784 = vmatprep.subr.bf16.mxu1 %v17098_v11  ;;  %v17102_v6 = vld [vmem:[#allocation4 + $0x128] sm:$0xff]   ;;  %v318_v27 = vld [vmem:[#allocation3 + $0x54] sm:$0x1]  ;;  %v17106_v45 = vld [vmem:[#allocation4 + $0xf0] sm:$0xff]  }
 0x1fe   :  { %v14174_v31 = vadd.f32 %v14173_v9, %v14172_v4  ;;  %v14175_v42 = vpop.f32.mrb[114].mxu1  ;;  %15785 = vmatpush3.bf16.msra.mxu1 %v17098_v11  ;;  %v17104_v4 = vld [vmem:[#allocation4 + $0xe8] sm:$0xff]   ;;  %14366 = vmatprep.subr.bf16.mxu0 %v17102_v6  ;;  %v319_v30 = vsel %vm17654_vm2, 0, %v318_v27 }
 0x1ff   :  { %v14176_v19 = vpop.f32.mrb[115].mxu1  ;;  %14367 = vmatpush3.bf16.msra.mxu0 %v17104_v4  ;;  %320 = vst [vmem:[#allocation3 + $0x54] sm:$0x1] %v319_v30  ;;  %v426_v6 = vld [vmem:[#allocation3 + $0x5c] sm:$0x1] }
 0x200   :  { %v16391_v12 = vadd.f32 %v14174_v31, %v18457_v14  ;;  %v14177_v62 = vadd.f32 %v14176_v19, %v14175_v42  ;;  %v14320_v15 = vpop.f32.mrb[88].mxu0  ;;  %v322_v42 = vsel %vm17654_vm2, 0, %v321_v49  ;;  %v429_v19 = vld [vmem:[#allocation3 + $0x68] sm:$0x1]  ;;  %v324_v30 = vld [vmem:[#allocation3 + $0x6c] sm:$0x1] }
 0x201   :  { %v14321_v2 = vpop.f32.mrb[89].mxu0  ;;  %323 = vst [vmem:[#allocation3 + $0x60] sm:$0x1] %v322_v42  ;;  %v430_v11 = vsel %vm17665_vm4, 0, %v429_v19  ;;  %v327_v42 = vld [vmem:[#allocation3 + $0x78] sm:$0x1] }
 0x202   :  { %v16397_v43 = vadd.f32 %v14177_v62, %v18459_v16  ;;  %v14322_v52 = vadd.f32 %v14321_v2, %v14320_v15  ;;  %v14323_v3 = vpop.f32.mrb[90].mxu0  ;;  %v18669_v14 = vadd.f32 %v16391_v12, %v18638_v40  ;;  %v17103_v12 = vld [vmem:[#allocation4 + $0x178] sm:$0xff]   ;;  %v17105_v62 = vld [vmem:[#allocation4 + $0x130] sm:$0xff]   ;;  %431 = vst [vmem:[#allocation3 + $0x68] sm:$0x1] %v430_v11  ;;  %v325_v19 = vsel %vm17654_vm2, 0, %v324_v30 }
 0x203   :  { %v14324_v37 = vpop.f32.mrb[91].mxu0  ;;  %15786 = vmatprep.subr.bf16.mxu1 %v17103_v12  ;;  %14368 = vmatprep.subr.bf16.mxu0 %v17105_v62  ;;  %326 = vst [vmem:[#allocation3 + $0x6c] sm:$0x1] %v325_v19  ;;  %v444_v19 = vld [vmem:[#allocation3 + $0xa4] sm:$0x1] }
 0x204   :  { %v14178_v41 = vpop.f32.mrb[116].mxu1  ;;  %v14325_v54 = vadd.f32 %v14324_v37, %v14323_v3  ;;  %v18672_v22 = vadd.f32 %v16397_v43, %v18642_v1  ;;  %15787 = vmatpush3.bf16.msra.mxu1 %v17103_v12  ;;  %14369 = vmatpush3.bf16.msra.mxu0 %v17106_v45 }
 0x205   :  { %v14179_v9 = vpop.f32.mrb[117].mxu1 }
 0x206   :  { %v14180_v31 = vadd.f32 %v14179_v9, %v14178_v41  ;;  %v14181_v16 = vpop.f32.mrb[118].mxu1 }
 0x207   :  { %v14182_v40 = vpop.f32.mrb[119].mxu1 }
 0x208   :  { %v16388_v51 = vadd.f32 %v14180_v31, %v18463_v32  ;;  %v14183_v1 = vadd.f32 %v14182_v40, %v14181_v16  ;;  %v14326_v5 = vpop.f32.mrb[92].mxu0  ;;  %v328_v40 = vsel %vm17654_vm2, 0, %v327_v42  ;;  %v336_v42 = vld [vmem:[#allocation3 + $0x9c] sm:$0x1] }
 0x209   :  { %v14327_v15 = vpop.f32.mrb[93].mxu0  ;;  %329 = vst [vmem:[#allocation3 + $0x78] sm:$0x1] %v328_v40  ;;  %v447_v40 = vld [vmem:[#allocation3 + $0xb0] sm:$0x1] }
 0x20a   :  { %v16394_v58 = vadd.f32 %v14183_v1, %v18465_v61  ;;  %v14328_v2 = vadd.f32 %v14327_v15, %v14326_v5  ;;  %v14329_v20 = vpop.f32.mrb[94].mxu0  ;;  %v18683_v43 = vadd.f32 %v16388_v51, %v18650_v34  ;;  %v427_v61 = vsel %vm17665_vm4, 0, %v426_v6  ;;  %v435_v51 = vld [vmem:[#allocation3 + $0x80] sm:$0x1]  ;;  %v17115_v6 = vld [vmem:[#allocation4 + $0xf8] sm:$0xff]  }
 0x20b   :  { %v14330_v32 = vpop.f32.mrb[95].mxu0  ;;  %428 = vst [vmem:[#allocation3 + $0x5c] sm:$0x1] %v427_v61  ;;  %v333_v61 = vld [vmem:[#allocation3 + $0x90] sm:$0x1]  ;;  %v448_v30 = vsel %vm17665_vm4, 0, %v447_v40 }
 0x20c   :  { %v14184_v3 = vpop.f32.mrb[120].mxu1  ;;  %v14331_v37 = vadd.f32 %v14330_v32, %v14329_v20  ;;  %v18686_v41 = vadd.f32 %v16394_v58, %v18654_v46  ;;  %449 = vst [vmem:[#allocation3 + $0xb0] sm:$0x1] %v448_v30 }
 0x20d   :  { %v14185_v4 = vpop.f32.mrb[121].mxu1 }
 0x20e   :  { %v14186_v9 = vadd.f32 %v14185_v4, %v14184_v3  ;;  %v14187_v49 = vpop.f32.mrb[122].mxu1  ;;  %v432_v3 = vld [vmem:[#allocation3 + $0x74] sm:$0x1] }
 0x20f   :  { %v14188_v31 = vpop.f32.mrb[123].mxu1  ;;  %v18710_v4 = vld [vmem:[#allocation4 + $0x80] sm:$0xff]  }
 0x210   :  { %v16403_v34 = vadd.f32 %v14186_v9, %v18469_v24  ;;  %v14189_v16 = vadd.f32 %v14188_v31, %v14187_v49  ;;  %v436_v24 = vsel %vm17665_vm4, 0, %v435_v51  ;;  %15820 = vmatprep.subr.bf16.mxu1 %v18710_v4  ;;  %v438_v49 = vld [vmem:[#allocation3 + $0x8c] sm:$0x1]  ;;  %v445_v51 = vsel %vm17665_vm4, 0, %v444_v19 }
 0x211   :  { %437 = vst [vmem:[#allocation3 + $0x80] sm:$0x1] %v436_v24  ;;  %v439_v31 = vsel %vm17665_vm4, 0, %v438_v49  ;;  %446 = vst [vmem:[#allocation3 + $0xa4] sm:$0x1] %v445_v51 }
 0x212   :  { %v16409_v27 = vadd.f32 %v14189_v16, %v18471_v33  ;;  %v18694_v46 = vadd.f32 %v16403_v34, %v14322_v52  ;;  %v17110_v33 = vld [vmem:[#allocation4 + $0x138] sm:$0xff]   ;;  %440 = vst [vmem:[#allocation3 + $0x8c] sm:$0x1] %v439_v31 }
 0x213   :  { %14370 = vmatprep.subr.bf16.mxu0 %v17110_v33  ;;  %v339_v34 = vld [vmem:[#allocation3 + $0xa8] sm:$0x1] }
 0x214   :  { %v14190_v1 = vpop.f32.mrb[124].mxu1  ;;  %v18700_v5 = vadd.f32 %v16409_v27, %v14325_v54  ;;  %v433_v54 = vsel %vm17665_vm4, 0, %v432_v3  ;;  %14371 = vmatpush3.bf16.msra.mxu0 %v17115_v6  ;;  %v340_v16 = vsel %vm17654_vm2, 0, %v339_v34  ;;  %v337_v27 = vsel %vm17654_vm2, 0, %v336_v42 }
 0x215   :  { %v14191_v11 = vpop.f32.mrb[125].mxu1  ;;  %434 = vst [vmem:[#allocation3 + $0x74] sm:$0x1] %v433_v54  ;;  %341 = vst [vmem:[#allocation3 + $0xa8] sm:$0x1] %v340_v16 }
 0x216   :  { %v14192_v12 = vadd.f32 %v14191_v11, %v14190_v1  ;;  %v14193_v62 = vpop.f32.mrb[126].mxu1  ;;  %338 = vst [vmem:[#allocation3 + $0x9c] sm:$0x1] %v337_v27  ;;  %v345_v1 = vld [vmem:[#allocation3 + $0xc0] sm:$0x1] }
 0x217   :  { %v14194_v15 = vpop.f32.mrb[127].mxu1  ;;  %v346_v24 = vsel %vm17654_vm2, 0, %v345_v1  ;;  %v342_v11 = vld [vmem:[#allocation3 + $0xb4] sm:$0x1]  ;;  %v18746_v54 = vld [vmem:[%s22396_s3] ss:$0 sm:$0xff] }
 0x218   :  { %v16400_v52 = vadd.f32 %v14192_v12, %v18486_v55  ;;  %v14195_v45 = vadd.f32 %v14194_v15, %v14193_v62  ;;  %v334_v55 = vsel %vm17654_vm2, 0, %v333_v61  ;;  %347 = vst [vmem:[#allocation3 + $0xc0] sm:$0x1] %v346_v24  ;;  %v343_v33 = vsel %vm17654_vm2, 0, %v342_v11  ;;  %v453_v12 = vld [vmem:[#allocation3 + $0xc8] sm:$0x1] }
 0x219   :  { %335 = vst [vmem:[#allocation3 + $0x90] sm:$0x1] %v334_v55  ;;  %344 = vst [vmem:[#allocation3 + $0xb4] sm:$0x1] %v343_v33  ;;  %v454_v62 = vsel %vm17665_vm4, 0, %v453_v12 }
 0x21a   :  { %v16406_v58 = vadd.f32 %v14195_v45, %v18488_v26  ;;  %v18704_v20 = vadd.f32 %v16400_v52, %v14328_v2  ;;  %v330_v26 = vld [vmem:[#allocation3 + $0x84] sm:$0x1]  ;;  %455 = vst [vmem:[#allocation3 + $0xc8] sm:$0x1] %v454_v62  ;;  %v450_v15 = vld [vmem:[#allocation3 + $0xbc] sm:$0x1] }
 0x21b   :  { %v331_v2 = vsel %vm17654_vm2, 0, %v330_v26  ;;  %v451_v52 = vsel %vm17665_vm4, 0, %v450_v15 }
 0x21c   :  { %v18706_v32 = vadd.f32 %v16406_v58, %v14331_v37  ;;  %332 = vst [vmem:[#allocation3 + $0x84] sm:$0x1] %v331_v2  ;;  %v441_v37 = vld [vmem:[#allocation3 + $0x98] sm:$0x1]  ;;  %452 = vst [vmem:[#allocation3 + $0xbc] sm:$0x1] %v451_v52 }
 0x21d   :  { %v442_v9 = vsel %vm17665_vm4, 0, %v441_v37  ;;  %v18740_v58 = vld [vmem:[%s22395_s2] ss:$0 sm:$0xff] }
 0x21e   :  { %443 = vst [vmem:[#allocation3 + $0x98] sm:$0x1] %v442_v9 }
 0x25c   :  { %v15742_v45 = vpop.f32.mrb[32].mxu1 }
 0x25d   :  { %v16318_v3 = vadd.f32 %v18567_v28, %v15742_v45  ;;  %v3457_v6 = vpop.f32.mrb[33].mxu1 }
 0x25e   :  { %v16321_v61 = vadd.f32 %v18559_v38, %v3457_v6  ;;  %v15743_v55 = vpop.f32.mrb[34].mxu1 }
 0x25f   :  { %v3625_v26 = vmul.f32 %v16318_v3, %v18740_v58  ;;  %v16324_v2 = vadd.f32 %v18569_v39, %v15743_v55  ;;  %v3460_v37 = vpop.f32.mrb[35].mxu1 }
 0x260   :  { %v3623_v9 = vmul.f32 %v16321_v61, %v18740_v58  ;;  %v16327_v49 = vadd.f32 %v18561_v60, %v3460_v37 }
 0x261   :  { %v3664_v28 = vadd.f32 %v18746_v54, %v3625_v26  ;;  %v3626_v31 = vmul.f32 %v16324_v2, %v18740_v58 }
 0x262   :  { %v3662_v34 = vadd.f32 %v18746_v54, %v3623_v9  ;;  %v3624_v16 = vmul.f32 %v16327_v49, %v18740_v58  ;;  %v4150_v9 = vld [vmem:[#allocation3 + $0x18] sm:$0xf] }
 0x263   :  { %v3696_v42 = vmax.f32 %v3664_v28, 0.0  ;;  %v3665_v38 = vadd.f32 %v18746_v54, %v3626_v31 }
 0x264   :  { %v3694_v27 = vmax.f32 %v3662_v34, 0.0  ;;  %v3663_v40 = vadd.f32 %v18746_v54, %v3624_v16  ;;  %v15746_v39 = vpop.f32.mrb[36].mxu1 }
 0x265   :  { %v13631_v30 = vpack.c.bf16 %v3696_v42, %v3696_v42  ;;  %v3697_v19 = vmax.f32 %v3665_v38, 0.0  ;;  %v16330_v51 = vadd.f32 %v18583_v44, %v15746_v39  ;;  %v3473_v60 = vpop.f32.mrb[37].mxu1  ;;  %v4143_v42 = vld [vmem:[#allocation3 + $0xc] sm:$0xf] }
 0x266   :  { %v13629_v1 = vpack.c.bf16 %v3694_v27, %v3694_v27  ;;  %v3695_v24 = vmax.f32 %v3663_v40, 0.0  ;;  %v16333_v11 = vadd.f32 %v18575_v10, %v3473_v60  ;;  %v15747_v33 = vpop.f32.mrb[38].mxu1 }
 0x267   :  { %v3840_v12 = vshrl.u32 %v13631_v30, 16  ;;  %v3843_v62 = vshll.u32 %v13631_v30, 16  ;;  %v13632_v15 = vpack.c.bf16 %v3697_v19, %v3697_v19  ;;  %v3629_v52 = vmul.f32 %v16330_v51, %v18740_v58  ;;  %v3476_v45 = vpop.f32.mrb[39].mxu1  ;;  %v4154_v30 = vld [vmem:[#allocation3 + $0x20] sm:$0x1] }
 0x268   :  { %v3823_v3 = vshrl.u32 %v13629_v1, 16  ;;  %v3826_v6 = vshll.u32 %v13629_v1, 16  ;;  %v13630_v61 = vpack.c.bf16 %v3695_v24, %v3695_v24  ;;  %v3627_v55 = vmul.f32 %v16333_v11, %v18740_v58 }
 0x269   :  { %v3842_v26 = vrot.slane %v3840_v12, 7  ;;  %v3848_v2 = vshrl.u32 %v13632_v15, 16  ;;  %v3851_v44 = vshll.u32 %v13632_v15, 16  ;;  %v3668_v37 = vadd.f32 %v18746_v54, %v3629_v52  ;;  %v4147_v15 = vld [vmem:[#allocation3 + $0x14] sm:$0x1] }
 0x26a   :  { %v3825_v49 = vrot.slane %v3823_v3, 7  ;;  %v3831_v10 = vshrl.u32 %v13630_v61, 16  ;;  %v3834_v28 = vshll.u32 %v13630_v61, 16  ;;  %v3666_v31 = vadd.f32 %v18746_v54, %v3627_v55 }
 0x26b   :  { %v3845_v34 = vor.u32 %v3843_v62, %v3842_v26  ;;  %v3846_v16 = vrot.slane %v3842_v26, 4  ;;  %v3850_v38 = vrot.slane %v3848_v2, 7  ;;  %v3700_v27 = vmax.f32 %v3668_v37, 0.0 }
 0x26c   :  { %v3828_v40 = vor.u32 %v3826_v6, %v3825_v49  ;;  %v3829_v39 = vrot.slane %v3825_v49, 4  ;;  %v3833_v19 = vrot.slane %v3831_v10, 7  ;;  %v3698_v51 = vmax.f32 %v3666_v31, 0.0  ;;  %v15750_v60 = vpop.f32.mrb[40].mxu1 }
 0x26d   :  { %v4151_v24 = vsel %vm17712_vm8, %v3845_v34, %v4150_v9  ;;  %v3853_v11 = vor.u32 %v3851_v44, %v3850_v38  ;;  %v3855_v12 = vrot.slane %v3850_v38, 4  ;;  %v13635_v52 = vpack.c.bf16 %v3700_v27, %v3700_v27  ;;  %v3489_v3 = vpop.f32.mrb[41].mxu1 }
 0x26e   :  { %4152 = vst [vmem:[#allocation3 + $0x18] sm:$0xf] %v4151_v24  ;;  %v4144_v62 = vsel %vm17712_vm8, %v3828_v40, %v4143_v42  ;;  %v3836_v61 = vor.u32 %v3834_v28, %v3833_v19  ;;  %v3838_v55 = vrot.slane %v3833_v19, 4  ;;  %v13633_v6 = vpack.c.bf16 %v3698_v51, %v3698_v51  ;;  %v15751_v26 = vpop.f32.mrb[42].mxu1 }
 0x26f   :  { %4145 = vst [vmem:[#allocation3 + $0xc] sm:$0xf] %v4144_v62  ;;  %v3854_v37 = vsel %vm17700_vm7, %v3846_v16, %v3853_v11  ;;  %v4155_v9 = vsel %vm17654_vm2, %v3855_v12, %v4154_v30  ;;  %v3874_v44 = vshrl.u32 %v13635_v52, 16  ;;  %v3877_v49 = vshll.u32 %v13635_v52, 16  ;;  %v3492_v10 = vpop.f32.mrb[43].mxu1 }
 0x270   :  { %4153 = vst [vmem:[#allocation3 + $0x1c] sm:$0xf] %v3854_v37  ;;  %4156 = vst [vmem:[#allocation3 + $0x20] sm:$0x1] %v4155_v9  ;;  %v3837_v31 = vsel %vm17700_vm7, %v3829_v39, %v3836_v61  ;;  %v4148_v28 = vsel %vm17654_vm2, %v3838_v55, %v4147_v15  ;;  %v3857_v34 = vshrl.u32 %v13633_v6, 16  ;;  %v3860_v42 = vshll.u32 %v13633_v6, 16 }
 0x271   :  { %4146 = vst [vmem:[#allocation3 + $0x10] sm:$0xf] %v3837_v31  ;;  %4149 = vst [vmem:[#allocation3 + $0x14] sm:$0x1] %v4148_v28  ;;  %v18777_v38 = vrot.slane %v3874_v44, 7  ;;  %v16336_v16 = vadd.f32 %v18585_v0, %v15747_v33  ;;  %v16339_v27 = vadd.f32 %v18577_v59, %v3476_v45  ;;  %v16342_v40 = vadd.f32 %v18596_v57, %v15750_v60 }
 0x272   :  { %v4164_v30 = vld [vmem:[#allocation3 + $0x30] sm:$0xf]  ;;  %v18782_v19 = vrot.slane %v3857_v34, 7  ;;  %v16345_v39 = vadd.f32 %v18590_v13, %v3489_v3  ;;  %v16348_v51 = vadd.f32 %v18598_v50, %v15751_v26  ;;  %v16351_v24 = vadd.f32 %v18592_v63, %v3492_v10  ;;  %v4157_v15 = vld [vmem:[#allocation3 + $0x24] sm:$0xf] }
 0x273   :  { %v3879_v11 = vor.u32 %v3877_v49, %v18777_v38  ;;  %v3880_v12 = vrot.slane %v18777_v38, 4  ;;  %v3630_v0 = vmul.f32 %v16336_v16, %v18740_v58  ;;  %v3628_v59 = vmul.f32 %v16339_v27, %v18740_v58 }
 0x274   :  { %v3862_v57 = vor.u32 %v3860_v42, %v18782_v19  ;;  %v3863_v33 = vrot.slane %v18782_v19, 4  ;;  %v3633_v45 = vmul.f32 %v16342_v40, %v18740_v58  ;;  %v3631_v13 = vmul.f32 %v16345_v39, %v18740_v58  ;;  %v15754_v50 = vpop.f32.mrb[44].mxu1 }
 0x275   :  { %v4165_v63 = vsel %vm17712_vm8, %v3879_v11, %v4164_v30  ;;  %v3669_v60 = vadd.f32 %v18746_v54, %v3630_v0  ;;  %v3667_v52 = vadd.f32 %v18746_v54, %v3628_v59  ;;  %v3634_v3 = vmul.f32 %v16348_v51, %v18740_v58  ;;  %v3505_v62 = vpop.f32.mrb[45].mxu1 }
 0x276   :  { %4166 = vst [vmem:[#allocation3 + $0x30] sm:$0xf] %v4165_v63  ;;  %v4158_v61 = vsel %vm17712_vm8, %v3862_v57, %v4157_v15  ;;  %v3672_v55 = vadd.f32 %v18746_v54, %v3633_v45  ;;  %v3670_v6 = vadd.f32 %v18746_v54, %v3631_v13  ;;  %v3632_v26 = vmul.f32 %v16351_v24, %v18740_v58  ;;  %v18805_v37 = vpop.f32.mrb[46].mxu1  ;;  %v4168_v45 = vld [vmem:[#allocation3 + $0x38] sm:$0x1] }
 0x277   :  { %4159 = vst [vmem:[#allocation3 + $0x24] sm:$0xf] %v4158_v61  ;;  %v3701_v9 = vmax.f32 %v3669_v60, 0.0  ;;  %v3699_v44 = vmax.f32 %v3667_v52, 0.0  ;;  %v3673_v49 = vadd.f32 %v18746_v54, %v3634_v3  ;;  %v16354_v10 = vadd.f32 %v18608_v56, %v15754_v50  ;;  %v18809_v31 = vpop.f32.mrb[47].mxu1 }
 0x278   :  { %v3704_v28 = vmax.f32 %v3672_v55, 0.0  ;;  %v3702_v34 = vmax.f32 %v3670_v6, 0.0  ;;  %v3671_v42 = vadd.f32 %v18746_v54, %v3632_v26  ;;  %v16357_v16 = vadd.f32 %v18602_v48, %v3505_v62  ;;  %v4161_v62 = vld [vmem:[#allocation3 + $0x2c] sm:$0x1] }
 0x279   :  { %v13636_v27 = vpack.c.bf16 %v3701_v9, %v3701_v9  ;;  %v13634_v40 = vpack.c.bf16 %v3699_v44, %v3699_v44  ;;  %v3705_v30 = vmax.f32 %v3673_v49, 0.0  ;;  %v3637_v39 = vmul.f32 %v16354_v10, %v18740_v58  ;;  %v4178_v9 = vld [vmem:[#allocation3 + $0x48] sm:$0xf] }
 0x27a   :  { %v13639_v51 = vpack.c.bf16 %v3704_v28, %v3704_v28  ;;  %v13637_v24 = vpack.c.bf16 %v3702_v34, %v3702_v34  ;;  %v3703_v11 = vmax.f32 %v3671_v42, 0.0  ;;  %v3635_v15 = vmul.f32 %v16357_v16, %v18740_v58 }
 0x27b   :  { %v3882_v0 = vshrl.u32 %v13636_v27, 16  ;;  %v3885_v56 = vshll.u32 %v13636_v27, 16  ;;  %v3865_v59 = vshrl.u32 %v13634_v40, 16  ;;  %v3868_v57 = vshll.u32 %v13634_v40, 16  ;;  %v4171_v40 = vld [vmem:[#allocation3 + $0x3c] sm:$0xf] }
 0x27c   :  { %v3908_v13 = vshrl.u32 %v13639_v51, 16  ;;  %v3911_v50 = vshll.u32 %v13639_v51, 16  ;;  %v3891_v63 = vshrl.u32 %v13637_v24, 16  ;;  %v3894_v60 = vshll.u32 %v13637_v24, 16  ;;  %v15758_v48 = vpop.f32.mrb[48].mxu1 }
 0x27d   :  { %v3884_v52 = vrot.slane %v3882_v0, 7  ;;  %v3867_v3 = vrot.slane %v3865_v59, 7  ;;  %v13640_v61 = vpack.c.bf16 %v3705_v30, %v3705_v30  ;;  %v13638_v55 = vpack.c.bf16 %v3703_v11, %v3703_v11  ;;  %v3521_v6 = vpop.f32.mrb[49].mxu1 }
 0x27e   :  { %v3910_v26 = vrot.slane %v3908_v13, 7  ;;  %v3893_v44 = vrot.slane %v3891_v63, 7  ;;  %v3676_v49 = vadd.f32 %v18746_v54, %v3637_v39  ;;  %v3674_v10 = vadd.f32 %v18746_v54, %v3635_v15  ;;  %v18817_v28 = vpop.f32.mrb[50].mxu1 }
 0x27f   :  { %v3887_v34 = vor.u32 %v3885_v56, %v3884_v52  ;;  %v3889_v42 = vrot.slane %v3884_v52, 4  ;;  %v3870_v16 = vor.u32 %v3868_v57, %v3867_v3  ;;  %v3872_v27 = vrot.slane %v3867_v3, 4  ;;  %v18819_v51 = vpop.f32.mrb[51].mxu1 }
 0x280   :  { %v3913_v24 = vor.u32 %v3911_v50, %v3910_v26  ;;  %v3914_v30 = vrot.slane %v3910_v26, 4  ;;  %v3896_v11 = vor.u32 %v3894_v60, %v3893_v44  ;;  %v3897_v0 = vrot.slane %v3893_v44, 4  ;;  %v4182_v26 = vld [vmem:[#allocation3 + $0x50] sm:$0x1] }
 0x281   :  { %v3888_v39 = vsel %vm17700_vm7, %v3880_v12, %v3887_v34  ;;  %v4169_v15 = vsel %vm17654_vm2, %v3889_v42, %v4168_v45  ;;  %v3871_v56 = vsel %vm17700_vm7, %v3863_v33, %v3870_v16  ;;  %v4162_v59 = vsel %vm17654_vm2, %v3872_v27, %v4161_v62  ;;  %v4175_v42 = vld [vmem:[#allocation3 + $0x44] sm:$0x1] }
 0x282   :  { %4167 = vst [vmem:[#allocation3 + $0x34] sm:$0xf] %v3888_v39  ;;  %4170 = vst [vmem:[#allocation3 + $0x38] sm:$0x1] %v4169_v15  ;;  %v4179_v38 = vsel %vm17712_vm8, %v3913_v24, %v4178_v9  ;;  %v4172_v12 = vsel %vm17712_vm8, %v3896_v11, %v4171_v40  ;;  %v3916_v57 = vshrl.u32 %v13640_v61, 16  ;;  %v3919_v45 = vshll.u32 %v13640_v61, 16 }
 0x283   :  { %4160 = vst [vmem:[#allocation3 + $0x28] sm:$0xf] %v3871_v56  ;;  %4163 = vst [vmem:[#allocation3 + $0x2c] sm:$0x1] %v4162_v59  ;;  %v3899_v19 = vshrl.u32 %v13638_v55, 16  ;;  %v3902_v13 = vshll.u32 %v13638_v55, 16  ;;  %v16360_v60 = vadd.f32 %v18610_v21, %v18805_v37  ;;  %v16363_v52 = vadd.f32 %v18604_v23, %v18809_v31 }
 0x284   :  { %4180 = vst [vmem:[#allocation3 + $0x48] sm:$0xf] %v4179_v38  ;;  %4173 = vst [vmem:[#allocation3 + $0x3c] sm:$0xf] %v4172_v12  ;;  %v3708_v33 = vmax.f32 %v3676_v49, 0.0  ;;  %v3706_v50 = vmax.f32 %v3674_v10, 0.0  ;;  %v16366_v3 = vadd.f32 %v18626_v18, %v15758_v48  ;;  %v16369_v34 = vadd.f32 %v18614_v35, %v3521_v6 }
 0x285   :  { %v3918_v63 = vrot.slane %v3916_v57, 7  ;;  %v18842_v62 = vpop.f32.mrb[52].mxu1  ;;  %v3901_v9 = vrot.slane %v3899_v19, 7  ;;  %v3638_v21 = vmul.f32 %v16360_v60, %v18740_v58  ;;  %v3636_v37 = vmul.f32 %v16363_v52, %v18740_v58 }
 0x286   :  { %v13643_v61 = vpack.c.bf16 %v3708_v33, %v3708_v33  ;;  %v13641_v44 = vpack.c.bf16 %v3706_v50, %v3706_v50  ;;  %v18845_v55 = vpop.f32.mrb[53].mxu1  ;;  %v3641_v12 = vmul.f32 %v16366_v3, %v18740_v58  ;;  %v3639_v57 = vmul.f32 %v16369_v34, %v18740_v58  ;;  %v18881_v34 = vld [vmem:[#allocation3 + $0x14] ss:$0 sps:$4 sm:$0x11]  }
 0x287   :  { %v3921_v49 = vor.u32 %v3919_v45, %v3918_v63  ;;  %v3923_v10 = vrot.slane %v3918_v63, 4  ;;  %v18849_v23 = vpop.f32.mrb[54].mxu1  ;;  %v3904_v18 = vor.u32 %v3902_v13, %v3901_v9  ;;  %v3906_v31 = vrot.slane %v3901_v9, 4  ;;  %v4185_v45 = vld [vmem:[#allocation3 + $0x54] sm:$0xf] }
 0x288   :  { %v3942_v48 = vshrl.u32 %v13643_v61, 16  ;;  %v3945_v16 = vshll.u32 %v13643_v61, 16  ;;  %v18851_v27 = vpop.f32.mrb[55].mxu1  ;;  %v3925_v40 = vshrl.u32 %v13641_v44, 16  ;;  %v3928_v24 = vshll.u32 %v13641_v44, 16 }
 0x289   :  { %v3922_v35 = vsel %vm17700_vm7, %v3914_v30, %v3921_v49  ;;  %v4183_v6 = vsel %vm17654_vm2, %v3923_v10, %v4182_v26  ;;  %v3905_v11 = vsel %vm17700_vm7, %v3897_v0, %v3904_v18  ;;  %v4176_v39 = vsel %vm17654_vm2, %v3906_v31, %v4175_v42  ;;  %v4192_v30 = vld [vmem:[#allocation3 + $0x60] sm:$0xf]  ;;  %v4258_v44 = vld [vmem:[#allocation3 + $0x10] sm:$0xf] }
 0x28a   :  { %4181 = vst [vmem:[#allocation3 + $0x4c] sm:$0xf] %v3922_v35  ;;  %4184 = vst [vmem:[#allocation3 + $0x50] sm:$0x1] %v4183_v6  ;;  %v18861_v15 = vrot.slane %v3942_v48, 7  ;;  %v3677_v56 = vadd.f32 %v18746_v54, %v3638_v21  ;;  %v18864_v59 = vrot.slane %v3925_v40, 7  ;;  %v3675_v38 = vadd.f32 %v18746_v54, %v3636_v37 }
 0x28b   :  { %4174 = vst [vmem:[#allocation3 + $0x40] sm:$0xf] %v3905_v11  ;;  %4177 = vst [vmem:[#allocation3 + $0x44] sm:$0x1] %v4176_v39  ;;  %v16372_v13 = vadd.f32 %v18630_v25, %v18817_v28  ;;  %v3680_v60 = vadd.f32 %v18746_v54, %v3641_v12  ;;  %v3678_v9 = vadd.f32 %v18746_v54, %v3639_v57  ;;  %v4196_v6 = vld [vmem:[#allocation3 + $0x68] sm:$0x1] }
 0x28c   :  { %v3947_v0 = vor.u32 %v3945_v16, %v18861_v15  ;;  %v3709_v19 = vmax.f32 %v3677_v56, 0.0  ;;  %v3948_v33 = vrot.slane %v18861_v15, 4  ;;  %v3930_v50 = vor.u32 %v3928_v24, %v18864_v59  ;;  %v18875_v52 = vpop.f32.mrb[56].mxu1  ;;  %v4310_v16 = vld [vmem:[#allocation3 + $0xc] sm:$0xe] }
 0x28d   :  { %v3707_v63 = vmax.f32 %v3675_v38, 0.0  ;;  %v3642_v61 = vmul.f32 %v16372_v13, %v18740_v58  ;;  %v18883_v25 = vpop.f32.mrb[57].mxu1  ;;  %v3931_v28 = vrot.slane %v18864_v59, 4  ;;  %v3712_v42 = vmax.f32 %v3680_v60, 0.0  ;;  %v4189_v56 = vld [vmem:[#allocation3 + $0x5c] sm:$0x1] }
 0x28e   :  { %v4193_v3 = vsel %vm17712_vm8, %v3947_v0, %v4192_v30  ;;  %v13644_v26 = vpack.c.bf16 %v3709_v19, %v3709_v19  ;;  %v4186_v49 = vsel %vm17712_vm8, %v3930_v50, %v4185_v45  ;;  %v18888_v21 = vpop.f32.mrb[58].mxu1  ;;  %v3710_v31 = vmax.f32 %v3678_v9, 0.0  ;;  %v4206_v50 = vld [vmem:[#allocation3 + $0x78] sm:$0xf] }
 0x28f   :  { %4194 = vst [vmem:[#allocation3 + $0x60] sm:$0xf] %v4193_v3  ;;  %v13642_v10 = vpack.c.bf16 %v3707_v63, %v3707_v63  ;;  %4187 = vst [vmem:[#allocation3 + $0x54] sm:$0xf] %v4186_v49  ;;  %v3681_v48 = vadd.f32 %v18746_v54, %v3642_v61  ;;  %v18891_v35 = vpop.f32.mrb[59].mxu1  ;;  %v13647_v11 = vpack.c.bf16 %v3712_v42, %v3712_v42  ;;  %v4781_v38 = vrot.slane %v18881_v34, 1 }
 0x290   :  { %v3950_v37 = vshrl.u32 %v13644_v26, 16  ;;  %v3953_v18 = vshll.u32 %v13644_v26, 16  ;;  %v13070_v39 = vcombine.low %v4310_v16, %v4258_v44  ;;  %v13645_v30 = vpack.c.bf16 %v3710_v31, %v3710_v31  ;;  %v4257_v3 = vld [vmem:[#allocation3 + $0xc] sm:$0xf] }
 0x291   :  { %v3933_v40 = vshrl.u32 %v13642_v10, 16  ;;  %v3936_v24 = vshll.u32 %v13642_v10, 16  ;;  %v3713_v59 = vmax.f32 %v3681_v48, 0.0  ;;  %v3976_v57 = vshrl.u32 %v13647_v11, 16  ;;  %v4260_v10 = vld [vmem:[#allocation3 + $0x1c] sm:$0xf] }
 0x292   :  { %v3952_v15 = vrot.slane %v3950_v37, 7  ;;  %v3979_v0 = vshll.u32 %v13647_v11, 16  ;;  %v4780_v45 = vrot.slane %v13070_v39, 1  ;;  %v3959_v63 = vshrl.u32 %v13645_v30, 16  ;;  %v4199_v39 = vld [vmem:[#allocation3 + $0x6c] sm:$0xf] }
 0x293   :  { %v3935_v12 = vrot.slane %v3933_v40, 7  ;;  %v3962_v60 = vshll.u32 %v13645_v30, 16  ;;  %v3978_v61 = vrot.slane %v3976_v57, 7  ;;  %v13648_v49 = vpack.c.bf16 %v3713_v59, %v3713_v59  ;;  %v18905_v16 = vld [vmem:[#allocation3 + $0x20] ss:$0 sps:$4 sm:$0x11]  }
 0x294   :  { %v3955_v19 = vor.u32 %v3953_v18, %v3952_v15  ;;  %v3957_v13 = vrot.slane %v3952_v15, 4  ;;  %v18894_v42 = vpop.f32.mrb[60].mxu1  ;;  %v18900_v48 = vrot.slane %v3959_v63, 7  ;;  %v18903_v18 = vsel %vm1969_vm10, %v4780_v45, %v4781_v38 }
 0x295   :  { %v3938_v26 = vor.u32 %v3936_v24, %v3935_v12  ;;  %v3940_v9 = vrot.slane %v3935_v12, 4  ;;  %v18907_v40 = vpop.f32.mrb[61].mxu1  ;;  %v3981_v11 = vor.u32 %v3979_v0, %v3978_v61  ;;  %15788 = vmatprep.mubr.bf16.mxu1 %v18903_v18  ;;  %v3982_v30 = vrot.slane %v3978_v61, 4  ;;  %v4311_v12 = vld [vmem:[#allocation3 + $0x18] sm:$0xe] }
 0x296   :  { %v3956_v37 = vsel %vm17700_vm7, %v3948_v33, %v3955_v19  ;;  %v4197_v31 = vsel %vm17654_vm2, %v3957_v13, %v4196_v6  ;;  %v18913_v6 = vcombine.low %v4257_v3, %v4258_v44  ;;  %v18916_v15 = vpop.f32.mrb[62].mxu1  ;;  %v3964_v59 = vor.u32 %v3962_v60, %v18900_v48  ;;  %v4259_v0 = vld [vmem:[#allocation3 + $0x18] sm:$0xf]  ;;  %v17178_v19 = vld [vmem:[#allocation4 + $0x40] sm:$0xff]  }
 0x297   :  { %4195 = vst [vmem:[#allocation3 + $0x64] sm:$0xf] %v3956_v37  ;;  %4198 = vst [vmem:[#allocation3 + $0x68] sm:$0x1] %v4197_v31  ;;  %v3939_v24 = vsel %vm17700_vm7, %v3931_v28, %v3938_v26  ;;  %v4190_v33 = vsel %vm17654_vm2, %v3940_v9, %v4189_v56  ;;  %v3984_v38 = vshrl.u32 %v13648_v49, 16  ;;  %v18919_v57 = vpop.f32.mrb[63].mxu1  ;;  %v4207_v28 = vsel %vm17712_vm8, %v3981_v11, %v4206_v50 }
 0x298   :  { %4188 = vst [vmem:[#allocation3 + $0x58] sm:$0xf] %v3939_v24  ;;  %4191 = vst [vmem:[#allocation3 + $0x5c] sm:$0x1] %v4190_v33  ;;  %v3987_v56 = vshll.u32 %v13648_v49, 16  ;;  %v16375_v44 = vadd.f32 %v18616_v53, %v18819_v51  ;;  %v13071_v45 = vcombine.low %v4311_v12, %v4260_v10  ;;  %v4200_v13 = vsel %vm17712_vm8, %v3964_v59, %v4199_v39  ;;  %v17122_v31 = vld [vmem:[#allocation4 + $0x88] sm:$0xff]  }
 0x299   :  { %4208 = vst [vmem:[#allocation3 + $0x78] sm:$0xf] %v4207_v28  ;;  %v3986_v63 = vrot.slane %v3984_v38, 7  ;;  %v18927_v60 = vcombine.low %v4259_v0, %v4260_v10  ;;  %v4784_v3 = vrot.slane %v18905_v16, 1  ;;  %4201 = vst [vmem:[#allocation3 + $0x6c] sm:$0xf] %v4200_v13  ;;  %14492 = vmatprep.subr.bf16.mxu0 %v17178_v19  ;;  %v16378_v10 = vadd.f32 %v18652_v17, %v18842_v62 }
 0x29a   :  { %v4210_v26 = vld [vmem:[#allocation3 + $0x80] sm:$0x1]  ;;  %v3640_v50 = vmul.f32 %v16375_v44, %v18740_v58  ;;  %v4783_v9 = vrot.slane %v13071_v45, 1  ;;  %v4504_v61 = vshll.u32 %v18913_v6, 16  ;;  %v4509_v53 = vshll.u32 %v18881_v34, 16 }
 0x29b   :  { %v3989_v51 = vor.u32 %v3987_v56, %v3986_v63  ;;  %v3991_v49 = vrot.slane %v3986_v63, 4  ;;  %v4502_v37 = vshrl.u32 %v18913_v6, 16  ;;  %v3645_v38 = vmul.f32 %v16378_v10, %v18740_v58  ;;  %v18947_v62 = vld [vmem:[#allocation3 + $0x2c] ss:$0 sps:$4 sm:$0x11]   ;;  %v17129_v63 = vld [vmem:[#allocation4 + $0x90] sm:$0xff]  }
 0x29c   :  { %v3679_v24 = vadd.f32 %v18746_v54, %v3640_v50  ;;  %v18938_v33 = vsel %vm1969_vm10, %v4783_v9, %v4784_v3  ;;  %v4506_v11 = vrot.slane %v4504_v61, 1  ;;  %v4511_v39 = vrot.slane %v4509_v53, 1  ;;  %v4262_v44 = vld [vmem:[#allocation3 + $0x28] sm:$0xf]  ;;  %v17179_v3 = vld [vmem:[#allocation4] sm:$0xff]  }
 0x29d   :  { %v3990_v59 = vsel %vm17700_vm7, %v3982_v30, %v3989_v51  ;;  %v4211_v34 = vsel %vm17654_vm2, %v3991_v49, %v4210_v26  ;;  %15789 = vmatmul.mubr.bf16.vlgmr.msra.gmra.mrb[128].mxu1 %v18938_v33  ;;  %v4516_v17 = vshll.u32 %v18927_v60, 16  ;;  %v4521_v56 = vshll.u32 %v18905_v16, 16 }
 0x29e   :  { %4209 = vst [vmem:[#allocation3 + $0x7c] sm:$0xf] %v3990_v59  ;;  %4212 = vst [vmem:[#allocation3 + $0x80] sm:$0x1] %v4211_v34  ;;  %v3711_v12 = vmax.f32 %v3679_v24, 0.0  ;;  %15821 = vmatpush3.bf16.msra.mxu1 %v18710_v4  ;;  %v4507_v28 = vor.u32 %v4506_v11, %v4502_v37  ;;  %v16381_v30 = vadd.f32 %v18640_v8, %v18845_v55  ;;  %v4514_v45 = vshrl.u32 %v18927_v60, 16 }
 0x29f   :  { %v3684_v0 = vadd.f32 %v18746_v54, %v3645_v38  ;;  %v4518_v19 = vrot.slane %v4516_v17, 1  ;;  %v16384_v13 = vadd.f32 %v18656_v47, %v18849_v23  ;;  %15822 = vmatprep.subr.bf16.mxu1 %v17122_v31  ;;  %v4523_v16 = vrot.slane %v4521_v56, 1  ;;  %v4312_v8 = vld [vmem:[#allocation3 + $0x24] sm:$0xe]  ;;  %v17180_v55 = vld [vmem:[#allocation4 + $0x48] sm:$0xff]  }
 0x2a0   :  { %v13646_v26 = vpack.c.bf16 %v3711_v12, %v3711_v12  ;;  %v18958_v4 = vsel %vm1680_vm9, %v4507_v28, %v4511_v39  ;;  %v3643_v50 = vmul.f32 %v16381_v30, %v18740_v58  ;;  %v13072_v51 = vcombine.low %v4312_v8, %v4262_v44  ;;  %v4261_v37 = vld [vmem:[#allocation3 + $0x24] sm:$0xf]  ;;  %v18971_v34 = vld [vmem:[#allocation3 + $0x38] ss:$0 sps:$4 sm:$0x11]  }
 0x2a1   :  { %5121 = vmatprep.mubr.bf16.mxu0 %v18958_v4  ;;  %v3716_v9 = vmax.f32 %v3684_v0, 0.0  ;;  %v4519_v61 = vor.u32 %v4518_v19, %v4514_v45  ;;  %v3646_v53 = vmul.f32 %v16384_v13, %v18740_v58  ;;  %v3965_v47 = vrot.slane %v18900_v48, 4  ;;  %v17136_v48 = vld [vmem:[#allocation4 + $0x98] sm:$0xff]   ;;  %v17182_v38 = vld [vmem:[#allocation4 + $0x8] sm:$0xff]   ;;  %v18976_v56 = vld [vmem:[#allocation3 + $0x34] sm:$0xf] }
 0x2a2   :  { %v3967_v23 = vshrl.u32 %v13646_v26, 16  ;;  %5122 = vmatmul.mubr.bf16.vlgmr.msra.gmra.mrb[96].mxu0 %v18913_v6  ;;  %v3682_v49 = vadd.f32 %v18746_v54, %v3643_v50  ;;  %v4787_v10 = vrot.slane %v18947_v62, 1  ;;  %15823 = vmatpush3.bf16.msra.mxu1 %v17122_v31  ;;  %v4786_v59 = vrot.slane %v13072_v51, 1  ;;  %v17184_v30 = vld [vmem:[#allocation4 + $0x50] sm:$0xff]   ;;  %v4203_v0 = vld [vmem:[#allocation3 + $0x74] sm:$0x1] }
 0x2a3   :  { %v13651_v24 = vpack.c.bf16 %v3716_v9, %v3716_v9  ;;  %v18968_v11 = vsel %vm1680_vm9, %v4519_v61, %v4523_v16  ;;  %v3685_v39 = vadd.f32 %v18746_v54, %v3646_v53  ;;  %15824 = vmatprep.subr.bf16.mxu1 %v17129_v63  ;;  %14493 = vmatpush3.bf16.msra.mxu0 %v17179_v3  ;;  %v3970_v12 = vshll.u32 %v13646_v26, 16  ;;  %v17185_v53 = vld [vmem:[#allocation4 + $0x10] sm:$0xff]   ;;  %v4275_v1 = vld [vmem:[#allocation3 + $0x78] sm:$0xf] }
 0x2a4   :  { %v3969_v17 = vrot.slane %v3967_v23, 7  ;;  %5129 = vmatprep.mubr.bf16.mxu0 %v18968_v11  ;;  %v3714_v28 = vmax.f32 %v3682_v49, 0.0  ;;  %v16387_v31 = vadd.f32 %v18644_v29, %v18851_v27  ;;  %14494 = vmatprep.subr.bf16.mxu0 %v17180_v55  ;;  %v18978_v13 = vcombine.low %v4261_v37, %v4262_v44  ;;  %v4313_v29 = vld [vmem:[#allocation3 + $0x30] sm:$0xe] }
 0x2a5   :  { %v4010_v45 = vshrl.u32 %v13651_v24, 16  ;;  %v3717_v19 = vmax.f32 %v3685_v39, 0.0  ;;  %v18981_v3 = vsel %vm1969_vm10, %v4786_v59, %v4787_v10  ;;  %v4013_v55 = vshll.u32 %v13651_v24, 16  ;;  %v17143_v44 = vld [vmem:[#allocation4 + $0xa0] sm:$0xff]  }
 0x2a6   :  { %v3972_v16 = vor.u32 %v3970_v12, %v3969_v17  ;;  %v3974_v26 = vrot.slane %v3969_v17, 4  ;;  %v13649_v50 = vpack.c.bf16 %v3714_v28, %v3714_v28  ;;  %15792 = vmatprep.mubr.bf16.mxu1 %v18981_v3  ;;  %v3644_v8 = vmul.f32 %v16387_v31, %v18740_v58  ;;  %15825 = vmatpush3.bf16.msra.mxu1 %v17129_v63  ;;  %v4220_v49 = vld [vmem:[#allocation3 + $0x90] sm:$0xf]  ;;  %v17186_v63 = vld [vmem:[#allocation4 + $0x58] sm:$0xff]  }
 0x2a7   :  { %v4012_v27 = vrot.slane %v4010_v45, 7  ;;  %v13652_v9 = vpack.c.bf16 %v3717_v19, %v3717_v19  ;;  %v13073_v61 = vcombine.low %v4313_v29, %v18976_v56  ;;  %15826 = vmatprep.subr.bf16.mxu1 %v17136_v48  ;;  %14495 = vmatpush3.bf16.msra.mxu0 %v17182_v38  ;;  %v4790_v10 = vrot.slane %v18971_v34, 1 }
 0x2a8   :  { %v3973_v51 = vsel %vm17700_vm7, %v3965_v47, %v3972_v16  ;;  %v4204_v23 = vsel %vm17654_vm2, %v3974_v26, %v4203_v0  ;;  %v3993_v37 = vshrl.u32 %v13649_v50, 16  ;;  %14496 = vmatprep.subr.bf16.mxu0 %v17184_v30  ;;  %v3996_v59 = vshll.u32 %v13649_v50, 16  ;;  %v4213_v30 = vld [vmem:[#allocation3 + $0x84] sm:$0xf]  ;;  %v17150_v16 = vld [vmem:[#allocation4 + $0xa8] sm:$0xff]  }
 0x2a9   :  { %4202 = vst [vmem:[#allocation3 + $0x70] sm:$0xf] %v3973_v51  ;;  %4205 = vst [vmem:[#allocation3 + $0x74] sm:$0x1] %v4204_v23  ;;  %v4015_v24 = vor.u32 %v4013_v55, %v4012_v27  ;;  %v4016_v39 = vrot.slane %v4012_v27, 4  ;;  %v4018_v17 = vshrl.u32 %v13652_v9, 16  ;;  %v3683_v12 = vadd.f32 %v18746_v54, %v3644_v8 }
 0x2aa   :  { %v18991_v38 = vrot.slane %v3993_v37, 7  ;;  %v4789_v47 = vrot.slane %v13073_v61, 1  ;;  %5130 = vmatmul.mubr.bf16.gmra.mrb[100].mxu0 %v18927_v60  ;;  %v16390_v28 = vadd.f32 %v18683_v43, %v18875_v52  ;;  %15827 = vmatpush3.bf16.msra.mxu1 %v17136_v48  ;;  %v4021_v45 = vshll.u32 %v13652_v9, 16  ;;  %v4224_v50 = vld [vmem:[#allocation3 + $0x98] sm:$0x1]  ;;  %v17188_v52 = vld [vmem:[#allocation4 + $0x18] sm:$0xff]  }
 0x2ab   :  { %v4221_v31 = vsel %vm17712_vm8, %v4015_v24, %v4220_v49  ;;  %v4020_v0 = vrot.slane %v4018_v17, 7  ;;  %v4528_v19 = vshll.u32 %v18978_v13, 16  ;;  %15828 = vmatprep.subr.bf16.mxu1 %v17143_v44  ;;  %14497 = vmatpush3.bf16.msra.mxu0 %v17185_v53  ;;  %v3715_v8 = vmax.f32 %v3683_v12, 0.0  ;;  %v17190_v61 = vld [vmem:[#allocation4 + $0x60] sm:$0xff]   ;;  %v19012_v37 = vld [vmem:[#allocation3 + $0x40] sm:$0xf] }
 0x2ac   :  { %4222 = vst [vmem:[#allocation3 + $0x90] sm:$0xf] %v4221_v31  ;;  %v3998_v26 = vor.u32 %v3996_v59, %v18991_v38  ;;  %v19002_v29 = vsel %vm1969_vm10, %v4789_v47, %v4790_v10  ;;  %v4526_v43 = vshrl.u32 %v18978_v13, 16  ;;  %14498 = vmatprep.subr.bf16.mxu0 %v17186_v63  ;;  %v3649_v55 = vmul.f32 %v16390_v28, %v18740_v58  ;;  %v19014_v10 = vld [vmem:[#allocation3 + $0x44] ss:$0 sps:$4 sm:$0x11]  }
 0x2ad   :  { %v4023_v48 = vor.u32 %v4021_v45, %v4020_v0  ;;  %v4025_v27 = vrot.slane %v4020_v0, 4  ;;  %15793 = vmatmul.mubr.bf16.gmra.mrb[132].mxu1 %v19002_v29  ;;  %v4530_v9 = vrot.slane %v4528_v19, 1  ;;  %v13650_v51 = vpack.c.bf16 %v3715_v8, %v3715_v8  ;;  %v4263_v59 = vld [vmem:[#allocation3 + $0x30] sm:$0xf]  ;;  %v4314_v28 = vld [vmem:[#allocation3 + $0x3c] sm:$0xe] }
 0x2ae   :  { %v4214_v53 = vsel %vm17712_vm8, %v3998_v26, %v4213_v30  ;;  %v4533_v23 = vshll.u32 %v18947_v62, 16  ;;  %v16393_v49 = vadd.f32 %v18669_v14, %v18883_v25  ;;  %15829 = vmatpush3.bf16.msra.mxu1 %v17143_v44  ;;  %v3688_v17 = vadd.f32 %v18746_v54, %v3649_v55  ;;  %v17157_v62 = vld [vmem:[#allocation4 + $0xb0] sm:$0xff]   ;;  %v17191_v45 = vld [vmem:[#allocation4 + $0x20] sm:$0xff]   ;;  %v4217_v26 = vld [vmem:[#allocation3 + $0x8c] sm:$0x1] }
 0x2af   :  { %4215 = vst [vmem:[#allocation3 + $0x84] sm:$0xf] %v4214_v53  ;;  %v4024_v63 = vsel %vm17700_vm7, %v4016_v39, %v4023_v48  ;;  %v4225_v24 = vsel %vm17654_vm2, %v4025_v27, %v4224_v50  ;;  %v4531_v12 = vor.u32 %v4530_v9, %v4526_v43  ;;  %15830 = vmatprep.subr.bf16.mxu1 %v17150_v16  ;;  %v4001_v14 = vshrl.u32 %v13650_v51, 16  ;;  %v19037_v48 = vld [vmem:[#allocation3 + $0x50] ss:$0 sps:$4 sm:$0x11]  }
 0x2b0   :  { %4223 = vst [vmem:[#allocation3 + $0x94] sm:$0xf] %v4024_v63  ;;  %4226 = vst [vmem:[#allocation3 + $0x98] sm:$0x1] %v4225_v24  ;;  %v19022_v25 = vcombine.low %v4263_v59, %v18976_v56  ;;  %v4535_v44 = vrot.slane %v4533_v23, 1  ;;  %v3647_v47 = vmul.f32 %v16393_v49, %v18740_v58  ;;  %14499 = vmatpush3.bf16.msra.mxu0 %v17188_v52  ;;  %v4004_v39 = vshll.u32 %v13650_v51, 16 }
 0x2b1   :  { %v3720_v31 = vmax.f32 %v3688_v17, 0.0  ;;  %v16396_v30 = vadd.f32 %v18686_v41, %v18888_v21  ;;  %v13074_v0 = vcombine.low %v4314_v28, %v19012_v37  ;;  %14500 = vmatprep.subr.bf16.mxu0 %v17190_v61  ;;  %v4003_v19 = vrot.slane %v4001_v14, 7  ;;  %v17192_v27 = vld [vmem:[#allocation4 + $0x68] sm:$0xff]   ;;  %v19040_v51 = vld [vmem:[#allocation3 + $0x4c] sm:$0xf]  ;;  %v17196_v14 = vld [vmem:[#allocation4 + $0x70] sm:$0xff]  }
 0x2b2   :  { %v19029_v50 = vsel %vm1680_vm9, %v4531_v12, %v4535_v44  ;;  %v3686_v56 = vadd.f32 %v18746_v54, %v3647_v47  ;;  %v4793_v8 = vrot.slane %v19014_v10, 1  ;;  %15831 = vmatpush3.bf16.msra.mxu1 %v17150_v16  ;;  %v16399_v21 = vadd.f32 %v18672_v22, %v18891_v35  ;;  %v17164_v16 = vld [vmem:[#allocation4 + $0xb8] sm:$0xff]   ;;  %v17194_v35 = vld [vmem:[#allocation4 + $0x28] sm:$0xff]  }
 0x2b3   :  { %v13655_v43 = vpack.c.bf16 %v3720_v31, %v3720_v31  ;;  %5137 = vmatprep.mubr.bf16.mxu0 %v19029_v50  ;;  %v3650_v52 = vmul.f32 %v16396_v30, %v18740_v58  ;;  %v4792_v41 = vrot.slane %v13074_v0, 1  ;;  %15832 = vmatprep.subr.bf16.mxu1 %v17157_v62  ;;  %v3999_v55 = vrot.slane %v18991_v38, 4  ;;  %v4315_v12 = vld [vmem:[#allocation3 + $0x48] sm:$0xe]  ;;  %v19060_v30 = vld [vmem:[%s22396_s3] ss:$0 sm:$0xff] }
 0x2b4   :  { %v4006_v9 = vor.u32 %v4004_v39, %v4003_v19  ;;  %v4008_v61 = vrot.slane %v4003_v19, 4  ;;  %v3718_v53 = vmax.f32 %v3686_v56, 0.0  ;;  %5138 = vmatmul.mubr.bf16.gmra.mrb[104].mxu0 %v18978_v13  ;;  %v3648_v17 = vmul.f32 %v16399_v21, %v18740_v58  ;;  %v4234_v39 = vld [vmem:[#allocation3 + $0xa8] sm:$0xf]  ;;  %v19072_v21 = vld [vmem:[%s22395_s2] ss:$0 sm:$0xff] }
 0x2b5   :  { %v4044_v23 = vshrl.u32 %v13655_v43, 16  ;;  %v4047_v49 = vshll.u32 %v13655_v43, 16  ;;  %v3689_v63 = vadd.f32 %v18746_v54, %v3650_v52  ;;  %v19045_v22 = vsel %vm1969_vm10, %v4792_v41, %v4793_v8  ;;  %14501 = vmatpush3.bf16.msra.mxu0 %v17191_v45  ;;  %v17168_v45 = vld [vmem:[#allocation4 + $0x1c0] sm:$0xff]   ;;  %v17197_v8 = vld [vmem:[#allocation4 + $0x30] sm:$0xff]  }
 0x2b6   :  { %v4007_v38 = vsel %vm17700_vm7, %v3999_v55, %v4006_v9  ;;  %v4218_v24 = vsel %vm17654_vm2, %v4008_v61, %v4217_v26  ;;  %v13653_v59 = vpack.c.bf16 %v3718_v53, %v3718_v53  ;;  %15796 = vmatprep.mubr.bf16.mxu1 %v19045_v22  ;;  %v13075_v47 = vcombine.low %v4315_v12, %v19040_v51  ;;  %v4227_v55 = vld [vmem:[#allocation3 + $0x9c] sm:$0xf]  ;;  %v4277_v2 = vld [vmem:[#allocation3 + $0x84] sm:$0xf] }
 0x2b7   :  { %4216 = vst [vmem:[#allocation3 + $0x88] sm:$0xf] %v4007_v38  ;;  %4219 = vst [vmem:[#allocation3 + $0x8c] sm:$0x1] %v4218_v24  ;;  %v19053_v54 = vrot.slane %v4044_v23, 7  ;;  %v3721_v44 = vmax.f32 %v3689_v63, 0.0  ;;  %15833 = vmatpush3.bf16.msra.mxu1 %v17157_v62  ;;  %14502 = vmatprep.subr.bf16.mxu0 %v17192_v27  ;;  %v3687_v58 = vadd.f32 %v19060_v30, %v3648_v17 }
 0x2b8   :  { %v4796_v28 = vrot.slane %v19037_v48, 1  ;;  %v4027_v31 = vshrl.u32 %v13653_v59, 16  ;;  %v16402_v0 = vadd.f32 %v18704_v20, %v18894_v42  ;;  %15834 = vmatprep.subr.bf16.mxu1 %v17164_v16  ;;  %v4030_v26 = vshll.u32 %v13653_v59, 16  ;;  %v17198_v42 = vld [vmem:[#allocation4 + $0x78] sm:$0xff]  }
 0x2b9   :  { %v4049_v19 = vor.u32 %v4047_v49, %v19053_v54  ;;  %v13656_v56 = vpack.c.bf16 %v3721_v44, %v3721_v44  ;;  %v4795_v62 = vrot.slane %v13075_v47, 1  ;;  %14503 = vmatpush3.bf16.msra.mxu0 %v17194_v35  ;;  %v4050_v43 = vrot.slane %v19053_v54, 4  ;;  %v4238_v54 = vld [vmem:[#allocation3 + $0xb0] sm:$0x1] }
 0x2ba   :  { %v19067_v52 = vrot.slane %v4027_v31, 7  ;;  %v3719_v41 = vmax.f32 %v3687_v58, 0.0  ;;  %v3653_v20 = vmul.f32 %v19072_v21, %v16402_v0  ;;  %14504 = vmatprep.subr.bf16.mxu0 %v17196_v14  ;;  %v4538_v53 = vshrl.u32 %v19022_v25, 16 }
 0x2bb   :  { %v4235_v27 = vsel %vm17712_vm8, %v4049_v19, %v4234_v39  ;;  %v4052_v9 = vshrl.u32 %v13656_v56, 16  ;;  %v19078_v61 = vsel %vm1969_vm10, %v4795_v62, %v4796_v28  ;;  %15835 = vmatpush3.bf16.msra.mxu1 %v17164_v16  ;;  %v4055_v49 = vshll.u32 %v13656_v56, 16  ;;  %v17200_v16 = vld [vmem:[#allocation4 + $0x38] sm:$0xff]   ;;  %v19096_v19 = vld [vmem:[#allocation3 + $0x5c] ss:$0 sps:$4 sm:$0x11]  }
 0x2bc   :  { %4236 = vst [vmem:[#allocation3 + $0xa8] sm:$0xf] %v4235_v27  ;;  %v4032_v23 = vor.u32 %v4030_v26, %v19067_v52  ;;  %v13654_v63 = vpack.c.bf16 %v3719_v41, %v3719_v41  ;;  %15797 = vmatmul.mubr.bf16.gmra.mrb[136].mxu1 %v19078_v61  ;;  %v3692_v35 = vadd.f32 %v19060_v30, %v3653_v20  ;;  %v4540_v24 = vshll.u32 %v19022_v25, 16  ;;  %v4231_v62 = vld [vmem:[#allocation3 + $0xa4] sm:$0x1] }
 0x2bd   :  { %14628 = vmatprep.subr.bf16.mxu1 %v17168_v45  ;;  %v4054_v38 = vrot.slane %v4052_v9, 7  ;;  %v4545_v59 = vshll.u32 %v18971_v34, 16  ;;  %v16405_v17 = vadd.f32 %v18694_v46, %v18907_v40  ;;  %14505 = vmatpush3.bf16.msra.mxu0 %v17197_v8  ;;  %v4033_v12 = vrot.slane %v19067_v52, 4  ;;  %v19094_v45 = vld [vmem:[#allocation3 + $0x58] sm:$0xf] }
 0x2be   :  { %v4228_v14 = vsel %vm17712_vm8, %v4032_v23, %v4227_v55  ;;  %v4035_v44 = vshrl.u32 %v13654_v63, 16  ;;  %v3724_v47 = vmax.f32 %v3692_v35, 0.0  ;;  %14506 = vmatprep.subr.bf16.mxu0 %v17198_v42  ;;  %v4038_v31 = vshll.u32 %v13654_v63, 16  ;;  %v4248_v27 = vld [vmem:[#allocation3 + $0xc0] sm:$0xf] }
 0x2bf   :  { %4229 = vst [vmem:[#allocation3 + $0x9c] sm:$0xf] %v4228_v14  ;;  %v4057_v28 = vor.u32 %v4055_v49, %v4054_v38  ;;  %v4059_v39 = vrot.slane %v4054_v38, 4  ;;  %v4542_v58 = vrot.slane %v4540_v24, 1  ;;  %v3651_v46 = vmul.f32 %v19072_v21, %v16405_v17 }
 0x2c0   :  { %v4037_v34 = vrot.slane %v4035_v44, 7  ;;  %v13659_v0 = vpack.c.bf16 %v3724_v47, %v3724_v47  ;;  %v16408_v40 = vadd.f32 %v18706_v32, %v18916_v15  ;;  %v4547_v52 = vrot.slane %v4545_v59, 1  ;;  %v4316_v15 = vld [vmem:[#allocation3 + $0x54] sm:$0xe]  ;;  %v4265_v59 = vld [vmem:[#allocation3 + $0x3c] sm:$0xf] }
 0x2c1   :  { %v4058_v26 = vsel %vm17700_vm7, %v4050_v43, %v4057_v28  ;;  %v4239_v56 = vsel %vm17654_vm2, %v4059_v39, %v4238_v54  ;;  %v4543_v8 = vor.u32 %v4542_v58, %v4538_v53  ;;  %14507 = vmatpush3.bf16.msra.mxu0 %v17200_v16  ;;  %v3690_v43 = vadd.f32 %v19060_v30, %v3651_v46  ;;  %v19108_v53 = vld [vmem:[#allocation3 + $0x64] sm:$0xf]  ;;  %v19118_v24 = vld [vmem:[#allocation3 + $0x68] ss:$0 sps:$4 sm:$0x11]  }
 0x2c2   :  { %4237 = vst [vmem:[#allocation3 + $0xac] sm:$0xf] %v4058_v26  ;;  %4240 = vst [vmem:[#allocation3 + $0xb0] sm:$0x1] %v4239_v56  ;;  %v4040_v41 = vor.u32 %v4038_v31, %v4037_v34  ;;  %v4042_v20 = vrot.slane %v4037_v34, 4  ;;  %v4078_v42 = vshrl.u32 %v13659_v0, 16  ;;  %v3654_v9 = vmul.f32 %v19072_v21, %v16408_v40 }
 0x2c3   :  { %v4081_v32 = vshll.u32 %v13659_v0, 16  ;;  %v19103_v55 = vsel %vm1680_vm9, %v4543_v8, %v4547_v52  ;;  %v13076_v23 = vcombine.low %v4316_v15, %v19094_v45  ;;  %v4799_v38 = vrot.slane %v19096_v19, 1  ;;  %v4317_v54 = vld [vmem:[#allocation3 + $0x60] sm:$0xe]  ;;  %v4267_v39 = vld [vmem:[#allocation3 + $0x48] sm:$0xf] }
 0x2c4   :  { %v4041_v49 = vsel %vm17700_vm7, %v4033_v12, %v4040_v41  ;;  %v4232_v63 = vsel %vm17654_vm2, %v4042_v20, %v4231_v62  ;;  %v19114_v35 = vrot.slane %v4078_v42, 7  ;;  %5145 = vmatprep.mubr.bf16.mxu0 %v19103_v55  ;;  %v3722_v17 = vmax.f32 %v3690_v43, 0.0  ;;  %v19137_v46 = vld [vmem:[#allocation3 + $0x74] ss:$0 sps:$4 sm:$0x11]  }
 0x2c5   :  { %4230 = vst [vmem:[#allocation3 + $0xa0] sm:$0xf] %v4041_v49  ;;  %4233 = vst [vmem:[#allocation3 + $0xa4] sm:$0x1] %v4232_v63  ;;  %v3693_v16 = vadd.f32 %v19060_v30, %v3654_v9  ;;  %v4798_v14 = vrot.slane %v13076_v23, 1  ;;  %v16411_v12 = vadd.f32 %v18700_v5, %v18919_v57  ;;  %5146 = vmatmul.mubr.bf16.gmra.mrb[108].mxu0 %v19022_v25  ;;  %v4557_v42 = vshll.u32 %v19014_v10, 16 }
 0x2c6   :  { %v19125_v44 = vcombine.low %v4265_v59, %v19012_v37  ;;  %v4083_v47 = vor.u32 %v4081_v32, %v19114_v35  ;;  %v13077_v28 = vcombine.low %v4317_v54, %v19108_v53  ;;  %v13657_v31 = vpack.c.bf16 %v3722_v17, %v3722_v17  ;;  %v19143_v8 = vld [vmem:[#allocation3 + $0x70] sm:$0xf]  ;;  %v4241_v52 = vld [vmem:[#allocation3 + $0xb4] sm:$0xf]  ;;  %v4318_v32 = vld [vmem:[#allocation3 + $0x6c] sm:$0xe] }
 0x2c7   :  { %v3725_v58 = vmax.f32 %v3693_v16, 0.0  ;;  %v19130_v34 = vsel %vm1969_vm10, %v4798_v14, %v4799_v38  ;;  %v3652_v0 = vmul.f32 %v19072_v21, %v16411_v12  ;;  %v4802_v37 = vrot.slane %v19118_v24, 1  ;;  %v4319_v16 = vld [vmem:[#allocation3 + $0x78] sm:$0xe]  ;;  %v4252_v14 = vld [vmem:[#allocation3 + $0xc8] sm:$0x1] }
 0x2c8   :  { %v4249_v5 = vsel %vm17712_vm8, %v4083_v47, %v4248_v27  ;;  %15800 = vmatprep.mubr.bf16.mxu1 %v19130_v34  ;;  %v4801_v57 = vrot.slane %v13077_v28, 1  ;;  %v19140_v40 = vcombine.low %v4267_v39, %v19040_v51  ;;  %v4061_v26 = vshrl.u32 %v13657_v31, 16 }
 0x2c9   :  { %4250 = vst [vmem:[#allocation3 + $0xc0] sm:$0xf] %v4249_v5  ;;  %v13660_v56 = vpack.c.bf16 %v3725_v58, %v3725_v58  ;;  %v3691_v62 = vadd.f32 %v19060_v30, %v3652_v0  ;;  %v4084_v21 = vrot.slane %v19114_v35, 4  ;;  %v4552_v20 = vshll.u32 %v19125_v44, 16  ;;  %v19154_v30 = vld [vmem:[#allocation3 + $0x7c] sm:$0xf] }
 0x2ca   :  { %v19147_v41 = vsel %vm1969_vm10, %v4801_v57, %v4802_v37  ;;  %v19151_v51 = vrot.slane %v4061_v26, 7  ;;  %v4064_v15 = vshll.u32 %v13657_v31, 16  ;;  %v4550_v9 = vshrl.u32 %v19125_v44, 16  ;;  %v19159_v35 = vld [vmem:[#allocation3 + $0x80] ss:$0 sps:$4 sm:$0x11]  }
 0x2cb   :  { %v4086_v27 = vshrl.u32 %v13660_v56, 16  ;;  %v3723_v43 = vmax.f32 %v3691_v62, 0.0  ;;  %15801 = vmatmul.mubr.bf16.gmra.mrb[140].mxu1 %v19147_v41  ;;  %v4554_v23 = vrot.slane %v4552_v20, 1  ;;  %v13078_v49 = vcombine.low %v4318_v32, %v19143_v8  ;;  %v4269_v0 = vld [vmem:[#allocation3 + $0x54] sm:$0xf] }
 0x2cc   :  { %v4805_v63 = vrot.slane %v19137_v46, 1  ;;  %v4066_v10 = vor.u32 %v4064_v15, %v19151_v51  ;;  %v4089_v59 = vshll.u32 %v13660_v56, 16  ;;  %v4559_v54 = vrot.slane %v4557_v42, 1  ;;  %v19165_v57 = vld [vmem:[#allocation3 + $0x88] sm:$0xf] }
 0x2cd   :  { %v4088_v38 = vrot.slane %v4086_v27, 7  ;;  %v13658_v17 = vpack.c.bf16 %v3723_v43, %v3723_v43  ;;  %v4555_v12 = vor.u32 %v4554_v23, %v4550_v9  ;;  %v4804_v47 = vrot.slane %v13078_v49, 1  ;;  %v4245_v26 = vld [vmem:[#allocation3 + $0xbc] sm:$0x1]  ;;  %v4320_v43 = vld [vmem:[#allocation3 + $0x84] sm:$0xe] }
 0x2ce   :  { %v13079_v28 = vcombine.low %v4319_v16, %v19154_v30  ;;  %v4242_v39 = vsel %vm17712_vm8, %v4066_v10, %v4241_v52  ;;  %v19173_v42 = vld [vmem:[#allocation3 + $0x8c] ss:$0 sps:$4 sm:$0x11]   ;;  %v4808_v27 = vrot.slane %v19159_v35, 1  ;;  %v19182_v9 = vld [vmem:[#allocation3 + $0x94] sm:$0xf]  ;;  %v19186_v49 = vcombine.low %v4269_v0, %v19094_v45 }
 0x2cf   :  { %v4091_v31 = vor.u32 %v4089_v59, %v4088_v38  ;;  %v4093_v58 = vrot.slane %v4088_v38, 4  ;;  %v4069_v5 = vshrl.u32 %v13658_v17, 16  ;;  %4243 = vst [vmem:[#allocation3 + $0xb4] sm:$0xf] %v4242_v39  ;;  %v4072_v37 = vshll.u32 %v13658_v17, 16 }
 0x2d0   :  { %v19168_v56 = vsel %vm1680_vm9, %v4555_v12, %v4559_v54  ;;  %v19171_v62 = vsel %vm1969_vm10, %v4804_v47, %v4805_v63  ;;  %v4807_v20 = vrot.slane %v13079_v28, 1  ;;  %v4067_v23 = vrot.slane %v19151_v51, 4  ;;  %v19191_v10 = vld [vmem:[#allocation3 + $0x98] ss:$0 sps:$4 sm:$0x11]  }
 0x2d1   :  { %v4092_v52 = vsel %vm17700_vm7, %v4084_v21, %v4091_v31  ;;  %v4253_v32 = vsel %vm17654_vm2, %v4093_v58, %v4252_v14  ;;  %v4071_v15 = vrot.slane %v4069_v5, 7  ;;  %5153 = vmatprep.mubr.bf16.mxu0 %v19168_v56  ;;  %15804 = vmatprep.mubr.bf16.mxu1 %v19171_v62  ;;  %v4564_v21 = vshll.u32 %v19140_v40, 16  ;;  %v4271_v17 = vld [vmem:[#allocation3 + $0x60] sm:$0xf]  ;;  %v4321_v14 = vld [vmem:[#allocation3 + $0x90] sm:$0xe] }
 0x2d2   :  { %4251 = vst [vmem:[#allocation3 + $0xc4] sm:$0xf] %v4092_v52  ;;  %4254 = vst [vmem:[#allocation3 + $0xc8] sm:$0x1] %v4253_v32  ;;  %5154 = vmatmul.mubr.bf16.gmra.mrb[112].mxu0 %v19125_v44  ;;  %v4569_v63 = vshll.u32 %v19037_v48, 16  ;;  %v19194_v16 = vsel %vm1969_vm10, %v4807_v20, %v4808_v27  ;;  %v13080_v51 = vcombine.low %v4320_v43, %v19165_v57  ;;  %v4562_v12 = vshrl.u32 %v19140_v40, 16 }
 0x2d3   :  { %v4074_v38 = vor.u32 %v4072_v37, %v4071_v15  ;;  %v4076_v59 = vrot.slane %v4071_v15, 4  ;;  %v19198_v45 = vcombine.low %v4271_v17, %v19108_v53  ;;  %15805 = vmatmul.mubr.bf16.gmra.mrb[144].mxu1 %v19194_v16  ;;  %v4566_v54 = vrot.slane %v4564_v21, 1  ;;  %v19203_v47 = vld [vmem:[#allocation3 + $0xa4] ss:$0 sps:$4 sm:$0x11]  }
 0x2d4   :  { %v4811_v48 = vrot.slane %v19173_v42, 1  ;;  %v4810_v31 = vrot.slane %v13080_v51, 1  ;;  %v13081_v58 = vcombine.low %v4321_v14, %v19182_v9  ;;  %v19210_v53 = vld [vmem:[#allocation3 + $0xa0] sm:$0xf]  ;;  %v4571_v5 = vrot.slane %v4569_v63, 1 }
 0x2d5   :  { %22507 = vst [vmem:[#allocation11_spill] sm:$0xff] %v19198_v45  ;;  %v4075_v28 = vsel %vm17700_vm7, %v4067_v23, %v4074_v38  ;;  %v4246_v39 = vsel %vm17654_vm2, %v4076_v59, %v4245_v26  ;;  %v4567_v0 = vor.u32 %v4566_v54, %v4562_v12  ;;  %v4814_v37 = vrot.slane %v19191_v10, 1  ;;  %v4322_v27 = vld [vmem:[#allocation3 + $0x9c] sm:$0xe]  ;;  %v19225_v38 = vld [vmem:[#allocation3 + $0xac] sm:$0xf] }
 0x2d6   :  { %4244 = vst [vmem:[#allocation3 + $0xb8] sm:$0xf] %v4075_v28  ;;  %4247 = vst [vmem:[#allocation3 + $0xbc] sm:$0x1] %v4246_v39  ;;  %v4576_v20 = vshll.u32 %v19186_v49, 16  ;;  %v19215_v52 = vsel %vm1969_vm10, %v4810_v31, %v4811_v48  ;;  %v4813_v32 = vrot.slane %v13081_v58, 1  ;;  %v13082_v21 = vcombine.low %v4322_v27, %v19210_v53 }
 0x2d7   :  { %v4574_v15 = vshrl.u32 %v19186_v49, 16  ;;  %v4581_v26 = vshll.u32 %v19096_v19, 16  ;;  %v19220_v43 = vsel %vm1680_vm9, %v4567_v0, %v4571_v5  ;;  %15808 = vmatprep.mubr.bf16.mxu1 %v19215_v52  ;;  %v4817_v63 = vrot.slane %v19203_v47, 1  ;;  %v4273_v59 = vld [vmem:[#allocation3 + $0x6c] sm:$0xf] }
 0x2d8   :  { %v4578_v23 = vrot.slane %v4576_v20, 1  ;;  %5161 = vmatprep.mubr.bf16.mxu0 %v19220_v43  ;;  %v4323_v17 = vld [vmem:[#allocation3 + $0xa8] sm:$0xe]  ;;  %v4816_v14 = vrot.slane %v13082_v21, 1  ;;  %v19232_v54 = vcombine.low %v4273_v59, %v19143_v8  ;;  %v19235_v48 = vsel %vm1969_vm10, %v4813_v32, %v4814_v37  ;;  %v297_v31 = vld [vmem:[#allocation3] sm:$0x1] }
 0x2d9   :  { %v4583_v51 = vrot.slane %v4581_v26, 1  ;;  %v19229_v12 = vld [vmem:[#allocation3 + $0xb0] ss:$0 sps:$4 sm:$0x11]   ;;  %v13083_v28 = vcombine.low %v4323_v17, %v19225_v38  ;;  %v4588_v39 = vshll.u32 %v19198_v45, 16  ;;  %v4593_v5 = vshll.u32 %v19118_v24, 16 }
 0x2da   :  { %5162 = vmatmul.mubr.bf16.gmra.mrb[116].mxu0 %v19140_v40  ;;  %v4579_v19 = vor.u32 %v4578_v23, %v4574_v15  ;;  %v19244_v0 = vsel %vm1969_vm10, %v4816_v14, %v4817_v63  ;;  %v4324_v8 = vld [vmem:[#allocation3 + $0xb4] sm:$0xe]  ;;  %v405_v20 = vld [vmem:[#allocation3 + $0x8] sm:$0x1]  ;;  %v4586_v37 = vshrl.u32 %v19198_v45, 16  ;;  %v4820_v26 = vrot.slane %v19229_v12, 1 }
 0x2db   :  { %15809 = vmatmul.mubr.bf16.gmra.mrb[148].mxu1 %v19235_v48  ;;  %v4590_v32 = vrot.slane %v4588_v39, 1  ;;  %v4819_v21 = vrot.slane %v13083_v28, 1  ;;  %v4600_v24 = vshll.u32 %v19232_v54, 16  ;;  %v298_v59 = vsel %vm17654_vm2, 0, %v297_v31  ;;  %v19260_v14 = vld [vmem:[#allocation3 + $0xc4] sm:$0xf] }
 0x2dc   :  { %v19241_v58 = vsel %vm1680_vm9, %v4579_v19, %v4583_v51  ;;  %15812 = vmatprep.mubr.bf16.mxu1 %v19244_v0  ;;  %v4595_v17 = vrot.slane %v4593_v5, 1  ;;  %299 = vst [vmem:[#allocation3] sm:$0x1] %v298_v59  ;;  %v406_v39 = vsel %vm17665_vm4, 0, %v405_v20  ;;  %v4309_v28 = vld [vmem:[#allocation3] sm:$0xe] }
 0x2dd   :  { %5169 = vmatprep.mubr.bf16.mxu0 %v19241_v58  ;;  %v19250_v15 = vld [vmem:[#allocation3 + $0xb8] sm:$0xf]  ;;  %v19253_v27 = vld [vmem:[#allocation3 + $0xbc] ss:$0 sps:$4 sm:$0x11]   ;;  %v4591_v63 = vor.u32 %v4590_v32, %v4586_v37  ;;  %v19267_v37 = vcombine.low %v4275_v1, %v19154_v30  ;;  %v19277_v20 = vsel %vm1969_vm10, %v4819_v21, %v4820_v26  ;;  %v4605_v30 = vshll.u32 %v19137_v46, 16 }
 0x2de   :  { %v13084_v23 = vcombine.low %v4324_v8, %v19250_v15  ;;  %v4823_v51 = vrot.slane %v19253_v27, 1  ;;  %407 = vst [vmem:[#allocation3 + $0x8] sm:$0x1] %v406_v39  ;;  %v19264_v8 = vld [vmem:[#allocation3 + $0x4] sm:$0xf]  ;;  %v19293_v46 = vcombine.low %v4277_v2, %v19165_v57  ;;  %v4617_v57 = vshll.u32 %v19159_v35, 16 }
 0x2df   :  { %v19271_v31 = vsel %vm1680_vm9, %v4591_v63, %v4595_v17  ;;  %v4325_v32 = vld [vmem:[#allocation3 + $0xc0] sm:$0xe]  ;;  %v19280_v59 = vld [vmem:[#allocation3 + $0xc8] ss:$0 sps:$4 sm:$0x11]   ;;  %v4598_v63 = vshrl.u32 %v19232_v54, 16  ;;  %v13069_v17 = vcombine.low %v4309_v28, %v19264_v8 }
 0x2e0   :  { %v4822_v19 = vrot.slane %v13084_v23, 1  ;;  %v4602_v23 = vrot.slane %v4600_v24, 1  ;;  %v13085_v1 = vcombine.low %v4325_v32, %v19260_v14  ;;  %v4612_v26 = vshll.u32 %v19267_v37, 16 }
 0x2e1   :  { %v4777_v32 = vrot.slane %v13069_v17, 1  ;;  %v4610_v2 = vshrl.u32 %v19267_v37, 16  ;;  %v4622_v35 = vshrl.u32 %v19293_v46, 16 }
 0x2e2   :  { %5170 = vmatmul.mubr.bf16.gmra.mrb[120].mxu0 %v19186_v49  ;;  %v19274_v5 = vsel %vm1969_vm10, %v4822_v19, %v4823_v51  ;;  %v4603_v24 = vor.u32 %v4602_v23, %v4598_v63  ;;  %v4825_v21 = vrot.slane %v13085_v1, 1  ;;  %v4826_v19 = vrot.slane %v19280_v59, 1 }
 0x2e3   :  { %5177 = vmatprep.mubr.bf16.mxu0 %v19271_v31  ;;  %15813 = vmatmul.mubr.bf16.gmra.mrb[152].mxu1 %v19277_v20  ;;  %v4607_v51 = vrot.slane %v4605_v30, 1  ;;  %v4614_v63 = vrot.slane %v4612_v26, 1  ;;  %v17169_v26 = vld [vmem:[#allocation4 + $0x180] sm:$0xff]  }
 0x2e4   :  { %15816 = vmatprep.mubr.bf16.mxu1 %v19274_v5  ;;  %v19301_v1 = vsel %vm1969_vm10, %v4825_v21, %v4826_v19 }
 0x2e5   :  { %v19290_v39 = vld [vmem:[#allocation3 + $0x8] ss:$0 sps:$4 sm:$0x11]   ;;  %v19297_v28 = vsel %vm1680_vm9, %v4603_v24, %v4607_v51  ;;  %v4615_v17 = vor.u32 %v4614_v63, %v4610_v2  ;;  %v4624_v24 = vshll.u32 %v19293_v46, 16  ;;  %v4619_v51 = vrot.slane %v4617_v57, 1 }
 0x2e6   :  { %v4778_v23 = vrot.slane %v19290_v39, 1  ;;  %v4629_v63 = vshll.u32 %v19173_v42, 16 }
 0x2e7   :  { %v19314_v19 = vsel %vm1680_vm9, %v4615_v17, %v4619_v51  ;;  %v4281_v17 = vld [vmem:[#allocation3 + $0x9c] sm:$0xf] }
 0x2e8   :  { %v4779_v30 = vsel %vm1969_vm10, %v4777_v32, %v4778_v23  ;;  %v17170_v32 = vld [vmem:[#allocation4 + $0x1c8] sm:$0xff]   ;;  %v4626_v23 = vrot.slane %v4624_v24, 1  ;;  %v4631_v57 = vrot.slane %v4629_v63, 1  ;;  %v17173_v24 = vld [vmem:[#allocation4 + $0x190] sm:$0xff]   ;;  %v19323_v51 = vcombine.low %v4281_v17, %v19210_v53  ;;  %v17175_v53 = vld [vmem:[#allocation4 + $0x198] sm:$0xff]  }
 0x2ea   :  { %5178 = vmatmul.mubr.bf16.gmra.mrb[124].mxu0 %v19198_v45  ;;  %v4279_v45 = vld [vmem:[#allocation3 + $0x90] sm:$0xf]  ;;  %v4648_v63 = vshll.u32 %v19323_v51, 16 }
 0x2eb   :  { %5185 = vmatprep.mubr.bf16.mxu0 %v19297_v28  ;;  %15817 = vmatmul.mubr.bf16.gmra.mrb[156].mxu1 %v19301_v1  ;;  %v19310_v21 = vcombine.low %v4279_v45, %v19182_v9  ;;  %v17171_v9 = vld [vmem:[#allocation4 + $0x188] sm:$0xff]   ;;  %v4627_v45 = vor.u32 %v4626_v23, %v4622_v35  ;;  %v4641_v23 = vshll.u32 %v19191_v10, 16 }
 0x2ec   :  { %15836 = vmatprep.mubr.bf16.mxu1 %v4779_v30  ;;  %v17172_v30 = vld [vmem:[#allocation4 + $0x1d0] sm:$0xff]   ;;  %v4650_v17 = vrot.slane %v4648_v63, 1  ;;  %v4285_v63 = vld [vmem:[#allocation3 + $0xb4] sm:$0xf] }
 0x2ed   :  { %v4636_v2 = vshll.u32 %v19310_v21, 16 }
 0x2ef   :  { %v4638_v42 = vrot.slane %v4636_v2, 1  ;;  %v17177_v2 = vld [vmem:[#allocation4 + $0x1a0] sm:$0xff]  }
 0x2f2   :  { %5186 = vmatmul.mubr.bf16.gmra.mrb[128].mxu0 %v19232_v54 }
 0x2f3   :  { %5193 = vmatprep.mubr.bf16.mxu0 %v19314_v19  ;;  %15837 = vmatmul.mubr.bf16.vlgmr.msra.gmra.mrb[128].mxu1 %v18903_v18  ;;  %v19327_v18 = vsel %vm1680_vm9, %v4627_v45, %v4631_v57  ;;  %v4643_v45 = vrot.slane %v4641_v23, 1 }
 0x2f4   :  { %15840 = vmatprep.mubr.bf16.mxu1 %v18938_v33  ;;  %14629 = vmatpush3.bf16.msra.mxu1 %v17169_v26  ;;  %v17174_v26 = vld [vmem:[#allocation4 + $0x1d8] sm:$0xff]  }
 0x2f5   :  { %14630 = vmatprep.subr.bf16.mxu1 %v17170_v32  ;;  %v4634_v32 = vshrl.u32 %v19310_v21, 16 }
 0x2f7   :  { %v4639_v35 = vor.u32 %v4638_v42, %v4634_v32  ;;  %v4646_v42 = vshrl.u32 %v19323_v51, 16 }
 0x2f8   :  { %14631 = vmatpush3.bf16.msra.mxu1 %v17171_v9  ;;  %v17176_v9 = vld [vmem:[#allocation4 + $0x1e0] sm:$0xff]  }
 0x2f9   :  { %14632 = vmatprep.subr.bf16.mxu1 %v17172_v30  ;;  %v4283_v30 = vld [vmem:[#allocation3 + $0xa8] sm:$0xf]  ;;  %v19340_v10 = vsel %vm1680_vm9, %v4639_v35, %v4643_v45  ;;  %v4651_v32 = vor.u32 %v4650_v17, %v4646_v42  ;;  %v19349_v45 = vcombine.low %v4285_v63, %v19250_v15 }
 0x2fa   :  { %5194 = vmatmul.mubr.bf16.gmra.mrb[132].mxu0 %v19267_v37  ;;  %v19336_v57 = vcombine.low %v4283_v30, %v19225_v38  ;;  %v17183_v38 = vld [vmem:[#allocation4 + $0x1a8] sm:$0xff]   ;;  %v17195_v15 = vld [vmem:[#allocation4 + $0x1b8] sm:$0xff]  }
 0x2fb   :  { %5201 = vmatprep.mubr.bf16.mxu0 %v19327_v18  ;;  %15841 = vmatmul.mubr.bf16.gmra.mrb[132].mxu1 %v18981_v3  ;;  %v4670_v63 = vshrl.u32 %v19349_v45, 16 }
 0x2fc   :  { %15844 = vmatprep.mubr.bf16.mxu1 %v19002_v29  ;;  %14633 = vmatpush3.bf16.msra.mxu1 %v17173_v24  ;;  %v17181_v24 = vld [vmem:[#allocation4 + $0x1e8] sm:$0xff]   ;;  %v4660_v23 = vshll.u32 %v19336_v57, 16  ;;  %v4658_v17 = vshrl.u32 %v19336_v57, 16 }
 0x2fd   :  { %14634 = vmatprep.subr.bf16.mxu1 %v17174_v26  ;;  %v4653_v26 = vshll.u32 %v19203_v47, 16 }
 0x2fe   :  { %v4662_v30 = vrot.slane %v4660_v23, 1  ;;  %v4287_v23 = vld [vmem:[#allocation3 + $0xc0] sm:$0xf] }
 0x2ff   :  { %v4655_v35 = vrot.slane %v4653_v26, 1  ;;  %v4672_v26 = vshll.u32 %v19349_v45, 16 }
 0x300   :  { %14635 = vmatpush3.bf16.msra.mxu1 %v17175_v53  ;;  %v17187_v53 = vld [vmem:[#allocation4 + $0x1f0] sm:$0xff]   ;;  %v4663_v42 = vor.u32 %v4662_v30, %v4658_v17 }
 0x301   :  { %14636 = vmatprep.subr.bf16.mxu1 %v17176_v9  ;;  %v17189_v9 = vld [vmem:[#allocation4 + $0x1b0] sm:$0xff]   ;;  %v19353_v47 = vsel %vm1680_vm9, %v4651_v32, %v4655_v35 }
 0x302   :  { %5202 = vmatmul.mubr.bf16.gmra.mrb[136].mxu0 %v19293_v46  ;;  %v4255_v30 = vld [vmem:[#allocation3] sm:$0xf] }
 0x303   :  { %5209 = vmatprep.mubr.bf16.mxu0 %v19340_v10  ;;  %15845 = vmatmul.mubr.bf16.gmra.mrb[136].mxu1 %v19045_v22 }
 0x304   :  { %15848 = vmatprep.mubr.bf16.mxu1 %v19078_v61  ;;  %14637 = vmatpush3.bf16.msra.mxu1 %v17177_v2  ;;  %v17193_v2 = vld [vmem:[#allocation4 + $0x1f8] sm:$0xff]  }
 0x305   :  { %14638 = vmatprep.subr.bf16.mxu1 %v17181_v24  ;;  %v4665_v24 = vshll.u32 %v19229_v12, 16  ;;  %v4674_v12 = vrot.slane %v4672_v26, 1 }
 0x307   :  { %v4667_v32 = vrot.slane %v4665_v24, 1  ;;  %v13033_v24 = vcombine.low %v4255_v30, %v19264_v8  ;;  %v4497_v30 = vshll.u32 %v19290_v39, 16 }
 0x308   :  { %14639 = vmatpush3.bf16.msra.mxu1 %v17183_v38  ;;  %v17199_v38 = vld [vmem:[#allocation4 + $0x200] sm:$0xff]  }
 0x309   :  { %14640 = vmatprep.subr.bf16.mxu1 %v17187_v53  ;;  %v19362_v53 = vcombine.low %v4287_v23, %v19260_v14  ;;  %v19366_v35 = vsel %vm1680_vm9, %v4663_v42, %v4667_v32  ;;  %v17207_v14 = vld [vmem:[%s22400_s7] sm:$0xff]   ;;  %v4689_v32 = vshll.u32 %v19280_v59, 16  ;;  %v4492_v23 = vshll.u32 %v13033_v24, 16 }
 0x30a   :  { %5210 = vmatmul.mubr.bf16.gmra.mrb[140].mxu0 %v19310_v21  ;;  %15916 = vmatprep.subr.bf16.mxu0 %v17207_v14  ;;  %v4499_v59 = vrot.slane %v4497_v30, 1  ;;  %v17206_v30 = vld [vmem:[#allocation4 + $0x230] sm:$0xff]  }
 0x30b   :  { %5217 = vmatprep.mubr.bf16.mxu0 %v19353_v47  ;;  %15849 = vmatmul.mubr.bf16.gmra.mrb[140].mxu1 %v19130_v34  ;;  %v4684_v17 = vshll.u32 %v19362_v53, 16  ;;  %v4682_v26 = vshrl.u32 %v19362_v53, 16  ;;  %v4691_v8 = vrot.slane %v4689_v32, 1 }
 0x30c   :  { %15852 = vmatprep.mubr.bf16.mxu1 %v19147_v41  ;;  %14641 = vmatpush3.bf16.msra.mxu1 %v17189_v9  ;;  %v4677_v9 = vshll.u32 %v19253_v27, 16 }
 0x30d   :  { %14642 = vmatprep.subr.bf16.mxu1 %v17193_v2  ;;  %v4675_v2 = vor.u32 %v4674_v12, %v4670_v63  ;;  %v4686_v27 = vrot.slane %v4684_v17, 1  ;;  %v4490_v63 = vshrl.u32 %v13033_v24, 16 }
 0x30f   :  { %v4687_v12 = vor.u32 %v4686_v27, %v4682_v26  ;;  %v456_v27 = vld [vmem:[#allocation3 + $0xd4] sm:$0x1] }
 0x310   :  { %14643 = vmatpush3.bf16.msra.mxu1 %v17195_v15  ;;  %v4679_v15 = vrot.slane %v4677_v9, 1  ;;  %v4494_v9 = vrot.slane %v4492_v23, 1  ;;  %v457_v39 = vsel %vm17665_vm4, 0, %v456_v27  ;;  %v17208_v23 = vld [vmem:[%s22400_s7 + $0x8] sm:$0xff]  }
 0x311   :  { %15868 = vmatprep.subr.bf16.mxu1 %v17199_v38  ;;  %458 = vst [vmem:[#allocation3 + $0xd4] sm:$0x1] %v457_v39  ;;  %v233_v27 = vld [vmem:[#allocation2 + $0xec] sm:$0x1] }
 0x312   :  { %5218 = vmatmul.mubr.bf16.gmra.mrb[144].mxu0 %v19323_v51  ;;  %v19380_v42 = vsel %vm1680_vm9, %v4675_v2, %v4679_v15  ;;  %v19390_v2 = vsel %vm1680_vm9, %v4687_v12, %v4691_v8  ;;  %v4495_v17 = vor.u32 %v4494_v9, %v4490_v63  ;;  %v348_v15 = vld [vmem:[#allocation3 + $0xcc] sm:$0x1]  ;;  %v17201_v12 = vld [vmem:[#allocation4 + $0x208] sm:$0xff]   ;;  %v17209_v8 = vld [vmem:[%s22400_s7 + $0x10] sm:$0xff]   ;;  %v234_v39 = vsel %vm17665_vm4, 0, %v233_v27 }
 0x313   :  { %5225 = vmatprep.mubr.bf16.mxu0 %v19366_v35  ;;  %15853 = vmatmul.mubr.bf16.gmra.mrb[144].mxu1 %v19171_v62  ;;  %v349_v26 = vsel %vm17654_vm2, 0, %v348_v15  ;;  %v17202_v63 = vld [vmem:[#allocation4 + $0x210] sm:$0xff]   ;;  %235 = vst [vmem:[#allocation2 + $0xec] sm:$0x1] %v234_v39 }
 0x314   :  { %15856 = vmatprep.mubr.bf16.mxu1 %v19194_v16  ;;  %350 = vst [vmem:[#allocation3 + $0xcc] sm:$0x1] %v349_v26  ;;  %v4500_v32 = vsel %vm1680_vm9, %v4495_v17, %v4499_v59  ;;  %v17216_v9 = vld [vmem:[%s22400_s7 + $0x30] sm:$0xff]   ;;  %v19442_v17 = vld [vmem:[%s22394_s1 + $0x140] sm:$0xff]   ;;  %v4326_v59 = vld [vmem:[#allocation3 + $0xcc] sm:$0xe] }
 0x31a   :  { %5226 = vmatmul.mubr.bf16.gmra.mrb[148].mxu0 %v19336_v57 }
 0x31b   :  { %5233 = vmatprep.mubr.bf16.mxu0 %v19380_v42  ;;  %15857 = vmatmul.mubr.bf16.gmra.mrb[148].mxu1 %v19215_v52 }
 0x31c   :  { %15860 = vmatprep.mubr.bf16.mxu1 %v19235_v48 }
 0x322   :  { %5234 = vmatmul.mubr.bf16.gmra.mrb[152].mxu0 %v19349_v45 }
 0x323   :  { %5241 = vmatprep.mubr.bf16.mxu0 %v19390_v2  ;;  %15861 = vmatmul.mubr.bf16.gmra.mrb[152].mxu1 %v19244_v0 }
 0x324   :  { %15864 = vmatprep.mubr.bf16.mxu1 %v19277_v20 }
 0x32a   :  { %5242 = vmatmul.mubr.bf16.gmra.mrb[156].mxu0 %v19362_v53 }
 0x32b   :  { %5587 = vmatprep.mubr.bf16.mxu0 %v4500_v32  ;;  %15865 = vmatmul.mubr.bf16.gmra.mrb[156].mxu1 %v19274_v5 }
 0x32c   :  { %6101 = vmatprep.mubr.bf16.mxu1 %v18968_v11 }
 0x332   :  { %5588 = vmatmul.mubr.bf16.vlgmr.msra.gmra.mrb[160].mxu0 %v13033_v24  ;;  %v17211_v24 = vld [vmem:[%s22400_s7 + $0x18] sm:$0xff]  }
 0x333   :  { %5595 = vmatprep.mubr.bf16.mxu0 %v18958_v4  ;;  %15917 = vmatpush3.bf16.msra.mxu0 %v17207_v14  ;;  %v17203_v4 = vld [vmem:[#allocation4 + $0x218] sm:$0xff]   ;;  %v17204_v14 = vld [vmem:[#allocation4 + $0x220] sm:$0xff]  }
 0x334   :  { %6102 = vmatmul.mubr.bf16.vlgmr.msra.gmra.mrb[160].mxu1 %v18927_v60  ;;  %15918 = vmatprep.subr.bf16.mxu0 %v17208_v23 }
 0x335   :  { %6109 = vmatprep.mubr.bf16.mxu1 %v19029_v50  ;;  %15869 = vmatpush3.bf16.msra.mxu1 %v17199_v38  ;;  %v17212_v38 = vld [vmem:[%s22400_s7 + $0x20] sm:$0xff]  }
 0x336   :  { %15870 = vmatprep.subr.bf16.mxu1 %v17201_v12 }
 0x337   :  { %15919 = vmatpush3.bf16.msra.mxu0 %v17208_v23 }
 0x338   :  { %15920 = vmatprep.subr.bf16.mxu0 %v17209_v8 }
 0x339   :  { %15871 = vmatpush3.bf16.msra.mxu1 %v17201_v12 }
 0x33a   :  { %5596 = vmatmul.mubr.bf16.gmra.mrb[164].mxu0 %v18913_v6  ;;  %15872 = vmatprep.subr.bf16.mxu1 %v17202_v63  ;;  %v17215_v6 = vld [vmem:[%s22400_s7 + $0x28] sm:$0xff]  }
 0x33b   :  { %5603 = vmatprep.mubr.bf16.mxu0 %v18968_v11  ;;  %15921 = vmatpush3.bf16.msra.mxu0 %v17209_v8  ;;  %v17205_v11 = vld [vmem:[#allocation4 + $0x228] sm:$0xff]  }
 0x33c   :  { %6110 = vmatmul.mubr.bf16.gmra.mrb[164].mxu1 %v18978_v13  ;;  %15922 = vmatprep.subr.bf16.mxu0 %v17211_v24 }
 0x33d   :  { %6117 = vmatprep.mubr.bf16.mxu1 %v19103_v55  ;;  %15873 = vmatpush3.bf16.msra.mxu1 %v17202_v63  ;;  %v126_v63 = vld [vmem:[#allocation2 + $0xf0] sm:$0x1] }
 0x33e   :  { %15874 = vmatprep.subr.bf16.mxu1 %v17203_v4 }
 0x33f   :  { %15923 = vmatpush3.bf16.msra.mxu0 %v17211_v24  ;;  %v236_v24 = vld [vmem:[#allocation2 + $0xf8] sm:$0x1] }
 0x340   :  { %15924 = vmatprep.subr.bf16.mxu0 %v17212_v38 }
 0x341   :  { %15875 = vmatpush3.bf16.msra.mxu1 %v17203_v4  ;;  %v547_v4 = vld [vmem:[%s22393_s0 + $0x88] sm:$0xf] }
 0x342   :  { %5604 = vmatmul.mubr.bf16.gmra.mrb[168].mxu0 %v18927_v60  ;;  %15876 = vmatprep.subr.bf16.mxu1 %v17204_v14  ;;  %v17217_v60 = vld [vmem:[%s22400_s7 + $0x38] sm:$0xff]  }
 0x343   :  { %5611 = vmatprep.mubr.bf16.mxu0 %v19029_v50  ;;  %15925 = vmatpush3.bf16.msra.mxu0 %v17212_v38  ;;  %v17210_v50 = vld [vmem:[#allocation4 + $0x238] sm:$0xff]  }
 0x344   :  { %6118 = vmatmul.mubr.bf16.gmra.mrb[168].mxu1 %v19022_v25  ;;  %15926 = vmatprep.subr.bf16.mxu0 %v17215_v6 }
 0x345   :  { %6125 = vmatprep.mubr.bf16.mxu1 %v19168_v56  ;;  %15877 = vmatpush3.bf16.msra.mxu1 %v17204_v14 }
 0x346   :  { %15878 = vmatprep.subr.bf16.mxu1 %v17205_v11 }
 0x347   :  { %15927 = vmatpush3.bf16.msra.mxu0 %v17215_v6  ;;  %v127_v6 = vsel %vm17654_vm2, 0, %v126_v63 }
 0x348   :  { %15928 = vmatprep.subr.bf16.mxu0 %v17216_v9  ;;  %128 = vst [vmem:[#allocation2 + $0xf0] sm:$0x1] %v127_v6 }
 0x349   :  { %15879 = vmatpush3.bf16.msra.mxu1 %v17205_v11  ;;  %v237_v11 = vsel %vm17665_vm4, 0, %v236_v24  ;;  %v1338_v24 = vld [vmem:[#allocation2 + $0xec] sm:$0x1] }
 0x34a   :  { %5612 = vmatmul.mubr.bf16.gmra.mrb[172].mxu0 %v18978_v13  ;;  %15880 = vmatprep.subr.bf16.mxu1 %v17206_v30  ;;  %v17233_v13 = vld [vmem:[%s22394_s1 + $0x100] sm:$0xff]   ;;  %238 = vst [vmem:[#allocation2 + $0xf8] sm:$0x1] %v237_v11 }
 0x34b   :  { %5619 = vmatprep.mubr.bf16.mxu0 %v19103_v55  ;;  %15929 = vmatpush3.bf16.msra.mxu0 %v17216_v9  ;;  %v19460_v55 = vld [vmem:[#allocation3 + $0xd4] ss:$0 sps:$4 sm:$0x11]   ;;  %v548_v9 = vld [vmem:[%s22393_s0 + $0x8c] sm:$0xf] }
 0x34c   :  { %6126 = vmatmul.mubr.bf16.gmra.mrb[172].mxu1 %v19125_v44  ;;  %15930 = vmatprep.subr.bf16.mxu0 %v17217_v60 }
 0x34d   :  { %6133 = vmatprep.mubr.bf16.mxu1 %v19220_v43  ;;  %15881 = vmatpush3.bf16.msra.mxu1 %v17206_v30  ;;  %v869_v30 = vshrl.u32 %v547_v4, 16 }
 0x34e   :  { %15882 = vmatprep.subr.bf16.mxu1 %v17210_v50 }
 0x34f   :  { %15931 = vmatpush3.bf16.msra.mxu0 %v17217_v60  ;;  %v872_v60 = vshll.u32 %v547_v4, 16 }
 0x350   :  { %14788 = vmatprep.subr.bf16.mxu0 %v17233_v13  ;;  %v880_v13 = vshll.u32 %v548_v9, 16 }
 0x351   :  { %15883 = vmatpush3.bf16.msra.mxu1 %v17210_v50  ;;  %v877_v50 = vshrl.u32 %v548_v9, 16 }
 0x352   :  { %5620 = vmatmul.mubr.bf16.gmra.mrb[176].mxu0 %v19022_v25  ;;  %15964 = vmatprep.subr.bf16.mxu1 %v19442_v17  ;;  %v22508_v25 = vld [vmem:[#allocation11_spill] sm:$0xff] }
 0x353   :  { %5627 = vmatprep.mubr.bf16.mxu0 %v19168_v56  ;;  %v19462_v56 = vld [vmem:[#allocation3 + $0xd0] sm:$0xf]  ;;  %v879_v27 = vrot.slane %v877_v50, 7 }
 0x354   :  { %6134 = vmatmul.mubr.bf16.gmra.mrb[176].mxu1 %v19140_v40 }
 0x355   :  { %6141 = vmatprep.mubr.bf16.mxu1 %v19241_v58  ;;  %v884_v50 = vrot.slane %v879_v27, 4 }
 0x35a   :  { %5628 = vmatmul.mubr.bf16.gmra.mrb[180].mxu0 %v19125_v44  ;;  %v13086_v44 = vcombine.low %v4326_v59, %v19462_v56 }
 0x35b   :  { %5635 = vmatprep.mubr.bf16.mxu0 %v19220_v43  ;;  %v4829_v43 = vrot.slane %v19460_v55, 1 }
 0x35c   :  { %6142 = vmatmul.mubr.bf16.gmra.mrb[180].mxu1 %v19186_v49  ;;  %v4828_v15 = vrot.slane %v13086_v44, 1 }
 0x35d   :  { %6149 = vmatprep.mubr.bf16.mxu1 %v19271_v31 }
 0x362   :  { %5636 = vmatmul.mubr.bf16.gmra.mrb[184].mxu0 %v19140_v40  ;;  %v19470_v40 = vsel %vm1969_vm10, %v4828_v15, %v4829_v43 }
 0x363   :  { %5643 = vmatprep.mubr.bf16.mxu0 %v19241_v58  ;;  %v123_v58 = vld [vmem:[#allocation2 + $0xe4] sm:$0x1] }
 0x364   :  { %6150 = vmatmul.mubr.bf16.gmra.mrb[184].mxu1 %v22508_v25  ;;  %v124_v26 = vsel %vm17654_vm2, 0, %v123_v58  ;;  %v871_v58 = vrot.slane %v869_v30, 7 }
 0x365   :  { %6157 = vmatprep.mubr.bf16.mxu1 %v19297_v28  ;;  %125 = vst [vmem:[#allocation2 + $0xe4] sm:$0x1] %v124_v26  ;;  %v129_v26 = vld [vmem:[#allocation2 + $0xfc] sm:$0x1] }
 0x366   :  { %v874_v4 = vor.u32 %v872_v60, %v871_v58 }
 0x36a   :  { %5644 = vmatmul.mubr.bf16.gmra.mrb[188].mxu0 %v19186_v49  ;;  %v545_v49 = vld [vmem:[%s22393_s0 + $0x80] sm:$0xf] }
 0x36b   :  { %5651 = vmatprep.mubr.bf16.mxu0 %v19271_v31  ;;  %v546_v31 = vld [vmem:[%s22393_s0 + $0x84] sm:$0xf]  ;;  %v852_v32 = vshrl.u32 %v545_v49, 16  ;;  %v855_v23 = vshll.u32 %v545_v49, 16 }
 0x36c   :  { %6158 = vmatmul.mubr.bf16.gmra.mrb[188].mxu1 %v19232_v54  ;;  %v860_v12 = vshrl.u32 %v546_v31, 16  ;;  %v863_v8 = vshll.u32 %v546_v31, 16  ;;  %v130_v31 = vsel %vm17654_vm2, 0, %v129_v26  ;;  %v1334_v63 = vld [vmem:[#allocation2 + $0xe4] sm:$0xf] }
 0x36d   :  { %6165 = vmatprep.mubr.bf16.mxu1 %v19314_v19  ;;  %v854_v38 = vrot.slane %v852_v32, 7  ;;  %v239_v32 = vld [vmem:[#allocation2 + $0x104] sm:$0x1]  ;;  %131 = vst [vmem:[#allocation2 + $0xfc] sm:$0x1] %v130_v31 }
 0x36e   :  { %v862_v14 = vrot.slane %v860_v12, 7  ;;  %v1345_v26 = vld [vmem:[#allocation2 + $0xf8] sm:$0x1] }
 0x36f   :  { %v858_v59 = vrot.slane %v854_v38, 4 }
 0x370   :  { %v865_v44 = vor.u32 %v863_v8, %v862_v14  ;;  %v867_v43 = vrot.slane %v862_v14, 4  ;;  %v882_v14 = vor.u32 %v880_v13, %v879_v27  ;;  %v1341_v27 = vld [vmem:[#allocation2 + $0xf0] sm:$0xf] }
 0x371   :  { %v1342_v31 = vsel %vm17712_vm8, %v874_v4, %v1341_v27 }
 0x372   :  { %5652 = vmatmul.mubr.bf16.gmra.mrb[192].mxu0 %v22508_v25  ;;  %v857_v25 = vor.u32 %v855_v23, %v854_v38  ;;  %v866_v49 = vsel %vm17700_vm7, %v858_v59, %v865_v44  ;;  %v549_v23 = vld [vmem:[%s22393_s0 + $0x90] sm:$0xf]  ;;  %v875_v38 = vrot.slane %v871_v58, 4  ;;  %v1339_v30 = vsel %vm17654_vm2, %v867_v43, %v1338_v24  ;;  %v550_v44 = vld [vmem:[%s22393_s0 + $0x94] sm:$0xf] }
 0x373   :  { %5659 = vmatprep.mubr.bf16.mxu0 %v19297_v28  ;;  %1337 = vst [vmem:[#allocation2 + $0xe8] sm:$0xf] %v866_v49  ;;  %v240_v59 = vsel %vm17665_vm4, 0, %v239_v32  ;;  %1340 = vst [vmem:[#allocation2 + $0xec] sm:$0x1] %v1339_v30  ;;  %v886_v13 = vshrl.u32 %v549_v23, 16  ;;  %v1346_v32 = vsel %vm17654_vm2, %v884_v50, %v1345_v26 }
 0x374   :  { %6166 = vmatmul.mubr.bf16.gmra.mrb[192].mxu1 %v19267_v37  ;;  %v1335_v9 = vsel %vm17712_vm8, %v857_v25, %v1334_v63  ;;  %v883_v60 = vsel %vm17700_vm7, %v875_v38, %v882_v14  ;;  %241 = vst [vmem:[#allocation2 + $0x104] sm:$0x1] %v240_v59  ;;  %v889_v25 = vshll.u32 %v549_v23, 16  ;;  %v132_v58 = vld [vmem:[#allocation2 + $0x108] sm:$0x1]  ;;  %v897_v49 = vshll.u32 %v550_v44, 16 }
 0x375   :  { %6173 = vmatprep.mubr.bf16.mxu1 %v19327_v18  ;;  %v14372_v15 = vpop.f32.mrb[96].mxu0  ;;  %1336 = vst [vmem:[#allocation2 + $0xe4] sm:$0xf] %v1335_v9  ;;  %v242_v43 = vld [vmem:[#allocation2 + $0x110] sm:$0x1]  ;;  %v133_v23 = vsel %vm17654_vm2, 0, %v132_v58 }
 0x376   :  { %v14373_v39 = vpop.f32.mrb[97].mxu0  ;;  %1344 = vst [vmem:[#allocation2 + $0xf4] sm:$0xf] %v883_v60  ;;  %v552_v63 = vld [vmem:[%s22393_s0 + $0x9c] sm:$0xf]  ;;  %v243_v24 = vsel %vm17665_vm4, 0, %v242_v43 }
 0x377   :  { %v19504_v12 = vadd.f32 %v14373_v39, %v14372_v15  ;;  %v14375_v8 = vpop.f32.mrb[98].mxu0  ;;  %v894_v39 = vshrl.u32 %v550_v44, 16  ;;  %1343 = vst [vmem:[#allocation2 + $0xf0] sm:$0xf] %v1342_v31  ;;  %1347 = vst [vmem:[#allocation2 + $0xf8] sm:$0x1] %v1346_v32 }
 0x378   :  { %v14376_v6 = vpop.f32.mrb[99].mxu0  ;;  %134 = vst [vmem:[#allocation2 + $0x108] sm:$0x1] %v133_v23  ;;  %244 = vst [vmem:[#allocation2 + $0x110] sm:$0x1] %v243_v24  ;;  %v911_v9 = vshrl.u32 %v552_v63, 16 }
 0x379   :  { %v19515_v15 = vadd.f32 %v14376_v6, %v14375_v8  ;;  %v888_v8 = vrot.slane %v886_v13, 7  ;;  %v135_v30 = vld [vmem:[#allocation2 + $0x114] sm:$0x1]  ;;  %v1348_v60 = vld [vmem:[#allocation2 + $0xfc] sm:$0xf]  ;;  %v914_v58 = vshll.u32 %v552_v63, 16 }
 0x37a   :  { %5660 = vmatmul.mubr.bf16.gmra.mrb[196].mxu0 %v19232_v54  ;;  %v551_v54 = vld [vmem:[%s22393_s0 + $0x98] sm:$0xf]  ;;  %v913_v31 = vrot.slane %v911_v9, 7  ;;  %v245_v32 = vld [vmem:[#allocation2 + $0x11c] sm:$0x1] }
 0x37b   :  { %5667 = vmatprep.mubr.bf16.mxu0 %v19314_v19  ;;  %v896_v19 = vrot.slane %v894_v39, 7  ;;  %v903_v4 = vshrl.u32 %v551_v54, 16  ;;  %v891_v14 = vor.u32 %v889_v25, %v888_v8  ;;  %v892_v6 = vrot.slane %v888_v8, 4  ;;  %v1352_v63 = vld [vmem:[#allocation2 + $0x104] sm:$0x1] }
 0x37c   :  { %6174 = vmatmul.mubr.bf16.gmra.mrb[196].mxu1 %v19293_v46  ;;  %v906_v13 = vshll.u32 %v551_v54, 16  ;;  %v916_v24 = vor.u32 %v914_v58, %v913_v31 }
 0x37d   :  { %6181 = vmatprep.mubr.bf16.mxu1 %v19340_v10  ;;  %v14378_v38 = vpop.f32.mrb[100].mxu0  ;;  %v899_v59 = vor.u32 %v897_v49, %v896_v19  ;;  %v901_v44 = vrot.slane %v896_v19, 4  ;;  %v1349_v43 = vsel %vm17712_vm8, %v891_v14, %v1348_v60  ;;  %v905_v39 = vrot.slane %v903_v4, 7 }
 0x37e   :  { %v14379_v50 = vpop.f32.mrb[101].mxu0  ;;  %1350 = vst [vmem:[#allocation2 + $0xfc] sm:$0xf] %v1349_v43  ;;  %v136_v49 = vsel %vm17654_vm2, 0, %v135_v30  ;;  %v918_v4 = vrot.slane %v913_v31, 4 }
 0x37f   :  { %v19537_v27 = vadd.f32 %v14379_v50, %v14378_v38  ;;  %v14381_v26 = vpop.f32.mrb[102].mxu0  ;;  %v900_v8 = vsel %vm17700_vm7, %v892_v6, %v899_v59  ;;  %v909_v54 = vrot.slane %v905_v39, 4  ;;  %137 = vst [vmem:[#allocation2 + $0x114] sm:$0x1] %v136_v49  ;;  %v908_v19 = vor.u32 %v906_v13, %v905_v39  ;;  %v1359_v9 = vld [vmem:[#allocation2 + $0x110] sm:$0x1] }
 0x380   :  { %v14382_v25 = vpop.f32.mrb[103].mxu0  ;;  %1351 = vst [vmem:[#allocation2 + $0x100] sm:$0xf] %v900_v8  ;;  %v246_v38 = vsel %vm17665_vm4, 0, %v245_v32  ;;  %v1353_v14 = vsel %vm17654_vm2, %v901_v44, %v1352_v63  ;;  %v553_v59 = vld [vmem:[%s22393_s0 + $0xa0] sm:$0xf] }
 0x381   :  { %v19545_v23 = vadd.f32 %v14382_v25, %v14381_v26  ;;  %247 = vst [vmem:[#allocation2 + $0x11c] sm:$0x1] %v246_v38  ;;  %1354 = vst [vmem:[#allocation2 + $0x104] sm:$0x1] %v1353_v14  ;;  %v917_v6 = vsel %vm17700_vm7, %v909_v54, %v916_v24  ;;  %v554_v26 = vld [vmem:[%s22393_s0 + $0xa4] sm:$0xf] }
 0x382   :  { %5668 = vmatmul.mubr.bf16.gmra.mrb[200].mxu0 %v19267_v37  ;;  %v1355_v37 = vld [vmem:[#allocation2 + $0x108] sm:$0xf]  ;;  %1358 = vst [vmem:[#allocation2 + $0x10c] sm:$0xf] %v917_v6  ;;  %v920_v43 = vshrl.u32 %v553_v59, 16  ;;  %v923_v32 = vshll.u32 %v553_v59, 16 }
 0x383   :  { %5675 = vmatprep.mubr.bf16.mxu0 %v19327_v18  ;;  %v1356_v30 = vsel %vm17712_vm8, %v908_v19, %v1355_v37  ;;  %v1360_v18 = vsel %vm17654_vm2, %v918_v4, %v1359_v9  ;;  %v138_v39 = vld [vmem:[#allocation2 + $0x120] sm:$0x1]  ;;  %v4289_v25 = vld [vmem:[#allocation3 + $0xcc] sm:$0xf]  ;;  %v928_v49 = vshrl.u32 %v554_v26, 16  ;;  %v931_v24 = vshll.u32 %v554_v26, 16 }
 0x384   :  { %6182 = vmatmul.mubr.bf16.gmra.mrb[200].mxu1 %v19310_v21  ;;  %1357 = vst [vmem:[#allocation2 + $0x108] sm:$0xf] %v1356_v30  ;;  %1361 = vst [vmem:[#allocation2 + $0x110] sm:$0x1] %v1360_v18  ;;  %v922_v8 = vrot.slane %v920_v43, 7  ;;  %v139_v54 = vsel %vm17654_vm2, 0, %v138_v39 }
 0x385   :  { %6189 = vmatprep.mubr.bf16.mxu1 %v19353_v47  ;;  %v248_v63 = vld [vmem:[#allocation2 + $0x128] sm:$0x1]  ;;  %140 = vst [vmem:[#allocation2 + $0x120] sm:$0x1] %v139_v54  ;;  %v930_v14 = vrot.slane %v928_v49, 7 }
 0x386   :  { %v925_v19 = vor.u32 %v923_v32, %v922_v8  ;;  %v555_v4 = vld [vmem:[%s22393_s0 + $0xa8] sm:$0xf]  ;;  %v926_v38 = vrot.slane %v922_v8, 4  ;;  %v249_v37 = vsel %vm17665_vm4, 0, %v248_v63  ;;  %v556_v9 = vld [vmem:[%s22393_s0 + $0xac] sm:$0xf] }
 0x387   :  { %v14384_v50 = vpop.f32.mrb[104].mxu0  ;;  %250 = vst [vmem:[#allocation2 + $0x128] sm:$0x1] %v249_v37  ;;  %v940_v18 = vshll.u32 %v555_v4, 16  ;;  %v935_v59 = vrot.slane %v930_v14, 4 }
 0x388   :  { %v14385_v44 = vpop.f32.mrb[105].mxu0  ;;  %v1366_v30 = vld [vmem:[#allocation2 + $0x11c] sm:$0x1]  ;;  %v251_v39 = vld [vmem:[#allocation2 + $0x134] sm:$0x1] }
 0x389   :  { %v19564_v60 = vadd.f32 %v14385_v44, %v14384_v50  ;;  %v14387_v13 = vpop.f32.mrb[106].mxu0  ;;  %v933_v50 = vor.u32 %v931_v24, %v930_v14  ;;  %v945_v44 = vshrl.u32 %v556_v9, 16  ;;  %v557_v49 = vld [vmem:[%s22393_s0 + $0xb0] sm:$0xf]  ;;  %v4701_v24 = vshll.u32 %v19460_v55, 16 }
 0x38a   :  { %5676 = vmatmul.mubr.bf16.gmra.mrb[204].mxu0 %v19293_v46  ;;  %v14388_v58 = vpop.f32.mrb[107].mxu0  ;;  %v1362_v46 = vld [vmem:[#allocation2 + $0x114] sm:$0xf]  ;;  %v252_v14 = vsel %vm17665_vm4, 0, %v251_v39 }
 0x38b   :  { %5683 = vmatprep.mubr.bf16.mxu0 %v19340_v10  ;;  %v19571_v31 = vadd.f32 %v14388_v58, %v14387_v13  ;;  %v19578_v10 = vcombine.low %v4289_v25, %v19462_v56  ;;  %v1363_v6 = vsel %vm17712_vm8, %v925_v19, %v1362_v46  ;;  %v937_v56 = vshrl.u32 %v555_v4, 16  ;;  %v141_v58 = vld [vmem:[#allocation2 + $0x12c] sm:$0x1]  ;;  %v558_v19 = vld [vmem:[%s22393_s0 + $0xb4] sm:$0xf] }
 0x38c   :  { %6190 = vmatmul.mubr.bf16.gmra.mrb[204].mxu1 %v19323_v51  ;;  %1364 = vst [vmem:[#allocation2 + $0x114] sm:$0xf] %v1363_v6  ;;  %v948_v13 = vshll.u32 %v556_v9, 16  ;;  %v934_v25 = vsel %vm17700_vm7, %v926_v38, %v933_v50  ;;  %v947_v8 = vrot.slane %v945_v44, 7  ;;  %v1369_v54 = vld [vmem:[#allocation2 + $0x120] sm:$0xf] }
 0x38d   :  { %6197 = vmatprep.mubr.bf16.mxu1 %v19366_v35  ;;  %v4696_v26 = vshll.u32 %v19578_v10, 16  ;;  %v939_v43 = vrot.slane %v937_v56, 7  ;;  %v4694_v32 = vshrl.u32 %v19578_v10, 16  ;;  %1365 = vst [vmem:[#allocation2 + $0x118] sm:$0xf] %v934_v25  ;;  %v142_v63 = vsel %vm17654_vm2, 0, %v141_v58 }
 0x38e   :  { %v950_v4 = vor.u32 %v948_v13, %v947_v8  ;;  %v952_v38 = vrot.slane %v947_v8, 4  ;;  %143 = vst [vmem:[#allocation2 + $0x12c] sm:$0x1] %v142_v63  ;;  %v144_v6 = vld [vmem:[#allocation2 + $0x138] sm:$0x1]  ;;  %v957_v56 = vshll.u32 %v557_v49, 16 }
 0x38f   :  { %v943_v46 = vrot.slane %v939_v43, 4  ;;  %v4698_v37 = vrot.slane %v4696_v26, 1  ;;  %253 = vst [vmem:[#allocation2 + $0x134] sm:$0x1] %v252_v14  ;;  %v962_v55 = vshrl.u32 %v558_v19, 16  ;;  %v965_v39 = vshll.u32 %v558_v19, 16 }
 0x390   :  { %v559_v44 = vld [vmem:[%s22393_s0 + $0xb8] sm:$0xf]  ;;  %v560_v13 = vld [vmem:[%s22393_s0 + $0xbc] sm:$0xf]  ;;  %v1373_v26 = vld [vmem:[#allocation2 + $0x128] sm:$0x1] }
 0x391   :  { %v145_v25 = vsel %vm17654_vm2, 0, %v144_v6 }
 0x392   :  { %5684 = vmatmul.mubr.bf16.gmra.mrb[208].mxu0 %v19310_v21  ;;  %v1367_v21 = vsel %vm17654_vm2, %v935_v59, %v1366_v30  ;;  %v954_v30 = vshrl.u32 %v557_v49, 16  ;;  %v951_v59 = vsel %vm17700_vm7, %v943_v46, %v950_v4  ;;  %v1374_v49 = vsel %vm17654_vm2, %v952_v38, %v1373_v26  ;;  %146 = vst [vmem:[#allocation2 + $0x138] sm:$0x1] %v145_v25 }
 0x393   :  { %5691 = vmatprep.mubr.bf16.mxu0 %v19353_v47  ;;  %1368 = vst [vmem:[#allocation2 + $0x11c] sm:$0x1] %v1367_v21  ;;  %v942_v47 = vor.u32 %v940_v18, %v939_v43  ;;  %v254_v18 = vld [vmem:[#allocation2 + $0x140] sm:$0x1]  ;;  %1372 = vst [vmem:[#allocation2 + $0x124] sm:$0xf] %v951_v59 }
 0x394   :  { %6198 = vmatmul.mubr.bf16.gmra.mrb[208].mxu1 %v19336_v57  ;;  %v956_v43 = vrot.slane %v954_v30, 7  ;;  %v255_v46 = vsel %vm17665_vm4, 0, %v254_v18  ;;  %1375 = vst [vmem:[#allocation2 + $0x128] sm:$0x1] %v1374_v49  ;;  %v971_v4 = vshrl.u32 %v559_v44, 16  ;;  %v4699_v30 = vor.u32 %v4698_v37, %v4694_v32 }
 0x395   :  { %6205 = vmatprep.mubr.bf16.mxu1 %v19380_v42  ;;  %v1370_v9 = vsel %vm17712_vm8, %v942_v47, %v1369_v54  ;;  %v964_v47 = vrot.slane %v962_v55, 7  ;;  %256 = vst [vmem:[#allocation2 + $0x140] sm:$0x1] %v255_v46  ;;  %v4703_v18 = vrot.slane %v4701_v24, 1  ;;  %v147_v37 = vld [vmem:[#allocation2 + $0x144] sm:$0x1] }
 0x396   :  { %1371 = vst [vmem:[#allocation2 + $0x120] sm:$0xf] %v1370_v9  ;;  %v959_v63 = vor.u32 %v957_v56, %v956_v43  ;;  %v960_v19 = vrot.slane %v956_v43, 4  ;;  %v979_v9 = vshrl.u32 %v560_v13, 16  ;;  %v1380_v55 = vld [vmem:[#allocation2 + $0x134] sm:$0x1] }
 0x397   :  { %v967_v6 = vor.u32 %v965_v39, %v964_v47  ;;  %v969_v38 = vrot.slane %v964_v47, 4  ;;  %v257_v39 = vld [vmem:[#allocation2 + $0x14c] sm:$0x1]  ;;  %v562_v46 = vld [vmem:[%s22393_s0 + $0xc4] sm:$0xf] }
 0x398   :  { %v14390_v50 = vpop.f32.mrb[108].mxu0 }
 0x399   :  { %v14391_v58 = vpop.f32.mrb[109].mxu0  ;;  %v968_v56 = vsel %vm17700_vm7, %v960_v19, %v967_v6  ;;  %v1381_v26 = vsel %vm17654_vm2, %v969_v38, %v1380_v55  ;;  %v1383_v25 = vld [vmem:[#allocation2 + $0x138] sm:$0xf]  ;;  %v996_v6 = vshrl.u32 %v562_v46, 16  ;;  %v999_v38 = vshll.u32 %v562_v46, 16 }
 0x39a   :  { %5692 = vmatmul.mubr.bf16.gmra.mrb[212].mxu0 %v19323_v51  ;;  %v19624_v21 = vadd.f32 %v14391_v58, %v14390_v50  ;;  %v14393_v8 = vpop.f32.mrb[110].mxu0  ;;  %v974_v51 = vshll.u32 %v559_v44, 16  ;;  %v1376_v50 = vld [vmem:[#allocation2 + $0x12c] sm:$0xf]  ;;  %v981_v44 = vrot.slane %v979_v9, 7  ;;  %v982_v58 = vshll.u32 %v560_v13, 16 }
 0x39b   :  { %5699 = vmatprep.mubr.bf16.mxu0 %v19366_v35  ;;  %v14394_v54 = vpop.f32.mrb[111].mxu0  ;;  %v973_v35 = vrot.slane %v971_v4, 7  ;;  %v1377_v59 = vsel %vm17712_vm8, %v959_v63, %v1376_v50  ;;  %1379 = vst [vmem:[#allocation2 + $0x130] sm:$0xf] %v968_v56  ;;  %1382 = vst [vmem:[#allocation2 + $0x134] sm:$0x1] %v1381_v26  ;;  %v4704_v13 = vsel %vm1680_vm9, %v4699_v30, %v4703_v18 }
 0x39c   :  { %6206 = vmatmul.mubr.bf16.gmra.mrb[212].mxu1 %v19349_v45  ;;  %v19632_v14 = vadd.f32 %v14394_v54, %v14393_v8  ;;  %1378 = vst [vmem:[#allocation2 + $0x12c] sm:$0xf] %v1377_v59  ;;  %v984_v32 = vor.u32 %v982_v58, %v981_v44  ;;  %v986_v24 = vrot.slane %v981_v44, 4  ;;  %v561_v8 = vld [vmem:[%s22393_s0 + $0xc0] sm:$0xf]  ;;  %v258_v63 = vsel %vm17665_vm4, 0, %v257_v39 }
 0x39d   :  { %6213 = vmatprep.mubr.bf16.mxu1 %v19390_v2  ;;  %v976_v43 = vor.u32 %v974_v51, %v973_v35  ;;  %v977_v2 = vrot.slane %v973_v35, 4  ;;  %v1387_v54 = vld [vmem:[#allocation2 + $0x140] sm:$0x1]  ;;  %259 = vst [vmem:[#allocation2 + $0x14c] sm:$0x1] %v258_v63  ;;  %v988_v4 = vshrl.u32 %v561_v8, 16 }
 0x39e   :  { %v1388_v19 = vsel %vm17654_vm2, %v986_v24, %v1387_v54  ;;  %v150_v9 = vld [vmem:[#allocation2 + $0x150] sm:$0x1]  ;;  %v260_v50 = vld [vmem:[#allocation2 + $0x158] sm:$0x1]  ;;  %v998_v59 = vrot.slane %v996_v6, 7 }
 0x39f   :  { %v985_v49 = vsel %vm17700_vm7, %v977_v2, %v984_v32  ;;  %v1384_v47 = vsel %vm17712_vm8, %v976_v43, %v1383_v25  ;;  %1389 = vst [vmem:[#allocation2 + $0x140] sm:$0x1] %v1388_v19  ;;  %v990_v18 = vrot.slane %v988_v4, 7  ;;  %v151_v26 = vsel %vm17654_vm2, 0, %v150_v9  ;;  %v564_v39 = vld [vmem:[%s22393_s0 + $0xcc] sm:$0xf] }
 0x3a0   :  { %1385 = vst [vmem:[#allocation2 + $0x138] sm:$0xf] %v1384_v47  ;;  %1386 = vst [vmem:[#allocation2 + $0x13c] sm:$0xf] %v985_v49  ;;  %v1001_v2 = vor.u32 %v999_v38, %v998_v59  ;;  %v1003_v32 = vrot.slane %v998_v59, 4  ;;  %v261_v24 = vsel %vm17665_vm4, 0, %v260_v50 }
 0x3a1   :  { %v994_v58 = vrot.slane %v990_v18, 4  ;;  %152 = vst [vmem:[#allocation2 + $0x150] sm:$0x1] %v151_v26  ;;  %262 = vst [vmem:[#allocation2 + $0x158] sm:$0x1] %v261_v24  ;;  %v1013_v63 = vshrl.u32 %v564_v39, 16 }
 0x3a2   :  { %5700 = vmatmul.mubr.bf16.gmra.mrb[216].mxu0 %v19336_v57  ;;  %v148_v57 = vsel %vm17654_vm2, 0, %v147_v37  ;;  %v563_v37 = vld [vmem:[%s22393_s0 + $0xc8] sm:$0xf]  ;;  %v153_v47 = vld [vmem:[#allocation2 + $0x15c] sm:$0x1]  ;;  %v1016_v19 = vshll.u32 %v564_v39, 16 }
 0x3a3   :  { %5707 = vmatprep.mubr.bf16.mxu0 %v19380_v42  ;;  %149 = vst [vmem:[#allocation2 + $0x144] sm:$0x1] %v148_v57  ;;  %v991_v42 = vshll.u32 %v561_v8, 16  ;;  %v1002_v25 = vsel %vm17700_vm7, %v994_v58, %v1001_v2  ;;  %v1005_v54 = vshrl.u32 %v563_v37, 16  ;;  %v1008_v57 = vshll.u32 %v563_v37, 16  ;;  %v17235_v50 = vld [vmem:[%s22394_s1 + $0x108] sm:$0xff]  }
 0x3a4   :  { %6214 = vmatmul.mubr.bf16.gmra.mrb[216].mxu1 %v19362_v53  ;;  %v17219_v53 = vld [vmem:[%s22393_s0] sm:$0xff]   ;;  %1393 = vst [vmem:[#allocation2 + $0x148] sm:$0xf] %v1002_v25  ;;  %v1015_v9 = vrot.slane %v1013_v63, 7  ;;  %v17221_v24 = vld [vmem:[%s22394_s1 + $0x148] sm:$0xff]  }
 0x3a5   :  { %v14396_v51 = vpop.f32.mrb[112].mxu0  ;;  %6221 = vmatprep.mubr.bf16.mxu1 %v4704_v13  ;;  %v993_v44 = vor.u32 %v991_v42, %v990_v18  ;;  %v1394_v13 = vld [vmem:[#allocation2 + $0x14c] sm:$0x1]  ;;  %v1007_v38 = vrot.slane %v1005_v54, 7  ;;  %v566_v39 = vld [vmem:[%s22393_s0 + $0xd4] sm:$0xf] }
 0x3a6   :  { %v14397_v30 = vpop.f32.mrb[113].mxu0  ;;  %v1395_v49 = vsel %vm17654_vm2, %v1003_v32, %v1394_v13  ;;  %v1018_v26 = vor.u32 %v1016_v19, %v1015_v9  ;;  %v565_v32 = vld [vmem:[%s22393_s0 + $0xd0] sm:$0xf]  ;;  %v1020_v37 = vrot.slane %v1015_v9, 4  ;;  %v17223_v19 = vld [vmem:[%s22393_s0 + $0x18] sm:$0xff]  }
 0x3a7   :  { %v19661_v35 = vadd.f32 %v14397_v30, %v14396_v51  ;;  %v14399_v56 = vpop.f32.mrb[114].mxu0  ;;  %1396 = vst [vmem:[#allocation2 + $0x14c] sm:$0x1] %v1395_v49  ;;  %v17222_v51 = vld [vmem:[%s22393_s0 + $0x10] sm:$0xff]   ;;  %v263_v30 = vld [vmem:[#allocation2 + $0x164] sm:$0x1] }
 0x3a8   :  { %v14400_v55 = vpop.f32.mrb[115].mxu0  ;;  %v264_v59 = vsel %vm17665_vm4, 0, %v263_v30  ;;  %v1011_v58 = vrot.slane %v1007_v38, 4  ;;  %v1401_v2 = vld [vmem:[#allocation2 + $0x158] sm:$0x1]  ;;  %v1022_v25 = vshrl.u32 %v565_v32, 16 }
 0x3a9   :  { %v19668_v43 = vadd.f32 %v14400_v55, %v14399_v56  ;;  %v1397_v56 = vld [vmem:[#allocation2 + $0x150] sm:$0xf]  ;;  %265 = vst [vmem:[#allocation2 + $0x164] sm:$0x1] %v264_v59  ;;  %v1025_v49 = vshll.u32 %v565_v32, 16 }
 0x3aa   :  { %5708 = vmatmul.mubr.bf16.gmra.mrb[220].mxu0 %v19349_v45  ;;  %v1390_v8 = vld [vmem:[#allocation2 + $0x144] sm:$0xf]  ;;  %v1019_v13 = vsel %vm17700_vm7, %v1011_v58, %v1018_v26  ;;  %v17240_v54 = vld [vmem:[%s22394_s1 + $0x110] sm:$0xff]   ;;  %v7218_v28 = vld [vmem:[#allocation2 + $0x12c] sm:$0xe] }
 0x3ab   :  { %15932 = vmatprep.mubr.bf16.mxu0 %v17219_v53  ;;  %v1391_v45 = vsel %vm17712_vm8, %v993_v44, %v1390_v8  ;;  %v154_v53 = vsel %vm17654_vm2, 0, %v153_v47  ;;  %v1010_v44 = vor.u32 %v1008_v57, %v1007_v38  ;;  %v17237_v8 = vld [vmem:[%s22394_s1 + $0xc8] sm:$0xff]   ;;  %v1030_v47 = vshrl.u32 %v566_v39, 16  ;;  %1400 = vst [vmem:[#allocation2 + $0x154] sm:$0xf] %v1019_v13  ;;  %v17241_v30 = vld [vmem:[%s22394_s1 + $0xd0] sm:$0xff]  }
 0x3ac   :  { %6222 = vmatmul.mubr.bf16.gmra.mrb[220].mxu1 %v19578_v10  ;;  %1392 = vst [vmem:[#allocation2 + $0x144] sm:$0xf] %v1391_v45  ;;  %v17220_v10 = vld [vmem:[%s22393_s0 + $0x8] sm:$0xff]   ;;  %155 = vst [vmem:[#allocation2 + $0x15c] sm:$0x1] %v154_v53  ;;  %v1402_v57 = vsel %vm17654_vm2, %v1020_v37, %v1401_v2  ;;  %v17227_v13 = vld [vmem:[%s22394_s1 + $0x158] sm:$0xff]  }
 0x3ad   :  { %15884 = vmatprep.mubr.bf16.mxu1 %v18938_v33  ;;  %v14402_v46 = vpop.f32.mrb[116].mxu0  ;;  %v17234_v33 = vld [vmem:[%s22394_s1 + $0xc0] sm:$0xff]   ;;  %v1398_v45 = vsel %vm17712_vm8, %v1010_v44, %v1397_v56  ;;  %1403 = vst [vmem:[#allocation2 + $0x158] sm:$0x1] %v1402_v57  ;;  %v567_v56 = vld [vmem:[%s22393_s0 + $0xd8] sm:$0xf] }
 0x3ae   :  { %v14403_v4 = vpop.f32.mrb[117].mxu0  ;;  %1399 = vst [vmem:[#allocation2 + $0x150] sm:$0xf] %v1398_v45  ;;  %v17247_v57 = vld [vmem:[%s22394_s1 + $0x120] sm:$0xff]  }
 0x3af   :  { %v19693_v42 = vadd.f32 %v14403_v4, %v14402_v46  ;;  %v14405_v6 = vpop.f32.mrb[118].mxu0  ;;  %v156_v46 = vld [vmem:[#allocation2 + $0x168] sm:$0x1]  ;;  %v1024_v4 = vrot.slane %v1022_v25, 7  ;;  %v568_v25 = vld [vmem:[%s22393_s0 + $0xdc] sm:$0xf] }
 0x3b0   :  { %v14406_v18 = vpop.f32.mrb[119].mxu0 }
 0x3b1   :  { %v19705_v55 = vadd.f32 %v14406_v18, %v14405_v6  ;;  %v1033_v6 = vshll.u32 %v566_v39, 16  ;;  %v17242_v18 = vld [vmem:[%s22394_s1 + $0x118] sm:$0xff]   ;;  %v1028_v59 = vrot.slane %v1024_v4, 4  ;;  %v1408_v39 = vld [vmem:[#allocation2 + $0x164] sm:$0x1] }
 0x3b2   :  { %15933 = vmatmul.mubr.bf16.vlgmr.msra.gmra.mrb[224].mxu0 %v17220_v10  ;;  %v1032_v10 = vrot.slane %v1030_v47, 7  ;;  %v1047_v47 = vshrl.u32 %v568_v25, 16 }
 0x3b3   :  { %15936 = vmatprep.mubr.bf16.mxu0 %v17222_v51  ;;  %14789 = vmatpush3.bf16.msra.mxu0 %v17234_v33  ;;  %v266_v33 = vld [vmem:[#allocation2 + $0x170] sm:$0x1]  ;;  %v1404_v26 = vld [vmem:[#allocation2 + $0x15c] sm:$0xf] }
 0x3b4   :  { %15885 = vmatmul.mubr.bf16.vlgmr.msra.gmra.mrb[128].mxu1 %v18981_v3  ;;  %14790 = vmatprep.subr.bf16.mxu0 %v17235_v50  ;;  %v17224_v3 = vld [vmem:[%s22394_s1 + $0x150] sm:$0xff]   ;;  %v1027_v50 = vor.u32 %v1025_v49, %v1024_v4  ;;  %v1035_v44 = vor.u32 %v1033_v6, %v1032_v10  ;;  %v1037_v58 = vrot.slane %v1032_v10, 4  ;;  %v267_v2 = vsel %vm17665_vm4, 0, %v266_v33  ;;  %v17230_v6 = vld [vmem:[%s22394_s1 + $0x160] sm:$0xff]  }
 0x3b5   :  { %15888 = vmatprep.mubr.bf16.mxu1 %v19002_v29  ;;  %15965 = vmatpush3.bf16.msra.mxu1 %v19442_v17  ;;  %v14408_v63 = vpop.f32.mrb[120].mxu0  ;;  %v17225_v29 = vld [vmem:[%s22393_s0 + $0x20] sm:$0xff]   ;;  %v157_v17 = vsel %vm17654_vm2, 0, %v156_v46  ;;  %268 = vst [vmem:[#allocation2 + $0x170] sm:$0x1] %v267_v2  ;;  %v1042_v49 = vshll.u32 %v567_v56, 16 }
 0x3b6   :  { %v14409_v51 = vpop.f32.mrb[121].mxu0  ;;  %15966 = vmatprep.subr.bf16.mxu1 %v17221_v24  ;;  %158 = vst [vmem:[#allocation2 + $0x168] sm:$0x1] %v157_v17  ;;  %v1405_v37 = vsel %vm17712_vm8, %v1027_v50, %v1404_v26  ;;  %v1409_v45 = vsel %vm17654_vm2, %v1037_v58, %v1408_v39  ;;  %v17244_v46 = vld [vmem:[%s22394_s1 + $0xd8] sm:$0xff]   ;;  %v17228_v4 = vld [vmem:[%s22393_s0 + $0x30] sm:$0xff]   ;;  %v1049_v10 = vrot.slane %v1047_v47, 7 }
 0x3b7   :  { %v19742_v38 = vadd.f32 %v14409_v51, %v14408_v63  ;;  %v14411_v9 = vpop.f32.mrb[122].mxu0  ;;  %14791 = vmatpush3.bf16.msra.mxu0 %v17237_v8  ;;  %v1039_v8 = vshrl.u32 %v567_v56, 16  ;;  %1406 = vst [vmem:[#allocation2 + $0x15c] sm:$0xf] %v1405_v37  ;;  %1410 = vst [vmem:[#allocation2 + $0x164] sm:$0x1] %v1409_v45 }
 0x3b8   :  { %v14412_v53 = vpop.f32.mrb[123].mxu0  ;;  %14792 = vmatprep.subr.bf16.mxu0 %v17240_v54  ;;  %v17226_v54 = vld [vmem:[%s22393_s0 + $0x28] sm:$0xff]   ;;  %v159_v51 = vld [vmem:[#allocation2 + $0x174] sm:$0x1]  ;;  %v17248_v17 = vld [vmem:[%s22394_s1 + $0xe0] sm:$0xff]   ;;  %v1054_v50 = vrot.slane %v1049_v10, 4 }
 0x3b9   :  { %15967 = vmatpush3.bf16.msra.mxu1 %v17221_v24  ;;  %v19755_v32 = vadd.f32 %v14412_v53, %v14411_v9  ;;  %v1036_v24 = vsel %vm17700_vm7, %v1028_v59, %v1035_v44  ;;  %v1041_v63 = vrot.slane %v1039_v8, 7  ;;  %v269_v56 = vld [vmem:[#allocation2 + $0x17c] sm:$0x1]  ;;  %v569_v53 = vld [vmem:[%s22393_s0 + $0xe0] sm:$0xf]  ;;  %v17250_v44 = vld [vmem:[%s22394_s1 + $0x128] sm:$0xff]  }
 0x3ba   :  { %15937 = vmatmul.mubr.bf16.gmra.mrb[228].mxu0 %v17223_v19  ;;  %15968 = vmatprep.subr.bf16.mxu1 %v17224_v3  ;;  %1407 = vst [vmem:[#allocation2 + $0x160] sm:$0xf] %v1036_v24  ;;  %v160_v2 = vsel %vm17654_vm2, 0, %v159_v51  ;;  %v570_v8 = vld [vmem:[%s22393_s0 + $0xe4] sm:$0xf]  ;;  %v17236_v24 = vld [vmem:[%s22394_s1 + $0x168] sm:$0xff]  }
 0x3bb   :  { %15940 = vmatprep.mubr.bf16.mxu0 %v17225_v29  ;;  %14793 = vmatpush3.bf16.msra.mxu0 %v17241_v30  ;;  %v1045_v33 = vrot.slane %v1041_v63, 4  ;;  %161 = vst [vmem:[#allocation2 + $0x174] sm:$0x1] %v160_v2  ;;  %v1056_v45 = vshrl.u32 %v569_v53, 16  ;;  %v17255_v47 = vld [vmem:[%s22394_s1 + $0x130] sm:$0xff]   ;;  %v17229_v51 = vld [vmem:[%s22393_s0 + $0x38] sm:$0xff]  }
 0x3bc   :  { %15889 = vmatmul.mubr.bf16.gmra.mrb[132].mxu1 %v19045_v22  ;;  %14794 = vmatprep.subr.bf16.mxu0 %v17242_v18  ;;  %v1050_v22 = vshll.u32 %v568_v25, 16  ;;  %v1415_v26 = vld [vmem:[#allocation2 + $0x170] sm:$0x1] }
 0x3bd   :  { %15892 = vmatprep.mubr.bf16.mxu1 %v19078_v61  ;;  %v14414_v19 = vpop.f32.mrb[124].mxu0  ;;  %15969 = vmatpush3.bf16.msra.mxu1 %v17224_v3  ;;  %v1044_v61 = vor.u32 %v1042_v49, %v1041_v63  ;;  %v1411_v3 = vld [vmem:[#allocation2 + $0x168] sm:$0xf]  ;;  %v1416_v25 = vsel %vm17654_vm2, %v1054_v50, %v1415_v26  ;;  %v1064_v63 = vshrl.u32 %v570_v8, 16  ;;  %v17231_v50 = vld [vmem:[%s22393_s0 + $0x40] sm:$0xff]  }
 0x3be   :  { %v14415_v29 = vpop.f32.mrb[125].mxu0  ;;  %15970 = vmatprep.subr.bf16.mxu1 %v17227_v13  ;;  %v1052_v18 = vor.u32 %v1050_v22, %v1049_v10  ;;  %1417 = vst [vmem:[#allocation2 + $0x170] sm:$0x1] %v1416_v25  ;;  %v17252_v49 = vld [vmem:[%s22394_s1 + $0xe8] sm:$0xff]  }
 0x3bf   :  { %v19789_v9 = vadd.f32 %v14415_v29, %v14414_v19  ;;  %v14417_v30 = vpop.f32.mrb[126].mxu0  ;;  %14795 = vmatpush3.bf16.msra.mxu0 %v17244_v46  ;;  %v1412_v58 = vsel %vm17712_vm8, %v1044_v61, %v1411_v3  ;;  %v1059_v46 = vshll.u32 %v569_v53, 16  ;;  %v1067_v19 = vshll.u32 %v570_v8, 16  ;;  %v272_v10 = vld [vmem:[#allocation2 + $0x188] sm:$0x1] }
 0x3c0   :  { %v14418_v59 = vpop.f32.mrb[127].mxu0  ;;  %14796 = vmatprep.subr.bf16.mxu0 %v17247_v57  ;;  %v1053_v39 = vsel %vm17700_vm7, %v1045_v33, %v1052_v18  ;;  %1413 = vst [vmem:[#allocation2 + $0x168] sm:$0xf] %v1412_v58  ;;  %v1058_v57 = vrot.slane %v1056_v45, 7  ;;  %v273_v29 = vsel %vm17665_vm4, 0, %v272_v10  ;;  %v1066_v33 = vrot.slane %v1064_v63, 7 }
 0x3c1   :  { %v19801_v37 = vadd.f32 %v14418_v59, %v14417_v30  ;;  %15971 = vmatpush3.bf16.msra.mxu1 %v17227_v13  ;;  %1414 = vst [vmem:[#allocation2 + $0x16c] sm:$0xf] %v1053_v39  ;;  %v270_v13 = vsel %vm17665_vm4, 0, %v269_v56  ;;  %274 = vst [vmem:[#allocation2 + $0x188] sm:$0x1] %v273_v29  ;;  %v17256_v56 = vld [vmem:[%s22394_s1 + $0xf0] sm:$0xff]  }
 0x3c2   :  { %15941 = vmatmul.mubr.bf16.gmra.mrb[232].mxu0 %v17226_v54  ;;  %15972 = vmatprep.subr.bf16.mxu1 %v17230_v6  ;;  %271 = vst [vmem:[#allocation2 + $0x17c] sm:$0x1] %v270_v13  ;;  %v162_v54 = vld [vmem:[#allocation2 + $0x180] sm:$0x1]  ;;  %v1061_v53 = vor.u32 %v1059_v46, %v1058_v57  ;;  %v17260_v58 = vld [vmem:[%s22394_s1 + $0x138] sm:$0xff]   ;;  %v1069_v26 = vor.u32 %v1067_v19, %v1066_v33  ;;  %v1071_v2 = vrot.slane %v1066_v33, 4 }
 0x3c3   :  { %15944 = vmatprep.mubr.bf16.mxu0 %v17228_v4  ;;  %14797 = vmatpush3.bf16.msra.mxu0 %v17248_v17  ;;  %v163_v4 = vsel %vm17654_vm2, 0, %v162_v54  ;;  %v571_v17 = vld [vmem:[%s22393_s0 + $0xe8] sm:$0xf]  ;;  %v1418_v8 = vld [vmem:[#allocation2 + $0x174] sm:$0xf]  ;;  %v17251_v13 = vld [vmem:[%s22394_s1 + $0x178] sm:$0xff]  }
 0x3c4   :  { %15893 = vmatmul.mubr.bf16.gmra.mrb[136].mxu1 %v19130_v34  ;;  %14798 = vmatprep.subr.bf16.mxu0 %v17250_v44  ;;  %v17243_v34 = vld [vmem:[%s22394_s1 + $0x170] sm:$0xff]   ;;  %164 = vst [vmem:[#allocation2 + $0x180] sm:$0x1] %v163_v4  ;;  %v1073_v3 = vshrl.u32 %v571_v17, 16  ;;  %v1076_v39 = vshll.u32 %v571_v17, 16  ;;  %v17265_v46 = vld [vmem:[%s22394_s1 + $0xf8] sm:$0xff]  }
 0x3c5   :  { %15896 = vmatprep.mubr.bf16.mxu1 %v19147_v41  ;;  %v14420_v22 = vpop.f32.mrb[128].mxu0  ;;  %15973 = vmatpush3.bf16.msra.mxu1 %v17230_v6  ;;  %v1062_v41 = vrot.slane %v1058_v57, 4  ;;  %v572_v6 = vld [vmem:[%s22393_s0 + $0xec] sm:$0xf]  ;;  %v573_v33 = vld [vmem:[%s22393_s0 + $0xf0] sm:$0xf] }
 0x3c6   :  { %v14421_v61 = vpop.f32.mrb[129].mxu0  ;;  %15974 = vmatprep.subr.bf16.mxu1 %v17236_v24  ;;  %v1081_v59 = vshrl.u32 %v572_v6, 16  ;;  %v1084_v63 = vshll.u32 %v572_v6, 16  ;;  %v165_v19 = vld [vmem:[#allocation2 + $0x18c] sm:$0x1] }
 0x3c7   :  { %v19839_v30 = vadd.f32 %v14421_v61, %v14420_v22  ;;  %v14423_v18 = vpop.f32.mrb[130].mxu0  ;;  %14799 = vmatpush3.bf16.msra.mxu0 %v17252_v49  ;;  %v1070_v45 = vsel %vm17700_vm7, %v1062_v41, %v1069_v26  ;;  %v278_v26 = vld [vmem:[#allocation2 + $0x1a0] sm:$0x1] }
 0x3c8   :  { %v14424_v44 = vpop.f32.mrb[131].mxu0  ;;  %14800 = vmatprep.subr.bf16.mxu0 %v17255_v47  ;;  %v1075_v47 = vrot.slane %v1073_v3, 7  ;;  %1421 = vst [vmem:[#allocation2 + $0x178] sm:$0xf] %v1070_v45  ;;  %v1083_v57 = vrot.slane %v1081_v59, 7  ;;  %v19875_v3 = vld [vmem:[%s22394_s1 + $0x80] sm:$0xff]  }
 0x3c9   :  { %v19850_v25 = vadd.f32 %v14424_v44, %v14423_v18  ;;  %15975 = vmatpush3.bf16.msra.mxu1 %v17236_v24  ;;  %v1422_v49 = vld [vmem:[#allocation2 + $0x17c] sm:$0x1]  ;;  %v1419_v24 = vsel %vm17712_vm8, %v1061_v53, %v1418_v8  ;;  %v1429_v41 = vld [vmem:[#allocation2 + $0x188] sm:$0x1]  ;;  %v574_v18 = vld [vmem:[%s22393_s0 + $0xf4] sm:$0xf] }
 0x3ca   :  { %15945 = vmatmul.mubr.bf16.gmra.mrb[236].mxu0 %v17229_v51  ;;  %15976 = vmatprep.subr.bf16.mxu1 %v17243_v34  ;;  %v1423_v54 = vsel %vm17654_vm2, %v1071_v2, %v1422_v49  ;;  %1420 = vst [vmem:[#allocation2 + $0x174] sm:$0xf] %v1419_v24  ;;  %v1078_v4 = vor.u32 %v1076_v39, %v1075_v47  ;;  %v1079_v10 = vrot.slane %v1075_v47, 4  ;;  %v275_v51 = vld [vmem:[#allocation2 + $0x194] sm:$0x1]  ;;  %v1088_v61 = vrot.slane %v1083_v57, 4 }
 0x3cb   :  { %15948 = vmatprep.mubr.bf16.mxu0 %v17231_v50  ;;  %14801 = vmatpush3.bf16.msra.mxu0 %v17256_v56  ;;  %1424 = vst [vmem:[#allocation2 + $0x17c] sm:$0x1] %v1423_v54  ;;  %v1425_v22 = vld [vmem:[#allocation2 + $0x180] sm:$0xf]  ;;  %v1086_v17 = vor.u32 %v1084_v63, %v1083_v57  ;;  %v17238_v53 = vld [vmem:[%s22393_s0 + $0x50] sm:$0xff]   ;;  %v276_v39 = vsel %vm17665_vm4, 0, %v275_v51 }
 0x3cc   :  { %15897 = vmatmul.mubr.bf16.gmra.mrb[140].mxu1 %v19171_v62  ;;  %14802 = vmatprep.subr.bf16.mxu0 %v17260_v58  ;;  %v17232_v62 = vld [vmem:[%s22393_s0 + $0x48] sm:$0xff]   ;;  %v1430_v44 = vsel %vm17654_vm2, %v1088_v61, %v1429_v41  ;;  %v168_v58 = vld [vmem:[#allocation2 + $0x198] sm:$0x1]  ;;  %v1090_v8 = vshrl.u32 %v573_v33, 16  ;;  %277 = vst [vmem:[#allocation2 + $0x194] sm:$0x1] %v276_v39 }
 0x3cd   :  { %15900 = vmatprep.mubr.bf16.mxu1 %v19194_v16  ;;  %v14426_v29 = vpop.f32.mrb[132].mxu0  ;;  %15977 = vmatpush3.bf16.msra.mxu1 %v17243_v34  ;;  %v1426_v16 = vsel %vm17712_vm8, %v1078_v4, %v1425_v22  ;;  %v166_v34 = vsel %vm17654_vm2, 0, %v165_v19  ;;  %v1087_v59 = vsel %vm17700_vm7, %v1079_v10, %v1086_v17  ;;  %1431 = vst [vmem:[#allocation2 + $0x188] sm:$0x1] %v1430_v44  ;;  %v1093_v49 = vshll.u32 %v573_v33, 16  ;;  %v17239_v33 = vld [vmem:[%s22393_s0 + $0x58] sm:$0xff]  }
 0x3ce   :  { %v14427_v6 = vpop.f32.mrb[133].mxu0  ;;  %15978 = vmatprep.subr.bf16.mxu1 %v17251_v13  ;;  %1427 = vst [vmem:[#allocation2 + $0x180] sm:$0xf] %v1426_v16  ;;  %167 = vst [vmem:[#allocation2 + $0x18c] sm:$0x1] %v166_v34  ;;  %v1098_v47 = vshrl.u32 %v574_v18, 16 }
 0x3cf   :  { %v19884_v50 = vadd.f32 %v14427_v6, %v14426_v29  ;;  %v14429_v56 = vpop.f32.mrb[134].mxu0  ;;  %14803 = vmatpush3.bf16.msra.mxu0 %v17265_v46  ;;  %1428 = vst [vmem:[#allocation2 + $0x184] sm:$0xf] %v1087_v59  ;;  %v575_v46 = vld [vmem:[%s22393_s0 + $0xf8] sm:$0xf]  ;;  %v1092_v24 = vrot.slane %v1090_v8, 7 }
 0x3d0   :  { %v14430_v2 = vpop.f32.mrb[135].mxu0  ;;  %v169_v54 = vsel %vm17654_vm2, 0, %v168_v58  ;;  %v279_v57 = vsel %vm17665_vm4, 0, %v278_v26  ;;  %v1107_v63 = vshrl.u32 %v575_v46, 16  ;;  %v576_v19 = vld [vmem:[%s22393_s0 + $0xfc] sm:$0xf] }
 0x3d1   :  { %22511 = vst [vmem:[#allocation12_spill] sm:$0xff] %v19884_v50  ;;  %v19895_v45 = vadd.f32 %v14430_v2, %v14429_v56  ;;  %15979 = vmatpush3.bf16.msra.mxu1 %v17251_v13  ;;  %v1101_v13 = vshll.u32 %v574_v18, 16  ;;  %170 = vst [vmem:[#allocation2 + $0x198] sm:$0x1] %v169_v54  ;;  %v7159_v4 = vld [vmem:[#allocation2 + $0xe4] sm:$0xf]  ;;  %v1095_v6 = vor.u32 %v1093_v49, %v1092_v24 }
 0x3d2   :  { %15949 = vmatmul.mubr.bf16.gmra.mrb[240].mxu0 %v17232_v62  ;;  %16012 = vmatprep.subr.bf16.mxu1 %v19875_v3  ;;  %280 = vst [vmem:[#allocation2 + $0x1a0] sm:$0x1] %v279_v57  ;;  %v19909_v10 = vld [vmem:[#allocation2 + $0xe8] sm:$0xf]  ;;  %v1096_v51 = vrot.slane %v1092_v24, 4  ;;  %v1100_v29 = vrot.slane %v1098_v47, 7 }
 0x3d3   :  { %22512 = vst [vmem:[#allocation11_spill] sm:$0xff] %v19895_v45  ;;  %15952 = vmatprep.mubr.bf16.mxu0 %v17238_v53  ;;  %v1109_v17 = vrot.slane %v1107_v63, 7  ;;  %v1110_v61 = vshll.u32 %v575_v46, 16  ;;  %v1115_v62 = vshrl.u32 %v576_v19, 16  ;;  %v17245_v34 = vld [vmem:[%s22393_s0 + $0x60] sm:$0xff]   ;;  %v19921_v59 = vcombine.low %v7159_v4, %v19909_v10 }
 0x3d4   :  { %15901 = vmatmul.mubr.bf16.gmra.mrb[144].mxu1 %v19215_v52  ;;  %v1105_v18 = vrot.slane %v1100_v29, 4  ;;  %v1118_v44 = vshll.u32 %v576_v19, 16  ;;  %v1436_v39 = vld [vmem:[#allocation2 + $0x194] sm:$0x1]  ;;  %v120_v8 = vld [vmem:[#allocation2 + $0xd8] sm:$0x1] }
 0x3d5   :  { %15904 = vmatprep.mubr.bf16.mxu1 %v19235_v48  ;;  %v14432_v22 = vpop.f32.mrb[136].mxu0  ;;  %v1103_v48 = vor.u32 %v1101_v13, %v1100_v29  ;;  %v1112_v56 = vor.u32 %v1110_v61, %v1109_v17  ;;  %22514 = vst [vmem:[#allocation14_spill] sm:$0xff] %v19921_v59  ;;  %v1432_v2 = vld [vmem:[#allocation2 + $0x18c] sm:$0xf]  ;;  %v1113_v46 = vrot.slane %v1109_v17, 4  ;;  %v1117_v24 = vrot.slane %v1115_v62, 7 }
 0x3d6   :  { %v14433_v41 = vpop.f32.mrb[137].mxu0  ;;  %v1433_v49 = vsel %vm17712_vm8, %v1095_v6, %v1432_v2  ;;  %v1437_v47 = vsel %vm17654_vm2, %v1105_v18, %v1436_v39  ;;  %v230_v13 = vld [vmem:[#allocation2 + $0xe0] sm:$0x1]  ;;  %v7406_v4 = vshll.u32 %v19921_v59, 16  ;;  %v121_v29 = vsel %vm17654_vm2, 0, %v120_v8 }
 0x3d7   :  { %v19915_v16 = vadd.f32 %v14433_v41, %v14432_v22  ;;  %v14435_v52 = vpop.f32.mrb[138].mxu0  ;;  %v1104_v26 = vsel %vm17700_vm7, %v1096_v51, %v1103_v48  ;;  %1434 = vst [vmem:[#allocation2 + $0x18c] sm:$0xf] %v1433_v49  ;;  %1438 = vst [vmem:[#allocation2 + $0x194] sm:$0x1] %v1437_v47  ;;  %v17328_v19 = vld [vmem:[%s22394_s1 + $0x40] sm:$0xff]   ;;  %v1120_v22 = vor.u32 %v1118_v44, %v1117_v24 }
 0x3d8   :  { %v14436_v53 = vpop.f32.mrb[139].mxu0  ;;  %1435 = vst [vmem:[#allocation2 + $0x190] sm:$0xf] %v1104_v26  ;;  %v1439_v54 = vld [vmem:[#allocation2 + $0x198] sm:$0xf]  ;;  %v1122_v51 = vrot.slane %v1117_v24, 4  ;;  %14924 = vmatprep.subr.bf16.mxu0 %v17328_v19 }
 0x3d9   :  { %22513 = vst [vmem:[#allocation13_spill] sm:$0xff] %v19915_v16  ;;  %v19923_v58 = vadd.f32 %v14436_v53, %v14435_v52  ;;  %v1440_v57 = vsel %vm17712_vm8, %v1112_v56, %v1439_v54  ;;  %v1443_v63 = vld [vmem:[#allocation2 + $0x1a0] sm:$0x1]  ;;  %v7161_v61 = vld [vmem:[#allocation2 + $0xf0] sm:$0xf]  ;;  %v231_v41 = vsel %vm17665_vm4, 0, %v230_v13  ;;  %v1121_v62 = vsel %vm17700_vm7, %v1113_v46, %v1120_v22 }
 0x3da   :  { %15953 = vmatmul.mubr.bf16.gmra.mrb[244].mxu0 %v17239_v33  ;;  %1441 = vst [vmem:[#allocation2 + $0x198] sm:$0xf] %v1440_v57  ;;  %122 = vst [vmem:[#allocation2 + $0xd8] sm:$0x1] %v121_v29  ;;  %v1444_v52 = vsel %vm17654_vm2, %v1122_v51, %v1443_v63  ;;  %v17253_v48 = vld [vmem:[%s22393_s0 + $0x70] sm:$0xff]   ;;  %v7404_v26 = vshrl.u32 %v19921_v59, 16 }
 0x3db   :  { %22515 = vst [vmem:[#allocation15_spill] sm:$0xff] %v19923_v58  ;;  %15956 = vmatprep.mubr.bf16.mxu0 %v17245_v34  ;;  %v17258_v6 = vld [vmem:[#allocation2 + $0xec] ss:$0 sps:$4 sm:$0x11]   ;;  %232 = vst [vmem:[#allocation2 + $0xe0] sm:$0x1] %v231_v41 }
 0x3dc   :  { %15905 = vmatmul.mubr.bf16.gmra.mrb[148].mxu1 %v19244_v0  ;;  %v17246_v0 = vld [vmem:[%s22393_s0 + $0x68] sm:$0xff]   ;;  %v7212_v18 = vld [vmem:[#allocation2 + $0xe4] sm:$0xe]  ;;  %v7162_v56 = vld [vmem:[#allocation2 + $0xf4] sm:$0xf]  ;;  %v7408_v2 = vrot.slane %v7406_v4, 1 }
 0x3dd   :  { %15908 = vmatprep.mubr.bf16.mxu1 %v19277_v20  ;;  %v14438_v17 = vpop.f32.mrb[140].mxu0  ;;  %1442 = vst [vmem:[#allocation2 + $0x19c] sm:$0xf] %v1121_v62  ;;  %1445 = vst [vmem:[#allocation2 + $0x1a0] sm:$0x1] %v1444_v52  ;;  %v19955_v44 = vcombine.low %v7161_v61, %v7162_v56  ;;  %v7411_v39 = vshll.u32 %v17258_v6, 16  ;;  %v13256_v49 = vcombine.low %v7212_v18, %v19909_v10 }
 0x3de   :  { %v14439_v33 = vpop.f32.mrb[141].mxu0  ;;  %v17254_v47 = vld [vmem:[%s22393_s0 + $0x78] sm:$0xff]   ;;  %v7213_v46 = vld [vmem:[#allocation2 + $0xf0] sm:$0xe]  ;;  %v7409_v54 = vor.u32 %v7408_v2, %v7404_v26  ;;  %v7683_v4 = vrot.slane %v17258_v6, 1 }
 0x3df   :  { %v19950_v20 = vadd.f32 %v14439_v33, %v14438_v17  ;;  %v14441_v34 = vpop.f32.mrb[142].mxu0  ;;  %22517 = vst [vmem:[#allocation17_spill] sm:$0xff] %v19955_v44  ;;  %v17262_v24 = vld [vmem:[#allocation2 + $0xf8] ss:$0 sps:$4 sm:$0x11]   ;;  %v7413_v57 = vrot.slane %v7411_v39, 1  ;;  %v13257_v61 = vcombine.low %v7213_v46, %v7162_v56 }
 0x3e0   :  { %v14442_v53 = vpop.f32.mrb[143].mxu0  ;;  %v7163_v63 = vld [vmem:[#allocation2 + $0xfc] sm:$0xf]  ;;  %v7418_v13 = vshll.u32 %v19955_v44, 16  ;;  %v7164_v22 = vld [vmem:[#allocation2 + $0x100] sm:$0xf] }
 0x3e1   :  { %22516 = vst [vmem:[#allocation16_spill] sm:$0xff] %v19950_v20  ;;  %v19958_v8 = vadd.f32 %v14442_v53, %v14441_v34  ;;  %v7682_v51 = vrot.slane %v13256_v49, 1  ;;  %v7214_v29 = vld [vmem:[#allocation2 + $0xfc] sm:$0xe]  ;;  %v19969_v41 = vcombine.low %v7163_v63, %v7164_v22  ;;  %v7416_v62 = vshrl.u32 %v19955_v44, 16 }
 0x3e2   :  { %15957 = vmatmul.mubr.bf16.gmra.mrb[248].mxu0 %v17246_v0  ;;  %v19972_v0 = vsel %vm1680_vm9, %v7409_v54, %v7413_v57  ;;  %v7420_v52 = vrot.slane %v7418_v13, 1  ;;  %v13258_v6 = vcombine.low %v7214_v29, %v7164_v22  ;;  %v17267_v18 = vld [vmem:[#allocation2 + $0x104] ss:$0 sps:$4 sm:$0x11]   ;;  %v7685_v53 = vrot.slane %v13257_v61, 1 }
 0x3e3   :  { %22518 = vst [vmem:[#allocation18_spill] sm:$0xff] %v19958_v8  ;;  %15960 = vmatprep.mubr.bf16.mxu0 %v17253_v48  ;;  %22520 = vst [vmem:[#allocation20_spill] sm:$0xff] %v19969_v41  ;;  %v19978_v48 = vsel %vm1969_vm10, %v7682_v51, %v7683_v4  ;;  %v7430_v56 = vshll.u32 %v19969_v41, 16  ;;  %v7686_v26 = vrot.slane %v17262_v24, 1  ;;  %v7166_v2 = vld [vmem:[#allocation2 + $0x10c] sm:$0xf] }
 0x3e4   :  { %15909 = vmatmul.mubr.bf16.gmra.mrb[152].mxu1 %v19274_v5  ;;  %22521 = vst [vmem:[#allocation21_spill] sm:$0xff] %v19972_v0  ;;  %v7421_v39 = vor.u32 %v7420_v52, %v7416_v62  ;;  %v7688_v54 = vrot.slane %v13258_v6, 1  ;;  %v7215_v57 = vld [vmem:[#allocation2 + $0x108] sm:$0xe]  ;;  %v7689_v13 = vrot.slane %v17267_v18, 1  ;;  %v17329_v29 = vld [vmem:[%s22394_s1] sm:$0xff]  }
 0x3e5   :  { %15912 = vmatprep.mubr.bf16.mxu1 %v19301_v1  ;;  %v14444_v19 = vpop.f32.mrb[144].mxu0  ;;  %v7423_v1 = vshll.u32 %v17262_v24, 16  ;;  %v7216_v4 = vld [vmem:[#allocation2 + $0x114] sm:$0xe]  ;;  %v7432_v51 = vrot.slane %v7430_v56, 1  ;;  %v7435_v24 = vshll.u32 %v17267_v18, 16  ;;  %v13259_v62 = vcombine.low %v7215_v57, %v7166_v2 }
 0x3e6   :  { %v14445_v10 = vpop.f32.mrb[145].mxu0  ;;  %v20001_v6 = vsel %vm1969_vm10, %v7685_v53, %v7686_v26  ;;  %v17332_v53 = vld [vmem:[%s22394_s1 + $0x8] sm:$0xff]   ;;  %v7167_v57 = vld [vmem:[#allocation2 + $0x114] sm:$0xf] }
 0x3e7   :  { %v19967_v5 = vadd.f32 %v14445_v10, %v14444_v19  ;;  %v14447_v17 = vpop.f32.mrb[146].mxu0  ;;  %v7425_v49 = vrot.slane %v7423_v1, 1  ;;  %v7168_v19 = vld [vmem:[#allocation2 + $0x118] sm:$0xf]  ;;  %v17330_v1 = vld [vmem:[%s22394_s1 + $0x48] sm:$0xff]   ;;  %22526 = vst [vmem:[#allocation26_spill] sm:$0xff] %v20001_v6 }
 0x3e8   :  { %v14448_v33 = vpop.f32.mrb[147].mxu0  ;;  %v13260_v56 = vcombine.low %v7216_v4, %v7168_v19  ;;  %v7691_v26 = vrot.slane %v13259_v62, 1  ;;  %v17334_v4 = vld [vmem:[%s22394_s1 + $0x50] sm:$0xff]   ;;  %v20142_v20 = vld [vmem:[#allocation2 + $0x158] ss:$0 sps:$4 sm:$0x11]  }
 0x3e9   :  { %22519 = vst [vmem:[#allocation19_spill] sm:$0xff] %v19967_v5  ;;  %v19975_v34 = vadd.f32 %v14448_v33, %v14447_v17  ;;  %v19992_v33 = vld [vmem:[#allocation2 + $0x110] ss:$0 sps:$4 sm:$0x11]   ;;  %v19995_v52 = vsel %vm1680_vm9, %v7421_v39, %v7425_v49 }
 0x3ea   :  { %15961 = vmatmul.mubr.bf16.gmra.mrb[252].mxu0 %v17254_v47  ;;  %v7165_v47 = vld [vmem:[#allocation2 + $0x108] sm:$0xf]  ;;  %22525 = vst [vmem:[#allocation25_spill] sm:$0xff] %v19995_v52  ;;  %v20012_v39 = vld [vmem:[#allocation2 + $0x11c] ss:$0 sps:$4 sm:$0x11]  }
 0x3eb   :  { %22522 = vst [vmem:[#allocation22_spill] sm:$0xff] %v19975_v34  ;;  %8023 = vmatprep.mubr.bf16.mxu0 %v19972_v0  ;;  %v19990_v61 = vcombine.low %v7165_v47, %v7166_v2  ;;  %v17272_v2 = vld [vmem:[%s22394_s1 + $0x88] sm:$0xff]   ;;  %v7437_v47 = vrot.slane %v7435_v24, 1  ;;  %v7217_v24 = vld [vmem:[#allocation2 + $0x120] sm:$0xe] }
 0x3ec   :  { %15913 = vmatmul.mubr.bf16.gmra.mrb[156].mxu1 %v19470_v40  ;;  %v7428_v40 = vshrl.u32 %v19969_v41, 16  ;;  %v20030_v62 = vld [vmem:[#allocation2 + $0x130] sm:$0xf] }
 0x3ed   :  { %v14450_v46 = vpop.f32.mrb[148].mxu0  ;;  %15980 = vmatprep.mubr.bf16.mxu1 %v19978_v48  ;;  %22524 = vst [vmem:[#allocation24_spill] sm:$0xff] %v19990_v61  ;;  %v7440_v0 = vshrl.u32 %v19990_v61, 16 }
 0x3ee   :  { %v14451_v63 = vpop.f32.mrb[149].mxu0  ;;  %v7433_v49 = vor.u32 %v7432_v51, %v7428_v40  ;;  %v7694_v40 = vrot.slane %v13260_v56, 1  ;;  %v7170_v51 = vld [vmem:[#allocation2 + $0x124] sm:$0xf] }
 0x3ef   :  { %v19984_v22 = vadd.f32 %v14451_v63, %v14450_v46  ;;  %v14453_v10 = vpop.f32.mrb[150].mxu0  ;;  %v20007_v46 = vsel %vm1969_vm10, %v7688_v54, %v7689_v13  ;;  %v7692_v54 = vrot.slane %v19992_v33, 1  ;;  %v17279_v63 = vld [vmem:[%s22394_s1 + $0x90] sm:$0xff]   ;;  %v7442_v13 = vshll.u32 %v19990_v61, 16 }
 0x3f0   :  { %v14454_v17 = vpop.f32.mrb[151].mxu0  ;;  %22528 = vst [vmem:[#allocation28_spill] sm:$0xff] %v20007_v46 }
 0x3f1   :  { %22523 = vst [vmem:[#allocation23_spill] sm:$0xff] %v19984_v22  ;;  %v20003_v18 = vadd.f32 %v14454_v17, %v14453_v10  ;;  %v7695_v17 = vrot.slane %v20012_v39, 1  ;;  %v7444_v22 = vrot.slane %v7442_v13, 1  ;;  %v20059_v13 = vld [vmem:[#allocation2 + $0x134] ss:$0 sps:$4 sm:$0x11]  }
 0x3f2   :  { %8024 = vmatmul.mubr.bf16.vlgmr.msra.gmra.mrb[0].mxu0 %v19921_v59  ;;  %v20035_v59 = vsel %vm1680_vm9, %v7433_v49, %v7437_v47  ;;  %v20048_v49 = vsel %vm1969_vm10, %v7691_v26, %v7692_v54  ;;  %v17286_v26 = vld [vmem:[%s22394_s1 + $0x98] sm:$0xff]   ;;  %v7169_v54 = vld [vmem:[#allocation2 + $0x120] sm:$0xf] }
 0x3f3   :  { %22527 = vst [vmem:[#allocation27_spill] sm:$0xff] %v20003_v18  ;;  %8031 = vmatprep.mubr.bf16.mxu0 %v19995_v52  ;;  %14925 = vmatpush3.bf16.msra.mxu0 %v17329_v29  ;;  %22530 = vst [vmem:[#allocation30_spill] sm:$0xff] %v20035_v59  ;;  %v20040_v18 = vcombine.low %v7167_v57, %v7168_v19  ;;  %v7447_v52 = vshll.u32 %v19992_v33, 16  ;;  %v13261_v19 = vcombine.low %v7217_v24, %v7170_v51 }
 0x3f4   :  { %15981 = vmatmul.mubr.bf16.vlgmr.msra.gmra.mrb[224].mxu1 %v20001_v6  ;;  %14926 = vmatprep.subr.bf16.mxu0 %v17330_v1  ;;  %22532 = vst [vmem:[#allocation32_spill] sm:$0xff] %v20048_v49  ;;  %v13262_v57 = vcombine.low %v7218_v28, %v20030_v62  ;;  %v20057_v33 = vsel %vm1969_vm10, %v7694_v40, %v7695_v17  ;;  %v17338_v28 = vld [vmem:[%s22394_s1 + $0x18] sm:$0xff]  }
 0x3f5   :  { %16013 = vmatpush3.bf16.msra.mxu1 %v19875_v3  ;;  %v14456_v10 = vpop.f32.mrb[152].mxu0  ;;  %15984 = vmatprep.mubr.bf16.mxu1 %v20007_v46  ;;  %v17335_v3 = vld [vmem:[%s22394_s1 + $0x10] sm:$0xff]   ;;  %22531 = vst [vmem:[#allocation31_spill] sm:$0xff] %v20040_v18  ;;  %22534 = vst [vmem:[#allocation34_spill] sm:$0xff] %v20057_v33  ;;  %v7449_v40 = vrot.slane %v7447_v52, 1  ;;  %v7454_v24 = vshll.u32 %v20040_v18, 16 }
 0x3f6   :  { %v14457_v29 = vpop.f32.mrb[153].mxu0  ;;  %16014 = vmatprep.subr.bf16.mxu1 %v17272_v2  ;;  %v7701_v52 = vrot.slane %v20059_v13, 1 }
 0x3f7   :  { %v20032_v1 = vadd.f32 %v14457_v29, %v14456_v10  ;;  %v14459_v11 = vpop.f32.mrb[154].mxu0  ;;  %14927 = vmatpush3.bf16.msra.mxu0 %v17332_v53  ;;  %v17336_v10 = vld [vmem:[%s22394_s1 + $0x58] sm:$0xff]   ;;  %v20052_v53 = vld [vmem:[#allocation2 + $0x128] ss:$0 sps:$4 sm:$0x11]   ;;  %v17340_v29 = vld [vmem:[%s22394_s1 + $0x60] sm:$0xff]  }
 0x3f8   :  { %v14460_v56 = vpop.f32.mrb[155].mxu0  ;;  %14928 = vmatprep.subr.bf16.mxu0 %v17334_v4  ;;  %v7445_v4 = vor.u32 %v7444_v22, %v7440_v0  ;;  %v17293_v0 = vld [vmem:[%s22394_s1 + $0xa0] sm:$0xff]   ;;  %v7456_v7 = vrot.slane %v7454_v24, 1  ;;  %v17300_v24 = vld [vmem:[%s22394_s1 + $0xa8] sm:$0xff]  }
 0x3f9   :  { %22529 = vst [vmem:[#allocation29_spill] sm:$0xff] %v20032_v1  ;;  %16015 = vmatpush3.bf16.msra.mxu1 %v17272_v2  ;;  %v20050_v47 = vadd.f32 %v14460_v56, %v14459_v11  ;;  %v20065_v11 = vld [vmem:[#allocation2 + $0x13c] sm:$0xf]  ;;  %v7219_v2 = vld [vmem:[#allocation2 + $0x138] sm:$0xe]  ;;  %v7698_v56 = vrot.slane %v20052_v53, 1 }
 0x3fa   :  { %8032 = vmatmul.mubr.bf16.gmra.mrb[4].mxu0 %v19955_v44  ;;  %16016 = vmatprep.subr.bf16.mxu1 %v17279_v63  ;;  %v20082_v1 = vld [vmem:[#allocation2 + $0x148] sm:$0xf]  ;;  %v20094_v36 = vsel %vm1680_vm9, %v7445_v4, %v7449_v40 }
 0x3fb   :  { %22533 = vst [vmem:[#allocation33_spill] sm:$0xff] %v20050_v47  ;;  %8039 = vmatprep.mubr.bf16.mxu0 %v20035_v59  ;;  %14929 = vmatpush3.bf16.msra.mxu0 %v17335_v3  ;;  %v7697_v3 = vrot.slane %v13261_v19, 1  ;;  %v7700_v47 = vrot.slane %v13262_v57, 1  ;;  %v7220_v59 = vld [vmem:[#allocation2 + $0x144] sm:$0xe]  ;;  %v20086_v19 = vcombine.low %v7169_v54, %v7170_v51  ;;  %22537 = vst [vmem:[#allocation37_spill] sm:$0xff] %v20094_v36 }
 0x3fc   :  { %15985 = vmatmul.mubr.bf16.gmra.mrb[228].mxu1 %v20048_v49  ;;  %14930 = vmatprep.subr.bf16.mxu0 %v17336_v10  ;;  %v13263_v10 = vcombine.low %v7219_v2, %v20065_v11  ;;  %v17341_v57 = vld [vmem:[%s22394_s1 + $0x20] sm:$0xff]   ;;  %v7452_v2 = vshrl.u32 %v20040_v18, 16  ;;  %v17342_v51 = vld [vmem:[%s22394_s1 + $0x68] sm:$0xff]  }
 0x3fd   :  { %v14462_v17 = vpop.f32.mrb[156].mxu0  ;;  %15988 = vmatprep.mubr.bf16.mxu1 %v20057_v33  ;;  %16017 = vmatpush3.bf16.msra.mxu1 %v17279_v63  ;;  %22536 = vst [vmem:[#allocation36_spill] sm:$0xff] %v20086_v19  ;;  %v20088_v63 = vld [vmem:[#allocation2 + $0x140] ss:$0 sps:$4 sm:$0x11]   ;;  %v20109_v4 = vsel %vm1969_vm10, %v7700_v47, %v7701_v52  ;;  %v17346_v52 = vld [vmem:[%s22394_s1 + $0x70] sm:$0xff]  }
 0x3fe   :  { %v14463_v22 = vpop.f32.mrb[157].mxu0  ;;  %16018 = vmatprep.subr.bf16.mxu1 %v17286_v26  ;;  %22540 = vst [vmem:[#allocation40_spill] sm:$0xff] %v20109_v4  ;;  %v7703_v40 = vrot.slane %v13263_v10, 1  ;;  %v7171_v47 = vld [vmem:[#allocation2 + $0x12c] sm:$0xf] }
 0x3ff   :  { %v20084_v44 = vadd.f32 %v14463_v22, %v14462_v17  ;;  %v14465_v34 = vpop.f32.mrb[158].mxu0  ;;  %14931 = vmatpush3.bf16.msra.mxu0 %v17338_v28  ;;  %v7459_v17 = vshll.u32 %v20012_v39, 16  ;;  %v20102_v28 = vsel %vm1969_vm10, %v7697_v3, %v7698_v56  ;;  %v13264_v22 = vcombine.low %v7220_v59, %v20082_v1  ;;  %v20111_v39 = vld [vmem:[#allocation2 + $0x14c] ss:$0 sps:$4 sm:$0x11]  }
 0x400   :  { %v14466_v5 = vpop.f32.mrb[159].mxu0  ;;  %14932 = vmatprep.subr.bf16.mxu0 %v17340_v29  ;;  %22538 = vst [vmem:[#allocation38_spill] sm:$0xff] %v20102_v28  ;;  %v7704_v29 = vrot.slane %v20088_v63, 1  ;;  %v7221_v59 = vld [vmem:[#allocation2 + $0x150] sm:$0xe]  ;;  %v7466_v56 = vshll.u32 %v20086_v19, 16 }
 0x401   :  { %22535 = vst [vmem:[#allocation35_spill] sm:$0xff] %v20084_v44  ;;  %v20104_v54 = vadd.f32 %v14466_v5, %v14465_v34  ;;  %16019 = vmatpush3.bf16.msra.mxu1 %v17286_v26  ;;  %v20118_v5 = vld [vmem:[#allocation2 + $0x154] sm:$0xf]  ;;  %v17344_v34 = vld [vmem:[%s22394_s1 + $0x28] sm:$0xff]   ;;  %v7457_v26 = vor.u32 %v7456_v7, %v7452_v2  ;;  %v7461_v3 = vrot.slane %v7459_v17, 1  ;;  %v7707_v7 = vrot.slane %v20111_v39, 1 }
 0x402   :  { %8040 = vmatmul.mubr.bf16.gmra.mrb[8].mxu0 %v19969_v41  ;;  %16020 = vmatprep.subr.bf16.mxu1 %v17293_v0  ;;  %v13265_v2 = vcombine.low %v7221_v59, %v20118_v5  ;;  %v20134_v17 = vld [vmem:[#allocation2 + $0x160] sm:$0xf]  ;;  %v20137_v41 = vcombine.low %v7171_v47, %v20030_v62  ;;  %v17347_v59 = vld [vmem:[%s22394_s1 + $0x30] sm:$0xff]   ;;  %v7464_v62 = vshrl.u32 %v20086_v19, 16  ;;  %v7468_v47 = vrot.slane %v7466_v56, 1 }
 0x403   :  { %22539 = vst [vmem:[#allocation39_spill] sm:$0xff] %v20104_v54  ;;  %8047 = vmatprep.mubr.bf16.mxu0 %v20094_v36  ;;  %14933 = vmatpush3.bf16.msra.mxu0 %v17341_v57  ;;  %v7706_v57 = vrot.slane %v13264_v22, 1  ;;  %v17307_v54 = vld [vmem:[%s22394_s1 + $0xb0] sm:$0xff]   ;;  %v20148_v45 = vsel %vm1680_vm9, %v7457_v26, %v7461_v3  ;;  %v20161_v56 = vld [vmem:[#allocation2 + $0x164] ss:$0 sps:$4 sm:$0x11]  }
 0x404   :  { %15989 = vmatmul.mubr.bf16.gmra.mrb[232].mxu1 %v20102_v28  ;;  %14934 = vmatprep.subr.bf16.mxu0 %v17342_v51  ;;  %v7222_v51 = vld [vmem:[#allocation2 + $0x15c] sm:$0xe]  ;;  %22541 = vst [vmem:[#allocation41_spill] sm:$0xff] %v20137_v41  ;;  %22543 = vst [vmem:[#allocation43_spill] sm:$0xff] %v20148_v45 }
 0x405   :  { %v14508_v10 = vpop.f32.mrb[160].mxu0  ;;  %15992 = vmatprep.mubr.bf16.mxu1 %v20109_v4  ;;  %16021 = vmatpush3.bf16.msra.mxu1 %v17293_v0  ;;  %v20140_v0 = vsel %vm1969_vm10, %v7703_v40, %v7704_v29  ;;  %v17348_v40 = vld [vmem:[%s22394_s1 + $0x78] sm:$0xff]   ;;  %v13266_v50 = vcombine.low %v7222_v51, %v20134_v17  ;;  %v20159_v3 = vsel %vm1969_vm10, %v7706_v57, %v7707_v7 }
 0x406   :  { %v14509_v44 = vpop.f32.mrb[161].mxu0  ;;  %16022 = vmatprep.subr.bf16.mxu1 %v17300_v24  ;;  %22542 = vst [vmem:[#allocation42_spill] sm:$0xff] %v20140_v0  ;;  %22544 = vst [vmem:[#allocation44_spill] sm:$0xff] %v20159_v3  ;;  %v7469_v57 = vor.u32 %v7468_v47, %v7464_v62  ;;  %v7223_v62 = vld [vmem:[#allocation2 + $0x168] sm:$0xe] }
 0x407   :  { %v14644_v36 = vpop.f32.mrb[160].mxu1  ;;  %v14510_v8 = vadd.f32 %v14509_v44, %v14508_v10  ;;  %v14511_v22 = vpop.f32.mrb[162].mxu0  ;;  %14935 = vmatpush3.bf16.msra.mxu0 %v17344_v34  ;;  %v7471_v44 = vshll.u32 %v20052_v53, 16  ;;  %v7709_v53 = vrot.slane %v13265_v2, 1  ;;  %v7478_v2 = vshll.u32 %v20137_v41, 16 }
 0x408   :  { %v14645_v58 = vpop.f32.mrb[161].mxu1  ;;  %v14512_v16 = vpop.f32.mrb[163].mxu0  ;;  %14936 = vmatprep.subr.bf16.mxu0 %v17346_v52  ;;  %v7173_v52 = vld [vmem:[#allocation2 + $0x138] sm:$0xf] }
 0x409   :  { %v14646_v29 = vadd.f32 %v14645_v58, %v14644_v36  ;;  %v14647_v34 = vpop.f32.mrb[162].mxu1  ;;  %v14513_v10 = vadd.f32 %v14512_v16, %v14511_v22  ;;  %16023 = vmatpush3.bf16.msra.mxu1 %v17300_v24  ;;  %v16415_v4 = vadd.f32 %v14510_v8, %v19504_v12  ;;  %v17314_v36 = vld [vmem:[%s22394_s1 + $0xb8] sm:$0xff]   ;;  %v7710_v58 = vrot.slane %v20142_v20, 1 }
 0x40a   :  { %v14648_v26 = vpop.f32.mrb[163].mxu1  ;;  %8048 = vmatmul.mubr.bf16.gmra.mrb[12].mxu0 %v19990_v61  ;;  %16024 = vmatprep.subr.bf16.mxu1 %v17307_v54  ;;  %v17350_v12 = vld [vmem:[%s22394_s1 + $0x38] sm:$0xff]   ;;  %v7473_v7 = vrot.slane %v7471_v44, 1  ;;  %v7712_v22 = vrot.slane %v13266_v50, 1  ;;  %v20186_v47 = vcombine.low %v7173_v52, %v20065_v11  ;;  %v7483_v11 = vshll.u32 %v20059_v13, 16 }
 0x40b   :  { %v14649_v16 = vadd.f32 %v14648_v26, %v14647_v34  ;;  %8055 = vmatprep.mubr.bf16.mxu0 %v20148_v45  ;;  %14937 = vmatpush3.bf16.msra.mxu0 %v17347_v59  ;;  %v20171_v8 = vadd.f32 %v16415_v4, %v14646_v29  ;;  %v16421_v24 = vadd.f32 %v14513_v10, %v19515_v15  ;;  %v17318_v4 = vld [vmem:[%s22394_s1 + $0x1c0] sm:$0xff]   ;;  %v7713_v29 = vrot.slane %v20161_v56, 1  ;;  %v20183_v34 = vld [vmem:[#allocation2 + $0x16c] sm:$0xf]  ;;  %v20191_v10 = vld [vmem:[#allocation2 + $0x178] sm:$0xf] }
 0x40c   :  { %15993 = vmatmul.mubr.bf16.gmra.mrb[236].mxu1 %v20140_v0  ;;  %14938 = vmatprep.subr.bf16.mxu0 %v17348_v40  ;;  %v20189_v50 = vsel %vm1969_vm10, %v7709_v53, %v7710_v58  ;;  %v7224_v26 = vld [vmem:[#allocation2 + $0x174] sm:$0xe]  ;;  %v7480_v45 = vrot.slane %v7478_v2, 1  ;;  %v20198_v53 = vld [vmem:[#allocation2 + $0x170] ss:$0 sps:$4 sm:$0x11]   ;;  %v13267_v58 = vcombine.low %v7223_v62, %v20183_v34 }
 0x40d   :  { %22545 = vst [vmem:[#allocation45_spill] sm:$0xff] %v20171_v8  ;;  %v14514_v51 = vpop.f32.mrb[164].mxu0  ;;  %15996 = vmatprep.mubr.bf16.mxu1 %v20159_v3  ;;  %16025 = vmatpush3.bf16.msra.mxu1 %v17307_v54  ;;  %v20180_v59 = vadd.f32 %v16421_v24, %v14649_v16  ;;  %22547 = vst [vmem:[#allocation47_spill] sm:$0xff] %v20189_v50  ;;  %v7476_v8 = vshrl.u32 %v20137_v41, 16  ;;  %v13268_v13 = vcombine.low %v7224_v26, %v20191_v10  ;;  %v7225_v62 = vld [vmem:[#allocation2 + $0x180] sm:$0xe] }
 0x40e   :  { %v14515_v15 = vpop.f32.mrb[165].mxu0  ;;  %16026 = vmatprep.subr.bf16.mxu1 %v17314_v36 }
 0x40f   :  { %22546 = vst [vmem:[#allocation46_spill] sm:$0xff] %v20180_v59  ;;  %v14650_v44 = vpop.f32.mrb[164].mxu1  ;;  %v14516_v40 = vadd.f32 %v14515_v15, %v14514_v51  ;;  %v14517_v54 = vpop.f32.mrb[166].mxu0  ;;  %14939 = vmatpush3.bf16.msra.mxu0 %v17350_v12  ;;  %v20194_v59 = vsel %vm1680_vm9, %v7469_v57, %v7473_v7  ;;  %v20204_v57 = vsel %vm1969_vm10, %v7712_v22, %v7713_v29  ;;  %v20206_v7 = vld [vmem:[#allocation2 + $0x17c] ss:$0 sps:$4 sm:$0x11]  }
 0x410   :  { %v14651_v16 = vpop.f32.mrb[165].mxu1  ;;  %v14518_v24 = vpop.f32.mrb[167].mxu0  ;;  %22548 = vst [vmem:[#allocation48_spill] sm:$0xff] %v20194_v59  ;;  %22549 = vst [vmem:[#allocation49_spill] sm:$0xff] %v20204_v57  ;;  %v7481_v22 = vor.u32 %v7480_v45, %v7476_v8  ;;  %v7485_v29 = vrot.slane %v7483_v11, 1 }
 0x411   :  { %v14652_v52 = vadd.f32 %v14651_v16, %v14650_v44  ;;  %v14653_v51 = vpop.f32.mrb[166].mxu1  ;;  %v14519_v15 = vadd.f32 %v14518_v24, %v14517_v54  ;;  %16027 = vmatpush3.bf16.msra.mxu1 %v17314_v36  ;;  %v16412_v12 = vadd.f32 %v14516_v40, %v19537_v27  ;;  %v7175_v44 = vld [vmem:[#allocation2 + $0x144] sm:$0xf]  ;;  %v7490_v40 = vshll.u32 %v20186_v47, 16 }
 0x412   :  { %v14654_v61 = vpop.f32.mrb[167].mxu1  ;;  %8056 = vmatmul.mubr.bf16.gmra.mrb[16].mxu0 %v20040_v18  ;;  %15060 = vmatprep.subr.bf16.mxu1 %v17318_v4  ;;  %v20214_v27 = vld [vmem:[#allocation2 + $0x184] sm:$0xf]  ;;  %v7716_v4 = vrot.slane %v20198_v53, 1 }
 0x413   :  { %v14655_v2 = vadd.f32 %v14654_v61, %v14653_v51  ;;  %8063 = vmatprep.mubr.bf16.mxu0 %v20194_v59  ;;  %v20210_v54 = vadd.f32 %v16412_v12, %v14652_v52  ;;  %v16418_v36 = vadd.f32 %v14519_v15, %v19545_v23  ;;  %v7715_v61 = vrot.slane %v13267_v58, 1  ;;  %v20222_v51 = vld [vmem:[#allocation2 + $0x188] ss:$0 sps:$4 sm:$0x11]   ;;  %v20228_v59 = vld [vmem:[#allocation2 + $0x190] sm:$0xf] }
 0x414   :  { %15997 = vmatmul.mubr.bf16.gmra.mrb[240].mxu1 %v20189_v50  ;;  %v7718_v52 = vrot.slane %v13268_v13, 1  ;;  %v7719_v23 = vrot.slane %v20206_v7, 1  ;;  %v20225_v15 = vcombine.low %v7175_v44, %v20082_v1  ;;  %v13269_v12 = vcombine.low %v7225_v62, %v20214_v27  ;;  %v7226_v58 = vld [vmem:[#allocation2 + $0x18c] sm:$0xe] }
 0x415   :  { %22550 = vst [vmem:[#allocation50_spill] sm:$0xff] %v20210_v54  ;;  %v14520_v16 = vpop.f32.mrb[168].mxu0  ;;  %16000 = vmatprep.mubr.bf16.mxu1 %v20204_v57  ;;  %v20219_v26 = vadd.f32 %v16418_v36, %v14655_v2  ;;  %v20231_v36 = vsel %vm1680_vm9, %v7481_v22, %v7485_v29  ;;  %v7488_v13 = vshrl.u32 %v20186_v47, 16  ;;  %v7495_v54 = vshll.u32 %v20088_v63, 16 }
 0x416   :  { %v14521_v24 = vpop.f32.mrb[169].mxu0  ;;  %22552 = vst [vmem:[#allocation52_spill] sm:$0xff] %v20231_v36  ;;  %v20241_v50 = vsel %vm1969_vm10, %v7718_v52, %v7719_v23  ;;  %v7722_v22 = vrot.slane %v20222_v51, 1  ;;  %v20244_v29 = vld [vmem:[#allocation2 + $0x194] ss:$0 sps:$4 sm:$0x11]   ;;  %v13270_v63 = vcombine.low %v7226_v58, %v20228_v59 }
 0x417   :  { %22551 = vst [vmem:[#allocation51_spill] sm:$0xff] %v20219_v26  ;;  %v14656_v45 = vpop.f32.mrb[168].mxu1  ;;  %v14522_v8 = vadd.f32 %v14521_v24, %v14520_v16  ;;  %v14523_v11 = vpop.f32.mrb[170].mxu0  ;;  %v7492_v26 = vrot.slane %v7490_v40, 1  ;;  %v20236_v16 = vsel %vm1969_vm10, %v7715_v61, %v7716_v4  ;;  %22554 = vst [vmem:[#allocation54_spill] sm:$0xff] %v20241_v50  ;;  %v7721_v40 = vrot.slane %v13269_v12, 1 }
 0x418   :  { %v14657_v18 = vpop.f32.mrb[169].mxu1  ;;  %v14524_v2 = vpop.f32.mrb[171].mxu0  ;;  %22553 = vst [vmem:[#allocation53_spill] sm:$0xff] %v20236_v16  ;;  %v7177_v4 = vld [vmem:[#allocation2 + $0x150] sm:$0xf]  ;;  %v7497_v52 = vrot.slane %v7495_v54, 1 }
 0x419   :  { %v14658_v1 = vadd.f32 %v14657_v18, %v14656_v45  ;;  %v14659_v44 = vpop.f32.mrb[170].mxu1  ;;  %v14525_v24 = vadd.f32 %v14524_v2, %v14523_v11  ;;  %v16427_v62 = vadd.f32 %v14522_v8, %v19564_v60  ;;  %v7493_v45 = vor.u32 %v7492_v26, %v7488_v13  ;;  %v7227_v11 = vld [vmem:[#allocation2 + $0x198] sm:$0xe] }
 0x41a   :  { %v14660_v57 = vpop.f32.mrb[171].mxu1  ;;  %8064 = vmatmul.mubr.bf16.gmra.mrb[20].mxu0 %v20086_v19  ;;  %v7502_v23 = vshll.u32 %v20225_v15, 16  ;;  %v7724_v12 = vrot.slane %v13270_v63, 1  ;;  %v7725_v2 = vrot.slane %v20244_v29, 1  ;;  %v20263_v54 = vsel %vm1969_vm10, %v7721_v40, %v7722_v22 }
 0x41b   :  { %v14661_v18 = vadd.f32 %v14660_v57, %v14659_v44  ;;  %8071 = vmatprep.mubr.bf16.mxu0 %v20231_v36  ;;  %v20248_v61 = vadd.f32 %v16427_v62, %v14658_v1  ;;  %v16433_v60 = vadd.f32 %v14525_v24, %v19571_v31  ;;  %v20257_v1 = vld [vmem:[#allocation2 + $0x19c] sm:$0xf]  ;;  %v20260_v31 = vcombine.low %v7177_v4, %v20118_v5  ;;  %v7211_v62 = vld [vmem:[#allocation2 + $0xd8] sm:$0xe] }
 0x41c   :  { %16001 = vmatmul.mubr.bf16.gmra.mrb[244].mxu1 %v20236_v16  ;;  %22557 = vst [vmem:[#allocation57_spill] sm:$0xff] %v20263_v54  ;;  %v20265_v24 = vld [vmem:[#allocation2 + $0xdc] sm:$0xf]  ;;  %v20268_v63 = vsel %vm1680_vm9, %v7493_v45, %v7497_v52  ;;  %v7500_v36 = vshrl.u32 %v20225_v15, 16  ;;  %v7504_v19 = vrot.slane %v7502_v23, 1  ;;  %v7507_v5 = vshll.u32 %v20111_v39, 16 }
 0x41d   :  { %22555 = vst [vmem:[#allocation55_spill] sm:$0xff] %v20248_v61  ;;  %v14526_v8 = vpop.f32.mrb[172].mxu0  ;;  %16004 = vmatprep.mubr.bf16.mxu1 %v20241_v50  ;;  %v20254_v58 = vadd.f32 %v16433_v60, %v14661_v18  ;;  %22558 = vst [vmem:[#allocation58_spill] sm:$0xff] %v20268_v63  ;;  %v13271_v22 = vcombine.low %v7227_v11, %v20257_v1  ;;  %v20278_v45 = vsel %vm1969_vm10, %v7724_v12, %v7725_v2  ;;  %v20280_v52 = vld [vmem:[#allocation2 + $0xe0] ss:$0 sps:$4 sm:$0x11]  }
 0x41e   :  { %v14527_v57 = vpop.f32.mrb[173].mxu0  ;;  %22559 = vst [vmem:[#allocation59_spill] sm:$0xff] %v20278_v45  ;;  %v13255_v23 = vcombine.low %v7211_v62, %v20265_v24  ;;  %v7179_v11 = vld [vmem:[#allocation2 + $0x15c] sm:$0xf] }
 0x41f   :  { %22556 = vst [vmem:[#allocation56_spill] sm:$0xff] %v20254_v58  ;;  %v14662_v44 = vpop.f32.mrb[172].mxu1  ;;  %v14528_v26 = vadd.f32 %v14527_v57, %v14526_v8  ;;  %v14529_v13 = vpop.f32.mrb[174].mxu0  ;;  %v20272_v57 = vld [vmem:[#allocation2 + $0x1a0] ss:$0 sps:$4 sm:$0x11]  }
 0x420   :  { %v14663_v18 = vpop.f32.mrb[173].mxu1  ;;  %v14530_v60 = vpop.f32.mrb[175].mxu0  ;;  %v7727_v2 = vrot.slane %v13271_v22, 1  ;;  %v7728_v62 = vrot.slane %v20272_v57, 1  ;;  %v7512_v22 = vshrl.u32 %v20260_v31, 16 }
 0x421   :  { %v14664_v4 = vadd.f32 %v14663_v18, %v14662_v44  ;;  %v14665_v58 = vpop.f32.mrb[174].mxu1  ;;  %v14531_v8 = vadd.f32 %v14530_v60, %v14529_v13  ;;  %v16424_v40 = vadd.f32 %v14528_v26, %v19624_v21  ;;  %v7505_v21 = vor.u32 %v7504_v19, %v7500_v36 }
 0x422   :  { %v14666_v61 = vpop.f32.mrb[175].mxu1  ;;  %8072 = vmatmul.mubr.bf16.gmra.mrb[24].mxu0 %v20137_v41  ;;  %v7509_v26 = vrot.slane %v7507_v5, 1  ;;  %v7514_v18 = vshll.u32 %v20260_v31, 16  ;;  %v7679_v60 = vrot.slane %v13255_v23, 1 }
 0x423   :  { %v14667_v39 = vadd.f32 %v14666_v61, %v14665_v58  ;;  %8079 = vmatprep.mubr.bf16.mxu0 %v20268_v63  ;;  %v20284_v44 = vadd.f32 %v16424_v40, %v14664_v4  ;;  %v16430_v13 = vadd.f32 %v14531_v8, %v19632_v14  ;;  %v7680_v4 = vrot.slane %v20280_v52, 1 }
 0x424   :  { %16005 = vmatmul.mubr.bf16.gmra.mrb[248].mxu1 %v20263_v54  ;;  %v20295_v14 = vcombine.low %v7179_v11, %v20134_v17  ;;  %v20298_v63 = vsel %vm1680_vm9, %v7505_v21, %v7509_v26  ;;  %v7516_v41 = vrot.slane %v7514_v18, 1  ;;  %v7181_v18 = vld [vmem:[#allocation2 + $0x168] sm:$0xf] }
 0x425   :  { %v14532_v12 = vpop.f32.mrb[176].mxu0  ;;  %16008 = vmatprep.mubr.bf16.mxu1 %v20278_v45  ;;  %v20291_v61 = vadd.f32 %v16430_v13, %v14667_v39  ;;  %v7519_v39 = vshll.u32 %v20142_v20, 16 }
 0x426   :  { %v14533_v58 = vpop.f32.mrb[177].mxu0 }
 0x427   :  { %22560 = vst [vmem:[#allocation60_spill] sm:$0xff] %v20291_v61  ;;  %v14668_v8 = vpop.f32.mrb[176].mxu1  ;;  %v14534_v19 = vadd.f32 %v14533_v58, %v14532_v12  ;;  %v14535_v36 = vpop.f32.mrb[178].mxu0  ;;  %v20303_v61 = vsel %vm1969_vm10, %v7727_v2, %v7728_v62  ;;  %v7681_v58 = vsel %vm1969_vm10, %v7679_v60, %v7680_v4  ;;  %v7517_v2 = vor.u32 %v7516_v41, %v7512_v22 }
 0x428   :  { %v14669_v5 = vpop.f32.mrb[177].mxu1  ;;  %v14536_v40 = vpop.f32.mrb[179].mxu0  ;;  %22561 = vst [vmem:[#allocation61_spill] sm:$0xff] %v20303_v61  ;;  %v7521_v62 = vrot.slane %v7519_v39, 1  ;;  %v20317_v60 = vcombine.low %v7181_v18, %v20183_v34  ;;  %v7524_v41 = vshrl.u32 %v20295_v14, 16  ;;  %v7531_v39 = vshll.u32 %v20161_v56, 16 }
 0x429   :  { %v14670_v13 = vadd.f32 %v14669_v5, %v14668_v8  ;;  %v14671_v23 = vpop.f32.mrb[178].mxu1  ;;  %v14537_v17 = vadd.f32 %v14536_v40, %v14535_v36  ;;  %v16439_v11 = vadd.f32 %v14534_v19, %v19661_v35  ;;  %v7526_v8 = vshll.u32 %v20295_v14, 16  ;;  %v17319_v34 = vld [vmem:[%s22394_s1 + $0x180] sm:$0xff]  }
 0x42a   :  { %v14672_v12 = vpop.f32.mrb[179].mxu1  ;;  %8080 = vmatmul.mubr.bf16.gmra.mrb[28].mxu0 %v20186_v47  ;;  %22562 = vst [vmem:[#allocation62_spill] sm:$0xff] %v20317_v60 }
 0x42b   :  { %v14673_v21 = vadd.f32 %v14672_v12, %v14671_v23  ;;  %8087 = vmatprep.mubr.bf16.mxu0 %v20298_v63  ;;  %v20309_v26 = vadd.f32 %v16439_v11, %v14670_v13  ;;  %v16445_v20 = vadd.f32 %v14537_v17, %v19668_v43  ;;  %v20320_v23 = vsel %vm1680_vm9, %v7517_v2, %v7521_v62  ;;  %v7183_v62 = vld [vmem:[#allocation2 + $0x174] sm:$0xf] }
 0x42c   :  { %16009 = vmatmul.mubr.bf16.gmra.mrb[252].mxu1 %v20303_v61  ;;  %v7528_v22 = vrot.slane %v7526_v8, 1 }
 0x42d   :  { %v14538_v35 = vpop.f32.mrb[180].mxu0  ;;  %16028 = vmatprep.mubr.bf16.mxu1 %v7681_v58  ;;  %v20314_v19 = vadd.f32 %v16445_v20, %v14673_v21  ;;  %v17320_v20 = vld [vmem:[%s22394_s1 + $0x1c8] sm:$0xff]  }
 0x42e   :  { %v14539_v36 = vpop.f32.mrb[181].mxu0  ;;  %v7529_v8 = vor.u32 %v7528_v22, %v7524_v41 }
 0x42f   :  { %v14674_v4 = vpop.f32.mrb[180].mxu1  ;;  %v14540_v5 = vadd.f32 %v14539_v36, %v14538_v35  ;;  %v14541_v40 = vpop.f32.mrb[182].mxu0  ;;  %v7533_v35 = vrot.slane %v7531_v39, 1 }
 0x430   :  { %v14675_v13 = vpop.f32.mrb[181].mxu1  ;;  %v14542_v43 = vpop.f32.mrb[183].mxu0 }
 0x431   :  { %v14676_v17 = vadd.f32 %v14675_v13, %v14674_v4  ;;  %v14677_v11 = vpop.f32.mrb[182].mxu1  ;;  %v14543_v12 = vadd.f32 %v14542_v43, %v14541_v40  ;;  %v16436_v58 = vadd.f32 %v14540_v5, %v19693_v42  ;;  %v7538_v42 = vshll.u32 %v20317_v60, 16  ;;  %v17321_v4 = vld [vmem:[%s22394_s1 + $0x188] sm:$0xff]  }
 0x432   :  { %v14678_v21 = vpop.f32.mrb[183].mxu1  ;;  %8088 = vmatmul.mubr.bf16.gmra.mrb[32].mxu0 %v20225_v15 }
 0x433   :  { %v14679_v18 = vadd.f32 %v14678_v21, %v14677_v11  ;;  %8095 = vmatprep.mubr.bf16.mxu0 %v20320_v23  ;;  %v20333_v56 = vadd.f32 %v16436_v58, %v14676_v17  ;;  %v16442_v2 = vadd.f32 %v14543_v12, %v19705_v55  ;;  %v17322_v55 = vld [vmem:[%s22394_s1 + $0x1d0] sm:$0xff]   ;;  %v20351_v17 = vsel %vm1680_vm9, %v7529_v8, %v7533_v35 }
 0x434   :  { %16029 = vmatmul.mubr.bf16.vlgmr.msra.gmra.mrb[224].mxu1 %v19978_v48  ;;  %v20348_v48 = vcombine.low %v7183_v62, %v20191_v10  ;;  %v7536_v11 = vshrl.u32 %v20317_v60, 16  ;;  %v7543_v12 = vshll.u32 %v20198_v53, 16  ;;  %v17323_v10 = vld [vmem:[%s22394_s1 + $0x190] sm:$0xff]   ;;  %v17324_v62 = vld [vmem:[%s22394_s1 + $0x1d8] sm:$0xff]  }
 0x435   :  { %15061 = vmatpush3.bf16.msra.mxu1 %v17319_v34  ;;  %v14544_v36 = vpop.f32.mrb[184].mxu0  ;;  %16032 = vmatprep.mubr.bf16.mxu1 %v20001_v6  ;;  %v20342_v5 = vadd.f32 %v16442_v2, %v14679_v18  ;;  %v7540_v34 = vrot.slane %v7538_v42, 1  ;;  %v7185_v42 = vld [vmem:[#allocation2 + $0x180] sm:$0xf] }
 0x436   :  { %v14545_v40 = vpop.f32.mrb[185].mxu0  ;;  %15062 = vmatprep.subr.bf16.mxu1 %v17320_v20  ;;  %22563 = vst [vmem:[#allocation63_spill] sm:$0xff] %v20348_v48 }
 0x437   :  { %v14680_v13 = vpop.f32.mrb[184].mxu1  ;;  %v14546_v43 = vadd.f32 %v14545_v40, %v14544_v36  ;;  %v14547_v41 = vpop.f32.mrb[186].mxu0  ;;  %v7541_v36 = vor.u32 %v7540_v34, %v7536_v11 }
 0x438   :  { %v14681_v22 = vpop.f32.mrb[185].mxu1  ;;  %v14548_v39 = vpop.f32.mrb[187].mxu0 }
 0x439   :  { %v14682_v58 = vadd.f32 %v14681_v22, %v14680_v13  ;;  %v14683_v21 = vpop.f32.mrb[186].mxu1  ;;  %15063 = vmatpush3.bf16.msra.mxu1 %v17321_v4  ;;  %v14549_v20 = vadd.f32 %v14548_v39, %v14547_v41  ;;  %v16451_v18 = vadd.f32 %v14546_v43, %v19742_v38  ;;  %v7545_v38 = vrot.slane %v7543_v12, 1 }
 0x43a   :  { %v14684_v2 = vpop.f32.mrb[187].mxu1  ;;  %8096 = vmatmul.mubr.bf16.gmra.mrb[36].mxu0 %v20260_v31  ;;  %15064 = vmatprep.subr.bf16.mxu1 %v17322_v55  ;;  %v7550_v4 = vshll.u32 %v20348_v48, 16  ;;  %v17325_v55 = vld [vmem:[%s22394_s1 + $0x198] sm:$0xff]   ;;  %v20379_v41 = vcombine.low %v7185_v42, %v20214_v27  ;;  %v17327_v27 = vld [vmem:[%s22394_s1 + $0x1a0] sm:$0xff]   ;;  %v17331_v42 = vld [vmem:[%s22394_s1 + $0x1e8] sm:$0xff]  }
 0x43b   :  { %v14685_v8 = vadd.f32 %v14684_v2, %v14683_v21  ;;  %8103 = vmatprep.mubr.bf16.mxu0 %v20351_v17  ;;  %v20364_v53 = vadd.f32 %v16451_v18, %v14682_v58  ;;  %v16457_v35 = vadd.f32 %v14549_v20, %v19755_v32  ;;  %v17326_v32 = vld [vmem:[%s22394_s1 + $0x1e0] sm:$0xff]   ;;  %v20382_v58 = vsel %vm1680_vm9, %v7541_v36, %v7545_v38 }
 0x43c   :  { %16033 = vmatmul.mubr.bf16.gmra.mrb[228].mxu1 %v20007_v46  ;;  %22564 = vst [vmem:[#allocation64_spill] sm:$0xff] %v20379_v41  ;;  %v7548_v21 = vshrl.u32 %v20348_v48, 16  ;;  %v7552_v20 = vrot.slane %v7550_v4, 1  ;;  %v7187_v4 = vld [vmem:[#allocation2 + $0x18c] sm:$0xf]  ;;  %v22603_v46 = vld [vmem:[#allocation45_spill] sm:$0xff] }
 0x43d   :  { %v14550_v40 = vpop.f32.mrb[188].mxu0  ;;  %16036 = vmatprep.mubr.bf16.mxu1 %v20048_v49  ;;  %15065 = vmatpush3.bf16.msra.mxu1 %v17323_v10  ;;  %v20373_v13 = vadd.f32 %v16457_v35, %v14685_v8  ;;  %v7555_v10 = vshll.u32 %v20206_v7, 16  ;;  %v20581_v49 = vld [vmem:[%s22399_s6] ss:$0 sm:$0xff] }
 0x43e   :  { %v14551_v43 = vpop.f32.mrb[189].mxu0  ;;  %15066 = vmatprep.subr.bf16.mxu1 %v17324_v62 }
 0x43f   :  { %v14686_v22 = vpop.f32.mrb[188].mxu1  ;;  %v14552_v39 = vadd.f32 %v14551_v43, %v14550_v40  ;;  %v14553_v11 = vpop.f32.mrb[190].mxu0  ;;  %v7553_v40 = vor.u32 %v7552_v20, %v7548_v21 }
 0x440   :  { %v14687_v34 = vpop.f32.mrb[189].mxu1  ;;  %v14554_v12 = vpop.f32.mrb[191].mxu0 }
 0x441   :  { %v14688_v18 = vadd.f32 %v14687_v34, %v14686_v22  ;;  %v14689_v2 = vpop.f32.mrb[190].mxu1  ;;  %v14555_v62 = vadd.f32 %v14554_v12, %v14553_v11  ;;  %15067 = vmatpush3.bf16.msra.mxu1 %v17325_v55  ;;  %v16448_v8 = vadd.f32 %v14552_v39, %v19789_v9  ;;  %v7557_v9 = vrot.slane %v7555_v10, 1 }
 0x442   :  { %v14690_v35 = vpop.f32.mrb[191].mxu1  ;;  %8104 = vmatmul.mubr.bf16.gmra.mrb[40].mxu0 %v20295_v14  ;;  %15068 = vmatprep.subr.bf16.mxu1 %v17326_v32  ;;  %v7562_v55 = vshll.u32 %v20379_v41, 16  ;;  %v17333_v32 = vld [vmem:[%s22394_s1 + $0x1a8] sm:$0xff]   ;;  %v20410_v11 = vcombine.low %v7187_v4, %v20228_v59  ;;  %v17339_v59 = vld [vmem:[%s22394_s1 + $0x1b0] sm:$0xff]   ;;  %v17343_v4 = vld [vmem:[%s22394_s1 + $0x1f8] sm:$0xff]  }
 0x443   :  { %v14691_v36 = vadd.f32 %v14690_v35, %v14689_v2  ;;  %8111 = vmatprep.mubr.bf16.mxu0 %v20382_v58  ;;  %v20395_v7 = vadd.f32 %v16448_v8, %v14688_v18  ;;  %v16454_v38 = vadd.f32 %v14555_v62, %v19801_v37  ;;  %v17337_v37 = vld [vmem:[%s22394_s1 + $0x1f0] sm:$0xff]   ;;  %v20413_v18 = vsel %vm1680_vm9, %v7553_v40, %v7557_v9 }
 0x444   :  { %16037 = vmatmul.mubr.bf16.gmra.mrb[232].mxu1 %v20057_v33  ;;  %22565 = vst [vmem:[#allocation65_spill] sm:$0xff] %v20410_v11  ;;  %22566 = vst [vmem:[#allocation66_spill] sm:$0xff] %v20413_v18  ;;  %v7560_v2 = vshrl.u32 %v20379_v41, 16  ;;  %v7564_v62 = vrot.slane %v7562_v55, 1  ;;  %v7189_v55 = vld [vmem:[#allocation2 + $0x198] sm:$0xf] }
 0x445   :  { %v14556_v43 = vpop.f32.mrb[192].mxu0  ;;  %16040 = vmatprep.mubr.bf16.mxu1 %v20102_v28  ;;  %15069 = vmatpush3.bf16.msra.mxu1 %v17327_v27  ;;  %v20404_v22 = vadd.f32 %v16454_v38, %v14691_v36  ;;  %v7567_v27 = vshll.u32 %v20222_v51, 16 }
 0x446   :  { %v14557_v39 = vpop.f32.mrb[193].mxu0  ;;  %15070 = vmatprep.subr.bf16.mxu1 %v17331_v42 }
 0x447   :  { %v14692_v34 = vpop.f32.mrb[192].mxu1  ;;  %v14559_v12 = vpop.f32.mrb[194].mxu0  ;;  %v14558_v21 = vadd.f32 %v14557_v39, %v14556_v43  ;;  %v22567_v43 = vld [vmem:[#allocation40_spill] sm:$0xff]  ;;  %v7574_v39 = vshll.u32 %v20410_v11, 16 }
 0x448   :  { %v14693_v20 = vpop.f32.mrb[193].mxu1  ;;  %v14560_v10 = vpop.f32.mrb[195].mxu0 }
 0x449   :  { %v14694_v8 = vadd.f32 %v14693_v20, %v14692_v34  ;;  %v14695_v35 = vpop.f32.mrb[194].mxu1  ;;  %15071 = vmatpush3.bf16.msra.mxu1 %v17333_v32  ;;  %v16463_v42 = vadd.f32 %v14558_v21, %v19839_v30  ;;  %v14561_v36 = vadd.f32 %v14560_v10, %v14559_v12  ;;  %v7565_v30 = vor.u32 %v7564_v62, %v7560_v2 }
 0x44a   :  { %v14696_v38 = vpop.f32.mrb[195].mxu1  ;;  %8112 = vmatmul.mubr.bf16.gmra.mrb[44].mxu0 %v20317_v60  ;;  %15072 = vmatprep.subr.bf16.mxu1 %v17337_v37  ;;  %v7569_v32 = vrot.slane %v7567_v27, 1  ;;  %v17345_v37 = vld [vmem:[%s22394_s1 + $0x1b8] sm:$0xff]   ;;  %v20443_v20 = vcombine.low %v7189_v55, %v20257_v1 }
 0x44b   :  { %v14697_v40 = vadd.f32 %v14696_v38, %v14695_v35  ;;  %8119 = vmatprep.mubr.bf16.mxu0 %v20413_v18  ;;  %v20426_v51 = vadd.f32 %v16463_v42, %v14694_v8  ;;  %v16469_v9 = vadd.f32 %v14561_v36, %v19850_v25  ;;  %v20440_v25 = vld [vmem:[%s22394_s1 + $0x200] sm:$0xff]   ;;  %v7576_v42 = vrot.slane %v7574_v39, 1 }
 0x44c   :  { %16041 = vmatmul.mubr.bf16.gmra.mrb[236].mxu1 %v22567_v43  ;;  %22568 = vst [vmem:[#allocation67_spill] sm:$0xff] %v20443_v20  ;;  %v20446_v35 = vsel %vm1680_vm9, %v7565_v30, %v7569_v32  ;;  %v7579_v36 = vshll.u32 %v20244_v29, 16  ;;  %v22571_v32 = vld [vmem:[#allocation11_spill] sm:$0xff] }
 0x44d   :  { %v14562_v34 = vpop.f32.mrb[196].mxu0  ;;  %16044 = vmatprep.mubr.bf16.mxu1 %v20140_v0  ;;  %15073 = vmatpush3.bf16.msra.mxu1 %v17339_v59  ;;  %v20435_v12 = vadd.f32 %v16469_v9, %v14697_v40  ;;  %22569 = vst [vmem:[#allocation68_spill] sm:$0xff] %v20446_v35  ;;  %v7572_v59 = vshrl.u32 %v20410_v11, 16  ;;  %v22570_v40 = vld [vmem:[#allocation12_spill] sm:$0xff] }
 0x44e   :  { %v14563_v21 = vpop.f32.mrb[197].mxu0  ;;  %15074 = vmatprep.subr.bf16.mxu1 %v17343_v4 }
 0x44f   :  { %v14698_v10 = vpop.f32.mrb[196].mxu1  ;;  %v14565_v2 = vpop.f32.mrb[198].mxu0  ;;  %v14564_v62 = vadd.f32 %v14563_v21, %v14562_v34  ;;  %v7157_v21 = vld [vmem:[#allocation2 + $0xd8] sm:$0xf]  ;;  %v7577_v29 = vor.u32 %v7576_v42, %v7572_v59  ;;  %v7584_v59 = vshrl.u32 %v20443_v20, 16 }
 0x450   :  { %v14699_v27 = vpop.f32.mrb[197].mxu1  ;;  %v14566_v8 = vpop.f32.mrb[199].mxu0 }
 0x451   :  { %v14700_v38 = vadd.f32 %v14699_v27, %v14698_v10  ;;  %v14701_v4 = vpop.f32.mrb[198].mxu1  ;;  %15075 = vmatpush3.bf16.msra.mxu1 %v17345_v37  ;;  %v16460_v9 = vadd.f32 %v14564_v62, %v22570_v40  ;;  %v14567_v1 = vadd.f32 %v14566_v8, %v14565_v2  ;;  %v7581_v37 = vrot.slane %v7579_v36, 1  ;;  %v22572_v62 = vld [vmem:[#allocation47_spill] sm:$0xff] }
 0x452   :  { %v14702_v55 = vpop.f32.mrb[199].mxu1  ;;  %8120 = vmatmul.mubr.bf16.gmra.mrb[48].mxu0 %v20348_v48  ;;  %16060 = vmatprep.subr.bf16.mxu1 %v20440_v25  ;;  %v7586_v10 = vshll.u32 %v20443_v20, 16  ;;  %v7591_v36 = vshll.u32 %v20272_v57, 16 }
 0x453   :  { %v14703_v34 = vadd.f32 %v14702_v55, %v14701_v4  ;;  %8127 = vmatprep.mubr.bf16.mxu0 %v20446_v35  ;;  %v20454_v30 = vadd.f32 %v16460_v9, %v14700_v38  ;;  %v16466_v39 = vadd.f32 %v14567_v1, %v22571_v32  ;;  %v20463_v4 = vcombine.low %v7157_v21, %v20265_v24 }
 0x454   :  { %16045 = vmatmul.mubr.bf16.gmra.mrb[240].mxu1 %v20159_v3  ;;  %v20466_v32 = vsel %vm1680_vm9, %v7577_v29, %v7581_v37  ;;  %v7588_v42 = vrot.slane %v7586_v10, 1  ;;  %v22575_v29 = vld [vmem:[#allocation15_spill] sm:$0xff]  ;;  %v7593_v0 = vrot.slane %v7591_v36, 1 }
 0x455   :  { %v14568_v2 = vpop.f32.mrb[200].mxu0  ;;  %16048 = vmatprep.mubr.bf16.mxu1 %v22572_v62  ;;  %v20460_v27 = vadd.f32 %v16466_v39, %v14703_v34  ;;  %22573 = vst [vmem:[#allocation12_spill] sm:$0xff] %v20466_v32  ;;  %v22574_v39 = vld [vmem:[#allocation13_spill] sm:$0xff]  ;;  %v7394_v57 = vshll.u32 %v20463_v4, 16 }
 0x456   :  { %v14569_v8 = vpop.f32.mrb[201].mxu0  ;;  %v7589_v10 = vor.u32 %v7588_v42, %v7584_v59  ;;  %v7399_v42 = vshll.u32 %v20280_v52, 16  ;;  %v171_v52 = vld [vmem:[#allocation2 + $0x1a4] sm:$0x1] }
 0x457   :  { %v14704_v38 = vpop.f32.mrb[200].mxu1  ;;  %v14571_v40 = vpop.f32.mrb[202].mxu0  ;;  %v14570_v9 = vadd.f32 %v14569_v8, %v14568_v2  ;;  %v22576_v8 = vld [vmem:[#allocation49_spill] sm:$0xff]  ;;  %v7396_v59 = vrot.slane %v7394_v57, 1 }
 0x458   :  { %v14705_v1 = vpop.f32.mrb[201].mxu1  ;;  %v14572_v55 = vpop.f32.mrb[203].mxu0 }
 0x459   :  { %v14706_v61 = vadd.f32 %v14705_v1, %v14704_v38  ;;  %v14707_v34 = vpop.f32.mrb[202].mxu1  ;;  %v16475_v62 = vadd.f32 %v14570_v9, %v22574_v39  ;;  %v14573_v3 = vadd.f32 %v14572_v55, %v14571_v40 }
 0x45a   :  { %v14708_v24 = vpop.f32.mrb[203].mxu1  ;;  %8128 = vmatmul.mubr.bf16.gmra.mrb[52].mxu0 %v20379_v41 }
 0x45b   :  { %v14709_v21 = vadd.f32 %v14708_v24, %v14707_v34  ;;  %8135 = vmatprep.mubr.bf16.mxu0 %v20466_v32  ;;  %v20473_v2 = vadd.f32 %v16475_v62, %v14706_v61  ;;  %v16481_v37 = vadd.f32 %v14573_v3, %v22575_v29  ;;  %v20482_v62 = vsel %vm1680_vm9, %v7589_v10, %v7593_v0  ;;  %v22578_v29 = vld [vmem:[#allocation16_spill] sm:$0xff]  ;;  %v22579_v0 = vld [vmem:[#allocation18_spill] sm:$0xff] }
 0x45c   :  { %16049 = vmatmul.mubr.bf16.gmra.mrb[244].mxu1 %v22576_v8  ;;  %22577 = vst [vmem:[#allocation11_spill] sm:$0xff] %v20482_v62  ;;  %v7392_v3 = vshrl.u32 %v20463_v4, 16 }
 0x45d   :  { %v14574_v38 = vpop.f32.mrb[204].mxu0  ;;  %16052 = vmatprep.mubr.bf16.mxu1 %v20236_v16  ;;  %v20479_v40 = vadd.f32 %v16481_v37, %v14709_v21 }
 0x45e   :  { %v14575_v9 = vpop.f32.mrb[205].mxu0  ;;  %v7397_v57 = vor.u32 %v7396_v59, %v7392_v3 }
 0x45f   :  { %v14710_v1 = vpop.f32.mrb[204].mxu1  ;;  %v14577_v55 = vpop.f32.mrb[206].mxu0  ;;  %v14576_v34 = vadd.f32 %v14575_v9, %v14574_v38  ;;  %v7401_v9 = vrot.slane %v7399_v42, 1 }
 0x460   :  { %v14711_v39 = vpop.f32.mrb[205].mxu1  ;;  %v14578_v61 = vpop.f32.mrb[207].mxu0 }
 0x461   :  { %v14712_v36 = vadd.f32 %v14711_v39, %v14710_v1  ;;  %v14713_v24 = vpop.f32.mrb[206].mxu1  ;;  %v16472_v16 = vadd.f32 %v14576_v34, %v22578_v29  ;;  %v14579_v21 = vadd.f32 %v14578_v61, %v14577_v55  ;;  %v281_v1 = vld [vmem:[#allocation2 + $0x1ac] sm:$0x1]  ;;  %v172_v61 = vsel %vm17654_vm2, 0, %v171_v52 }
 0x462   :  { %v14714_v37 = vpop.f32.mrb[207].mxu1  ;;  %8136 = vmatmul.mubr.bf16.gmra.mrb[56].mxu0 %v20410_v11  ;;  %173 = vst [vmem:[#allocation2 + $0x1a4] sm:$0x1] %v172_v61  ;;  %v22583_v61 = vld [vmem:[#allocation22_spill] sm:$0xff]  ;;  %v22604_v11 = vld [vmem:[#allocation51_spill] sm:$0xff] }
 0x463   :  { %v14715_v8 = vadd.f32 %v14714_v37, %v14713_v24  ;;  %8143 = vmatprep.mubr.bf16.mxu0 %v20482_v62  ;;  %v20489_v38 = vadd.f32 %v16472_v16, %v14712_v36  ;;  %v16478_v10 = vadd.f32 %v14579_v21, %v22579_v0  ;;  %v282_v16 = vsel %vm17665_vm4, 0, %v281_v1  ;;  %v22588_v24 = vld [vmem:[#allocation17_spill] sm:$0xff] }
 0x464   :  { %16053 = vmatmul.mubr.bf16.gmra.mrb[248].mxu1 %v20241_v50  ;;  %283 = vst [vmem:[#allocation2 + $0x1ac] sm:$0x1] %v282_v16  ;;  %v7402_v37 = vsel %vm1680_vm9, %v7397_v57, %v7401_v9 }
 0x465   :  { %v14580_v39 = vpop.f32.mrb[208].mxu0  ;;  %16056 = vmatprep.mubr.bf16.mxu1 %v20263_v54  ;;  %v20494_v55 = vadd.f32 %v16478_v10, %v14715_v8  ;;  %v22582_v8 = vld [vmem:[#allocation19_spill] sm:$0xff] }
 0x466   :  { %v14581_v36 = vpop.f32.mrb[209].mxu0 }
 0x467   :  { %v14716_v29 = vpop.f32.mrb[208].mxu1  ;;  %v14583_v21 = vpop.f32.mrb[210].mxu0  ;;  %v14582_v3 = vadd.f32 %v14581_v36, %v14580_v39  ;;  %v22584_v36 = vld [vmem:[#allocation25_spill] sm:$0xff] }
 0x468   :  { %v14717_v59 = vpop.f32.mrb[209].mxu1  ;;  %v14584_v42 = vpop.f32.mrb[211].mxu0 }
 0x469   :  { %v14718_v0 = vadd.f32 %v14717_v59, %v14716_v29  ;;  %v14719_v54 = vpop.f32.mrb[210].mxu1  ;;  %v16487_v10 = vadd.f32 %v14582_v3, %v22582_v8  ;;  %v14585_v50 = vadd.f32 %v14584_v42, %v14583_v21 }
 0x46a   :  { %v14720_v34 = vpop.f32.mrb[211].mxu1  ;;  %8144 = vmatmul.mubr.bf16.gmra.mrb[60].mxu0 %v20443_v20 }
 0x46b   :  { %v14721_v52 = vadd.f32 %v14720_v34, %v14719_v54  ;;  %8489 = vmatprep.mubr.bf16.mxu0 %v7402_v37  ;;  %v20503_v1 = vadd.f32 %v16487_v10, %v14718_v0  ;;  %v16493_v16 = vadd.f32 %v14585_v50, %v22583_v61  ;;  %v22585_v34 = vld [vmem:[#allocation23_spill] sm:$0xff]  ;;  %v17351_v50 = vld [vmem:[%s22394_s1 + $0x208] sm:$0xff]   ;;  %v22586_v61 = vld [vmem:[#allocation21_spill] sm:$0xff] }
 0x46c   :  { %16057 = vmatmul.mubr.bf16.gmra.mrb[252].mxu1 %v20278_v45 }
 0x46d   :  { %v14586_v39 = vpop.f32.mrb[212].mxu0  ;;  %9003 = vmatprep.mubr.bf16.mxu1 %v22584_v36  ;;  %v20508_v57 = vadd.f32 %v16493_v16, %v14721_v52 }
 0x46e   :  { %v14587_v9 = vpop.f32.mrb[213].mxu0 }
 0x46f   :  { %v14722_v29 = vpop.f32.mrb[212].mxu1  ;;  %v14589_v3 = vpop.f32.mrb[214].mxu0  ;;  %v14588_v21 = vadd.f32 %v14587_v9, %v14586_v39  ;;  %v22587_v39 = vld [vmem:[#allocation27_spill] sm:$0xff] }
 0x470   :  { %v14723_v59 = vpop.f32.mrb[213].mxu1  ;;  %v14590_v42 = vpop.f32.mrb[215].mxu0 }
 0x471   :  { %v14724_v8 = vadd.f32 %v14723_v59, %v14722_v29  ;;  %v14725_v54 = vpop.f32.mrb[214].mxu1  ;;  %v16484_v37 = vadd.f32 %v14588_v21, %v22585_v34  ;;  %v14591_v0 = vadd.f32 %v14590_v42, %v14589_v3  ;;  %v22589_v3 = vld [vmem:[#allocation30_spill] sm:$0xff]  ;;  %v17352_v59 = vld [vmem:[%s22394_s1 + $0x210] sm:$0xff]  }
 0x472   :  { %v14726_v10 = vpop.f32.mrb[215].mxu1  ;;  %8490 = vmatmul.mubr.bf16.vlgmr.msra.gmra.mrb[64].mxu0 %v20463_v4 }
 0x473   :  { %v14727_v52 = vadd.f32 %v14726_v10, %v14725_v54  ;;  %8497 = vmatprep.mubr.bf16.mxu0 %v22586_v61  ;;  %v20516_v16 = vadd.f32 %v16484_v37, %v14724_v8  ;;  %v16490_v9 = vadd.f32 %v14591_v0, %v22587_v39 }
 0x474   :  { %9004 = vmatmul.mubr.bf16.vlgmr.msra.gmra.mrb[0].mxu1 %v22588_v24 }
 0x475   :  { %16061 = vmatpush3.bf16.msra.mxu1 %v20440_v25  ;;  %v14592_v29 = vpop.f32.mrb[216].mxu0  ;;  %9011 = vmatprep.mubr.bf16.mxu1 %v22589_v3  ;;  %v20522_v21 = vadd.f32 %v16490_v9, %v14727_v52  ;;  %v22590_v25 = vld [vmem:[#allocation29_spill] sm:$0xff]  ;;  %v22591_v52 = vld [vmem:[#allocation14_spill] sm:$0xff] }
 0x476   :  { %v14593_v4 = vpop.f32.mrb[217].mxu0  ;;  %16062 = vmatprep.subr.bf16.mxu1 %v17351_v50  ;;  %v17353_v9 = vld [vmem:[%s22394_s1 + $0x218] sm:$0xff]  }
 0x477   :  { %v14728_v42 = vpop.f32.mrb[216].mxu1  ;;  %v14595_v8 = vpop.f32.mrb[218].mxu0  ;;  %v14594_v54 = vadd.f32 %v14593_v4, %v14592_v29  ;;  %v22593_v4 = vld [vmem:[#allocation33_spill] sm:$0xff] }
 0x478   :  { %v14729_v34 = vpop.f32.mrb[217].mxu1  ;;  %v14596_v37 = vpop.f32.mrb[219].mxu0 }
 0x479   :  { %v14730_v0 = vadd.f32 %v14729_v34, %v14728_v42  ;;  %v14731_v10 = vpop.f32.mrb[218].mxu1  ;;  %16063 = vmatpush3.bf16.msra.mxu1 %v17351_v50  ;;  %v16499_v61 = vadd.f32 %v14594_v54, %v22590_v25  ;;  %v14597_v39 = vadd.f32 %v14596_v37, %v14595_v8  ;;  %v22594_v34 = vld [vmem:[#allocation20_spill] sm:$0xff]  ;;  %v22595_v54 = vld [vmem:[#allocation37_spill] sm:$0xff] }
 0x47a   :  { %v14732_v45 = vpop.f32.mrb[219].mxu1  ;;  %8498 = vmatmul.mubr.bf16.gmra.mrb[68].mxu0 %v22591_v52  ;;  %16064 = vmatprep.subr.bf16.mxu1 %v17352_v59 }
 0x47b   :  { %v14733_v43 = vadd.f32 %v14732_v45, %v14731_v10  ;;  %8505 = vmatprep.mubr.bf16.mxu0 %v22584_v36  ;;  %v20533_v29 = vadd.f32 %v16499_v61, %v14730_v0  ;;  %v16505_v42 = vadd.f32 %v14597_v39, %v22593_v4  ;;  %v17354_v45 = vld [vmem:[%s22394_s1 + $0x220] sm:$0xff]  }
 0x47c   :  { %9012 = vmatmul.mubr.bf16.gmra.mrb[4].mxu1 %v22594_v34  ;;  %v22597_v4 = vld [vmem:[#allocation35_spill] sm:$0xff] }
 0x47d   :  { %22592 = vst [vmem:[#allocation13_spill] sm:$0xff] %v20533_v29  ;;  %v14598_v50 = vpop.f32.mrb[220].mxu0  ;;  %9019 = vmatprep.mubr.bf16.mxu1 %v22595_v54  ;;  %16065 = vmatpush3.bf16.msra.mxu1 %v17352_v59  ;;  %v20538_v8 = vadd.f32 %v16505_v42, %v14733_v43  ;;  %v17355_v43 = vld [vmem:[%s22394_s1 + $0x228] sm:$0xff]  }
 0x47e   :  { %v14599_v37 = vpop.f32.mrb[221].mxu0  ;;  %16066 = vmatprep.subr.bf16.mxu1 %v17353_v9 }
 0x47f   :  { %22596 = vst [vmem:[#allocation15_spill] sm:$0xff] %v20538_v8  ;;  %v14734_v10 = vpop.f32.mrb[220].mxu1  ;;  %v14601_v36 = vpop.f32.mrb[222].mxu0  ;;  %v14600_v0 = vadd.f32 %v14599_v37, %v14598_v50  ;;  %v20551_v50 = vld [vmem:[%s22401_s8] ss:$0 sm:$0xff] }
 0x480   :  { %v14735_v25 = vpop.f32.mrb[221].mxu1  ;;  %v14602_v61 = vpop.f32.mrb[223].mxu0  ;;  %v22598_v37 = vld [vmem:[#allocation39_spill] sm:$0xff] }
 0x481   :  { %v14736_v39 = vadd.f32 %v14735_v25, %v14734_v10  ;;  %v14737_v52 = vpop.f32.mrb[222].mxu1  ;;  %16067 = vmatpush3.bf16.msra.mxu1 %v17353_v9  ;;  %v16496_v28 = vadd.f32 %v14600_v0, %v22597_v4  ;;  %v14603_v33 = vadd.f32 %v14602_v61, %v14601_v36  ;;  %v22599_v36 = vld [vmem:[#allocation24_spill] sm:$0xff]  ;;  %v22600_v0 = vld [vmem:[#allocation43_spill] sm:$0xff] }
 0x482   :  { %v14738_v59 = vpop.f32.mrb[223].mxu1  ;;  %8506 = vmatmul.mubr.bf16.gmra.mrb[72].mxu0 %v22588_v24  ;;  %16068 = vmatprep.subr.bf16.mxu1 %v17354_v45 }
 0x483   :  { %v14739_v42 = vadd.f32 %v14738_v59, %v14737_v52  ;;  %8513 = vmatprep.mubr.bf16.mxu0 %v22589_v3  ;;  %v20554_v9 = vadd.f32 %v16496_v28, %v14736_v39  ;;  %v16502_v10 = vadd.f32 %v14603_v33, %v22598_v37  ;;  %v17356_v3 = vld [vmem:[%s22394_s1 + $0x230] sm:$0xff]   ;;  %v20568_v33 = vld [vmem:[%s22398_s5] ss:$0 sm:$0xff]  ;;  %v22602_v59 = vld [vmem:[#allocation50_spill] sm:$0xff] }
 0x484   :  { %9020 = vmatmul.mubr.bf16.gmra.mrb[8].mxu1 %v22599_v36 }
 0x485   :  { %v15934_v24 = vpop.f32.mrb[224].mxu0  ;;  %9027 = vmatprep.mubr.bf16.mxu1 %v22600_v0  ;;  %16069 = vmatpush3.bf16.msra.mxu1 %v17354_v45  ;;  %v20559_v25 = vadd.f32 %v16502_v10, %v14739_v42  ;;  %v20573_v45 = vld [vmem:[%s22402_s9] ss:$0 sm:$0xff] }
 0x486   :  { %v6863_v61 = vmul.f32 %v15934_v24, %v20551_v50  ;;  %v6727_v52 = vpop.f32.mrb[225].mxu0  ;;  %16070 = vmatprep.subr.bf16.mxu1 %v17355_v43 }
 0x487   :  { %22601 = vst [vmem:[#allocation16_spill] sm:$0xff] %v20559_v25  ;;  %v15886_v28 = vpop.f32.mrb[128].mxu1  ;;  %v6861_v39 = vmul.f32 %v20551_v50, %v6727_v52  ;;  %v15935_v4 = vpop.f32.mrb[226].mxu0 }
 0x488   :  { %v16414_v42 = vadd.f32 %v22602_v59, %v15886_v28  ;;  %v6264_v37 = vpop.f32.mrb[129].mxu1  ;;  %v6864_v10 = vmul.f32 %v15935_v4, %v20551_v50  ;;  %v6730_v24 = vpop.f32.mrb[227].mxu0  ;;  %v6902_v59 = vadd.f32 %v20573_v45, %v6863_v61  ;;  %v17357_v4 = vld [vmem:[%s22394_s1 + $0x238] sm:$0xff]   ;;  %v22606_v61 = vld [vmem:[#allocation31_spill] sm:$0xff] }
 0x489   :  { %v16417_v6 = vadd.f32 %v22603_v46, %v6264_v37  ;;  %v15887_v20 = vpop.f32.mrb[130].mxu1  ;;  %v6862_v62 = vmul.f32 %v20551_v50, %v6730_v24  ;;  %16071 = vmatpush3.bf16.msra.mxu1 %v17355_v43  ;;  %v22605_v37 = vld [vmem:[#allocation46_spill] sm:$0xff]  ;;  %v6900_v43 = vadd.f32 %v20573_v45, %v6861_v39 }
 0x48a   :  { %v6432_v52 = vmul.f32 %v16414_v42, %v20568_v33  ;;  %v16420_v32 = vadd.f32 %v22604_v11, %v15887_v20  ;;  %v6267_v28 = vpop.f32.mrb[131].mxu1  ;;  %8514 = vmatmul.mubr.bf16.gmra.mrb[76].mxu0 %v22594_v34  ;;  %16072 = vmatprep.subr.bf16.mxu1 %v17356_v3  ;;  %v6903_v34 = vadd.f32 %v20573_v45, %v6864_v10 }
 0x48b   :  { %v6430_v46 = vmul.f32 %v16417_v6, %v20568_v33  ;;  %v16423_v41 = vadd.f32 %v22605_v37, %v6267_v28  ;;  %8521 = vmatprep.mubr.bf16.mxu0 %v22595_v54  ;;  %v6901_v6 = vadd.f32 %v20573_v45, %v6862_v62  ;;  %v22607_v28 = vld [vmem:[#allocation48_spill] sm:$0xff] }
 0x48c   :  { %v6471_v11 = vadd.f32 %v20581_v49, %v6432_v52  ;;  %v6433_v20 = vmul.f32 %v16420_v32, %v20568_v33  ;;  %9028 = vmatmul.mubr.bf16.gmra.mrb[12].mxu1 %v22606_v61 }
 0x48d   :  { %v6469_v42 = vadd.f32 %v20581_v49, %v6430_v46  ;;  %v6431_v24 = vmul.f32 %v16423_v41, %v20568_v33  ;;  %v15938_v35 = vpop.f32.mrb[228].mxu0  ;;  %9035 = vmatprep.mubr.bf16.mxu1 %v22607_v28  ;;  %16073 = vmatpush3.bf16.msra.mxu1 %v17356_v3 }
 0x48e   :  { %v6472_v54 = vadd.f32 %v20581_v49, %v6433_v20  ;;  %v6934_v39 = vadd.f32 %v6902_v59, %v6471_v11  ;;  %v6867_v52 = vmul.f32 %v15938_v35, %v20551_v50  ;;  %v6743_v32 = vpop.f32.mrb[229].mxu0  ;;  %16074 = vmatprep.subr.bf16.mxu1 %v17357_v4  ;;  %v22608_v35 = vld [vmem:[#allocation55_spill] sm:$0xff] }
 0x48f   :  { %v6470_v37 = vadd.f32 %v20581_v49, %v6431_v24  ;;  %v6932_v10 = vadd.f32 %v6900_v43, %v6469_v42  ;;  %v15890_v48 = vpop.f32.mrb[132].mxu1  ;;  %v6865_v46 = vmul.f32 %v20551_v50, %v6743_v32  ;;  %v15939_v41 = vpop.f32.mrb[230].mxu0  ;;  %v22609_v32 = vld [vmem:[#allocation60_spill] sm:$0xff] }
 0x490   :  { %v6966_v18 = vmax.f32 %v6934_v39, 0.0  ;;  %v6935_v62 = vadd.f32 %v6903_v34, %v6472_v54  ;;  %v16426_v60 = vadd.f32 %v20284_v44, %v15890_v48  ;;  %v6280_v8 = vpop.f32.mrb[133].mxu1  ;;  %v6906_v3 = vadd.f32 %v20573_v45, %v6867_v52  ;;  %v6746_v20 = vpop.f32.mrb[231].mxu0 }
 0x491   :  { %v6964_v59 = vmax.f32 %v6932_v10, 0.0  ;;  %v6933_v11 = vadd.f32 %v6901_v6, %v6470_v37  ;;  %v16429_v25 = vadd.f32 %v22608_v35, %v6280_v8  ;;  %v15891_v29 = vpop.f32.mrb[134].mxu1  ;;  %v6904_v24 = vadd.f32 %v20573_v45, %v6865_v46  ;;  %16075 = vmatpush3.bf16.msra.mxu1 %v17357_v4  ;;  %v22610_v6 = vld [vmem:[#allocation56_spill] sm:$0xff] }
 0x492   :  { %v6967_v43 = vmax.f32 %v6935_v62, 0.0  ;;  %v6436_v42 = vmul.f32 %v16426_v60, %v20568_v33  ;;  %v16432_v39 = vadd.f32 %v22609_v32, %v15891_v29  ;;  %v6283_v34 = vpop.f32.mrb[135].mxu1  ;;  %v6868_v44 = vmul.f32 %v15939_v41, %v20551_v50  ;;  %8522 = vmatmul.mubr.bf16.gmra.mrb[80].mxu0 %v22599_v36  ;;  %v22611_v29 = vld [vmem:[#allocation36_spill] sm:$0xff] }
 0x493   :  { %v6965_v48 = vmax.f32 %v6933_v11, 0.0  ;;  %v6434_v54 = vmul.f32 %v16429_v25, %v20568_v33  ;;  %v16435_v52 = vadd.f32 %v22610_v6, %v6283_v34  ;;  %v6866_v8 = vmul.f32 %v20551_v50, %v6746_v20  ;;  %8529 = vmatprep.mubr.bf16.mxu0 %v22600_v0  ;;  %v22612_v20 = vld [vmem:[#allocation52_spill] sm:$0xff] }
 0x494   :  { %v13765_v4 = vpack.c.bf16 %v6967_v43, %v6966_v18  ;;  %v6475_v37 = vadd.f32 %v20581_v49, %v6436_v42  ;;  %v6437_v60 = vmul.f32 %v16432_v39, %v20568_v33  ;;  %9036 = vmatmul.mubr.bf16.gmra.mrb[16].mxu1 %v22611_v29  ;;  %v6907_v10 = vadd.f32 %v20573_v45, %v6868_v44 }
 0x495   :  { %v13760_v46 = vpack.c.bf16 %v6965_v48, %v6964_v59  ;;  %v6473_v36 = vadd.f32 %v20581_v49, %v6434_v54  ;;  %v6435_v25 = vmul.f32 %v16435_v52, %v20568_v33  ;;  %v6905_v41 = vadd.f32 %v20573_v45, %v6866_v8  ;;  %v15942_v62 = vpop.f32.mrb[232].mxu0  ;;  %9043 = vmatprep.mubr.bf16.mxu1 %v22612_v20 }
 0x496   :  { %13917 = vst [vmem:[%s22403_s10 + $0x8] sm:$0xff] %v13765_v4   ;;  %v6476_v18 = vadd.f32 %v20581_v49, %v6437_v60  ;;  %v6938_v0 = vadd.f32 %v6906_v3, %v6475_v37  ;;  %v6871_v11 = vmul.f32 %v15942_v62, %v20551_v50  ;;  %v6759_v35 = vpop.f32.mrb[233].mxu0 }
 0x497   :  { %13761 = vst [vmem:[%s22403_s10] sm:$0xff] %v13760_v46   ;;  %v6474_v59 = vadd.f32 %v20581_v49, %v6435_v25  ;;  %v6936_v43 = vadd.f32 %v6904_v24, %v6473_v36  ;;  %v15894_v42 = vpop.f32.mrb[136].mxu1  ;;  %v6869_v32 = vmul.f32 %v20551_v50, %v6759_v35  ;;  %v15943_v39 = vpop.f32.mrb[234].mxu0 }
 0x498   :  { %v6970_v34 = vmax.f32 %v6938_v0, 0.0  ;;  %v6939_v44 = vadd.f32 %v6907_v10, %v6476_v18  ;;  %v16438_v48 = vadd.f32 %v20333_v56, %v15894_v42  ;;  %v6296_v54 = vpop.f32.mrb[137].mxu1  ;;  %v6910_v3 = vadd.f32 %v20573_v45, %v6871_v11  ;;  %v6762_v6 = vpop.f32.mrb[235].mxu0 }
 0x499   :  { %v6968_v52 = vmax.f32 %v6936_v43, 0.0  ;;  %v6937_v8 = vadd.f32 %v6905_v41, %v6474_v59  ;;  %v16441_v4 = vadd.f32 %v20309_v26, %v6296_v54  ;;  %v15895_v37 = vpop.f32.mrb[138].mxu1  ;;  %v6908_v60 = vadd.f32 %v20573_v45, %v6869_v32  ;;  %v22614_v32 = vld [vmem:[#allocation58_spill] sm:$0xff] }
 0x49a   :  { %v6971_v24 = vmax.f32 %v6939_v44, 0.0  ;;  %v6440_v46 = vmul.f32 %v16438_v48, %v20568_v33  ;;  %v16444_v36 = vadd.f32 %v20342_v5, %v15895_v37  ;;  %v6299_v25 = vpop.f32.mrb[139].mxu1  ;;  %v6872_v10 = vmul.f32 %v15943_v39, %v20551_v50  ;;  %8530 = vmatmul.mubr.bf16.gmra.mrb[84].mxu0 %v22606_v61  ;;  %v22613_v5 = vld [vmem:[#allocation41_spill] sm:$0xff] }
 0x49b   :  { %v6969_v56 = vmax.f32 %v6937_v8, 0.0  ;;  %v6438_v62 = vmul.f32 %v16441_v4, %v20568_v33  ;;  %v16447_v41 = vadd.f32 %v20314_v19, %v6299_v25  ;;  %v6870_v26 = vmul.f32 %v20551_v50, %v6762_v6  ;;  %8537 = vmatprep.mubr.bf16.mxu0 %v22607_v28 }
 0x49c   :  { %v13775_v18 = vpack.c.bf16 %v6971_v24, %v6970_v34  ;;  %v6479_v0 = vadd.f32 %v20581_v49, %v6440_v46  ;;  %v6441_v11 = vmul.f32 %v16444_v36, %v20568_v33  ;;  %9044 = vmatmul.mubr.bf16.gmra.mrb[20].mxu1 %v22613_v5  ;;  %v6911_v35 = vadd.f32 %v20573_v45, %v6872_v10 }
 0x49d   :  { %v13770_v59 = vpack.c.bf16 %v6969_v56, %v6968_v52  ;;  %v6477_v61 = vadd.f32 %v20581_v49, %v6438_v62  ;;  %v6439_v43 = vmul.f32 %v16447_v41, %v20568_v33  ;;  %v6909_v19 = vadd.f32 %v20573_v45, %v6870_v26  ;;  %v15946_v42 = vpop.f32.mrb[236].mxu0  ;;  %9051 = vmatprep.mubr.bf16.mxu1 %v22614_v32 }
 0x49e   :  { %13919 = vst [vmem:[%s22403_s10 + $0x18] sm:$0xff] %v13775_v18   ;;  %v6480_v28 = vadd.f32 %v20581_v49, %v6441_v11  ;;  %v6942_v39 = vadd.f32 %v6910_v3, %v6479_v0  ;;  %v6875_v34 = vmul.f32 %v15946_v42, %v20551_v50  ;;  %v6775_v44 = vpop.f32.mrb[237].mxu0 }
 0x49f   :  { %13918 = vst [vmem:[%s22403_s10 + $0x10] sm:$0xff] %v13770_v59   ;;  %v6478_v48 = vadd.f32 %v20581_v49, %v6439_v43  ;;  %v6940_v54 = vadd.f32 %v6908_v60, %v6477_v61  ;;  %v15898_v6 = vpop.f32.mrb[140].mxu1  ;;  %v6873_v52 = vmul.f32 %v20551_v50, %v6775_v44  ;;  %v15947_v8 = vpop.f32.mrb[238].mxu0 }
 0x4a0   :  { %v6974_v4 = vmax.f32 %v6942_v39, 0.0  ;;  %v6943_v37 = vadd.f32 %v6911_v35, %v6480_v28  ;;  %v16450_v24 = vadd.f32 %v20395_v7, %v15898_v6  ;;  %v6312_v46 = vpop.f32.mrb[141].mxu1  ;;  %v6914_v3 = vadd.f32 %v20573_v45, %v6875_v34  ;;  %v6778_v36 = vpop.f32.mrb[239].mxu0  ;;  %v20693_v6 = vld [vmem:[#allocation2 + $0x1a8] sm:$0xf] }
 0x4a1   :  { %v6972_v25 = vmax.f32 %v6940_v54, 0.0  ;;  %v6941_v10 = vadd.f32 %v6909_v19, %v6478_v48  ;;  %v16453_v56 = vadd.f32 %v20364_v53, %v6312_v46  ;;  %v15899_v62 = vpop.f32.mrb[142].mxu1  ;;  %v6912_v41 = vadd.f32 %v20573_v45, %v6873_v52 }
 0x4a2   :  { %v6975_v60 = vmax.f32 %v6943_v37, 0.0  ;;  %v6444_v26 = vmul.f32 %v16450_v24, %v20568_v33  ;;  %v16456_v18 = vadd.f32 %v20404_v22, %v15899_v62  ;;  %v6315_v0 = vpop.f32.mrb[143].mxu1  ;;  %v6876_v11 = vmul.f32 %v15947_v8, %v20551_v50  ;;  %8538 = vmatmul.mubr.bf16.gmra.mrb[88].mxu0 %v22611_v29 }
 0x4a3   :  { %v6973_v7 = vmax.f32 %v6941_v10, 0.0  ;;  %v6442_v35 = vmul.f32 %v16453_v56, %v20568_v33  ;;  %v16459_v59 = vadd.f32 %v20373_v13, %v6315_v0  ;;  %v6874_v53 = vmul.f32 %v20551_v50, %v6778_v36  ;;  %8545 = vmatprep.mubr.bf16.mxu0 %v22612_v20  ;;  %v7228_v20 = vld [vmem:[#allocation2 + $0x1a4] sm:$0xe] }
 0x4a4   :  { %v13785_v61 = vpack.c.bf16 %v6975_v60, %v6974_v4  ;;  %v6483_v43 = vadd.f32 %v20581_v49, %v6444_v26  ;;  %v6445_v19 = vmul.f32 %v16456_v18, %v20568_v33  ;;  %9052 = vmatmul.mubr.bf16.gmra.mrb[24].mxu1 %v20186_v47  ;;  %v6915_v22 = vadd.f32 %v20573_v45, %v6876_v11 }
 0x4a5   :  { %v13780_v42 = vpack.c.bf16 %v6973_v7, %v6972_v25  ;;  %v6481_v29 = vadd.f32 %v20581_v49, %v6442_v35  ;;  %v6443_v28 = vmul.f32 %v16459_v59, %v20568_v33  ;;  %v6913_v13 = vadd.f32 %v20573_v45, %v6874_v53  ;;  %v15950_v39 = vpop.f32.mrb[240].mxu0  ;;  %9059 = vmatprep.mubr.bf16.mxu1 %v20298_v63 }
 0x4a6   :  { %13921 = vst [vmem:[%s22403_s10 + $0x28] sm:$0xff] %v13785_v61   ;;  %v6484_v34 = vadd.f32 %v20581_v49, %v6445_v19  ;;  %v6946_v44 = vadd.f32 %v6914_v3, %v6483_v43  ;;  %v6879_v48 = vmul.f32 %v15950_v39, %v20551_v50  ;;  %v6791_v54 = vpop.f32.mrb[241].mxu0  ;;  %v13272_v46 = vcombine.low %v7228_v20, %v20693_v6 }
 0x4a7   :  { %13920 = vst [vmem:[%s22403_s10 + $0x20] sm:$0xff] %v13780_v42   ;;  %v6482_v52 = vadd.f32 %v20581_v49, %v6443_v28  ;;  %v6944_v8 = vadd.f32 %v6912_v41, %v6481_v29  ;;  %v15902_v4 = vpop.f32.mrb[144].mxu1  ;;  %v6877_v37 = vmul.f32 %v20551_v50, %v6791_v54  ;;  %v15951_v24 = vpop.f32.mrb[242].mxu0  ;;  %v20717_v29 = vld [vmem:[#allocation2 + $0x1ac] ss:$0 sps:$4 sm:$0x11]  }
 0x4a8   :  { %v6978_v36 = vmax.f32 %v6946_v44, 0.0  ;;  %v6947_v3 = vadd.f32 %v6915_v22, %v6484_v34  ;;  %v16462_v25 = vadd.f32 %v20454_v30, %v15902_v4  ;;  %v6328_v10 = vpop.f32.mrb[145].mxu1  ;;  %v6918_v56 = vadd.f32 %v20573_v45, %v6879_v48  ;;  %v6794_v62 = vpop.f32.mrb[243].mxu0 }
 0x4a9   :  { %v6976_v60 = vmax.f32 %v6944_v8, 0.0  ;;  %v6945_v26 = vadd.f32 %v6913_v13, %v6482_v52  ;;  %v16465_v18 = vadd.f32 %v20426_v51, %v6328_v10  ;;  %v15903_v0 = vpop.f32.mrb[146].mxu1  ;;  %v6916_v41 = vadd.f32 %v20573_v45, %v6877_v37 }
 0x4aa   :  { %v6979_v11 = vmax.f32 %v6947_v3, 0.0  ;;  %v6448_v7 = vmul.f32 %v16462_v25, %v20568_v33  ;;  %v16468_v35 = vadd.f32 %v20460_v27, %v15903_v0  ;;  %v6331_v59 = vpop.f32.mrb[147].mxu1  ;;  %v6880_v53 = vmul.f32 %v15951_v24, %v20551_v50  ;;  %8546 = vmatmul.mubr.bf16.gmra.mrb[92].mxu0 %v22613_v5 }
 0x4ab   :  { %v6977_v30 = vmax.f32 %v6945_v26, 0.0  ;;  %v6446_v61 = vmul.f32 %v16465_v18, %v20568_v33  ;;  %v16471_v43 = vadd.f32 %v20435_v12, %v6331_v59  ;;  %v6878_v51 = vmul.f32 %v20551_v50, %v6794_v62  ;;  %8553 = vmatprep.mubr.bf16.mxu0 %v22614_v32 }
 0x4ac   :  { %v13795_v19 = vpack.c.bf16 %v6979_v11, %v6978_v36  ;;  %v6487_v22 = vadd.f32 %v20581_v49, %v6448_v7  ;;  %v6449_v42 = vmul.f32 %v16468_v35, %v20568_v33  ;;  %9060 = vmatmul.mubr.bf16.gmra.mrb[28].mxu1 %v20225_v15  ;;  %v6919_v27 = vadd.f32 %v20573_v45, %v6880_v53 }
 0x4ad   :  { %v13790_v5 = vpack.c.bf16 %v6977_v30, %v6976_v60  ;;  %v6485_v28 = vadd.f32 %v20581_v49, %v6446_v61  ;;  %v6447_v12 = vmul.f32 %v16471_v43, %v20568_v33  ;;  %v6917_v13 = vadd.f32 %v20573_v45, %v6878_v51  ;;  %v15954_v39 = vpop.f32.mrb[244].mxu0  ;;  %9067 = vmatprep.mubr.bf16.mxu1 %v20320_v23 }
 0x4ae   :  { %13923 = vst [vmem:[%s22403_s10 + $0x38] sm:$0xff] %v13795_v19   ;;  %v6488_v32 = vadd.f32 %v20581_v49, %v6449_v42  ;;  %v6950_v20 = vadd.f32 %v6918_v56, %v6487_v22  ;;  %v6883_v34 = vmul.f32 %v15954_v39, %v20551_v50  ;;  %v6807_v44 = vpop.f32.mrb[245].mxu0  ;;  %v7731_v48 = vrot.slane %v20717_v29, 1 }
 0x4af   :  { %13922 = vst [vmem:[%s22403_s10 + $0x30] sm:$0xff] %v13790_v5   ;;  %v6486_v54 = vadd.f32 %v20581_v49, %v6447_v12  ;;  %v6948_v52 = vadd.f32 %v6916_v41, %v6485_v28  ;;  %v15906_v8 = vpop.f32.mrb[148].mxu1  ;;  %v6881_v4 = vmul.f32 %v20551_v50, %v6807_v44  ;;  %v15955_v37 = vpop.f32.mrb[246].mxu0  ;;  %v7730_v24 = vrot.slane %v13272_v46, 1 }
 0x4b0   :  { %v6982_v36 = vmax.f32 %v6950_v20, 0.0  ;;  %v6951_v3 = vadd.f32 %v6919_v27, %v6488_v32  ;;  %v16474_v25 = vadd.f32 %v20489_v38, %v15906_v8  ;;  %v6344_v10 = vpop.f32.mrb[149].mxu1  ;;  %v6922_v56 = vadd.f32 %v20573_v45, %v6883_v34  ;;  %v6810_v62 = vpop.f32.mrb[247].mxu0 }
 0x4b1   :  { %v6980_v60 = vmax.f32 %v6948_v52, 0.0  ;;  %v6949_v26 = vadd.f32 %v6917_v13, %v6486_v54  ;;  %v16477_v18 = vadd.f32 %v20473_v2, %v6344_v10  ;;  %v15907_v0 = vpop.f32.mrb[150].mxu1  ;;  %v6920_v41 = vadd.f32 %v20573_v45, %v6881_v4 }
 0x4b2   :  { %v6983_v11 = vmax.f32 %v6951_v3, 0.0  ;;  %v6452_v7 = vmul.f32 %v16474_v25, %v20568_v33  ;;  %v16480_v46 = vadd.f32 %v20494_v55, %v15907_v0  ;;  %v6347_v35 = vpop.f32.mrb[151].mxu1  ;;  %v6884_v59 = vmul.f32 %v15955_v37, %v20551_v50  ;;  %8554 = vmatmul.mubr.bf16.gmra.mrb[96].mxu0 %v20186_v47 }
 0x4b3   :  { %v6981_v38 = vmax.f32 %v6949_v26, 0.0  ;;  %v6450_v53 = vmul.f32 %v16477_v18, %v20568_v33  ;;  %v16483_v30 = vadd.f32 %v20479_v40, %v6347_v35  ;;  %v6882_v2 = vmul.f32 %v20551_v50, %v6810_v62  ;;  %8561 = vmatprep.mubr.bf16.mxu0 %v20298_v63 }
 0x4b4   :  { %v13805_v61 = vpack.c.bf16 %v6983_v11, %v6982_v36  ;;  %v6491_v43 = vadd.f32 %v20581_v49, %v6452_v7  ;;  %v6453_v51 = vmul.f32 %v16480_v46, %v20568_v33  ;;  %9068 = vmatmul.mubr.bf16.gmra.mrb[64].mxu1 %v20260_v31  ;;  %v6923_v55 = vadd.f32 %v20573_v45, %v6884_v59 }
 0x4b5   :  { %v13800_v19 = vpack.c.bf16 %v6981_v38, %v6980_v60  ;;  %v6489_v47 = vadd.f32 %v20581_v49, %v6450_v53  ;;  %v6451_v22 = vmul.f32 %v16483_v30, %v20568_v33  ;;  %v6921_v40 = vadd.f32 %v20573_v45, %v6882_v2  ;;  %v15958_v42 = vpop.f32.mrb[248].mxu0  ;;  %9075 = vmatprep.mubr.bf16.mxu1 %v20351_v17 }
 0x4b6   :  { %13925 = vst [vmem:[%s22403_s10 + $0x48] sm:$0xff] %v13805_v61   ;;  %v6492_v63 = vadd.f32 %v20581_v49, %v6453_v51  ;;  %v6954_v27 = vadd.f32 %v6922_v56, %v6491_v43  ;;  %v6887_v5 = vmul.f32 %v15958_v42, %v20551_v50  ;;  %v6823_v28 = vpop.f32.mrb[249].mxu0  ;;  %v20760_v12 = vsel %vm1969_vm10, %v7730_v24, %v7731_v48 }
 0x4b7   :  { %13924 = vst [vmem:[%s22403_s10 + $0x40] sm:$0xff] %v13800_v19   ;;  %v6490_v13 = vadd.f32 %v20581_v49, %v6451_v22  ;;  %v6952_v39 = vadd.f32 %v6920_v41, %v6489_v47  ;;  %v15910_v32 = vpop.f32.mrb[152].mxu1  ;;  %v6885_v20 = vmul.f32 %v20551_v50, %v6823_v28  ;;  %v15959_v34 = vpop.f32.mrb[250].mxu0  ;;  %v22615_v28 = vld [vmem:[#allocation13_spill] sm:$0xff] }
 0x4b8   :  { %v6986_v44 = vmax.f32 %v6954_v27, 0.0  ;;  %v6955_v54 = vadd.f32 %v6923_v55, %v6492_v63  ;;  %v16486_v52 = vadd.f32 %v20516_v16, %v15910_v32  ;;  %v6360_v8 = vpop.f32.mrb[153].mxu1  ;;  %v6926_v4 = vadd.f32 %v20573_v45, %v6887_v5  ;;  %v6826_v48 = vpop.f32.mrb[251].mxu0 }
 0x4b9   :  { %v6984_v37 = vmax.f32 %v6952_v39, 0.0  ;;  %v6953_v24 = vadd.f32 %v6921_v40, %v6490_v13  ;;  %v16489_v36 = vadd.f32 %v20503_v1, %v6360_v8  ;;  %v15911_v3 = vpop.f32.mrb[154].mxu1  ;;  %v6924_v25 = vadd.f32 %v20573_v45, %v6885_v20 }
 0x4ba   :  { %v6987_v10 = vmax.f32 %v6955_v54, 0.0  ;;  %v6456_v56 = vmul.f32 %v16486_v52, %v20568_v33  ;;  %v16492_v62 = vadd.f32 %v20522_v21, %v15911_v3  ;;  %v6363_v60 = vpop.f32.mrb[155].mxu1  ;;  %v6888_v26 = vmul.f32 %v15959_v34, %v20551_v50  ;;  %8562 = vmatmul.mubr.bf16.gmra.mrb[100].mxu0 %v20225_v15 }
 0x4bb   :  { %v6985_v16 = vmax.f32 %v6953_v24, 0.0  ;;  %v6454_v18 = vmul.f32 %v16489_v36, %v20568_v33  ;;  %v16495_v0 = vadd.f32 %v20508_v57, %v6363_v60  ;;  %v6886_v1 = vmul.f32 %v20551_v50, %v6826_v48  ;;  %8569 = vmatprep.mubr.bf16.mxu0 %v20320_v23  ;;  %v22617_v48 = vld [vmem:[#allocation15_spill] sm:$0xff] }
 0x4bc   :  { %v13815_v41 = vpack.c.bf16 %v6987_v10, %v6986_v44  ;;  %v6495_v11 = vadd.f32 %v20581_v49, %v6456_v56  ;;  %v6457_v7 = vmul.f32 %v16492_v62, %v20568_v33  ;;  %9076 = vmatmul.mubr.bf16.gmra.mrb[68].mxu1 %v20295_v14  ;;  %v6927_v21 = vadd.f32 %v20573_v45, %v6888_v26  ;;  %v22616_v44 = vld [vmem:[#allocation16_spill] sm:$0xff]  ;;  %v22618_v10 = vld [vmem:[#allocation62_spill] sm:$0xff] }
 0x4bd   :  { %v13810_v46 = vpack.c.bf16 %v6985_v16, %v6984_v37  ;;  %v6493_v15 = vadd.f32 %v20581_v49, %v6454_v18  ;;  %v6455_v35 = vmul.f32 %v16495_v0, %v20568_v33  ;;  %v6925_v57 = vadd.f32 %v20573_v45, %v6886_v1  ;;  %v15962_v59 = vpop.f32.mrb[252].mxu0  ;;  %9083 = vmatprep.mubr.bf16.mxu1 %v20382_v58  ;;  %v22619_v16 = vld [vmem:[#allocation66_spill] sm:$0xff] }
 0x4be   :  { %13927 = vst [vmem:[%s22403_s10 + $0x58] sm:$0xff] %v13815_v41   ;;  %v6496_v23 = vadd.f32 %v20581_v49, %v6457_v7  ;;  %v6958_v38 = vadd.f32 %v6926_v4, %v6495_v11  ;;  %v6891_v53 = vmul.f32 %v15962_v59, %v20551_v50  ;;  %v6839_v30 = vpop.f32.mrb[253].mxu0 }
 0x4bf   :  { %13926 = vst [vmem:[%s22403_s10 + $0x50] sm:$0xff] %v13810_v46   ;;  %v6494_v2 = vadd.f32 %v20581_v49, %v6455_v35  ;;  %v6956_v61 = vadd.f32 %v6924_v25, %v6493_v15  ;;  %v15914_v43 = vpop.f32.mrb[156].mxu1  ;;  %v6889_v51 = vmul.f32 %v20551_v50, %v6839_v30  ;;  %v15963_v55 = vpop.f32.mrb[254].mxu0 }
 0x4c0   :  { %v6990_v19 = vmax.f32 %v6958_v38, 0.0  ;;  %v6959_v47 = vadd.f32 %v6927_v21, %v6496_v23  ;;  %v16498_v22 = vadd.f32 %v20554_v9, %v15914_v43  ;;  %v6376_v40 = vpop.f32.mrb[157].mxu1  ;;  %v6930_v42 = vadd.f32 %v20573_v45, %v6891_v53  ;;  %v6842_v63 = vpop.f32.mrb[255].mxu0  ;;  %v22620_v38 = vld [vmem:[#allocation63_spill] sm:$0xff]  ;;  %v22621_v53 = vld [vmem:[#allocation68_spill] sm:$0xff] }
 0x4c1   :  { %v6988_v27 = vmax.f32 %v6956_v61, 0.0  ;;  %v6957_v5 = vadd.f32 %v6925_v57, %v6494_v2  ;;  %v16501_v13 = vadd.f32 %v22615_v28, %v6376_v40  ;;  %v15915_v39 = vpop.f32.mrb[158].mxu1  ;;  %v6928_v32 = vadd.f32 %v20573_v45, %v6889_v51 }
 0x4c2   :  { %v6991_v20 = vmax.f32 %v6959_v47, 0.0  ;;  %v6460_v34 = vmul.f32 %v16498_v22, %v20568_v33  ;;  %v16504_v54 = vadd.f32 %v22616_v44, %v15915_v39  ;;  %v6379_v52 = vpop.f32.mrb[159].mxu1  ;;  %v6892_v8 = vmul.f32 %v15963_v55, %v20551_v50  ;;  %8570 = vmatmul.mubr.bf16.gmra.mrb[104].mxu0 %v20260_v31  ;;  %v22623_v47 = vld [vmem:[#allocation12_spill] sm:$0xff] }
 0x4c3   :  { %v6989_v9 = vmax.f32 %v6957_v5, 0.0  ;;  %v6458_v4 = vmul.f32 %v16501_v13, %v20568_v33  ;;  %v16507_v37 = vadd.f32 %v22617_v48, %v6379_v52  ;;  %v6890_v24 = vmul.f32 %v20551_v50, %v6842_v63  ;;  %8577 = vmatprep.mubr.bf16.mxu0 %v20351_v17 }
 0x4c4   :  { %v13825_v36 = vpack.c.bf16 %v6991_v20, %v6990_v19  ;;  %v6499_v3 = vadd.f32 %v20581_v49, %v6460_v34  ;;  %v6461_v25 = vmul.f32 %v16504_v54, %v20568_v33  ;;  %9084 = vmatmul.mubr.bf16.gmra.mrb[72].mxu1 %v22618_v10  ;;  %v6931_v56 = vadd.f32 %v20573_v45, %v6892_v8  ;;  %v22622_v19 = vld [vmem:[#allocation64_spill] sm:$0xff]  ;;  %v22625_v20 = vld [vmem:[#allocation11_spill] sm:$0xff] }
 0x4c5   :  { %v13820_v62 = vpack.c.bf16 %v6989_v9, %v6988_v27  ;;  %v6497_v31 = vadd.f32 %v20581_v49, %v6458_v4  ;;  %v6459_v60 = vmul.f32 %v16507_v37, %v20568_v33  ;;  %v6929_v26 = vadd.f32 %v20573_v45, %v6890_v24  ;;  %9091 = vmatprep.mubr.bf16.mxu1 %v22619_v16  ;;  %v14804_v50 = vpop.f32.mrb[0].mxu0  ;;  %v22626_v37 = vld [vmem:[#allocation67_spill] sm:$0xff] }
 0x4c6   :  { %13929 = vst [vmem:[%s22403_s10 + $0x68] sm:$0xff] %v13825_v36   ;;  %v6500_v17 = vadd.f32 %v20581_v49, %v6461_v25  ;;  %v6962_v18 = vadd.f32 %v6930_v42, %v6499_v3  ;;  %v14805_v0 = vpop.f32.mrb[1].mxu0 }
 0x4c7   :  { %13928 = vst [vmem:[%s22403_s10 + $0x60] sm:$0xff] %v13820_v62   ;;  %v6498_v1 = vadd.f32 %v20581_v49, %v6459_v60  ;;  %v6960_v33 = vadd.f32 %v6928_v32, %v6497_v31  ;;  %v20825_v41 = vadd.f32 %v14805_v0, %v14804_v50  ;;  %v14807_v45 = vpop.f32.mrb[2].mxu0  ;;  %v22624_v32 = vld [vmem:[#allocation65_spill] sm:$0xff]  ;;  %v17361_v62 = vld [vmem:[#allocation4 + $0x100] sm:$0xff]   ;;  %v22627_v31 = vld [vmem:[#allocation26_spill] sm:$0xff] }
 0x4c8   :  { %v6963_v11 = vadd.f32 %v6931_v56, %v6500_v17  ;;  %v14808_v7 = vpop.f32.mrb[3].mxu0  ;;  %v6994_v15 = vmax.f32 %v6962_v18, 0.0  ;;  %15196 = vmatprep.subr.bf16.mxu0 %v17361_v62  ;;  %v17362_v17 = vld [vmem:[#allocation4 + $0xc0] sm:$0xff]   ;;  %v17367_v62 = vld [vmem:[#allocation4 + $0x118] sm:$0xff]  }
 0x4c9   :  { %v6961_v21 = vadd.f32 %v6929_v26, %v6498_v1  ;;  %v20827_v46 = vadd.f32 %v14808_v7, %v14807_v45  ;;  %v6992_v57 = vmax.f32 %v6960_v33, 0.0  ;;  %15197 = vmatpush3.bf16.msra.mxu0 %v17362_v17  ;;  %v22628_v1 = vld [vmem:[#allocation28_spill] sm:$0xff] }
 0x4ca   :  { %v6995_v35 = vmax.f32 %v6963_v11, 0.0  ;;  %8578 = vmatmul.mubr.bf16.gmra.mrb[108].mxu0 %v20295_v14  ;;  %v7191_v14 = vld [vmem:[#allocation2 + $0x1a4] sm:$0xf]  ;;  %v22629_v33 = vld [vmem:[#allocation32_spill] sm:$0xff] }
 0x4cb   :  { %v6993_v59 = vmax.f32 %v6961_v21, 0.0  ;;  %8585 = vmatprep.mubr.bf16.mxu0 %v20382_v58  ;;  %v13236_v55 = vcombine.low %v7191_v14, %v20693_v6  ;;  %v7603_v6 = vshll.u32 %v20717_v29, 16 }
 0x4cc   :  { %v13835_v23 = vpack.c.bf16 %v6995_v35, %v6994_v15  ;;  %9092 = vmatmul.mubr.bf16.gmra.mrb[76].mxu1 %v22620_v38 }
 0x4cd   :  { %v13830_v49 = vpack.c.bf16 %v6993_v59, %v6992_v57  ;;  %9099 = vmatprep.mubr.bf16.mxu1 %v22621_v53  ;;  %v14810_v30 = vpop.f32.mrb[4].mxu0  ;;  %v7598_v40 = vshll.u32 %v13236_v55, 16  ;;  %v7596_v13 = vshrl.u32 %v13236_v55, 16  ;;  %v7605_v54 = vrot.slane %v7603_v6, 1  ;;  %v17363_v57 = vld [vmem:[#allocation4 + $0x108] sm:$0xff]   ;;  %v22630_v59 = vld [vmem:[#allocation34_spill] sm:$0xff] }
 0x4ce   :  { %13931 = vst [vmem:[%s22403_s10 + $0x78] sm:$0xff] %v13835_v23   ;;  %v14811_v2 = vpop.f32.mrb[5].mxu0  ;;  %v22631_v23 = vld [vmem:[#allocation38_spill] sm:$0xff]  ;;  %15198 = vmatprep.subr.bf16.mxu0 %v17363_v57 }
 0x4cf   :  { %13930 = vst [vmem:[%s22403_s10 + $0x70] sm:$0xff] %v13830_v49   ;;  %v20839_v61 = vadd.f32 %v14811_v2, %v14810_v30  ;;  %v14813_v58 = vpop.f32.mrb[6].mxu0  ;;  %v7600_v39 = vrot.slane %v7598_v40, 1  ;;  %v17364_v2 = vld [vmem:[#allocation4 + $0xc8] sm:$0xff]  }
 0x4d0   :  { %v14814_v43 = vpop.f32.mrb[7].mxu0  ;;  %15199 = vmatpush3.bf16.msra.mxu0 %v17364_v2 }
 0x4d1   :  { %v20841_v51 = vadd.f32 %v14814_v43, %v14813_v58  ;;  %v7601_v44 = vor.u32 %v7600_v39, %v7596_v13  ;;  %v22632_v43 = vld [vmem:[#allocation40_spill] sm:$0xff]  ;;  %v22635_v39 = vld [vmem:[#allocation47_spill] sm:$0xff] }
 0x4d2   :  { %8586 = vmatmul.mubr.bf16.gmra.mrb[112].mxu0 %v22618_v10  ;;  %v22634_v13 = vld [vmem:[#allocation44_spill] sm:$0xff] }
 0x4d3   :  { %8593 = vmatprep.mubr.bf16.mxu0 %v22619_v16  ;;  %v7606_v29 = vsel %vm1680_vm9, %v7601_v44, %v7605_v54  ;;  %v17366_v44 = vld [vmem:[#allocation4 + $0xd0] sm:$0xff]  }
 0x4d4   :  { %9100 = vmatmul.mubr.bf16.gmra.mrb[80].mxu1 %v22622_v19 }
 0x4d5   :  { %9107 = vmatprep.mubr.bf16.mxu1 %v22623_v47  ;;  %v14816_v22 = vpop.f32.mrb[8].mxu0 }
 0x4d6   :  { %v14817_v42 = vpop.f32.mrb[9].mxu0 }
 0x4d7   :  { %v20848_v63 = vadd.f32 %v14817_v42, %v14816_v22  ;;  %v14819_v27 = vpop.f32.mrb[10].mxu0 }
 0x4d8   :  { %v14820_v5 = vpop.f32.mrb[11].mxu0 }
 0x4d9   :  { %v20850_v28 = vadd.f32 %v14820_v5, %v14819_v27  ;;  %v17365_v5 = vld [vmem:[#allocation4 + $0x110] sm:$0xff]  }
 0x4da   :  { %8594 = vmatmul.mubr.bf16.gmra.mrb[116].mxu0 %v22620_v38  ;;  %15200 = vmatprep.subr.bf16.mxu0 %v17365_v5 }
 0x4db   :  { %8601 = vmatprep.mubr.bf16.mxu0 %v22621_v53  ;;  %15201 = vmatpush3.bf16.msra.mxu0 %v17366_v44 }
 0x4dc   :  { %9108 = vmatmul.mubr.bf16.gmra.mrb[84].mxu1 %v22624_v32  ;;  %15202 = vmatprep.subr.bf16.mxu0 %v17367_v62 }
 0x4dd   :  { %9115 = vmatprep.mubr.bf16.mxu1 %v22625_v20  ;;  %v14822_v34 = vpop.f32.mrb[12].mxu0 }
 0x4de   :  { %v14823_v52 = vpop.f32.mrb[13].mxu0 }
 0x4df   :  { %v20857_v8 = vadd.f32 %v14823_v52, %v14822_v34  ;;  %v14825_v9 = vpop.f32.mrb[14].mxu0 }
 0x4e0   :  { %v14826_v4 = vpop.f32.mrb[15].mxu0 }
 0x4e1   :  { %v20859_v48 = vadd.f32 %v14826_v4, %v14825_v9  ;;  %v22636_v9 = vld [vmem:[#allocation49_spill] sm:$0xff] }
 0x4e2   :  { %8602 = vmatmul.mubr.bf16.gmra.mrb[120].mxu0 %v22622_v19  ;;  %v22637_v4 = vld [vmem:[#allocation53_spill] sm:$0xff] }
 0x4e3   :  { %8609 = vmatprep.mubr.bf16.mxu0 %v22623_v47 }
 0x4e4   :  { %9116 = vmatmul.mubr.bf16.gmra.mrb[88].mxu1 %v22626_v37 }
 0x4e5   :  { %9123 = vmatprep.mubr.bf16.mxu1 %v7606_v29  ;;  %v14828_v24 = vpop.f32.mrb[16].mxu0 }
 0x4e6   :  { %v14829_v36 = vpop.f32.mrb[17].mxu0 }
 0x4e7   :  { %v20865_v3 = vadd.f32 %v14829_v36, %v14828_v24  ;;  %v14831_v25 = vpop.f32.mrb[18].mxu0 }
 0x4e8   :  { %v14832_v10 = vpop.f32.mrb[19].mxu0 }
 0x4e9   :  { %v20867_v56 = vadd.f32 %v14832_v10, %v14831_v25 }
 0x4ea   :  { %8610 = vmatmul.mubr.bf16.gmra.mrb[124].mxu0 %v22624_v32 }
 0x4ec   :  { %9124 = vmatmul.mubr.bf16.gmra.mrb[92].mxu1 %v13236_v55  ;;  %v22633_v55 = vld [vmem:[#allocation42_spill] sm:$0xff] }
 0x4ed   :  { %16076 = vmatprep.mubr.bf16.mxu1 %v22627_v31  ;;  %v14834_v60 = vpop.f32.mrb[20].mxu0  ;;  %v22638_v31 = vld [vmem:[#allocation54_spill] sm:$0xff] }
 0x4ee   :  { %v14835_v26 = vpop.f32.mrb[21].mxu0 }
 0x4ef   :  { %v20871_v16 = vadd.f32 %v14835_v26, %v14834_v60  ;;  %v14837_v50 = vpop.f32.mrb[22].mxu0  ;;  %v22639_v60 = vld [vmem:[#allocation57_spill] sm:$0xff] }
 0x4f0   :  { %v14838_v18 = vpop.f32.mrb[23].mxu0 }
 0x4f1   :  { %v20873_v0 = vadd.f32 %v14838_v18, %v14837_v50 }
 0x4f4   :  { %16077 = vmatmul.mubr.bf16.vlgmr.msra.gmra.mrb[224].mxu1 %v22628_v1  ;;  %v17368_v1 = vld [vmem:[#allocation4 + $0xd8] sm:$0xff]  }
 0x4f5   :  { %16080 = vmatprep.mubr.bf16.mxu1 %v22629_v33  ;;  %v14840_v45 = vpop.f32.mrb[24].mxu0  ;;  %15203 = vmatpush3.bf16.msra.mxu0 %v17368_v1 }
 0x4f6   :  { %v14841_v11 = vpop.f32.mrb[25].mxu0 }
 0x4f7   :  { %v20877_v7 = vadd.f32 %v14841_v11, %v14840_v45  ;;  %v14843_v21 = vpop.f32.mrb[26].mxu0  ;;  %v22640_v11 = vld [vmem:[#allocation59_spill] sm:$0xff] }
 0x4f8   :  { %v14844_v15 = vpop.f32.mrb[27].mxu0 }
 0x4f9   :  { %v20879_v35 = vadd.f32 %v14844_v15, %v14843_v21  ;;  %v22641_v21 = vld [vmem:[#allocation61_spill] sm:$0xff] }
 0x4fc   :  { %16081 = vmatmul.mubr.bf16.gmra.mrb[228].mxu1 %v22630_v59 }
 0x4fd   :  { %16084 = vmatprep.mubr.bf16.mxu1 %v22631_v23  ;;  %v14846_v38 = vpop.f32.mrb[28].mxu0 }
 0x4fe   :  { %v14847_v49 = vpop.f32.mrb[29].mxu0 }
 0x4ff   :  { %v20883_v53 = vadd.f32 %v14847_v49, %v14846_v38  ;;  %v14849_v30 = vpop.f32.mrb[30].mxu0 }
 0x500   :  { %v14850_v14 = vpop.f32.mrb[31].mxu0 }
 0x501   :  { %v20885_v58 = vadd.f32 %v14850_v14, %v14849_v30  ;;  %v17369_v30 = vld [vmem:[#allocation4 + $0x120] sm:$0xff]  }
 0x502   :  { %15204 = vmatprep.subr.bf16.mxu0 %v17369_v30 }
 0x504   :  { %16085 = vmatmul.mubr.bf16.gmra.mrb[232].mxu1 %v22632_v43 }
 0x505   :  { %16088 = vmatprep.mubr.bf16.mxu1 %v22633_v55  ;;  %v14852_v19 = vpop.f32.mrb[32].mxu0 }
 0x506   :  { %v14853_v47 = vpop.f32.mrb[33].mxu0 }
 0x507   :  { %v20889_v22 = vadd.f32 %v14853_v47, %v14852_v19  ;;  %v14855_v40 = vpop.f32.mrb[34].mxu0  ;;  %v17370_v19 = vld [vmem:[#allocation4 + $0xe0] sm:$0xff]  }
 0x508   :  { %v14856_v42 = vpop.f32.mrb[35].mxu0  ;;  %15205 = vmatpush3.bf16.msra.mxu0 %v17370_v19 }
 0x509   :  { %v20891_v27 = vadd.f32 %v14856_v42, %v14855_v40 }
 0x50c   :  { %16089 = vmatmul.mubr.bf16.gmra.mrb[236].mxu1 %v22634_v13 }
 0x50d   :  { %16092 = vmatprep.mubr.bf16.mxu1 %v22635_v39  ;;  %v14858_v6 = vpop.f32.mrb[36].mxu0 }
 0x50e   :  { %v14859_v32 = vpop.f32.mrb[37].mxu0 }
 0x50f   :  { %v20895_v20 = vadd.f32 %v14859_v32, %v14858_v6  ;;  %v14861_v34 = vpop.f32.mrb[38].mxu0 }
 0x510   :  { %v14862_v54 = vpop.f32.mrb[39].mxu0 }
 0x511   :  { %v20897_v52 = vadd.f32 %v14862_v54, %v14861_v34 }
 0x514   :  { %16093 = vmatmul.mubr.bf16.gmra.mrb[240].mxu1 %v22636_v9 }
 0x515   :  { %16096 = vmatprep.mubr.bf16.mxu1 %v22637_v4  ;;  %v14864_v29 = vpop.f32.mrb[40].mxu0  ;;  %v17372_v4 = vld [vmem:[#allocation4 + $0xe8] sm:$0xff]  }
 0x516   :  { %v14865_v37 = vpop.f32.mrb[41].mxu0 }
 0x517   :  { %v20901_v24 = vadd.f32 %v14865_v37, %v14864_v29  ;;  %v14867_v36 = vpop.f32.mrb[42].mxu0 }
 0x518   :  { %v14868_v25 = vpop.f32.mrb[43].mxu0 }
 0x519   :  { %v20903_v10 = vadd.f32 %v14868_v25, %v14867_v36  ;;  %v17373_v36 = vld [vmem:[#allocation4 + $0x40] sm:$0xff]  }
 0x51a   :  { %v357_v25 = vld [vmem:[#allocation3 + $0xf0] sm:$0x1]  ;;  %15332 = vmatprep.subr.bf16.mxu1 %v17373_v36 }
 0x51c   :  { %16097 = vmatmul.mubr.bf16.gmra.mrb[244].mxu1 %v22638_v31  ;;  %v358_v31 = vsel %vm17654_vm2, 0, %v357_v25 }
 0x51d   :  { %16100 = vmatprep.mubr.bf16.mxu1 %v22639_v60  ;;  %v14870_v26 = vpop.f32.mrb[44].mxu0  ;;  %359 = vst [vmem:[#allocation3 + $0xf0] sm:$0x1] %v358_v31 }
 0x51e   :  { %v14871_v50 = vpop.f32.mrb[45].mxu0 }
 0x51f   :  { %v20907_v17 = vadd.f32 %v14871_v50, %v14870_v26  ;;  %v14873_v18 = vpop.f32.mrb[46].mxu0 }
 0x520   :  { %v14874_v33 = vpop.f32.mrb[47].mxu0 }
 0x521   :  { %v20909_v45 = vadd.f32 %v14874_v33, %v14873_v18 }
 0x524   :  { %16101 = vmatmul.mubr.bf16.gmra.mrb[248].mxu1 %v22640_v11 }
 0x525   :  { %16104 = vmatprep.mubr.bf16.mxu1 %v22641_v21  ;;  %v14876_v15 = vpop.f32.mrb[48].mxu0 }
 0x526   :  { %v14877_v57 = vpop.f32.mrb[49].mxu0 }
 0x527   :  { %v20913_v59 = vadd.f32 %v14877_v57, %v14876_v15  ;;  %v14879_v23 = vpop.f32.mrb[50].mxu0 }
 0x528   :  { %v14880_v38 = vpop.f32.mrb[51].mxu0 }
 0x529   :  { %v20915_v49 = vadd.f32 %v14880_v38, %v14879_v23 }
 0x52c   :  { %16105 = vmatmul.mubr.bf16.gmra.mrb[252].mxu1 %v20760_v12  ;;  %v17371_v12 = vld [vmem:[#allocation4 + $0x128] sm:$0xff]  }
 0x52d   :  { %v14882_v2 = vpop.f32.mrb[52].mxu0  ;;  %15206 = vmatprep.subr.bf16.mxu0 %v17371_v12 }
 0x52e   :  { %v14883_v14 = vpop.f32.mrb[53].mxu0  ;;  %15207 = vmatpush3.bf16.msra.mxu0 %v17372_v4 }
 0x52f   :  { %v20918_v43 = vadd.f32 %v14883_v14, %v14882_v2  ;;  %v14885_v55 = vpop.f32.mrb[54].mxu0 }
 0x530   :  { %v14886_v47 = vpop.f32.mrb[55].mxu0 }
 0x531   :  { %v20920_v40 = vadd.f32 %v14886_v47, %v14885_v55 }
 0x535   :  { %v14888_v42 = vpop.f32.mrb[56].mxu0 }
 0x536   :  { %v14889_v5 = vpop.f32.mrb[57].mxu0 }
 0x537   :  { %v20922_v13 = vadd.f32 %v14889_v5, %v14888_v42  ;;  %v14891_v39 = vpop.f32.mrb[58].mxu0 }
 0x538   :  { %v14892_v6 = vpop.f32.mrb[59].mxu0 }
 0x539   :  { %v20924_v32 = vadd.f32 %v14892_v6, %v14891_v39 }
 0x53d   :  { %v14894_v34 = vpop.f32.mrb[60].mxu0 }
 0x53e   :  { %v14895_v44 = vpop.f32.mrb[61].mxu0 }
 0x53f   :  { %v20926_v54 = vadd.f32 %v14895_v44, %v14894_v34  ;;  %v14897_v9 = vpop.f32.mrb[62].mxu0 }
 0x540   :  { %v14898_v29 = vpop.f32.mrb[63].mxu0 }
 0x541   :  { %v20928_v37 = vadd.f32 %v14898_v29, %v14897_v9 }
 0x545   :  { %v14940_v60 = vpop.f32.mrb[64].mxu0 }
 0x546   :  { %v14941_v26 = vpop.f32.mrb[65].mxu0 }
 0x547   :  { %v15076_v50 = vpop.f32.mrb[0].mxu1  ;;  %v14942_v18 = vadd.f32 %v14941_v26, %v14940_v60  ;;  %v14943_v1 = vpop.f32.mrb[66].mxu0 }
 0x548   :  { %v15077_v33 = vpop.f32.mrb[1].mxu1  ;;  %v14944_v11 = vpop.f32.mrb[67].mxu0 }
 0x549   :  { %v15078_v21 = vadd.f32 %v15077_v33, %v15076_v50  ;;  %v15079_v15 = vpop.f32.mrb[2].mxu1  ;;  %v16511_v57 = vadd.f32 %v14942_v18, %v20825_v41  ;;  %v14945_v23 = vadd.f32 %v14944_v11, %v14943_v1 }
 0x54a   :  { %v15080_v38 = vpop.f32.mrb[3].mxu1 }
 0x54b   :  { %v15081_v30 = vadd.f32 %v15080_v38, %v15079_v15  ;;  %v16517_v2 = vadd.f32 %v14945_v23, %v20827_v46  ;;  %v20934_v14 = vadd.f32 %v16511_v57, %v15078_v21  ;;  %v17374_v57 = vld [vmem:[#allocation4] sm:$0xff]   ;;  %v354_v23 = vld [vmem:[#allocation3 + $0xe4] sm:$0x1] }
 0x54c   :  { %15333 = vmatpush3.bf16.msra.mxu1 %v17374_v57 }
 0x54d   :  { %v14946_v55 = vpop.f32.mrb[68].mxu0  ;;  %v20936_v19 = vadd.f32 %v16517_v2, %v15081_v30  ;;  %v465_v30 = vld [vmem:[#allocation3 + $0xf8] sm:$0x1] }
 0x54e   :  { %v14947_v47 = vpop.f32.mrb[69].mxu0 }
 0x54f   :  { %v15082_v42 = vpop.f32.mrb[4].mxu1  ;;  %v14948_v5 = vadd.f32 %v14947_v47, %v14946_v55  ;;  %v14949_v39 = vpop.f32.mrb[70].mxu0 }
 0x550   :  { %v15083_v6 = vpop.f32.mrb[5].mxu1  ;;  %v14950_v12 = vpop.f32.mrb[71].mxu0 }
 0x551   :  { %v15084_v34 = vadd.f32 %v15083_v6, %v15082_v42  ;;  %v15085_v44 = vpop.f32.mrb[6].mxu1  ;;  %v16508_v41 = vadd.f32 %v14948_v5, %v20839_v61  ;;  %v14951_v9 = vadd.f32 %v14950_v12, %v14949_v39  ;;  %v466_v42 = vsel %vm17665_vm4, 0, %v465_v30  ;;  %v462_v5 = vld [vmem:[#allocation3 + $0xec] sm:$0x1]  ;;  %v17375_v6 = vld [vmem:[#allocation4 + $0x48] sm:$0xff]  }
 0x552   :  { %v15086_v4 = vpop.f32.mrb[7].mxu1  ;;  %467 = vst [vmem:[#allocation3 + $0xf8] sm:$0x1] %v466_v42  ;;  %v17376_v12 = vld [vmem:[#allocation4 + $0x8] sm:$0xff]   ;;  %15334 = vmatprep.subr.bf16.mxu1 %v17375_v6  ;;  %v17382_v6 = vld [vmem:[#allocation4 + $0x18] sm:$0xff]  }
 0x553   :  { %v15087_v29 = vadd.f32 %v15086_v4, %v15085_v44  ;;  %v16514_v46 = vadd.f32 %v14951_v9, %v20841_v51  ;;  %v20940_v36 = vadd.f32 %v16508_v41, %v15084_v34  ;;  %v355_v51 = vsel %vm17654_vm2, 0, %v354_v23  ;;  %v17377_v34 = vld [vmem:[#allocation4 + $0x130] sm:$0xff]   ;;  %v363_v9 = vld [vmem:[#allocation3 + $0x108] sm:$0x1]  ;;  %15335 = vmatpush3.bf16.msra.mxu1 %v17376_v12 }
 0x554   :  { %356 = vst [vmem:[#allocation3 + $0xe4] sm:$0x1] %v355_v51  ;;  %v17378_v41 = vld [vmem:[#allocation4 + $0x50] sm:$0xff]   ;;  %15208 = vmatprep.subr.bf16.mxu0 %v17377_v34 }
 0x555   :  { %v14952_v25 = vpop.f32.mrb[72].mxu0  ;;  %v20942_v31 = vadd.f32 %v16514_v46, %v15087_v29  ;;  %v364_v29 = vsel %vm17654_vm2, 0, %v363_v9  ;;  %15336 = vmatprep.subr.bf16.mxu1 %v17378_v41 }
 0x556   :  { %v14953_v60 = vpop.f32.mrb[73].mxu0  ;;  %365 = vst [vmem:[#allocation3 + $0x108] sm:$0x1] %v364_v29 }
 0x557   :  { %v15088_v26 = vpop.f32.mrb[8].mxu1  ;;  %v14954_v50 = vadd.f32 %v14953_v60, %v14952_v25  ;;  %v14955_v18 = vpop.f32.mrb[74].mxu0 }
 0x558   :  { %v15089_v1 = vpop.f32.mrb[9].mxu1  ;;  %v14956_v33 = vpop.f32.mrb[75].mxu0 }
 0x559   :  { %v15090_v11 = vadd.f32 %v15089_v1, %v15088_v26  ;;  %v15091_v21 = vpop.f32.mrb[10].mxu1  ;;  %v16523_v61 = vadd.f32 %v14954_v50, %v20848_v63  ;;  %v14957_v15 = vadd.f32 %v14956_v33, %v14955_v18  ;;  %v463_v63 = vsel %vm17665_vm4, 0, %v462_v5  ;;  %v17381_v5 = vld [vmem:[#allocation4 + $0x58] sm:$0xff]  }
 0x55a   :  { %v15092_v38 = vpop.f32.mrb[11].mxu1  ;;  %464 = vst [vmem:[#allocation3 + $0xec] sm:$0x1] %v463_v63 }
 0x55b   :  { %v15093_v2 = vadd.f32 %v15092_v38, %v15091_v21  ;;  %v16529_v55 = vadd.f32 %v14957_v15, %v20850_v28  ;;  %v20950_v39 = vadd.f32 %v16523_v61, %v15090_v11  ;;  %v17379_v21 = vld [vmem:[#allocation4 + $0xf0] sm:$0xff]   ;;  %v360_v15 = vld [vmem:[#allocation3 + $0xfc] sm:$0x1]  ;;  %v471_v38 = vld [vmem:[#allocation3 + $0x110] sm:$0x1] }
 0x55c   :  { %v17380_v61 = vld [vmem:[#allocation4 + $0x10] sm:$0xff]   ;;  %v361_v23 = vsel %vm17654_vm2, 0, %v360_v15  ;;  %15209 = vmatpush3.bf16.msra.mxu0 %v17379_v21 }
 0x55d   :  { %v14958_v44 = vpop.f32.mrb[76].mxu0  ;;  %v20954_v28 = vadd.f32 %v16529_v55, %v15093_v2  ;;  %15337 = vmatpush3.bf16.msra.mxu1 %v17380_v61  ;;  %362 = vst [vmem:[#allocation3 + $0xfc] sm:$0x1] %v361_v23  ;;  %v17385_v23 = vld [vmem:[#allocation4 + $0x68] sm:$0xff]  }
 0x55e   :  { %v14959_v4 = vpop.f32.mrb[77].mxu0  ;;  %15338 = vmatprep.subr.bf16.mxu1 %v17381_v5 }
 0x55f   :  { %v15094_v46 = vpop.f32.mrb[12].mxu1  ;;  %v14960_v25 = vadd.f32 %v14959_v4, %v14958_v44  ;;  %v14961_v60 = vpop.f32.mrb[78].mxu0 }
 0x560   :  { %v15095_v26 = vpop.f32.mrb[13].mxu1  ;;  %v14962_v50 = vpop.f32.mrb[79].mxu0 }
 0x561   :  { %v15096_v18 = vadd.f32 %v15095_v26, %v15094_v46  ;;  %v15097_v1 = vpop.f32.mrb[14].mxu1  ;;  %v16520_v33 = vadd.f32 %v14960_v25, %v20857_v8  ;;  %v14963_v11 = vadd.f32 %v14962_v50, %v14961_v60  ;;  %v472_v8 = vsel %vm17665_vm4, 0, %v471_v38  ;;  %15339 = vmatpush3.bf16.msra.mxu1 %v17382_v6  ;;  %v17383_v26 = vld [vmem:[#allocation4 + $0x60] sm:$0xff]  }
 0x562   :  { %v15098_v57 = vpop.f32.mrb[15].mxu1  ;;  %473 = vst [vmem:[#allocation3 + $0x110] sm:$0x1] %v472_v8  ;;  %15340 = vmatprep.subr.bf16.mxu1 %v17383_v26  ;;  %v366_v8 = vld [vmem:[#allocation3 + $0x114] sm:$0x1] }
 0x563   :  { %v15099_v51 = vadd.f32 %v15098_v57, %v15097_v1  ;;  %v16526_v30 = vadd.f32 %v14963_v11, %v20859_v48  ;;  %v20962_v2 = vadd.f32 %v16520_v33, %v15096_v18  ;;  %v351_v48 = vld [vmem:[#allocation3 + $0xd8] sm:$0x1]  ;;  %v17384_v18 = vld [vmem:[#allocation4 + $0x20] sm:$0xff]   ;;  %v459_v1 = vld [vmem:[#allocation3 + $0xe0] sm:$0x1]  ;;  %v367_v6 = vsel %vm17654_vm2, 0, %v366_v8 }
 0x564   :  { %v352_v4 = vsel %vm17654_vm2, 0, %v351_v48  ;;  %v460_v61 = vsel %vm17665_vm4, 0, %v459_v1  ;;  %v468_v57 = vld [vmem:[#allocation3 + $0x104] sm:$0x1]  ;;  %368 = vst [vmem:[#allocation3 + $0x114] sm:$0x1] %v367_v6 }
 0x565   :  { %v14964_v55 = vpop.f32.mrb[80].mxu0  ;;  %v20966_v42 = vadd.f32 %v16526_v30, %v15099_v51  ;;  %353 = vst [vmem:[#allocation3 + $0xd8] sm:$0x1] %v352_v4  ;;  %15341 = vmatpush3.bf16.msra.mxu1 %v17384_v18  ;;  %461 = vst [vmem:[#allocation3 + $0xe0] sm:$0x1] %v460_v61  ;;  %v469_v51 = vsel %vm17665_vm4, 0, %v468_v57 }
 0x566   :  { %v14965_v63 = vpop.f32.mrb[81].mxu0  ;;  %v369_v30 = vld [vmem:[#allocation3 + $0x120] sm:$0x1]  ;;  %470 = vst [vmem:[#allocation3 + $0x104] sm:$0x1] %v469_v51  ;;  %15342 = vmatprep.subr.bf16.mxu1 %v17385_v23 }
 0x567   :  { %v15100_v12 = vpop.f32.mrb[16].mxu1  ;;  %v14966_v34 = vadd.f32 %v14965_v63, %v14964_v55  ;;  %v14967_v44 = vpop.f32.mrb[82].mxu0  ;;  %v370_v63 = vsel %vm17654_vm2, 0, %v369_v30  ;;  %v9966_v26 = vld [vmem:[#allocation3 + $0xdc] sm:$0xf]  ;;  %v17390_v18 = vld [vmem:[#allocation4 + $0x30] sm:$0xff]  }
 0x568   :  { %v15101_v41 = vpop.f32.mrb[17].mxu1  ;;  %v14968_v9 = vpop.f32.mrb[83].mxu0  ;;  %371 = vst [vmem:[#allocation3 + $0x120] sm:$0x1] %v370_v63  ;;  %v17387_v30 = vld [vmem:[#allocation4 + $0x138] sm:$0xff]  }
 0x569   :  { %v15102_v29 = vadd.f32 %v15101_v41, %v15100_v12  ;;  %v15103_v46 = vpop.f32.mrb[18].mxu1  ;;  %v16535_v25 = vadd.f32 %v14966_v34, %v20865_v3  ;;  %v14969_v60 = vadd.f32 %v14968_v9, %v14967_v44  ;;  %v477_v12 = vld [vmem:[#allocation3 + $0x128] sm:$0x1]  ;;  %v17386_v41 = vld [vmem:[#allocation4 + $0x28] sm:$0xff]   ;;  %15210 = vmatprep.subr.bf16.mxu0 %v17387_v30 }
 0x56a   :  { %v15104_v50 = vpop.f32.mrb[19].mxu1  ;;  %v478_v48 = vsel %vm17665_vm4, 0, %v477_v12  ;;  %15343 = vmatpush3.bf16.msra.mxu1 %v17386_v41  ;;  %v375_v8 = vld [vmem:[#allocation3 + $0x138] sm:$0x1] }
 0x56b   :  { %v15105_v33 = vadd.f32 %v15104_v50, %v15103_v46  ;;  %v16541_v11 = vadd.f32 %v14969_v60, %v20867_v56  ;;  %v20972_v21 = vadd.f32 %v16535_v25, %v15102_v29  ;;  %479 = vst [vmem:[#allocation3 + $0x128] sm:$0x1] %v478_v48  ;;  %v17388_v60 = vld [vmem:[#allocation4 + $0x70] sm:$0xff]  }
 0x56c   :  { %v9965_v9 = vld [vmem:[#allocation3 + $0xd8] sm:$0xf]  ;;  %15344 = vmatprep.subr.bf16.mxu1 %v17388_v60  ;;  %v17394_v57 = vld [vmem:[#allocation3 + $0xe0] ss:$0 sps:$4 sm:$0x11]   ;;  %v17389_v60 = vld [vmem:[#allocation4 + $0xf8] sm:$0xff]  }
 0x56d   :  { %v14970_v15 = vpop.f32.mrb[84].mxu0  ;;  %v20976_v3 = vadd.f32 %v16541_v11, %v15105_v33  ;;  %v13379_v1 = vcombine.low %v9965_v9, %v9966_v26  ;;  %v10207_v9 = vshll.u32 %v17394_v57, 16  ;;  %v372_v26 = vld [vmem:[#allocation3 + $0x12c] sm:$0x1]  ;;  %15211 = vmatpush3.bf16.msra.mxu0 %v17389_v60  ;;  %v378_v60 = vld [vmem:[#allocation3 + $0x144] sm:$0x1] }
 0x56e   :  { %v14971_v38 = vpop.f32.mrb[85].mxu0  ;;  %15345 = vmatpush3.bf16.msra.mxu1 %v17390_v18  ;;  %v373_v18 = vsel %vm17654_vm2, 0, %v372_v26 }
 0x56f   :  { %v15106_v56 = vpop.f32.mrb[20].mxu1  ;;  %v14972_v55 = vadd.f32 %v14971_v38, %v14970_v15  ;;  %v14973_v5 = vpop.f32.mrb[86].mxu0  ;;  %v474_v15 = vld [vmem:[#allocation3 + $0x11c] sm:$0x1]  ;;  %v10202_v23 = vshll.u32 %v13379_v1, 16  ;;  %v10200_v63 = vshrl.u32 %v13379_v1, 16 }
 0x570   :  { %v15107_v34 = vpop.f32.mrb[21].mxu1  ;;  %v14974_v44 = vpop.f32.mrb[87].mxu0  ;;  %374 = vst [vmem:[#allocation3 + $0x12c] sm:$0x1] %v373_v18  ;;  %v379_v18 = vsel %vm17654_vm2, 0, %v378_v60 }
 0x571   :  { %v15108_v4 = vadd.f32 %v15107_v34, %v15106_v56  ;;  %v15109_v29 = vpop.f32.mrb[22].mxu1  ;;  %v16532_v46 = vadd.f32 %v14972_v55, %v20871_v16  ;;  %v14975_v25 = vadd.f32 %v14974_v44, %v14973_v5  ;;  %v475_v16 = vsel %vm17665_vm4, 0, %v474_v15  ;;  %v17391_v56 = vld [vmem:[#allocation4 + $0x78] sm:$0xff]   ;;  %380 = vst [vmem:[#allocation3 + $0x144] sm:$0x1] %v379_v18 }
 0x572   :  { %v15110_v50 = vpop.f32.mrb[23].mxu1  ;;  %476 = vst [vmem:[#allocation3 + $0x11c] sm:$0x1] %v475_v16  ;;  %v17392_v5 = vld [vmem:[#allocation4 + $0x38] sm:$0xff]   ;;  %15346 = vmatprep.subr.bf16.mxu1 %v17391_v56  ;;  %v10204_v41 = vrot.slane %v10202_v23, 1  ;;  %v10209_v15 = vrot.slane %v10207_v9, 1 }
 0x573   :  { %v15111_v33 = vadd.f32 %v15110_v50, %v15109_v29  ;;  %v16538_v11 = vadd.f32 %v14975_v25, %v20873_v0  ;;  %v20988_v61 = vadd.f32 %v16532_v46, %v15108_v4  ;;  %v376_v0 = vsel %vm17654_vm2, 0, %v375_v8  ;;  %15347 = vmatpush3.bf16.msra.mxu1 %v17392_v5 }
 0x574   :  { %377 = vst [vmem:[#allocation3 + $0x138] sm:$0x1] %v376_v0 }
 0x575   :  { %v14976_v38 = vpop.f32.mrb[88].mxu0  ;;  %v20990_v51 = vadd.f32 %v16538_v11, %v15111_v33  ;;  %v483_v33 = vld [vmem:[#allocation3 + $0x140] sm:$0x1]  ;;  %v10205_v11 = vor.u32 %v10204_v41, %v10200_v63 }
 0x576   :  { %v14977_v55 = vpop.f32.mrb[89].mxu0 }
 0x577   :  { %v15112_v6 = vpop.f32.mrb[24].mxu1  ;;  %v14978_v12 = vadd.f32 %v14977_v55, %v14976_v38  ;;  %v14979_v34 = vpop.f32.mrb[90].mxu0  ;;  %v10210_v23 = vsel %vm1680_vm9, %v10205_v11, %v10209_v15  ;;  %v480_v55 = vld [vmem:[#allocation3 + $0x134] sm:$0x1] }
 0x578   :  { %v15113_v44 = vpop.f32.mrb[25].mxu1  ;;  %v14980_v48 = vpop.f32.mrb[91].mxu0  ;;  %11297 = vmatprep.mubr.bf16.mxu1 %v10210_v23  ;;  %v481_v63 = vsel %vm17665_vm4, 0, %v480_v55 }
 0x579   :  { %v15114_v4 = vadd.f32 %v15113_v44, %v15112_v6  ;;  %v15115_v29 = vpop.f32.mrb[26].mxu1  ;;  %v16547_v46 = vadd.f32 %v14978_v12, %v20877_v7  ;;  %v14981_v25 = vadd.f32 %v14980_v48, %v14979_v34  ;;  %v484_v7 = vsel %vm17665_vm4, 0, %v483_v33  ;;  %11298 = vmatmul.mubr.bf16.vlgmr.msra.gmra.mrb[96].mxu1 %v13379_v1  ;;  %482 = vst [vmem:[#allocation3 + $0x134] sm:$0x1] %v481_v63 }
 0x57a   :  { %v15116_v50 = vpop.f32.mrb[27].mxu1  ;;  %485 = vst [vmem:[#allocation3 + $0x140] sm:$0x1] %v484_v7 }
 0x57b   :  { %v15117_v38 = vadd.f32 %v15116_v50, %v15115_v29  ;;  %v16553_v16 = vadd.f32 %v14981_v25, %v20879_v35  ;;  %v21000_v57 = vadd.f32 %v16547_v46, %v15114_v4  ;;  %v381_v4 = vld [vmem:[#allocation3 + $0x150] sm:$0x1] }
 0x57c   :  { %v382_v25 = vsel %vm17654_vm2, 0, %v381_v4 }
 0x57d   :  { %v14982_v30 = vpop.f32.mrb[92].mxu0  ;;  %v21005_v8 = vadd.f32 %v16553_v16, %v15117_v38  ;;  %383 = vst [vmem:[#allocation3 + $0x150] sm:$0x1] %v382_v25 }
 0x57e   :  { %v14983_v56 = vpop.f32.mrb[93].mxu0 }
 0x57f   :  { %v15118_v0 = vpop.f32.mrb[28].mxu1  ;;  %v14984_v5 = vadd.f32 %v14983_v56, %v14982_v30  ;;  %v14985_v35 = vpop.f32.mrb[94].mxu0 }
 0x580   :  { %v15119_v6 = vpop.f32.mrb[29].mxu1  ;;  %v14986_v12 = vpop.f32.mrb[95].mxu0 }
 0x581   :  { %v15120_v34 = vadd.f32 %v15119_v6, %v15118_v0  ;;  %v15121_v44 = vpop.f32.mrb[30].mxu1  ;;  %v16544_v48 = vadd.f32 %v14984_v5, %v20883_v53  ;;  %v14987_v41 = vadd.f32 %v14986_v12, %v14985_v35  ;;  %v489_v53 = vld [vmem:[#allocation3 + $0x158] sm:$0x1] }
 0x582   :  { %v15122_v9 = vpop.f32.mrb[31].mxu1  ;;  %v490_v11 = vsel %vm17665_vm4, 0, %v489_v53 }
 0x583   :  { %v15123_v29 = vadd.f32 %v15122_v9, %v15121_v44  ;;  %v16550_v46 = vadd.f32 %v14987_v41, %v20885_v58  ;;  %v21011_v1 = vadd.f32 %v16544_v48, %v15120_v34  ;;  %v486_v58 = vld [vmem:[#allocation3 + $0x14c] sm:$0x1]  ;;  %491 = vst [vmem:[#allocation3 + $0x158] sm:$0x1] %v490_v11  ;;  %v21027_v34 = vld [vmem:[#allocation4 + $0x140] sm:$0xff]  }
 0x584   :  { %v487_v7 = vsel %vm17665_vm4, 0, %v486_v58  ;;  %v387_v44 = vld [vmem:[#allocation3 + $0x168] sm:$0x1]  ;;  %16108 = vmatprep.subr.bf16.mxu0 %v21027_v34 }
 0x585   :  { %v14988_v26 = vpop.f32.mrb[96].mxu0  ;;  %v21015_v50 = vadd.f32 %v16550_v46, %v15123_v29  ;;  %488 = vst [vmem:[#allocation3 + $0x14c] sm:$0x1] %v487_v7  ;;  %v388_v9 = vsel %vm17654_vm2, 0, %v387_v44  ;;  %v384_v7 = vld [vmem:[#allocation3 + $0x15c] sm:$0x1] }
 0x586   :  { %v14989_v33 = vpop.f32.mrb[97].mxu0  ;;  %389 = vst [vmem:[#allocation3 + $0x168] sm:$0x1] %v388_v9 }
 0x587   :  { %v15124_v15 = vpop.f32.mrb[64].mxu1  ;;  %v14990_v38 = vadd.f32 %v14989_v33, %v14988_v26  ;;  %v14991_v16 = vpop.f32.mrb[98].mxu0 }
 0x588   :  { %v15125_v23 = vpop.f32.mrb[65].mxu1  ;;  %v14992_v30 = vpop.f32.mrb[99].mxu0 }
 0x589   :  { %v15126_v56 = vadd.f32 %v15125_v23, %v15124_v15  ;;  %v15127_v55 = vpop.f32.mrb[66].mxu1  ;;  %v16559_v0 = vadd.f32 %v14990_v38, %v20889_v22  ;;  %v14993_v5 = vadd.f32 %v14992_v30, %v14991_v16  ;;  %v385_v30 = vsel %vm17654_vm2, 0, %v384_v7 }
 0x58a   :  { %v15128_v35 = vpop.f32.mrb[67].mxu1  ;;  %386 = vst [vmem:[#allocation3 + $0x15c] sm:$0x1] %v385_v30 }
 0x58b   :  { %v15129_v63 = vadd.f32 %v15128_v35, %v15127_v55  ;;  %v16565_v6 = vadd.f32 %v14993_v5, %v20891_v27  ;;  %v21025_v12 = vadd.f32 %v16559_v0, %v15126_v56 }
 0x58d   :  { %v14994_v48 = vpop.f32.mrb[100].mxu0  ;;  %v21029_v41 = vadd.f32 %v16565_v6, %v15129_v63 }
 0x58e   :  { %v14995_v4 = vpop.f32.mrb[101].mxu0 }
 0x58f   :  { %v15130_v22 = vpop.f32.mrb[68].mxu1  ;;  %v14996_v29 = vadd.f32 %v14995_v4, %v14994_v48  ;;  %v14997_v46 = vpop.f32.mrb[102].mxu0 }
 0x590   :  { %v15131_v25 = vpop.f32.mrb[69].mxu1  ;;  %v14998_v27 = vpop.f32.mrb[103].mxu0 }
 0x591   :  { %v15132_v60 = vadd.f32 %v15131_v25, %v15130_v22  ;;  %v15133_v26 = vpop.f32.mrb[70].mxu1  ;;  %v16556_v18 = vadd.f32 %v14996_v29, %v20895_v20  ;;  %v14999_v53 = vadd.f32 %v14998_v27, %v14997_v46  ;;  %v495_v29 = vld [vmem:[#allocation3 + $0x170] sm:$0x1] }
 0x592   :  { %v15134_v33 = vpop.f32.mrb[71].mxu1  ;;  %v496_v27 = vsel %vm17665_vm4, 0, %v495_v29 }
 0x593   :  { %v15135_v11 = vadd.f32 %v15134_v33, %v15133_v26  ;;  %v16562_v58 = vadd.f32 %v14999_v53, %v20897_v52  ;;  %v21036_v15 = vadd.f32 %v16556_v18, %v15132_v60  ;;  %v492_v60 = vld [vmem:[#allocation3 + $0x164] sm:$0x1]  ;;  %497 = vst [vmem:[#allocation3 + $0x170] sm:$0x1] %v496_v27  ;;  %v393_v33 = vld [vmem:[#allocation3 + $0x180] sm:$0x1] }
 0x594   :  { %v498_v27 = vld [vmem:[#allocation3 + $0x17c] sm:$0x1] }
 0x595   :  { %v15000_v38 = vpop.f32.mrb[104].mxu0  ;;  %v21038_v16 = vadd.f32 %v16562_v58, %v15135_v11  ;;  %v394_v58 = vsel %vm17654_vm2, 0, %v393_v33 }
 0x596   :  { %v15001_v23 = vpop.f32.mrb[105].mxu0  ;;  %395 = vst [vmem:[#allocation3 + $0x180] sm:$0x1] %v394_v58 }
 0x597   :  { %v15136_v56 = vpop.f32.mrb[72].mxu1  ;;  %v15002_v55 = vadd.f32 %v15001_v23, %v15000_v38  ;;  %v15003_v0 = vpop.f32.mrb[106].mxu0  ;;  %v390_v38 = vld [vmem:[#allocation3 + $0x174] sm:$0x1] }
 0x598   :  { %v15137_v20 = vpop.f32.mrb[73].mxu1  ;;  %v15004_v5 = vpop.f32.mrb[107].mxu0 }
 0x599   :  { %v15138_v35 = vadd.f32 %v15137_v20, %v15136_v56  ;;  %v15139_v63 = vpop.f32.mrb[74].mxu1  ;;  %v16571_v52 = vadd.f32 %v15002_v55, %v20901_v24  ;;  %v15005_v6 = vadd.f32 %v15004_v5, %v15003_v0  ;;  %v493_v24 = vsel %vm17665_vm4, 0, %v492_v60 }
 0x59a   :  { %v15140_v44 = vpop.f32.mrb[75].mxu1  ;;  %494 = vst [vmem:[#allocation3 + $0x164] sm:$0x1] %v493_v24  ;;  %v391_v55 = vsel %vm17654_vm2, 0, %v390_v38 }
 0x59b   :  { %v15141_v48 = vadd.f32 %v15140_v44, %v15139_v63  ;;  %v16577_v9 = vadd.f32 %v15005_v6, %v20903_v10  ;;  %v21044_v4 = vadd.f32 %v16571_v52, %v15138_v35  ;;  %392 = vst [vmem:[#allocation3 + $0x174] sm:$0x1] %v391_v55  ;;  %v501_v63 = vld [vmem:[#allocation3 + $0x188] sm:$0x1] }
 0x59c   :  { %v502_v52 = vsel %vm17665_vm4, 0, %v501_v63 }
 0x59d   :  { %v15006_v22 = vpop.f32.mrb[108].mxu0  ;;  %v21046_v46 = vadd.f32 %v16577_v9, %v15141_v48  ;;  %503 = vst [vmem:[#allocation3 + $0x188] sm:$0x1] %v502_v52 }
 0x59e   :  { %v15007_v25 = vpop.f32.mrb[109].mxu0 }
 0x59f   :  { %v15142_v26 = vpop.f32.mrb[76].mxu1  ;;  %v15008_v18 = vadd.f32 %v15007_v25, %v15006_v22  ;;  %v15009_v53 = vpop.f32.mrb[110].mxu0 }
 0x5a0   :  { %v15143_v10 = vpop.f32.mrb[77].mxu1  ;;  %v15010_v11 = vpop.f32.mrb[111].mxu0 }
 0x5a1   :  { %v15144_v7 = vadd.f32 %v15143_v10, %v15142_v26  ;;  %v15145_v23 = vpop.f32.mrb[78].mxu1  ;;  %v16568_v30 = vadd.f32 %v15008_v18, %v20907_v17  ;;  %v15011_v56 = vadd.f32 %v15010_v11, %v15009_v53  ;;  %v499_v53 = vsel %vm17665_vm4, 0, %v498_v27 }
 0x5a2   :  { %v15146_v0 = vpop.f32.mrb[79].mxu1  ;;  %500 = vst [vmem:[#allocation3 + $0x17c] sm:$0x1] %v499_v53 }
 0x5a3   :  { %v15147_v20 = vadd.f32 %v15146_v0, %v15145_v23  ;;  %v16574_v5 = vadd.f32 %v15011_v56, %v20909_v45  ;;  %v21058_v35 = vadd.f32 %v16568_v30, %v15144_v7  ;;  %v399_v7 = vld [vmem:[#allocation3 + $0x198] sm:$0x1] }
 0x5a4   :  { %v400_v30 = vsel %vm17654_vm2, 0, %v399_v7 }
 0x5a5   :  { %v15012_v6 = vpop.f32.mrb[112].mxu0  ;;  %v21062_v44 = vadd.f32 %v16574_v5, %v15147_v20  ;;  %401 = vst [vmem:[#allocation3 + $0x198] sm:$0x1] %v400_v30  ;;  %v396_v5 = vld [vmem:[#allocation3 + $0x18c] sm:$0x1] }
 0x5a6   :  { %v15013_v17 = vpop.f32.mrb[113].mxu0 }
 0x5a7   :  { %v15148_v48 = vpop.f32.mrb[80].mxu1  ;;  %v15014_v9 = vadd.f32 %v15013_v17, %v15012_v6  ;;  %v15015_v22 = vpop.f32.mrb[114].mxu0  ;;  %v397_v17 = vsel %vm17654_vm2, 0, %v396_v5 }
 0x5a8   :  { %v15149_v29 = vpop.f32.mrb[81].mxu1  ;;  %v15016_v25 = vpop.f32.mrb[115].mxu0  ;;  %398 = vst [vmem:[#allocation3 + $0x18c] sm:$0x1] %v397_v17 }
 0x5a9   :  { %v15150_v60 = vadd.f32 %v15149_v29, %v15148_v48  ;;  %v15151_v26 = vpop.f32.mrb[82].mxu1  ;;  %v16583_v45 = vadd.f32 %v15014_v9, %v20913_v59  ;;  %v15017_v18 = vadd.f32 %v15016_v25, %v15015_v22 }
 0x5aa   :  { %v15152_v24 = vpop.f32.mrb[83].mxu1 }
 0x5ab   :  { %v15153_v33 = vadd.f32 %v15152_v24, %v15151_v26  ;;  %v16589_v10 = vadd.f32 %v15017_v18, %v20915_v49  ;;  %v21068_v11 = vadd.f32 %v16583_v45, %v15150_v60  ;;  %v507_v60 = vld [vmem:[#allocation3 + $0x1a0] sm:$0x1]  ;;  %v504_v24 = vld [vmem:[#allocation3 + $0x194] sm:$0x1] }
 0x5ac   :  { %v508_v45 = vsel %vm17665_vm4, 0, %v507_v60 }
 0x5ad   :  { %v15018_v58 = vpop.f32.mrb[116].mxu0  ;;  %v21070_v38 = vadd.f32 %v16589_v10, %v15153_v33  ;;  %509 = vst [vmem:[#allocation3 + $0x1a0] sm:$0x1] %v508_v45 }
 0x5ae   :  { %v15019_v23 = vpop.f32.mrb[117].mxu0 }
 0x5af   :  { %v15154_v59 = vpop.f32.mrb[84].mxu1  ;;  %v15020_v56 = vadd.f32 %v15019_v23, %v15018_v58  ;;  %v15021_v55 = vpop.f32.mrb[118].mxu0 }
 0x5b0   :  { %v15155_v0 = vpop.f32.mrb[85].mxu1  ;;  %v15022_v20 = vpop.f32.mrb[119].mxu0 }
 0x5b1   :  { %v15156_v63 = vadd.f32 %v15155_v0, %v15154_v59  ;;  %v15157_v52 = vpop.f32.mrb[86].mxu1  ;;  %v16580_v49 = vadd.f32 %v15020_v56, %v20918_v43  ;;  %v15023_v6 = vadd.f32 %v15022_v20, %v15021_v55 }
 0x5b2   :  { %v15158_v48 = vpop.f32.mrb[87].mxu1 }
 0x5b3   :  { %v15159_v9 = vadd.f32 %v15158_v48, %v15157_v52  ;;  %v16586_v22 = vadd.f32 %v15023_v6, %v20920_v40  ;;  %v21078_v29 = vadd.f32 %v16580_v49, %v15156_v63  ;;  %v505_v40 = vsel %vm17665_vm4, 0, %v504_v24 }
 0x5b4   :  { %506 = vst [vmem:[#allocation3 + $0x194] sm:$0x1] %v505_v40 }
 0x5b5   :  { %v15024_v25 = vpop.f32.mrb[120].mxu0  ;;  %v21080_v27 = vadd.f32 %v16586_v22, %v15159_v9 }
 0x5b6   :  { %v15025_v26 = vpop.f32.mrb[121].mxu0 }
 0x5b7   :  { %v15160_v43 = vpop.f32.mrb[88].mxu1  ;;  %v15026_v18 = vadd.f32 %v15025_v26, %v15024_v25  ;;  %v15027_v53 = vpop.f32.mrb[122].mxu0 }
 0x5b8   :  { %v15161_v33 = vpop.f32.mrb[89].mxu1  ;;  %v15028_v10 = vpop.f32.mrb[123].mxu0 }
 0x5b9   :  { %v15162_v58 = vadd.f32 %v15161_v33, %v15160_v43  ;;  %v15163_v7 = vpop.f32.mrb[90].mxu1  ;;  %v16595_v23 = vadd.f32 %v15026_v18, %v20922_v13  ;;  %v15029_v30 = vadd.f32 %v15028_v10, %v15027_v53  ;;  %v21101_v53 = vld [vmem:[%s22395_s2] ss:$0 sm:$0xff] }
 0x5ba   :  { %v15164_v59 = vpop.f32.mrb[91].mxu1 }
 0x5bb   :  { %v15165_v56 = vadd.f32 %v15164_v59, %v15163_v7  ;;  %v16601_v55 = vadd.f32 %v15029_v30, %v20924_v32  ;;  %v21088_v0 = vadd.f32 %v16595_v23, %v15162_v58 }
 0x5bd   :  { %v15030_v20 = vpop.f32.mrb[124].mxu0  ;;  %v21090_v5 = vadd.f32 %v16601_v55, %v15165_v56 }
 0x5be   :  { %v15031_v63 = vpop.f32.mrb[125].mxu0 }
 0x5bf   :  { %v15166_v52 = vpop.f32.mrb[92].mxu1  ;;  %v15032_v49 = vadd.f32 %v15031_v63, %v15030_v20  ;;  %v15033_v6 = vpop.f32.mrb[126].mxu0 }
 0x5c0   :  { %v15167_v17 = vpop.f32.mrb[93].mxu1  ;;  %v15034_v48 = vpop.f32.mrb[127].mxu0 }
 0x5c1   :  { %v15168_v9 = vadd.f32 %v15167_v17, %v15166_v52  ;;  %v15169_v22 = vpop.f32.mrb[94].mxu1  ;;  %v16592_v13 = vadd.f32 %v15032_v49, %v20926_v54  ;;  %v15035_v25 = vadd.f32 %v15034_v48, %v15033_v6  ;;  %v21107_v54 = vld [vmem:[%s22396_s3] ss:$0 sm:$0xff] }
 0x5c2   :  { %v15170_v60 = vpop.f32.mrb[95].mxu1 }
 0x5c3   :  { %v15171_v26 = vadd.f32 %v15170_v60, %v15169_v22  ;;  %v16598_v32 = vadd.f32 %v15035_v25, %v20928_v37  ;;  %v21094_v45 = vadd.f32 %v16592_v13, %v15168_v9 }
 0x5c5   :  { %v21096_v43 = vadd.f32 %v16598_v32, %v15171_v26 }
 0x5c7   :  { %v16078_v18 = vpop.f32.mrb[224].mxu1 }
 0x5c8   :  { %v16510_v24 = vadd.f32 %v20940_v36, %v16078_v18  ;;  %v9166_v33 = vpop.f32.mrb[225].mxu1 }
 0x5c9   :  { %v16513_v37 = vadd.f32 %v20934_v14, %v9166_v33  ;;  %v16079_v10 = vpop.f32.mrb[226].mxu1 }
 0x5ca   :  { %v9334_v40 = vmul.f32 %v16510_v24, %v21101_v53  ;;  %v16516_v58 = vadd.f32 %v20942_v31, %v16079_v10  ;;  %v9169_v7 = vpop.f32.mrb[227].mxu1 }
 0x5cb   :  { %v9332_v23 = vmul.f32 %v16513_v37, %v21101_v53  ;;  %v16519_v30 = vadd.f32 %v20936_v19, %v9169_v7 }
 0x5cc   :  { %v9373_v36 = vadd.f32 %v21107_v54, %v9334_v40  ;;  %v9335_v59 = vmul.f32 %v16516_v58, %v21101_v53 }
 0x5cd   :  { %v9371_v56 = vadd.f32 %v21107_v54, %v9332_v23  ;;  %v9333_v55 = vmul.f32 %v16519_v30, %v21101_v53  ;;  %v9859_v23 = vld [vmem:[#allocation3 + $0xf0] sm:$0xf] }
 0x5ce   :  { %v9405_v20 = vmax.f32 %v9373_v36, 0.0  ;;  %v9374_v14 = vadd.f32 %v21107_v54, %v9335_v59 }
 0x5cf   :  { %v9403_v63 = vmax.f32 %v9371_v56, 0.0  ;;  %v9372_v52 = vadd.f32 %v21107_v54, %v9333_v55  ;;  %v16082_v31 = vpop.f32.mrb[228].mxu1 }
 0x5d0   :  { %v13695_v49 = vpack.c.bf16 %v9405_v20, %v9405_v20  ;;  %v9406_v6 = vmax.f32 %v9374_v14, 0.0  ;;  %v16522_v17 = vadd.f32 %v20962_v2, %v16082_v31  ;;  %v9182_v19 = vpop.f32.mrb[229].mxu1  ;;  %v9852_v20 = vld [vmem:[#allocation3 + $0xe4] sm:$0xf] }
 0x5d1   :  { %v13693_v48 = vpack.c.bf16 %v9403_v63, %v9403_v63  ;;  %v9404_v9 = vmax.f32 %v9372_v52, 0.0  ;;  %v16525_v22 = vadd.f32 %v20950_v39, %v9182_v19  ;;  %v16083_v13 = vpop.f32.mrb[230].mxu1 }
 0x5d2   :  { %v9549_v25 = vshrl.u32 %v13695_v49, 16  ;;  %v9552_v60 = vshll.u32 %v13695_v49, 16  ;;  %v13696_v26 = vpack.c.bf16 %v9406_v6, %v9406_v6  ;;  %v9338_v32 = vmul.f32 %v16522_v17, %v21101_v53  ;;  %v9185_v18 = vpop.f32.mrb[231].mxu1  ;;  %v9863_v49 = vld [vmem:[#allocation3 + $0xf8] sm:$0x1] }
 0x5d3   :  { %v9532_v24 = vshrl.u32 %v13693_v48, 16  ;;  %v9535_v33 = vshll.u32 %v13693_v48, 16  ;;  %v13694_v37 = vpack.c.bf16 %v9404_v9, %v9404_v9  ;;  %v9336_v10 = vmul.f32 %v16525_v22, %v21101_v53 }
 0x5d4   :  { %v9551_v40 = vrot.slane %v9549_v25, 7  ;;  %v9557_v58 = vshrl.u32 %v13696_v26, 16  ;;  %v9560_v2 = vshll.u32 %v13696_v26, 16  ;;  %v9377_v7 = vadd.f32 %v21107_v54, %v9338_v32  ;;  %v9856_v26 = vld [vmem:[#allocation3 + $0xec] sm:$0x1] }
 0x5d5   :  { %v9534_v30 = vrot.slane %v9532_v24, 7  ;;  %v9540_v39 = vshrl.u32 %v13694_v37, 16  ;;  %v9543_v36 = vshll.u32 %v13694_v37, 16  ;;  %v9375_v59 = vadd.f32 %v21107_v54, %v9336_v10 }
 0x5d6   :  { %v9554_v56 = vor.u32 %v9552_v60, %v9551_v40  ;;  %v9555_v55 = vrot.slane %v9551_v40, 4  ;;  %v9559_v14 = vrot.slane %v9557_v58, 7  ;;  %v9409_v63 = vmax.f32 %v9377_v7, 0.0 }
 0x5d7   :  { %v9537_v52 = vor.u32 %v9535_v33, %v9534_v30  ;;  %v9538_v31 = vrot.slane %v9534_v30, 4  ;;  %v9542_v6 = vrot.slane %v9540_v39, 7  ;;  %v9407_v17 = vmax.f32 %v9375_v59, 0.0  ;;  %v16086_v19 = vpop.f32.mrb[232].mxu1 }
 0x5d8   :  { %v9860_v9 = vsel %vm17712_vm8, %v9554_v56, %v9859_v23  ;;  %v9562_v22 = vor.u32 %v9560_v2, %v9559_v14  ;;  %v9564_v25 = vrot.slane %v9559_v14, 4  ;;  %v13699_v32 = vpack.c.bf16 %v9409_v63, %v9409_v63  ;;  %v9198_v24 = vpop.f32.mrb[233].mxu1 }
 0x5d9   :  { %9861 = vst [vmem:[#allocation3 + $0xf0] sm:$0xf] %v9860_v9  ;;  %v9853_v60 = vsel %vm17712_vm8, %v9537_v52, %v9852_v20  ;;  %v9545_v37 = vor.u32 %v9543_v36, %v9542_v6  ;;  %v9547_v10 = vrot.slane %v9542_v6, 4  ;;  %v13697_v33 = vpack.c.bf16 %v9407_v17, %v9407_v17  ;;  %v16087_v40 = vpop.f32.mrb[234].mxu1 }
 0x5da   :  { %9854 = vst [vmem:[#allocation3 + $0xe4] sm:$0xf] %v9853_v60  ;;  %v9563_v7 = vsel %vm17700_vm7, %v9555_v55, %v9562_v22  ;;  %v9864_v23 = vsel %vm17654_vm2, %v9564_v25, %v9863_v49  ;;  %v9583_v2 = vshrl.u32 %v13699_v32, 16  ;;  %v9586_v30 = vshll.u32 %v13699_v32, 16  ;;  %v9201_v39 = vpop.f32.mrb[235].mxu1 }
 0x5db   :  { %9862 = vst [vmem:[#allocation3 + $0xf4] sm:$0xf] %v9563_v7  ;;  %9865 = vst [vmem:[#allocation3 + $0xf8] sm:$0x1] %v9864_v23  ;;  %v9546_v59 = vsel %vm17700_vm7, %v9538_v31, %v9545_v37  ;;  %v9857_v36 = vsel %vm17654_vm2, %v9547_v10, %v9856_v26  ;;  %v9566_v56 = vshrl.u32 %v13697_v33, 16  ;;  %v9569_v20 = vshll.u32 %v13697_v33, 16 }
 0x5dc   :  { %9855 = vst [vmem:[#allocation3 + $0xe8] sm:$0xf] %v9546_v59  ;;  %9858 = vst [vmem:[#allocation3 + $0xec] sm:$0x1] %v9857_v36  ;;  %v21138_v14 = vrot.slane %v9583_v2, 7  ;;  %v16528_v55 = vadd.f32 %v20966_v42, %v16083_v13  ;;  %v16531_v63 = vadd.f32 %v20954_v28, %v9185_v18  ;;  %v16534_v52 = vadd.f32 %v20988_v61, %v16086_v19 }
 0x5dd   :  { %v9873_v49 = vld [vmem:[#allocation3 + $0x108] sm:$0xf]  ;;  %v21143_v6 = vrot.slane %v9566_v56, 7  ;;  %v16537_v31 = vadd.f32 %v20972_v21, %v9198_v24  ;;  %v16540_v17 = vadd.f32 %v20990_v51, %v16087_v40  ;;  %v16543_v9 = vadd.f32 %v20976_v3, %v9201_v39  ;;  %v9866_v26 = vld [vmem:[#allocation3 + $0xfc] sm:$0xf] }
 0x5de   :  { %v9588_v22 = vor.u32 %v9586_v30, %v21138_v14  ;;  %v9589_v25 = vrot.slane %v21138_v14, 4  ;;  %v9339_v42 = vmul.f32 %v16528_v55, %v21101_v53  ;;  %v9337_v28 = vmul.f32 %v16531_v63, %v21101_v53 }
 0x5df   :  { %v9571_v61 = vor.u32 %v9569_v20, %v21143_v6  ;;  %v9572_v13 = vrot.slane %v21143_v6, 4  ;;  %v9342_v18 = vmul.f32 %v16534_v52, %v21101_v53  ;;  %v9340_v21 = vmul.f32 %v16537_v31, %v21101_v53  ;;  %v16090_v51 = vpop.f32.mrb[236].mxu1 }
 0x5e0   :  { %v9874_v3 = vsel %vm17712_vm8, %v9588_v22, %v9873_v49  ;;  %v9378_v19 = vadd.f32 %v21107_v54, %v9339_v42  ;;  %v9376_v32 = vadd.f32 %v21107_v54, %v9337_v28  ;;  %v9343_v24 = vmul.f32 %v16540_v17, %v21101_v53  ;;  %v9214_v60 = vpop.f32.mrb[237].mxu1 }
 0x5e1   :  { %9875 = vst [vmem:[#allocation3 + $0x108] sm:$0xf] %v9874_v3  ;;  %v9867_v37 = vsel %vm17712_vm8, %v9571_v61, %v9866_v26  ;;  %v9381_v10 = vadd.f32 %v21107_v54, %v9342_v18  ;;  %v9379_v33 = vadd.f32 %v21107_v54, %v9340_v21  ;;  %v9341_v40 = vmul.f32 %v16543_v9, %v21101_v53  ;;  %v21166_v7 = vpop.f32.mrb[238].mxu1  ;;  %v9877_v18 = vld [vmem:[#allocation3 + $0x110] sm:$0x1] }
 0x5e2   :  { %9868 = vst [vmem:[#allocation3 + $0xfc] sm:$0xf] %v9867_v37  ;;  %v9410_v23 = vmax.f32 %v9378_v19, 0.0  ;;  %v9408_v2 = vmax.f32 %v9376_v32, 0.0  ;;  %v9382_v30 = vadd.f32 %v21107_v54, %v9343_v24  ;;  %v16546_v39 = vadd.f32 %v21011_v1, %v16090_v51  ;;  %v21170_v59 = vpop.f32.mrb[239].mxu1 }
 0x5e3   :  { %v9413_v36 = vmax.f32 %v9381_v10, 0.0  ;;  %v9411_v56 = vmax.f32 %v9379_v33, 0.0  ;;  %v9380_v20 = vadd.f32 %v21107_v54, %v9341_v40  ;;  %v16549_v55 = vadd.f32 %v21000_v57, %v9214_v60  ;;  %v9870_v60 = vld [vmem:[#allocation3 + $0x104] sm:$0x1] }
 0x5e4   :  { %v13700_v63 = vpack.c.bf16 %v9410_v23, %v9410_v23  ;;  %v13698_v52 = vpack.c.bf16 %v9408_v2, %v9408_v2  ;;  %v9414_v49 = vmax.f32 %v9382_v30, 0.0  ;;  %v9346_v31 = vmul.f32 %v16546_v39, %v21101_v53  ;;  %v9887_v23 = vld [vmem:[#allocation3 + $0x120] sm:$0xf] }
 0x5e5   :  { %v13703_v17 = vpack.c.bf16 %v9413_v36, %v9413_v36  ;;  %v13701_v9 = vpack.c.bf16 %v9411_v56, %v9411_v56  ;;  %v9412_v22 = vmax.f32 %v9380_v20, 0.0  ;;  %v9344_v26 = vmul.f32 %v16549_v55, %v21101_v53 }
 0x5e6   :  { %v9591_v42 = vshrl.u32 %v13700_v63, 16  ;;  %v9594_v1 = vshll.u32 %v13700_v63, 16  ;;  %v9574_v28 = vshrl.u32 %v13698_v52, 16  ;;  %v9577_v61 = vshll.u32 %v13698_v52, 16  ;;  %v9880_v52 = vld [vmem:[#allocation3 + $0x114] sm:$0xf] }
 0x5e7   :  { %v9617_v21 = vshrl.u32 %v13703_v17, 16  ;;  %v9620_v51 = vshll.u32 %v13703_v17, 16  ;;  %v9600_v3 = vshrl.u32 %v13701_v9, 16  ;;  %v9603_v19 = vshll.u32 %v13701_v9, 16  ;;  %v16094_v57 = vpop.f32.mrb[240].mxu1 }
 0x5e8   :  { %v9593_v32 = vrot.slane %v9591_v42, 7  ;;  %v9576_v24 = vrot.slane %v9574_v28, 7  ;;  %v13704_v37 = vpack.c.bf16 %v9414_v49, %v9414_v49  ;;  %v13702_v10 = vpack.c.bf16 %v9412_v22, %v9412_v22  ;;  %v9230_v33 = vpop.f32.mrb[241].mxu1 }
 0x5e9   :  { %v9619_v40 = vrot.slane %v9617_v21, 7  ;;  %v9602_v2 = vrot.slane %v9600_v3, 7  ;;  %v9385_v30 = vadd.f32 %v21107_v54, %v9346_v31  ;;  %v9383_v39 = vadd.f32 %v21107_v54, %v9344_v26  ;;  %v21178_v36 = vpop.f32.mrb[242].mxu1 }
 0x5ea   :  { %v9596_v56 = vor.u32 %v9594_v1, %v9593_v32  ;;  %v9598_v20 = vrot.slane %v9593_v32, 4  ;;  %v9579_v55 = vor.u32 %v9577_v61, %v9576_v24  ;;  %v9581_v63 = vrot.slane %v9576_v24, 4  ;;  %v21180_v17 = vpop.f32.mrb[243].mxu1 }
 0x5eb   :  { %v9622_v9 = vor.u32 %v9620_v51, %v9619_v40  ;;  %v9623_v49 = vrot.slane %v9619_v40, 4  ;;  %v9605_v22 = vor.u32 %v9603_v19, %v9602_v2  ;;  %v9606_v42 = vrot.slane %v9602_v2, 4  ;;  %v9891_v40 = vld [vmem:[#allocation3 + $0x128] sm:$0x1] }
 0x5ec   :  { %v9597_v31 = vsel %vm17700_vm7, %v9589_v25, %v9596_v56  ;;  %v9878_v26 = vsel %vm17654_vm2, %v9598_v20, %v9877_v18  ;;  %v9580_v1 = vsel %vm17700_vm7, %v9572_v13, %v9579_v55  ;;  %v9871_v28 = vsel %vm17654_vm2, %v9581_v63, %v9870_v60  ;;  %v9884_v20 = vld [vmem:[#allocation3 + $0x11c] sm:$0x1] }
 0x5ed   :  { %9876 = vst [vmem:[#allocation3 + $0x10c] sm:$0xf] %v9597_v31  ;;  %9879 = vst [vmem:[#allocation3 + $0x110] sm:$0x1] %v9878_v26  ;;  %v9888_v14 = vsel %vm17712_vm8, %v9622_v9, %v9887_v23  ;;  %v9881_v25 = vsel %vm17712_vm8, %v9605_v22, %v9880_v52  ;;  %v9625_v61 = vshrl.u32 %v13704_v37, 16  ;;  %v9628_v18 = vshll.u32 %v13704_v37, 16 }
 0x5ee   :  { %9869 = vst [vmem:[#allocation3 + $0x100] sm:$0xf] %v9580_v1  ;;  %9872 = vst [vmem:[#allocation3 + $0x104] sm:$0x1] %v9871_v28  ;;  %v9608_v6 = vshrl.u32 %v13702_v10, 16  ;;  %v9611_v21 = vshll.u32 %v13702_v10, 16  ;;  %v16552_v19 = vadd.f32 %v21015_v50, %v21166_v7  ;;  %v16555_v32 = vadd.f32 %v21005_v8, %v21170_v59 }
 0x5ef   :  { %9889 = vst [vmem:[#allocation3 + $0x120] sm:$0xf] %v9888_v14  ;;  %9882 = vst [vmem:[#allocation3 + $0x114] sm:$0xf] %v9881_v25  ;;  %v9417_v13 = vmax.f32 %v9385_v30, 0.0  ;;  %v9415_v51 = vmax.f32 %v9383_v39, 0.0  ;;  %v16558_v24 = vadd.f32 %v21036_v15, %v16094_v57  ;;  %v16561_v56 = vadd.f32 %v21025_v12, %v9230_v33 }
 0x5f0   :  { %v9627_v3 = vrot.slane %v9625_v61, 7  ;;  %v21203_v60 = vpop.f32.mrb[244].mxu1  ;;  %v9610_v23 = vrot.slane %v9608_v6, 7  ;;  %v9347_v50 = vmul.f32 %v16552_v19, %v21101_v53  ;;  %v9345_v7 = vmul.f32 %v16555_v32, %v21101_v53  ;;  %v9894_v6 = vld [vmem:[#allocation3 + $0x12c] sm:$0xf] }
 0x5f1   :  { %v13707_v37 = vpack.c.bf16 %v9417_v13, %v9417_v13  ;;  %v13705_v2 = vpack.c.bf16 %v9415_v51, %v9415_v51  ;;  %v21206_v10 = vpop.f32.mrb[245].mxu1  ;;  %v9350_v25 = vmul.f32 %v16558_v24, %v21101_v53  ;;  %v9348_v61 = vmul.f32 %v16561_v56, %v21101_v53 }
 0x5f2   :  { %v9630_v30 = vor.u32 %v9628_v18, %v9627_v3  ;;  %v9632_v39 = vrot.slane %v9627_v3, 4  ;;  %v21210_v8 = vpop.f32.mrb[246].mxu1  ;;  %v9613_v15 = vor.u32 %v9611_v21, %v9610_v23  ;;  %v9615_v59 = vrot.slane %v9610_v23, 4 }
 0x5f3   :  { %v9651_v57 = vshrl.u32 %v13707_v37, 16  ;;  %v9654_v55 = vshll.u32 %v13707_v37, 16  ;;  %v21212_v63 = vpop.f32.mrb[247].mxu1  ;;  %v9634_v52 = vshrl.u32 %v13705_v2, 16  ;;  %v9637_v9 = vshll.u32 %v13705_v2, 16 }
 0x5f4   :  { %v9631_v12 = vsel %vm17700_vm7, %v9623_v49, %v9630_v30  ;;  %v9892_v33 = vsel %vm17654_vm2, %v9632_v39, %v9891_v40  ;;  %v9614_v22 = vsel %vm17700_vm7, %v9606_v42, %v9613_v15  ;;  %v9885_v31 = vsel %vm17654_vm2, %v9615_v59, %v9884_v20  ;;  %v9901_v49 = vld [vmem:[#allocation3 + $0x138] sm:$0xf]  ;;  %v9968_v20 = vld [vmem:[#allocation3 + $0xe8] sm:$0xf] }
 0x5f5   :  { %9890 = vst [vmem:[#allocation3 + $0x124] sm:$0xf] %v9631_v12  ;;  %9893 = vst [vmem:[#allocation3 + $0x128] sm:$0x1] %v9892_v33  ;;  %v21222_v26 = vrot.slane %v9651_v57, 7  ;;  %v9386_v1 = vadd.f32 %v21107_v54, %v9347_v50  ;;  %v21225_v28 = vrot.slane %v9634_v52, 7  ;;  %v9384_v14 = vadd.f32 %v21107_v54, %v9345_v7 }
 0x5f6   :  { %9883 = vst [vmem:[#allocation3 + $0x118] sm:$0xf] %v9614_v22  ;;  %9886 = vst [vmem:[#allocation3 + $0x11c] sm:$0x1] %v9885_v31  ;;  %v16564_v13 = vadd.f32 %v21038_v16, %v21178_v36  ;;  %v9389_v32 = vadd.f32 %v21107_v54, %v9350_v25  ;;  %v9387_v37 = vadd.f32 %v21107_v54, %v9348_v61  ;;  %v9967_v22 = vld [vmem:[#allocation3 + $0xe4] sm:$0xf] }
 0x5f7   :  { %v9656_v42 = vor.u32 %v9654_v55, %v21222_v26  ;;  %v9657_v18 = vrot.slane %v21222_v26, 4  ;;  %v9418_v21 = vmax.f32 %v9386_v1, 0.0  ;;  %v9639_v51 = vor.u32 %v9637_v9, %v21225_v28  ;;  %v21237_v40 = vpop.f32.mrb[248].mxu1  ;;  %v9905_v1 = vld [vmem:[#allocation3 + $0x140] sm:$0x1] }
 0x5f8   :  { %v9640_v3 = vrot.slane %v21225_v28, 4  ;;  %v9416_v19 = vmax.f32 %v9384_v14, 0.0  ;;  %v9351_v2 = vmul.f32 %v16564_v13, %v21101_v53  ;;  %v21243_v56 = vpop.f32.mrb[249].mxu1  ;;  %v9421_v30 = vmax.f32 %v9389_v32, 0.0 }
 0x5f9   :  { %v9902_v24 = vsel %vm17712_vm8, %v9656_v42, %v9901_v49  ;;  %v13708_v23 = vpack.c.bf16 %v9418_v21, %v9418_v21  ;;  %v9895_v16 = vsel %vm17712_vm8, %v9639_v51, %v9894_v6  ;;  %v16567_v39 = vadd.f32 %v21029_v41, %v21180_v17  ;;  %v21249_v50 = vpop.f32.mrb[250].mxu1  ;;  %v9898_v6 = vld [vmem:[#allocation3 + $0x134] sm:$0x1] }
 0x5fa   :  { %9903 = vst [vmem:[#allocation3 + $0x138] sm:$0xf] %v9902_v24  ;;  %v13706_v36 = vpack.c.bf16 %v9416_v19, %v9416_v19  ;;  %9896 = vst [vmem:[#allocation3 + $0x12c] sm:$0xf] %v9895_v16  ;;  %v9419_v59 = vmax.f32 %v9387_v37, 0.0  ;;  %v9390_v57 = vadd.f32 %v21107_v54, %v9351_v2  ;;  %v21252_v55 = vpop.f32.mrb[251].mxu1  ;;  %v13711_v52 = vpack.c.bf16 %v9421_v30, %v9421_v30 }
 0x5fb   :  { %v9659_v7 = vshrl.u32 %v13708_v23, 16  ;;  %v9662_v15 = vshll.u32 %v13708_v23, 16  ;;  %v9349_v9 = vmul.f32 %v16567_v39, %v21101_v53  ;;  %v21255_v17 = vcombine.low %v9967_v22, %v9968_v20  ;;  %v9915_v24 = vld [vmem:[#allocation3 + $0x150] sm:$0xf] }
 0x5fc   :  { %v9642_v12 = vshrl.u32 %v13706_v36, 16  ;;  %v9645_v33 = vshll.u32 %v13706_v36, 16  ;;  %v13709_v26 = vpack.c.bf16 %v9419_v59, %v9419_v59  ;;  %v9422_v41 = vmax.f32 %v9390_v57, 0.0  ;;  %v17396_v39 = vld [vmem:[#allocation3 + $0xec] ss:$0 sps:$4 sm:$0x11]  }
 0x5fd   :  { %v9661_v31 = vrot.slane %v9659_v7, 7  ;;  %v9685_v28 = vshrl.u32 %v13711_v52, 16  ;;  %v9688_v14 = vshll.u32 %v13711_v52, 16  ;;  %v9388_v25 = vadd.f32 %v21107_v54, %v9349_v9 }
 0x5fe   :  { %v9644_v49 = vrot.slane %v9642_v12, 7  ;;  %v9668_v21 = vshrl.u32 %v13709_v26, 16  ;;  %v9671_v13 = vshll.u32 %v13709_v26, 16  ;;  %v13712_v23 = vpack.c.bf16 %v9422_v41, %v9422_v41 }
 0x5ff   :  { %v9664_v61 = vor.u32 %v9662_v15, %v9661_v31  ;;  %v9666_v42 = vrot.slane %v9661_v31, 4  ;;  %v9687_v32 = vrot.slane %v9685_v28, 7  ;;  %v21258_v37 = vpop.f32.mrb[252].mxu1  ;;  %v9420_v30 = vmax.f32 %v9388_v25, 0.0  ;;  %v9970_v31 = vld [vmem:[#allocation3 + $0xf4] sm:$0xf] }
 0x600   :  { %v9647_v51 = vor.u32 %v9645_v33, %v9644_v49  ;;  %v9649_v19 = vrot.slane %v9644_v49, 4  ;;  %v21264_v36 = vrot.slane %v9668_v21, 7  ;;  %v21266_v20 = vpop.f32.mrb[253].mxu1  ;;  %v9693_v9 = vshrl.u32 %v13712_v23, 16  ;;  %v9969_v28 = vld [vmem:[#allocation3 + $0xf0] sm:$0xf] }
 0x601   :  { %v9665_v2 = vsel %vm17700_vm7, %v9657_v18, %v9664_v61  ;;  %v9906_v16 = vsel %vm17654_vm2, %v9666_v42, %v9905_v1  ;;  %v9690_v59 = vor.u32 %v9688_v14, %v9687_v32  ;;  %v9691_v57 = vrot.slane %v9687_v32, 4  ;;  %v9908_v18 = vld [vmem:[#allocation3 + $0x144] sm:$0xf]  ;;  %v21272_v12 = vpop.f32.mrb[254].mxu1  ;;  %v9919_v21 = vld [vmem:[#allocation3 + $0x158] sm:$0x1] }
 0x602   :  { %9904 = vst [vmem:[#allocation3 + $0x13c] sm:$0xf] %v9665_v2  ;;  %9907 = vst [vmem:[#allocation3 + $0x140] sm:$0x1] %v9906_v16  ;;  %v9648_v7 = vsel %vm17700_vm7, %v9640_v3, %v9647_v51  ;;  %v9899_v15 = vsel %vm17654_vm2, %v9649_v19, %v9898_v6  ;;  %v9673_v33 = vor.u32 %v9671_v13, %v21264_v36  ;;  %v9674_v52 = vrot.slane %v21264_v36, 4  ;;  %v21276_v26 = vpop.f32.mrb[255].mxu1 }
 0x603   :  { %9897 = vst [vmem:[#allocation3 + $0x130] sm:$0xf] %v9648_v7  ;;  %9900 = vst [vmem:[#allocation3 + $0x134] sm:$0x1] %v9899_v15  ;;  %v9696_v22 = vshll.u32 %v13712_v23, 16  ;;  %v9916_v3 = vsel %vm17712_vm8, %v9690_v59, %v9915_v24  ;;  %v13710_v41 = vpack.c.bf16 %v9420_v30, %v9420_v30  ;;  %v10212_v1 = vshrl.u32 %v21255_v17, 16 }
 0x604   :  { %v10214_v49 = vshll.u32 %v21255_v17, 16  ;;  %9917 = vst [vmem:[#allocation3 + $0x150] sm:$0xf] %v9916_v3  ;;  %v9909_v14 = vsel %vm17712_vm8, %v9673_v33, %v9908_v18  ;;  %v9695_v25 = vrot.slane %v9693_v9, 7  ;;  %v10219_v61 = vshll.u32 %v17396_v39, 16  ;;  %v17403_v9 = vld [vmem:[#allocation4 + $0x148] sm:$0xff]  }
 0x605   :  { %v16570_v42 = vadd.f32 %v21058_v35, %v21203_v60  ;;  %v17399_v6 = vld [vmem:[#allocation3 + $0xf8] ss:$0 sps:$4 sm:$0x11]   ;;  %9910 = vst [vmem:[#allocation3 + $0x144] sm:$0xf] %v9909_v14  ;;  %v9676_v13 = vshrl.u32 %v13710_v41, 16  ;;  %v21286_v32 = vcombine.low %v9969_v28, %v9970_v31 }
 0x606   :  { %v9679_v51 = vshll.u32 %v13710_v41, 16  ;;  %v10216_v19 = vrot.slane %v10214_v49, 1  ;;  %v9698_v24 = vor.u32 %v9696_v22, %v9695_v25  ;;  %v9700_v23 = vrot.slane %v9695_v25, 4  ;;  %v21291_v35 = vld [vmem:[#allocation3 + $0x104] ss:$0 sps:$4 sm:$0x11]  }
 0x607   :  { %v10221_v2 = vrot.slane %v10219_v61, 1  ;;  %v9354_v16 = vmul.f32 %v16570_v42, %v21101_v53  ;;  %v9678_v36 = vrot.slane %v9676_v13, 7  ;;  %v10224_v39 = vshrl.u32 %v21286_v32, 16  ;;  %v9912_v59 = vld [vmem:[#allocation3 + $0x14c] sm:$0x1] }
 0x608   :  { %v10217_v30 = vor.u32 %v10216_v19, %v10212_v1  ;;  %v10226_v7 = vshll.u32 %v21286_v32, 16  ;;  %v9699_v60 = vsel %vm17700_vm7, %v9691_v57, %v9698_v24  ;;  %v9920_v15 = vsel %vm17654_vm2, %v9700_v23, %v9919_v21  ;;  %v10021_v1 = vld [vmem:[#allocation3 + $0xf0] sm:$0xe]  ;;  %v21299_v61 = vld [vmem:[#allocation3 + $0x100] sm:$0xf] }
 0x609   :  { %v9393_v18 = vadd.f32 %v21107_v54, %v9354_v16  ;;  %v10231_v33 = vshll.u32 %v17399_v6, 16  ;;  %9918 = vst [vmem:[#allocation3 + $0x154] sm:$0xf] %v9699_v60  ;;  %9921 = vst [vmem:[#allocation3 + $0x158] sm:$0x1] %v9920_v15  ;;  %v9681_v22 = vor.u32 %v9679_v51, %v9678_v36  ;;  %v9683_v3 = vrot.slane %v9678_v36, 4 }
 0x60a   :  { %v10222_v41 = vsel %vm1680_vm9, %v10217_v30, %v10221_v2  ;;  %v10228_v49 = vrot.slane %v10226_v7, 1  ;;  %v13417_v14 = vcombine.low %v10021_v1, %v9970_v31  ;;  %v10494_v25 = vrot.slane %v17399_v6, 1  ;;  %v9971_v24 = vld [vmem:[#allocation3 + $0xfc] sm:$0xf]  ;;  %v9929_v60 = vld [vmem:[#allocation3 + $0x168] sm:$0xf] }
 0x60b   :  { %10831 = vmatprep.mubr.bf16.mxu0 %v10222_v41  ;;  %11305 = vmatprep.mubr.bf16.mxu1 %v10222_v41  ;;  %v9425_v28 = vmax.f32 %v9393_v18, 0.0  ;;  %v10233_v57 = vrot.slane %v10231_v33, 1  ;;  %v9682_v42 = vsel %vm17700_vm7, %v9674_v52, %v9681_v22  ;;  %v9913_v21 = vsel %vm17654_vm2, %v9683_v3, %v9912_v59  ;;  %v17413_v22 = vld [vmem:[#allocation4 + $0x158] sm:$0xff]  }
 0x60c   :  { %10832 = vmatmul.mubr.bf16.vlgmr.msra.gmra.mrb[128].mxu0 %v21255_v17  ;;  %11306 = vmatmul.mubr.bf16.gmra.mrb[100].mxu1 %v21255_v17  ;;  %v10229_v13 = vor.u32 %v10228_v49, %v10224_v39  ;;  %v10243_v51 = vshll.u32 %v21291_v35, 16  ;;  %9911 = vst [vmem:[#allocation3 + $0x148] sm:$0xf] %v9682_v42  ;;  %9914 = vst [vmem:[#allocation3 + $0x14c] sm:$0x1] %v9913_v21  ;;  %v10493_v31 = vrot.slane %v13417_v14, 1 }
 0x60d   :  { %v13715_v19 = vpack.c.bf16 %v9425_v28, %v9425_v28  ;;  %16109 = vmatpush3.bf16.msra.mxu0 %v21027_v34  ;;  %v16573_v6 = vadd.f32 %v21044_v4, %v21206_v10  ;;  %v16576_v52 = vadd.f32 %v21062_v44, %v21210_v8  ;;  %v16579_v17 = vadd.f32 %v21046_v46, %v21212_v63  ;;  %v17408_v34 = vld [vmem:[#allocation4 + $0x150] sm:$0xff]  }
 0x60e   :  { %v21314_v23 = vsel %vm1680_vm9, %v10229_v13, %v10233_v57  ;;  %v16582_v2 = vadd.f32 %v21078_v29, %v21237_v40  ;;  %v21321_v16 = vcombine.low %v9971_v24, %v21299_v61  ;;  %16110 = vmatprep.subr.bf16.mxu0 %v17403_v9  ;;  %v21324_v10 = vsel %vm1969_vm10, %v10493_v31, %v10494_v25  ;;  %v17418_v31 = vld [vmem:[#allocation4 + $0x160] sm:$0xff]  }
 0x60f   :  { %v9719_v36 = vshrl.u32 %v13715_v19, 16  ;;  %v9722_v4 = vshll.u32 %v13715_v19, 16  ;;  %10839 = vmatprep.mubr.bf16.mxu0 %v21314_v23  ;;  %11313 = vmatprep.mubr.bf16.mxu1 %v21314_v23  ;;  %v9352_v44 = vmul.f32 %v16573_v6, %v21101_v53  ;;  %v9355_v46 = vmul.f32 %v16576_v52, %v21101_v53 }
 0x610   :  { %v9353_v29 = vmul.f32 %v16579_v17, %v21101_v53  ;;  %v9358_v8 = vmul.f32 %v16582_v2, %v21101_v53  ;;  %v10236_v63 = vshrl.u32 %v21321_v16, 16  ;;  %v10238_v39 = vshll.u32 %v21321_v16, 16 }
 0x611   :  { %v21333_v40 = vrot.slane %v9719_v36, 7  ;;  %v9391_v30 = vadd.f32 %v21107_v54, %v9352_v44  ;;  %v10245_v7 = vrot.slane %v10243_v51, 1  ;;  %16111 = vmatpush3.bf16.msra.mxu0 %v17403_v9  ;;  %v9394_v15 = vadd.f32 %v21107_v54, %v9355_v46 }
 0x612   :  { %v9392_v59 = vadd.f32 %v21107_v54, %v9353_v29  ;;  %v9397_v18 = vadd.f32 %v21107_v54, %v9358_v8  ;;  %v16585_v33 = vadd.f32 %v21068_v11, %v21243_v56  ;;  %16112 = vmatprep.subr.bf16.mxu0 %v17408_v34  ;;  %v10240_v49 = vrot.slane %v10238_v39, 1 }
 0x613   :  { %v9724_v3 = vor.u32 %v9722_v4, %v21333_v40  ;;  %v9725_v41 = vrot.slane %v21333_v40, 4  ;;  %v9423_v1 = vmax.f32 %v9391_v30, 0.0  ;;  %v9426_v28 = vmax.f32 %v9394_v15, 0.0  ;;  %v21497_v58 = vld [vmem:[#allocation3 + $0x148] sm:$0xf] }
 0x614   :  { %v9424_v9 = vmax.f32 %v9392_v59, 0.0  ;;  %10840 = vmatmul.mubr.bf16.gmra.mrb[132].mxu0 %v21286_v32  ;;  %11314 = vmatmul.mubr.bf16.gmra.mrb[104].mxu1 %v21286_v32  ;;  %v9429_v57 = vmax.f32 %v9397_v18, 0.0  ;;  %v9356_v14 = vmul.f32 %v16585_v33, %v21101_v53  ;;  %v10241_v25 = vor.u32 %v10240_v49, %v10236_v63  ;;  %v9933_v63 = vld [vmem:[#allocation3 + $0x170] sm:$0x1]  ;;  %v9926_v18 = vld [vmem:[#allocation3 + $0x164] sm:$0x1] }
 0x615   :  { %v9930_v11 = vsel %vm17712_vm8, %v9724_v3, %v9929_v60  ;;  %v13713_v56 = vpack.c.bf16 %v9423_v1, %v9423_v1  ;;  %v16588_v42 = vadd.f32 %v21080_v27, %v21249_v50  ;;  %16113 = vmatpush3.bf16.msra.mxu0 %v17408_v34  ;;  %v13716_v21 = vpack.c.bf16 %v9426_v28, %v9426_v28  ;;  %v9922_v34 = vld [vmem:[#allocation3 + $0x15c] sm:$0xf]  ;;  %v9943_v3 = vld [vmem:[#allocation3 + $0x180] sm:$0xf] }
 0x616   :  { %9931 = vst [vmem:[#allocation3 + $0x168] sm:$0xf] %v9930_v11  ;;  %v13714_v13 = vpack.c.bf16 %v9424_v9, %v9424_v9  ;;  %v13719_v51 = vpack.c.bf16 %v9429_v57, %v9429_v57  ;;  %v9395_v19 = vadd.f32 %v21107_v54, %v9356_v14  ;;  %16114 = vmatprep.subr.bf16.mxu0 %v17413_v22  ;;  %v17423_v60 = vld [vmem:[#allocation4 + $0x168] sm:$0xff]   ;;  %v21365_v57 = vld [vmem:[#allocation3 + $0x110] ss:$0 sps:$4 sm:$0x11]  }
 0x617   :  { %v9702_v6 = vshrl.u32 %v13713_v56, 16  ;;  %v9705_v52 = vshll.u32 %v13713_v56, 16  ;;  %v21353_v24 = vsel %vm1680_vm9, %v10241_v25, %v10245_v7  ;;  %v9359_v17 = vmul.f32 %v16588_v42, %v21101_v53  ;;  %v21370_v11 = vld [vmem:[#allocation3 + $0x10c] sm:$0xf] }
 0x618   :  { %v9727_v2 = vshrl.u32 %v13716_v21, 16  ;;  %v9730_v36 = vshll.u32 %v13716_v21, 16  ;;  %v9710_v4 = vshrl.u32 %v13714_v13, 16  ;;  %v9713_v27 = vshll.u32 %v13714_v13, 16  ;;  %10847 = vmatprep.mubr.bf16.mxu0 %v21353_v24  ;;  %11321 = vmatprep.mubr.bf16.mxu1 %v21353_v24  ;;  %v17428_v13 = vld [vmem:[#allocation4 + $0x170] sm:$0xff]  }
 0x619   :  { %v9704_v50 = vrot.slane %v9702_v6, 7  ;;  %v9753_v44 = vshrl.u32 %v13719_v51, 16  ;;  %v9756_v46 = vshll.u32 %v13719_v51, 16  ;;  %v9427_v29 = vmax.f32 %v9395_v19, 0.0  ;;  %16115 = vmatpush3.bf16.msra.mxu0 %v17413_v22  ;;  %v9936_v6 = vld [vmem:[#allocation3 + $0x174] sm:$0xf] }
 0x61a   :  { %v9729_v8 = vrot.slane %v9727_v2, 7  ;;  %v9712_v30 = vrot.slane %v9710_v4, 7  ;;  %v9398_v39 = vadd.f32 %v21107_v54, %v9359_v17  ;;  %v16591_v7 = vadd.f32 %v21070_v38, %v21252_v55  ;;  %16116 = vmatprep.subr.bf16.mxu0 %v17418_v31 }
 0x61b   :  { %v9707_v15 = vor.u32 %v9705_v52, %v9704_v50  ;;  %v9708_v59 = vrot.slane %v9704_v50, 4  ;;  %v21361_v33 = vrot.slane %v9753_v44, 7  ;;  %v13717_v1 = vpack.c.bf16 %v9427_v29, %v9427_v29 }
 0x61c   :  { %v9732_v49 = vor.u32 %v9730_v36, %v9729_v8  ;;  %v9734_v28 = vrot.slane %v9729_v8, 4  ;;  %v9715_v22 = vor.u32 %v9713_v27, %v9712_v30  ;;  %v9717_v9 = vrot.slane %v9712_v30, 4  ;;  %10848 = vmatmul.mubr.bf16.gmra.mrb[136].mxu0 %v21321_v16  ;;  %11322 = vmatmul.mubr.bf16.gmra.mrb[108].mxu1 %v21321_v16 }
 0x61d   :  { %v9923_v38 = vsel %vm17712_vm8, %v9707_v15, %v9922_v34  ;;  %v9758_v55 = vor.u32 %v9756_v46, %v21361_v33  ;;  %v9736_v14 = vshrl.u32 %v13717_v1, 16  ;;  %16117 = vmatpush3.bf16.msra.mxu0 %v17418_v31  ;;  %v9430_v19 = vmax.f32 %v9398_v39, 0.0  ;;  %v9973_v31 = vld [vmem:[#allocation3 + $0x108] sm:$0xf] }
 0x61e   :  { %9924 = vst [vmem:[#allocation3 + $0x15c] sm:$0xf] %v9923_v38  ;;  %v9733_v56 = vsel %vm17700_vm7, %v9725_v41, %v9732_v49  ;;  %v9934_v25 = vsel %vm17654_vm2, %v9734_v28, %v9933_v63  ;;  %v9716_v42 = vsel %vm17700_vm7, %v9708_v59, %v9715_v22  ;;  %v9927_v21 = vsel %vm17654_vm2, %v9717_v9, %v9926_v18  ;;  %v9975_v18 = vld [vmem:[#allocation3 + $0x114] sm:$0xf]  ;;  %v9947_v28 = vld [vmem:[#allocation3 + $0x188] sm:$0x1] }
 0x61f   :  { %16118 = vmatprep.subr.bf16.mxu0 %v17423_v60  ;;  %9932 = vst [vmem:[#allocation3 + $0x16c] sm:$0xf] %v9733_v56  ;;  %9935 = vst [vmem:[#allocation3 + $0x170] sm:$0x1] %v9934_v25  ;;  %v9944_v40 = vsel %vm17712_vm8, %v9758_v55, %v9943_v3  ;;  %v21384_v51 = vrot.slane %v9736_v14, 7  ;;  %v9739_v41 = vshll.u32 %v13717_v1, 16  ;;  %v9357_v52 = vmul.f32 %v16591_v7, %v21101_v53 }
 0x620   :  { %9925 = vst [vmem:[#allocation3 + $0x160] sm:$0xf] %v9716_v42  ;;  %9928 = vst [vmem:[#allocation3 + $0x164] sm:$0x1] %v9927_v21  ;;  %v16594_v17 = vadd.f32 %v21094_v45, %v21258_v37  ;;  %v21390_v2 = vcombine.low %v9973_v31, %v21370_v11  ;;  %v10255_v36 = vshll.u32 %v21365_v57, 16  ;;  %v9759_v4 = vrot.slane %v21361_v33, 4 }
 0x621   :  { %9945 = vst [vmem:[#allocation3 + $0x180] sm:$0xf] %v9944_v40  ;;  %v9741_v27 = vor.u32 %v9739_v41, %v21384_v51  ;;  %v13720_v50 = vpack.c.bf16 %v9430_v19, %v9430_v19  ;;  %16119 = vmatpush3.bf16.msra.mxu0 %v17423_v60  ;;  %v9396_v34 = vadd.f32 %v21107_v54, %v9357_v52  ;;  %v21399_v45 = vld [vmem:[#allocation3 + $0x118] sm:$0xf]  ;;  %v17433_v37 = vld [vmem:[#allocation4 + $0x178] sm:$0xff]   ;;  %v21423_v42 = vld [vmem:[#allocation4 + $0x80] sm:$0xff]  }
 0x622   :  { %v9362_v44 = vmul.f32 %v16594_v17, %v21101_v53  ;;  %v10248_v46 = vshrl.u32 %v21390_v2, 16  ;;  %v10250_v29 = vshll.u32 %v21390_v2, 16  ;;  %16120 = vmatprep.subr.bf16.mxu0 %v17428_v13  ;;  %v10257_v39 = vrot.slane %v10255_v36, 1  ;;  %v17532_v40 = vld [vmem:[%s22396_s3] ss:$0 sm:$0xff] }
 0x623   :  { %v9937_v8 = vsel %vm17712_vm8, %v9741_v27, %v9936_v6  ;;  %v9761_v63 = vshrl.u32 %v13720_v50, 16  ;;  %v9764_v30 = vshll.u32 %v13720_v50, 16  ;;  %v9428_v7 = vmax.f32 %v9396_v34, 0.0  ;;  %v9940_v19 = vld [vmem:[#allocation3 + $0x17c] sm:$0x1] }
 0x624   :  { %9938 = vst [vmem:[#allocation3 + $0x174] sm:$0xf] %v9937_v8  ;;  %v9401_v60 = vadd.f32 %v21107_v54, %v9362_v44  ;;  %v10252_v15 = vrot.slane %v10250_v29, 1  ;;  %v16597_v59 = vadd.f32 %v21088_v0, %v21266_v20  ;;  %v16600_v3 = vadd.f32 %v21096_v43, %v21272_v12  ;;  %v17531_v43 = vld [vmem:[%s22395_s2] ss:$0 sm:$0xff] }
 0x625   :  { %v9763_v33 = vrot.slane %v9761_v63, 7  ;;  %v16603_v1 = vadd.f32 %v21090_v5, %v21276_v26  ;;  %v21411_v49 = vcombine.low %v9975_v18, %v21399_v45  ;;  %16121 = vmatpush3.bf16.msra.mxu0 %v17428_v13  ;;  %v13718_v22 = vpack.c.bf16 %v9428_v7, %v9428_v7  ;;  %v21417_v5 = vld [vmem:[#allocation3 + $0x11c] ss:$0 sps:$4 sm:$0x11]   ;;  %v9957_v17 = vld [vmem:[#allocation3 + $0x198] sm:$0xf] }
 0x626   :  { %v9433_v9 = vmax.f32 %v9401_v60, 0.0  ;;  %v10253_v54 = vor.u32 %v10252_v15, %v10248_v46  ;;  %v9360_v38 = vmul.f32 %v16597_v59, %v21101_v53  ;;  %16122 = vmatprep.subr.bf16.mxu0 %v17433_v37  ;;  %v9363_v12 = vmul.f32 %v17531_v43, %v16600_v3  ;;  %v21440_v8 = vld [vmem:[#allocation3 + $0x128] ss:$0 sps:$4 sm:$0x11]   ;;  %v21444_v60 = vld [vmem:[#allocation3 + $0x124] sm:$0xf] }
 0x627   :  { %v9766_v0 = vor.u32 %v9764_v30, %v9763_v33  ;;  %v9768_v20 = vrot.slane %v9763_v33, 4  ;;  %v9361_v55 = vmul.f32 %v17531_v43, %v16603_v1  ;;  %v9742_v26 = vrot.slane %v21384_v51, 4 }
 0x628   :  { %v9744_v14 = vshrl.u32 %v13718_v22, 16  ;;  %v13723_v56 = vpack.c.bf16 %v9433_v9, %v9433_v9  ;;  %v21421_v25 = vsel %vm1680_vm9, %v10253_v54, %v10257_v39  ;;  %v9747_v13 = vshll.u32 %v13718_v22, 16  ;;  %v9977_v22 = vld [vmem:[#allocation3 + $0x120] sm:$0xf]  ;;  %v9950_v54 = vld [vmem:[#allocation3 + $0x18c] sm:$0xf] }
 0x629   :  { %v9767_v53 = vsel %vm17700_vm7, %v9759_v4, %v9766_v0  ;;  %v9948_v21 = vsel %vm17654_vm2, %v9768_v20, %v9947_v28  ;;  %10855 = vmatprep.mubr.bf16.mxu0 %v21421_v25  ;;  %11329 = vmatprep.mubr.bf16.mxu1 %v21421_v25  ;;  %v9399_v51 = vadd.f32 %v17532_v40, %v9360_v38  ;;  %v10262_v27 = vshll.u32 %v21411_v49, 16 }
 0x62a   :  { %9946 = vst [vmem:[#allocation3 + $0x184] sm:$0xf] %v9767_v53  ;;  %9949 = vst [vmem:[#allocation3 + $0x188] sm:$0x1] %v9948_v21  ;;  %v9746_v41 = vrot.slane %v9744_v14, 7  ;;  %v9787_v31 = vshrl.u32 %v13723_v56, 16  ;;  %v9402_v52 = vadd.f32 %v17532_v40, %v9363_v12  ;;  %10856 = vmatmul.mubr.bf16.gmra.mrb[140].mxu0 %v21390_v2  ;;  %11330 = vmatmul.mubr.bf16.gmra.mrb[112].mxu1 %v21390_v2 }
 0x62b   :  { %v9790_v6 = vshll.u32 %v13723_v56, 16  ;;  %v9431_v36 = vmax.f32 %v9399_v51, 0.0  ;;  %v9400_v4 = vadd.f32 %v17532_v40, %v9361_v55  ;;  %v10267_v50 = vshll.u32 %v21417_v5, 16  ;;  %16123 = vmatpush3.bf16.msra.mxu0 %v17433_v37  ;;  %v9979_v14 = vld [vmem:[#allocation3 + $0x12c] sm:$0xf] }
 0x62c   :  { %v9749_v34 = vor.u32 %v9747_v13, %v9746_v41  ;;  %v9751_v44 = vrot.slane %v9746_v41, 4  ;;  %v21438_v46 = vrot.slane %v9787_v31, 7  ;;  %v9434_v29 = vmax.f32 %v9402_v52, 0.0  ;;  %16156 = vmatprep.subr.bf16.mxu0 %v21423_v42  ;;  %v21458_v56 = vld [vmem:[#allocation3 + $0x130] sm:$0xf] }
 0x62d   :  { %v13721_v63 = vpack.c.bf16 %v9431_v36, %v9431_v36  ;;  %v9432_v30 = vmax.f32 %v9400_v4, 0.0  ;;  %v10260_v39 = vshrl.u32 %v21411_v49, 16  ;;  %v10264_v7 = vrot.slane %v10262_v27, 1 }
 0x62e   :  { %v9750_v15 = vsel %vm17700_vm7, %v9742_v26, %v9749_v34  ;;  %v9941_v37 = vsel %vm17654_vm2, %v9751_v44, %v9940_v19  ;;  %v9792_v59 = vor.u32 %v9790_v6, %v21438_v46  ;;  %v10269_v18 = vrot.slane %v10267_v50, 1  ;;  %v21467_v6 = vld [vmem:[#allocation3 + $0x134] ss:$0 sps:$4 sm:$0x11]  }
 0x62f   :  { %9939 = vst [vmem:[#allocation3 + $0x178] sm:$0xf] %v9750_v15  ;;  %9942 = vst [vmem:[#allocation3 + $0x17c] sm:$0x1] %v9941_v37  ;;  %v9793_v33 = vrot.slane %v21438_v46, 4  ;;  %v9770_v3 = vshrl.u32 %v13721_v63, 16  ;;  %v13724_v1 = vpack.c.bf16 %v9434_v29, %v9434_v29  ;;  %v13722_v28 = vpack.c.bf16 %v9432_v30, %v9432_v30 }
 0x630   :  { %v9958_v9 = vsel %vm17712_vm8, %v9792_v59, %v9957_v17  ;;  %v10265_v38 = vor.u32 %v10264_v7, %v10260_v39  ;;  %v21455_v0 = vcombine.low %v9977_v22, %v21444_v60  ;;  %v10279_v20 = vshll.u32 %v21440_v8, 16  ;;  %v9961_v17 = vld [vmem:[#allocation3 + $0x1a0] sm:$0x1]  ;;  %v9954_v29 = vld [vmem:[#allocation3 + $0x194] sm:$0x1] }
 0x631   :  { %9959 = vst [vmem:[#allocation3 + $0x198] sm:$0xf] %v9958_v9  ;;  %v9772_v43 = vrot.slane %v9770_v3, 7  ;;  %v9773_v12 = vshll.u32 %v13721_v63, 16  ;;  %v9795_v55 = vshrl.u32 %v13724_v1, 16  ;;  %v9778_v26 = vshrl.u32 %v13722_v28, 16 }
 0x632   :  { %v9798_v53 = vshll.u32 %v13724_v1, 16  ;;  %v9781_v21 = vshll.u32 %v13722_v28, 16  ;;  %v21461_v13 = vsel %vm1680_vm9, %v10265_v38, %v10269_v18  ;;  %v10274_v40 = vshll.u32 %v21455_v0, 16  ;;  %v21476_v63 = vld [vmem:[#allocation3 + $0x13c] sm:$0xf] }
 0x633   :  { %v9775_v51 = vor.u32 %v9773_v12, %v9772_v43  ;;  %v9797_v41 = vrot.slane %v9795_v55, 7  ;;  %v9780_v19 = vrot.slane %v9778_v26, 7  ;;  %10863 = vmatprep.mubr.bf16.mxu0 %v21461_v13  ;;  %11337 = vmatprep.mubr.bf16.mxu1 %v21461_v13  ;;  %v10272_v31 = vshrl.u32 %v21455_v0, 16  ;;  %v9981_v3 = vld [vmem:[#allocation3 + $0x138] sm:$0xf] }
 0x634   :  { %v9776_v52 = vrot.slane %v9772_v43, 4  ;;  %10864 = vmatmul.mubr.bf16.gmra.mrb[144].mxu0 %v21411_v49  ;;  %11338 = vmatmul.mubr.bf16.gmra.mrb[116].mxu1 %v21411_v49  ;;  %v10276_v36 = vrot.slane %v10274_v40, 1  ;;  %v10281_v4 = vrot.slane %v10279_v20, 1  ;;  %v21472_v27 = vcombine.low %v9979_v14, %v21458_v56  ;;  %v21499_v38 = vld [vmem:[#allocation3 + $0x140] ss:$0 sps:$4 sm:$0x11]  }
 0x635   :  { %v9951_v50 = vsel %vm17712_vm8, %v9775_v51, %v9950_v54  ;;  %v9800_v34 = vor.u32 %v9798_v53, %v9797_v41  ;;  %v9802_v44 = vrot.slane %v9797_v41, 4  ;;  %v9783_v46 = vor.u32 %v9781_v21, %v9780_v19  ;;  %v9983_v43 = vld [vmem:[#allocation3 + $0x144] sm:$0xf]  ;;  %v21510_v14 = vld [vmem:[#allocation3 + $0x154] sm:$0xf] }
 0x636   :  { %9952 = vst [vmem:[#allocation3 + $0x18c] sm:$0xf] %v9951_v50  ;;  %v9785_v30 = vrot.slane %v9780_v19, 4  ;;  %v10277_v39 = vor.u32 %v10276_v36, %v10272_v31  ;;  %v10284_v7 = vshrl.u32 %v21472_v27, 16  ;;  %v10286_v15 = vshll.u32 %v21472_v27, 16 }
 0x637   :  { %v9801_v37 = vsel %vm17700_vm7, %v9793_v33, %v9800_v34  ;;  %v9962_v48 = vsel %vm17654_vm2, %v9802_v44, %v9961_v17  ;;  %v9784_v59 = vsel %vm17700_vm7, %v9776_v52, %v9783_v46  ;;  %v10291_v18 = vshll.u32 %v21467_v6, 16  ;;  %v9985_v40 = vld [vmem:[#allocation3 + $0x150] sm:$0xf]  ;;  %v21520_v31 = vld [vmem:[#allocation3 + $0x160] sm:$0xf] }
 0x638   :  { %9960 = vst [vmem:[#allocation3 + $0x19c] sm:$0xf] %v9801_v37  ;;  %9963 = vst [vmem:[#allocation3 + $0x1a0] sm:$0x1] %v9962_v48  ;;  %v9955_v1 = vsel %vm17654_vm2, %v9785_v30, %v9954_v29  ;;  %v21490_v28 = vsel %vm1680_vm9, %v10277_v39, %v10281_v4  ;;  %v10288_v22 = vrot.slane %v10286_v15, 1  ;;  %v21493_v33 = vcombine.low %v9981_v3, %v21476_v63 }
 0x639   :  { %9953 = vst [vmem:[#allocation3 + $0x190] sm:$0xf] %v9784_v59  ;;  %9956 = vst [vmem:[#allocation3 + $0x194] sm:$0x1] %v9955_v1  ;;  %10871 = vmatprep.mubr.bf16.mxu0 %v21490_v28  ;;  %11345 = vmatprep.mubr.bf16.mxu1 %v21490_v28  ;;  %v10293_v54 = vrot.slane %v10291_v18, 1  ;;  %v21508_v26 = vcombine.low %v9983_v43, %v21497_v58  ;;  %v10303_v21 = vshll.u32 %v21499_v38, 16 }
 0x63a   :  { %v10289_v9 = vor.u32 %v10288_v22, %v10284_v7  ;;  %v10298_v20 = vshll.u32 %v21493_v33, 16  ;;  %v10296_v53 = vshrl.u32 %v21493_v33, 16  ;;  %v21517_v51 = vcombine.low %v9985_v40, %v21510_v14  ;;  %v21522_v52 = vld [vmem:[#allocation3 + $0x14c] ss:$0 sps:$4 sm:$0x11]  }
 0x63b   :  { %v10310_v19 = vshll.u32 %v21508_v26, 16  ;;  %v10305_v17 = vrot.slane %v10303_v21, 1  ;;  %v9987_v36 = vld [vmem:[#allocation3 + $0x15c] sm:$0xf]  ;;  %v10308_v29 = vshrl.u32 %v21508_v26, 16  ;;  %v10315_v30 = vshll.u32 %v21522_v52, 16 }
 0x63c   :  { %10872 = vmatmul.mubr.bf16.gmra.mrb[148].mxu0 %v21455_v0  ;;  %11346 = vmatmul.mubr.bf16.gmra.mrb[120].mxu1 %v21455_v0  ;;  %v21505_v12 = vsel %vm1680_vm9, %v10289_v9, %v10293_v54  ;;  %v10300_v55 = vrot.slane %v10298_v20, 1  ;;  %v21524_v4 = vld [vmem:[#allocation3 + $0x158] ss:$0 sps:$4 sm:$0x11]   ;;  %v10322_v50 = vshll.u32 %v21517_v51, 16  ;;  %v21528_v34 = vcombine.low %v9987_v36, %v21520_v31 }
 0x63d   :  { %10879 = vmatprep.mubr.bf16.mxu0 %v21505_v12  ;;  %11353 = vmatprep.mubr.bf16.mxu1 %v21505_v12  ;;  %v10312_v46 = vrot.slane %v10310_v19, 1  ;;  %v21539_v39 = vld [vmem:[#allocation3 + $0x16c] sm:$0xf]  ;;  %v10327_v15 = vshll.u32 %v21524_v4, 16  ;;  %v9989_v18 = vld [vmem:[#allocation3 + $0x168] sm:$0xf] }
 0x63e   :  { %v10301_v41 = vor.u32 %v10300_v55, %v10296_v53  ;;  %v10324_v7 = vrot.slane %v10322_v50, 1  ;;  %v21542_v37 = vld [vmem:[#allocation3 + $0x164] ss:$0 sps:$4 sm:$0x11]   ;;  %v10334_v48 = vshll.u32 %v21528_v34, 16  ;;  %v10500_v3 = vrot.slane %v21365_v57, 1 }
 0x63f   :  { %v10313_v59 = vor.u32 %v10312_v46, %v10308_v29  ;;  %v10320_v1 = vshrl.u32 %v21517_v51, 16  ;;  %v21548_v22 = vcombine.low %v9989_v18, %v21539_v39  ;;  %v21550_v9 = vld [vmem:[#allocation3 + $0x170] ss:$0 sps:$4 sm:$0x11]   ;;  %v10022_v54 = vld [vmem:[#allocation3 + $0xfc] sm:$0xe] }
 0x640   :  { %v21533_v44 = vsel %vm1680_vm9, %v10301_v41, %v10305_v17  ;;  %v10506_v20 = vrot.slane %v21440_v8, 1  ;;  %v10317_v55 = vrot.slane %v10315_v30, 1  ;;  %v10023_v21 = vld [vmem:[#allocation3 + $0x108] sm:$0xe]  ;;  %v10329_v41 = vrot.slane %v10327_v15, 1 }
 0x641   :  { %v10325_v40 = vor.u32 %v10324_v7, %v10320_v1  ;;  %v10336_v19 = vrot.slane %v10334_v48, 1  ;;  %v10024_v17 = vld [vmem:[#allocation3 + $0x114] sm:$0xe]  ;;  %v21561_v8 = vld [vmem:[#allocation3 + $0x188] ss:$0 sps:$4 sm:$0x11]   ;;  %v13418_v50 = vcombine.low %v10022_v54, %v21299_v61  ;;  %v13419_v29 = vcombine.low %v10023_v21, %v21370_v11 }
 0x642   :  { %v21559_v36 = vsel %vm1680_vm9, %v10313_v59, %v10317_v55  ;;  %v10497_v46 = vrot.slane %v21291_v35, 1  ;;  %v10025_v30 = vld [vmem:[#allocation3 + $0x120] sm:$0xe]  ;;  %v10332_v7 = vshrl.u32 %v21528_v34, 16  ;;  %v13420_v48 = vcombine.low %v10024_v17, %v21399_v45  ;;  %v10026_v18 = vld [vmem:[#allocation3 + $0x12c] sm:$0xe] }
 0x643   :  { %v10503_v59 = vrot.slane %v21417_v5, 1  ;;  %v10524_v61 = vrot.slane %v21550_v9, 1  ;;  %v10496_v1 = vrot.slane %v13418_v50, 1  ;;  %v10499_v35 = vrot.slane %v13419_v29, 1  ;;  %v10027_v54 = vld [vmem:[#allocation3 + $0x138] sm:$0xe] }
 0x644   :  { %10880 = vmatmul.mubr.bf16.gmra.mrb[152].mxu0 %v21472_v27  ;;  %11354 = vmatmul.mubr.bf16.gmra.mrb[124].mxu1 %v21472_v27  ;;  %v13421_v11 = vcombine.low %v10025_v30, %v21444_v60  ;;  %v21575_v55 = vsel %vm1680_vm9, %v10325_v40, %v10329_v41  ;;  %v21577_v21 = vor.u32 %v10336_v19, %v10332_v7  ;;  %v10502_v57 = vrot.slane %v13420_v48, 1  ;;  %v10028_v53 = vld [vmem:[#allocation3 + $0x144] sm:$0xe]  ;;  %v10029_v45 = vld [vmem:[#allocation3 + $0x150] sm:$0xe] }
 0x645   :  { %10887 = vmatprep.mubr.bf16.mxu0 %v21533_v44  ;;  %11361 = vmatprep.mubr.bf16.mxu1 %v21533_v44  ;;  %v13422_v15 = vcombine.low %v10026_v18, %v21458_v56  ;;  %v21580_v17 = vld [vmem:[#allocation3 + $0x178] sm:$0xf]  ;;  %v10530_v5 = vrot.slane %v21561_v8, 1  ;;  %v21584_v50 = vsel %vm1969_vm10, %v10496_v1, %v10497_v46  ;;  %v21587_v60 = vsel %vm1969_vm10, %v10499_v35, %v10500_v3  ;;  %v10030_v40 = vld [vmem:[#allocation3 + $0x15c] sm:$0xe] }
 0x646   :  { %22646 = vst [vmem:[#allocation18_spill] sm:$0xff] %v21587_v60  ;;  %v10505_v29 = vrot.slane %v13421_v11, 1  ;;  %v21589_v41 = vld [vmem:[#allocation3 + $0x17c] ss:$0 sps:$4 sm:$0x11]   ;;  %v21592_v19 = vsel %vm1969_vm10, %v10502_v57, %v10503_v59  ;;  %v10509_v30 = vrot.slane %v21467_v6, 1  ;;  %v13423_v7 = vcombine.low %v10027_v54, %v21476_v63 }
 0x647   :  { %22647 = vst [vmem:[#allocation19_spill] sm:$0xff] %v21592_v19  ;;  %v10508_v56 = vrot.slane %v13422_v15, 1  ;;  %v10031_v48 = vld [vmem:[#allocation3 + $0x168] sm:$0xe]  ;;  %v10032_v18 = vld [vmem:[#allocation3 + $0x174] sm:$0xe]  ;;  %v13424_v1 = vcombine.low %v10028_v53, %v21497_v58  ;;  %v13425_v57 = vcombine.low %v10029_v45, %v21510_v14  ;;  %v13426_v11 = vcombine.low %v10030_v40, %v21520_v31 }
 0x648   :  { %v21596_v43 = vld [vmem:[#allocation3 + $0x184] sm:$0xf]  ;;  %v21598_v46 = vld [vmem:[#allocation3 + $0x190] sm:$0xf]  ;;  %v21601_v3 = vsel %vm1969_vm10, %v10505_v29, %v10506_v20  ;;  %v10515_v35 = vrot.slane %v21522_v52, 1  ;;  %v10511_v63 = vrot.slane %v13423_v7, 1  ;;  %v13427_v14 = vcombine.low %v10031_v48, %v21539_v39 }
 0x649   :  { %22648 = vst [vmem:[#allocation22_spill] sm:$0xff] %v21601_v3  ;;  %v10033_v15 = vld [vmem:[#allocation3 + $0x180] sm:$0xe]  ;;  %v21606_v59 = vld [vmem:[#allocation3 + $0x194] ss:$0 sps:$4 sm:$0x11]   ;;  %v21609_v6 = vsel %vm1969_vm10, %v10508_v56, %v10509_v30  ;;  %v13428_v53 = vcombine.low %v10032_v18, %v21580_v17 }
 0x64a   :  { %v10521_v54 = vrot.slane %v21542_v37, 1  ;;  %v21615_v58 = vld [vmem:[#allocation3 + $0x1a0] ss:$0 sps:$4 sm:$0x11]   ;;  %v10514_v52 = vrot.slane %v13424_v1, 1  ;;  %v10517_v20 = vrot.slane %v13425_v57, 1  ;;  %v13429_v30 = vcombine.low %v10033_v15, %v21596_v43 }
 0x64b   :  { %v21621_v45 = vld [vmem:[#allocation3 + $0x19c] sm:$0xf]  ;;  %v22649_v31 = vrot.slane %v21499_v38, 1  ;;  %v10520_v40 = vrot.slane %v13426_v11, 1  ;;  %v10527_v56 = vrot.slane %v21589_v41, 1  ;;  %v22650_v7 = vrot.slane %v21524_v4, 1 }
 0x64c   :  { %10888 = vmatmul.mubr.bf16.gmra.mrb[156].mxu0 %v21493_v33  ;;  %11362 = vmatmul.mubr.bf16.gmra.mrb[32].mxu1 %v21493_v33  ;;  %v21631_v39 = vsel %vm1969_vm10, %v10514_v52, %v10515_v35  ;;  %v10523_v18 = vrot.slane %v13427_v14, 1  ;;  %v10526_v1 = vrot.slane %v13428_v53, 1  ;;  %v10034_v57 = vld [vmem:[#allocation3 + $0x18c] sm:$0xe]  ;;  %v10035_v15 = vld [vmem:[#allocation3 + $0x198] sm:$0xe] }
 0x64d   :  { %10895 = vmatprep.mubr.bf16.mxu0 %v21559_v36  ;;  %11369 = vmatprep.mubr.bf16.mxu1 %v21559_v36  ;;  %v21626_v29 = vsel %vm1969_vm10, %v10511_v63, %v22649_v31  ;;  %v21636_v48 = vsel %vm1969_vm10, %v10517_v20, %v22650_v7  ;;  %v21639_v38 = vsel %vm1969_vm10, %v10520_v40, %v10521_v54  ;;  %v10529_v63 = vrot.slane %v13429_v30, 1  ;;  %v9991_v7 = vld [vmem:[#allocation3 + $0x174] sm:$0xf] }
 0x64e   :  { %v13430_v11 = vcombine.low %v10034_v57, %v21598_v46  ;;  %v10533_v31 = vrot.slane %v21606_v59, 1  ;;  %v10536_v35 = vrot.slane %v21615_v58, 1  ;;  %v21645_v52 = vsel %vm1969_vm10, %v10523_v18, %v10524_v61 }
 0x64f   :  { %v21648_v4 = vsel %vm1969_vm10, %v10526_v1, %v10527_v56  ;;  %v13431_v20 = vcombine.low %v10035_v15, %v21621_v45  ;;  %v21652_v14 = vsel %vm1969_vm10, %v10529_v63, %v10530_v5  ;;  %v22651_v53 = vshll.u32 %v21542_v37, 16  ;;  %v15348_v1 = vpop.f32.mrb[96].mxu1 }
 0x650   :  { %v10532_v54 = vrot.slane %v13430_v11, 1  ;;  %v22652_v5 = vshll.u32 %v21548_v22, 16  ;;  %v21668_v18 = vcombine.low %v9991_v7, %v21580_v17  ;;  %v10344_v63 = vshrl.u32 %v21548_v22, 16 }
 0x651   :  { %v10341_v40 = vrot.slane %v22651_v53, 1  ;;  %v10535_v30 = vrot.slane %v13431_v20, 1  ;;  %v10351_v11 = vshll.u32 %v21550_v9, 16 }
 0x652   :  { %v21657_v57 = vsel %vm1969_vm10, %v10532_v54, %v10533_v31  ;;  %v10348_v56 = vrot.slane %v22652_v5, 1  ;;  %v10358_v20 = vshll.u32 %v21668_v18, 16  ;;  %v9993_v54 = vld [vmem:[#allocation3 + $0x180] sm:$0xf]  ;;  %v10356_v7 = vshrl.u32 %v21668_v18, 16 }
 0x653   :  { %v21663_v61 = vsel %vm1680_vm9, %v21577_v21, %v10341_v40  ;;  %v21671_v37 = vsel %vm1969_vm10, %v10535_v30, %v10536_v35  ;;  %v15349_v21 = vpop.f32.mrb[97].mxu1  ;;  %v10353_v17 = vrot.slane %v10351_v11, 1  ;;  %v21686_v40 = vcombine.low %v9993_v54, %v21596_v43 }
 0x654   :  { %10896 = vmatmul.mubr.bf16.gmra.mrb[160].mxu0 %v21508_v26  ;;  %11370 = vmatmul.mubr.bf16.gmra.mrb[36].mxu1 %v21508_v26  ;;  %22653 = vst [vmem:[#allocation25_spill] sm:$0xff] %v21671_v37  ;;  %v21677_v31 = vadd.f32 %v15349_v21, %v15348_v1  ;;  %v10349_v15 = vor.u32 %v10348_v56, %v10344_v63  ;;  %v10360_v53 = vrot.slane %v10358_v20, 1  ;;  %v15351_v9 = vpop.f32.mrb[98].mxu1  ;;  %v10363_v5 = vshll.u32 %v21589_v41, 16  ;;  %v9995_v21 = vld [vmem:[#allocation3 + $0x18c] sm:$0xf] }
 0x655   :  { %10903 = vmatprep.mubr.bf16.mxu0 %v21575_v55  ;;  %11377 = vmatprep.mubr.bf16.mxu1 %v21575_v55  ;;  %v15352_v30 = vpop.f32.mrb[99].mxu1  ;;  %v10370_v63 = vshll.u32 %v21686_v40, 16  ;;  %v21701_v20 = vcombine.low %v9995_v21, %v21598_v46  ;;  %v10368_v41 = vshrl.u32 %v21686_v40, 16 }
 0x656   :  { %v21683_v35 = vsel %vm1680_vm9, %v10349_v15, %v10353_v17  ;;  %v21692_v56 = vadd.f32 %v15352_v30, %v15351_v9  ;;  %v10361_v1 = vor.u32 %v10360_v53, %v10356_v7  ;;  %v10365_v11 = vrot.slane %v10363_v5, 1  ;;  %v9997_v30 = vld [vmem:[#allocation3 + $0x198] sm:$0xf] }
 0x657   :  { %v10372_v15 = vrot.slane %v10370_v63, 1  ;;  %v10375_v17 = vshll.u32 %v21561_v8, 16  ;;  %v10382_v53 = vshll.u32 %v21701_v20, 16  ;;  %v21714_v5 = vcombine.low %v9997_v30, %v21621_v45  ;;  %v17533_v30 = vld [vmem:[#allocation3 + $0xe8] sm:$0xf] }
 0x658   :  { %v21698_v43 = vsel %vm1680_vm9, %v10361_v1, %v10365_v11  ;;  %v10380_v8 = vshrl.u32 %v21701_v20, 16  ;;  %v10387_v1 = vshll.u32 %v21606_v59, 16  ;;  %v10399_v59 = vshll.u32 %v21615_v58, 16 }
 0x659   :  { %v10373_v54 = vor.u32 %v10372_v15, %v10368_v41  ;;  %v10377_v9 = vrot.slane %v10375_v17, 1  ;;  %v10384_v7 = vrot.slane %v10382_v53, 1  ;;  %v10394_v11 = vshll.u32 %v21714_v5, 16  ;;  %v10020_v53 = vld [vmem:[#allocation3 + $0xe4] sm:$0xe] }
 0x65a   :  { %v10389_v21 = vrot.slane %v10387_v1, 1  ;;  %v10392_v41 = vshrl.u32 %v21714_v5, 16  ;;  %v17534_v1 = vld [vmem:[#allocation3 + $0xec] ss:$0 sps:$4 sm:$0x11]  }
 0x65b   :  { %v21711_v46 = vsel %vm1680_vm9, %v10373_v54, %v10377_v9  ;;  %v10385_v63 = vor.u32 %v10384_v7, %v10380_v8  ;;  %v10396_v45 = vrot.slane %v10394_v11, 1  ;;  %v10401_v54 = vrot.slane %v10399_v59, 1  ;;  %v17440_v11 = vld [vmem:[#allocation4 + $0x88] sm:$0xff]   ;;  %v17449_v59 = vld [vmem:[#allocation4 + $0xa0] sm:$0xff]  }
 0x65c   :  { %10904 = vmatmul.mubr.bf16.gmra.mrb[164].mxu0 %v21517_v51  ;;  %11378 = vmatmul.mubr.bf16.gmra.mrb[40].mxu1 %v21517_v51  ;;  %v13416_v7 = vcombine.low %v10020_v53, %v17533_v30  ;;  %v17458_v53 = vld [vmem:[#allocation4 + $0xb8] sm:$0xff]   ;;  %v17460_v30 = vld [vmem:[#allocation4 + $0x1c0] sm:$0xff]  }
 0x65d   :  { %10911 = vmatprep.mubr.bf16.mxu0 %v21663_v61  ;;  %11385 = vmatprep.mubr.bf16.mxu1 %v21663_v61  ;;  %v21724_v15 = vsel %vm1680_vm9, %v10385_v63, %v10389_v21  ;;  %v10397_v17 = vor.u32 %v10396_v45, %v10392_v41  ;;  %v10491_v63 = vrot.slane %v17534_v1, 1  ;;  %v17477_v21 = vld [vmem:[%s22400_s7] sm:$0xff]   ;;  %v17443_v45 = vld [vmem:[#allocation4 + $0x90] sm:$0xff]   ;;  %v17446_v41 = vld [vmem:[#allocation4 + $0x98] sm:$0xff]  }
 0x65e   :  { %v10490_v8 = vrot.slane %v13416_v7, 1  ;;  %16252 = vmatprep.subr.bf16.mxu1 %v17477_v21  ;;  %v17481_v7 = vld [vmem:[%s22400_s7 + $0x10] sm:$0xff]   ;;  %v17535_v1 = vld [vmem:[#allocation3 + $0xdc] sm:$0xf] }
 0x65f   :  { %v21733_v9 = vsel %vm1680_vm9, %v10397_v17, %v10401_v54  ;;  %16253 = vmatpush3.bf16.msra.mxu1 %v17477_v21  ;;  %v17479_v17 = vld [vmem:[%s22400_s7 + $0x8] sm:$0xff]   ;;  %v17455_v54 = vld [vmem:[#allocation4 + $0xb0] sm:$0xff]  }
 0x660   :  { %v10492_v58 = vsel %vm1969_vm10, %v10490_v8, %v10491_v63  ;;  %16254 = vmatprep.subr.bf16.mxu1 %v17479_v17  ;;  %v10019_v8 = vld [vmem:[#allocation3 + $0xd8] sm:$0xe] }
 0x661   :  { %v13415_v63 = vcombine.low %v10019_v8, %v17535_v1  ;;  %v17466_v8 = vld [vmem:[#allocation4 + $0x1d8] sm:$0xff]   ;;  %v17468_v1 = vld [vmem:[#allocation4 + $0x1e0] sm:$0xff]  }
 0x663   :  { %16255 = vmatpush3.bf16.msra.mxu1 %v17479_v17  ;;  %v10487_v21 = vrot.slane %v13415_v63, 1  ;;  %v17462_v17 = vld [vmem:[#allocation4 + $0x1c8] sm:$0xff]  }
 0x664   :  { %10912 = vmatmul.mubr.bf16.gmra.mrb[168].mxu0 %v21528_v34  ;;  %11386 = vmatmul.mubr.bf16.gmra.mrb[44].mxu1 %v21528_v34 }
 0x665   :  { %10919 = vmatprep.mubr.bf16.mxu0 %v21683_v35  ;;  %11393 = vmatprep.mubr.bf16.mxu1 %v21683_v35 }
 0x666   :  { %16256 = vmatprep.subr.bf16.mxu1 %v17481_v7 }
 0x667   :  { %16257 = vmatpush3.bf16.msra.mxu1 %v17481_v7  ;;  %v17465_v7 = vld [vmem:[#allocation4 + $0x190] sm:$0xff]  }
 0x66c   :  { %10920 = vmatmul.mubr.bf16.gmra.mrb[172].mxu0 %v21548_v22  ;;  %11394 = vmatmul.mubr.bf16.gmra.mrb[48].mxu1 %v21548_v22 }
 0x66d   :  { %10927 = vmatprep.mubr.bf16.mxu0 %v21698_v43  ;;  %11401 = vmatprep.mubr.bf16.mxu1 %v21698_v43 }
 0x674   :  { %10928 = vmatmul.mubr.bf16.gmra.mrb[176].mxu0 %v21668_v18  ;;  %11402 = vmatmul.mubr.bf16.gmra.mrb[52].mxu1 %v21668_v18 }
 0x675   :  { %10935 = vmatprep.mubr.bf16.mxu0 %v21711_v46  ;;  %11409 = vmatprep.mubr.bf16.mxu1 %v21711_v46 }
 0x67c   :  { %10936 = vmatmul.mubr.bf16.gmra.mrb[180].mxu0 %v21686_v40  ;;  %11410 = vmatmul.mubr.bf16.gmra.mrb[56].mxu1 %v21686_v40 }
 0x67d   :  { %10943 = vmatprep.mubr.bf16.mxu0 %v21724_v15  ;;  %11417 = vmatprep.mubr.bf16.mxu1 %v21724_v15 }
 0x684   :  { %10944 = vmatmul.mubr.bf16.gmra.mrb[184].mxu0 %v21701_v20  ;;  %11418 = vmatmul.mubr.bf16.gmra.mrb[60].mxu1 %v21701_v20 }
 0x685   :  { %10951 = vmatprep.mubr.bf16.mxu0 %v21733_v9 }
 0x68c   :  { %10952 = vmatmul.mubr.bf16.gmra.mrb[188].mxu0 %v21714_v5 }
 0x68d   :  { %16124 = vmatprep.mubr.bf16.mxu0 %v10492_v58 }
 0x694   :  { %16125 = vmatmul.mubr.bf16.vlgmr.msra.gmra.mrb[192].mxu0 %v21324_v10 }
 0x695   :  { %16128 = vmatprep.mubr.bf16.mxu0 %v21584_v50  ;;  %16157 = vmatpush3.bf16.msra.mxu0 %v21423_v42  ;;  %v17452_v42 = vld [vmem:[#allocation4 + $0xa8] sm:$0xff]  }
 0x696   :  { %16158 = vmatprep.subr.bf16.mxu0 %v17440_v11 }
 0x699   :  { %16159 = vmatpush3.bf16.msra.mxu0 %v17440_v11  ;;  %v17483_v11 = vld [vmem:[%s22400_s7 + $0x18] sm:$0xff]  }
 0x69a   :  { %16160 = vmatprep.subr.bf16.mxu0 %v17443_v45  ;;  %16258 = vmatprep.subr.bf16.mxu1 %v17483_v11 }
 0x69b   :  { %16259 = vmatpush3.bf16.msra.mxu1 %v17483_v11 }
 0x69c   :  { %16129 = vmatmul.mubr.bf16.gmra.mrb[196].mxu0 %v21587_v60 }
 0x69d   :  { %16132 = vmatprep.mubr.bf16.mxu0 %v21592_v19  ;;  %16161 = vmatpush3.bf16.msra.mxu0 %v17443_v45  ;;  %v17536_v45 = vld [vmem:[#allocation3 + $0xe0] ss:$0 sps:$4 sm:$0x11]  }
 0x69e   :  { %16162 = vmatprep.subr.bf16.mxu0 %v17446_v41 }
 0x6a1   :  { %16163 = vmatpush3.bf16.msra.mxu0 %v17446_v41  ;;  %v10488_v41 = vrot.slane %v17536_v45, 1 }
 0x6a2   :  { %16164 = vmatprep.subr.bf16.mxu0 %v17449_v59 }
 0x6a4   :  { %16133 = vmatmul.mubr.bf16.gmra.mrb[200].mxu0 %v21601_v3 }
 0x6a5   :  { %16136 = vmatprep.mubr.bf16.mxu0 %v21609_v6  ;;  %16165 = vmatpush3.bf16.msra.mxu0 %v17449_v59  ;;  %v10489_v59 = vsel %vm1969_vm10, %v10487_v21, %v10488_v41 }
 0x6a6   :  { %16166 = vmatprep.subr.bf16.mxu0 %v17452_v42 }
 0x6a9   :  { %16167 = vmatpush3.bf16.msra.mxu0 %v17452_v42  ;;  %v17461_v42 = vld [vmem:[#allocation4 + $0x180] sm:$0xff]  }
 0x6aa   :  { %16168 = vmatprep.subr.bf16.mxu0 %v17455_v54 }
 0x6ac   :  { %16137 = vmatmul.mubr.bf16.gmra.mrb[204].mxu0 %v21626_v29 }
 0x6ad   :  { %16140 = vmatprep.mubr.bf16.mxu0 %v21631_v39  ;;  %16169 = vmatpush3.bf16.msra.mxu0 %v17455_v54  ;;  %v17463_v54 = vld [vmem:[#allocation4 + $0x188] sm:$0xff]  }
 0x6ae   :  { %16170 = vmatprep.subr.bf16.mxu0 %v17458_v53 }
 0x6b1   :  { %16171 = vmatpush3.bf16.msra.mxu0 %v17458_v53  ;;  %v17485_v53 = vld [vmem:[%s22400_s7 + $0x20] sm:$0xff]  }
 0x6b2   :  { %15468 = vmatprep.subr.bf16.mxu0 %v17460_v30  ;;  %v17464_v30 = vld [vmem:[#allocation4 + $0x1d0] sm:$0xff]   ;;  %16260 = vmatprep.subr.bf16.mxu1 %v17485_v53 }
 0x6b3   :  { %16261 = vmatpush3.bf16.msra.mxu1 %v17485_v53 }
 0x6b4   :  { %16141 = vmatmul.mubr.bf16.gmra.mrb[208].mxu0 %v21636_v48 }
 0x6b5   :  { %16144 = vmatprep.mubr.bf16.mxu0 %v21639_v38 }
 0x6bc   :  { %16145 = vmatmul.mubr.bf16.gmra.mrb[212].mxu0 %v21645_v52 }
 0x6bd   :  { %16148 = vmatprep.mubr.bf16.mxu0 %v21648_v4 }
 0x6c4   :  { %16149 = vmatmul.mubr.bf16.gmra.mrb[216].mxu0 %v21652_v14 }
 0x6c5   :  { %16152 = vmatprep.mubr.bf16.mxu0 %v21657_v57 }
 0x6cc   :  { %16153 = vmatmul.mubr.bf16.gmra.mrb[220].mxu0 %v21671_v37  ;;  %v17470_v37 = vld [vmem:[#allocation4 + $0x1e8] sm:$0xff]  }
 0x6cd   :  { %16172 = vmatprep.mubr.bf16.mxu0 %v10489_v59 }
 0x6d4   :  { %16173 = vmatmul.mubr.bf16.vlgmr.msra.gmra.mrb[192].mxu0 %v10492_v58  ;;  %v17467_v58 = vld [vmem:[#allocation4 + $0x198] sm:$0xff]  }
 0x6d5   :  { %16176 = vmatprep.mubr.bf16.mxu0 %v21324_v10  ;;  %15469 = vmatpush3.bf16.msra.mxu0 %v17461_v42 }
 0x6d6   :  { %15470 = vmatprep.subr.bf16.mxu0 %v17462_v17 }
 0x6d9   :  { %15471 = vmatpush3.bf16.msra.mxu0 %v17463_v54  ;;  %v17469_v54 = vld [vmem:[#allocation4 + $0x1a0] sm:$0xff]  }
 0x6da   :  { %15472 = vmatprep.subr.bf16.mxu0 %v17464_v30 }
 0x6dc   :  { %16177 = vmatmul.mubr.bf16.gmra.mrb[196].mxu0 %v21584_v50 }
 0x6dd   :  { %16180 = vmatprep.mubr.bf16.mxu0 %v21587_v60  ;;  %15473 = vmatpush3.bf16.msra.mxu0 %v17465_v7 }
 0x6de   :  { %15474 = vmatprep.subr.bf16.mxu0 %v17466_v8 }
 0x6df   :  { %v15212_v63 = vpop.f32.mrb[128].mxu0  ;;  %v15354_v11 = vpop.f32.mrb[100].mxu1 }
 0x6e0   :  { %v15213_v21 = vpop.f32.mrb[129].mxu0  ;;  %v15355_v45 = vpop.f32.mrb[101].mxu1 }
 0x6e1   :  { %v15214_v41 = vadd.f32 %v15213_v21, %v15212_v63  ;;  %v15356_v59 = vadd.f32 %v15355_v45, %v15354_v11  ;;  %v15215_v42 = vpop.f32.mrb[130].mxu0  ;;  %v15357_v17 = vpop.f32.mrb[102].mxu1  ;;  %15475 = vmatpush3.bf16.msra.mxu0 %v17467_v58  ;;  %v17471_v11 = vld [vmem:[#allocation4 + $0x1a8] sm:$0xff]  }
 0x6e2   :  { %v15216_v53 = vpop.f32.mrb[131].mxu0  ;;  %v15358_v30 = vpop.f32.mrb[103].mxu1  ;;  %15476 = vmatprep.subr.bf16.mxu0 %v17468_v1  ;;  %v17487_v58 = vld [vmem:[%s22400_s7 + $0x28] sm:$0xff]   ;;  %v17472_v1 = vld [vmem:[#allocation4 + $0x1f0] sm:$0xff]  }
 0x6e3   :  { %v21774_v60 = vadd.f32 %v21677_v31, %v15214_v41  ;;  %v15217_v7 = vadd.f32 %v15216_v53, %v15215_v42  ;;  %v15359_v8 = vadd.f32 %v15358_v30, %v15357_v17  ;;  %16262 = vmatprep.subr.bf16.mxu1 %v17487_v58 }
 0x6e4   :  { %16181 = vmatmul.mubr.bf16.gmra.mrb[200].mxu0 %v21592_v19  ;;  %16263 = vmatpush3.bf16.msra.mxu1 %v17487_v58  ;;  %v17475_v58 = vld [vmem:[#allocation4 + $0x1b8] sm:$0xff]  }
 0x6e5   :  { %22654 = vst [vmem:[#allocation23_spill] sm:$0xff] %v21774_v60  ;;  %16184 = vmatprep.mubr.bf16.mxu0 %v21601_v3  ;;  %v21779_v63 = vadd.f32 %v21692_v56, %v15217_v7  ;;  %15477 = vmatpush3.bf16.msra.mxu0 %v17469_v54  ;;  %v17473_v56 = vld [vmem:[#allocation4 + $0x1b0] sm:$0xff]  }
 0x6e6   :  { %15478 = vmatprep.subr.bf16.mxu0 %v17470_v37 }
 0x6e7   :  { %22655 = vst [vmem:[#allocation21_spill] sm:$0xff] %v21779_v63  ;;  %v15218_v21 = vpop.f32.mrb[132].mxu0  ;;  %v15360_v31 = vpop.f32.mrb[104].mxu1  ;;  %v17474_v63 = vld [vmem:[#allocation4 + $0x1f8] sm:$0xff]  }
 0x6e8   :  { %v15219_v45 = vpop.f32.mrb[133].mxu0  ;;  %v15361_v41 = vpop.f32.mrb[105].mxu1 }
 0x6e9   :  { %v15220_v42 = vadd.f32 %v15219_v45, %v15218_v21  ;;  %v15362_v17 = vadd.f32 %v15361_v41, %v15360_v31  ;;  %v15221_v53 = vpop.f32.mrb[134].mxu0  ;;  %v15363_v30 = vpop.f32.mrb[106].mxu1  ;;  %15479 = vmatpush3.bf16.msra.mxu0 %v17471_v11  ;;  %v21790_v21 = vld [vmem:[#allocation4 + $0x200] sm:$0xff]  }
 0x6ea   :  { %v15222_v54 = vpop.f32.mrb[135].mxu0  ;;  %v15364_v7 = vpop.f32.mrb[107].mxu1  ;;  %15480 = vmatprep.subr.bf16.mxu0 %v17472_v1 }
 0x6eb   :  { %v21784_v60 = vadd.f32 %v15356_v59, %v15220_v42  ;;  %v15223_v37 = vadd.f32 %v15222_v54, %v15221_v53  ;;  %v15365_v3 = vadd.f32 %v15364_v7, %v15363_v30 }
 0x6ec   :  { %16185 = vmatmul.mubr.bf16.gmra.mrb[204].mxu0 %v21609_v6 }
 0x6ed   :  { %16188 = vmatprep.mubr.bf16.mxu0 %v21626_v29  ;;  %v21788_v19 = vadd.f32 %v15359_v8, %v15223_v37  ;;  %15481 = vmatpush3.bf16.msra.mxu0 %v17473_v56  ;;  %v17489_v37 = vld [vmem:[%s22400_s7 + $0x30] sm:$0xff]  }
 0x6ee   :  { %15482 = vmatprep.subr.bf16.mxu0 %v17474_v63  ;;  %16264 = vmatprep.subr.bf16.mxu1 %v17489_v37 }
 0x6ef   :  { %v15224_v11 = vpop.f32.mrb[136].mxu0  ;;  %v15366_v31 = vpop.f32.mrb[108].mxu1  ;;  %16265 = vmatpush3.bf16.msra.mxu1 %v17489_v37  ;;  %v17491_v37 = vld [vmem:[%s22400_s7 + $0x38] sm:$0xff]  }
 0x6f0   :  { %v15225_v45 = vpop.f32.mrb[137].mxu0  ;;  %v15367_v1 = vpop.f32.mrb[109].mxu1  ;;  %16266 = vmatprep.subr.bf16.mxu1 %v17491_v37 }
 0x6f1   :  { %v15226_v41 = vadd.f32 %v15225_v45, %v15224_v11  ;;  %v15368_v59 = vadd.f32 %v15367_v1, %v15366_v31  ;;  %v15227_v42 = vpop.f32.mrb[138].mxu0  ;;  %v15369_v53 = vpop.f32.mrb[110].mxu1  ;;  %15483 = vmatpush3.bf16.msra.mxu0 %v17475_v58 }
 0x6f2   :  { %v15228_v30 = vpop.f32.mrb[139].mxu0  ;;  %v15370_v54 = vpop.f32.mrb[111].mxu1  ;;  %16204 = vmatprep.subr.bf16.mxu0 %v21790_v21 }
 0x6f3   :  { %v21793_v8 = vadd.f32 %v15362_v17, %v15226_v41  ;;  %v15229_v56 = vadd.f32 %v15228_v30, %v15227_v42  ;;  %v15371_v7 = vadd.f32 %v15370_v54, %v15369_v53  ;;  %16267 = vmatpush3.bf16.msra.mxu1 %v17491_v37  ;;  %v17495_v37 = vld [vmem:[%s22393_s0 + $0x80] sm:$0xff]  }
 0x6f4   :  { %16189 = vmatmul.mubr.bf16.gmra.mrb[208].mxu0 %v21631_v39  ;;  %16268 = vmatprep.mubr.bf16.mxu1 %v17495_v37  ;;  %v17497_v37 = vld [vmem:[%s22393_s0 + $0x90] sm:$0xff]  }
 0x6f5   :  { %22656 = vst [vmem:[#allocation27_spill] sm:$0xff] %v21793_v8  ;;  %16192 = vmatprep.mubr.bf16.mxu0 %v21636_v48  ;;  %v21797_v63 = vadd.f32 %v15365_v3, %v15229_v56  ;;  %v402_v8 = vld [vmem:[#allocation3 + $0x1a4] sm:$0x1] }
 0x6f7   :  { %22657 = vst [vmem:[#allocation17_spill] sm:$0xff] %v21797_v63 }
 0x6fc   :  { %16193 = vmatmul.mubr.bf16.gmra.mrb[212].mxu0 %v21639_v38 }
 0x6fd   :  { %16196 = vmatprep.mubr.bf16.mxu0 %v21645_v52  ;;  %v15230_v17 = vpop.f32.mrb[140].mxu0  ;;  %v15372_v58 = vpop.f32.mrb[112].mxu1 }
 0x6fe   :  { %v15231_v11 = vpop.f32.mrb[141].mxu0  ;;  %v15373_v31 = vpop.f32.mrb[113].mxu1 }
 0x6ff   :  { %v15232_v45 = vadd.f32 %v15231_v11, %v15230_v17  ;;  %v15374_v1 = vadd.f32 %v15373_v31, %v15372_v58  ;;  %v15233_v41 = vpop.f32.mrb[142].mxu0  ;;  %v15375_v42 = vpop.f32.mrb[114].mxu1  ;;  %v403_v17 = vsel %vm17654_vm2, 0, %v402_v8  ;;  %v510_v58 = vld [vmem:[#allocation3 + $0x1ac] sm:$0x1] }
 0x700   :  { %v15234_v3 = vpop.f32.mrb[143].mxu0  ;;  %v15376_v53 = vpop.f32.mrb[115].mxu1  ;;  %404 = vst [vmem:[#allocation3 + $0x1a4] sm:$0x1] %v403_v17 }
 0x701   :  { %v21804_v30 = vadd.f32 %v15368_v59, %v15232_v45  ;;  %v15235_v54 = vadd.f32 %v15234_v3, %v15233_v41  ;;  %v15377_v56 = vadd.f32 %v15376_v53, %v15375_v42  ;;  %v511_v59 = vsel %vm17665_vm4, 0, %v510_v58 }
 0x702   :  { %512 = vst [vmem:[#allocation3 + $0x1ac] sm:$0x1] %v511_v59 }
 0x703   :  { %22658 = vst [vmem:[#allocation30_spill] sm:$0xff] %v21804_v30  ;;  %v21806_v63 = vadd.f32 %v15371_v7, %v15235_v54 }
 0x704   :  { %16197 = vmatmul.mubr.bf16.gmra.mrb[216].mxu0 %v21648_v4 }
 0x705   :  { %22659 = vst [vmem:[#allocation29_spill] sm:$0xff] %v21806_v63  ;;  %16200 = vmatprep.mubr.bf16.mxu0 %v21652_v14 }
 0x707   :  { %v15236_v7 = vpop.f32.mrb[144].mxu0  ;;  %v15378_v11 = vpop.f32.mrb[116].mxu1 }
 0x708   :  { %v15237_v31 = vpop.f32.mrb[145].mxu0  ;;  %v15379_v45 = vpop.f32.mrb[117].mxu1 }
 0x709   :  { %v15238_v41 = vadd.f32 %v15237_v31, %v15236_v7  ;;  %v15380_v42 = vadd.f32 %v15379_v45, %v15378_v11  ;;  %v15239_v3 = vpop.f32.mrb[146].mxu0  ;;  %v15381_v53 = vpop.f32.mrb[118].mxu1 }
 0x70a   :  { %v15240_v54 = vpop.f32.mrb[147].mxu0  ;;  %v15382_v63 = vpop.f32.mrb[119].mxu1 }
 0x70b   :  { %v21817_v62 = vadd.f32 %v15374_v1, %v15238_v41  ;;  %v15241_v8 = vadd.f32 %v15240_v54, %v15239_v3  ;;  %v15383_v30 = vadd.f32 %v15382_v63, %v15381_v53  ;;  %v17478_v3 = vld [vmem:[#allocation4 + $0x208] sm:$0xff]  }
 0x70c   :  { %16201 = vmatmul.mubr.bf16.gmra.mrb[220].mxu0 %v21657_v57  ;;  %v17496_v54 = vld [vmem:[%s22393_s0 + $0x88] sm:$0xff]  }
 0x70d   :  { %v21820_v47 = vadd.f32 %v15377_v56, %v15241_v8  ;;  %11811 = vmatprep.mubr.bf16.mxu0 %v21314_v23  ;;  %16269 = vmatmul.mubr.bf16.vlgmr.msra.gmra.mrb[160].mxu1 %v17496_v54  ;;  %v17498_v54 = vld [vmem:[%s22393_s0 + $0x98] sm:$0xff]  }
 0x70e   :  { %16272 = vmatprep.mubr.bf16.mxu1 %v17497_v37 }
 0x70f   :  { %v15242_v17 = vpop.f32.mrb[148].mxu0  ;;  %v15384_v58 = vpop.f32.mrb[120].mxu1 }
 0x710   :  { %v15243_v59 = vpop.f32.mrb[149].mxu0  ;;  %v15385_v7 = vpop.f32.mrb[121].mxu1 }
 0x711   :  { %v15244_v11 = vadd.f32 %v15243_v59, %v15242_v17  ;;  %v15386_v1 = vadd.f32 %v15385_v7, %v15384_v58  ;;  %v15245_v31 = vpop.f32.mrb[150].mxu0  ;;  %v15387_v45 = vpop.f32.mrb[122].mxu1 }
 0x712   :  { %v15246_v63 = vpop.f32.mrb[151].mxu0  ;;  %v15388_v41 = vpop.f32.mrb[123].mxu1 }
 0x713   :  { %v21826_v56 = vadd.f32 %v15380_v42, %v15244_v11  ;;  %v15247_v53 = vadd.f32 %v15246_v63, %v15245_v31  ;;  %v15389_v23 = vadd.f32 %v15388_v41, %v15387_v45  ;;  %v17480_v42 = vld [vmem:[#allocation4 + $0x210] sm:$0xff]  }
 0x714   :  { %11812 = vmatmul.mubr.bf16.vlgmr.msra.gmra.mrb[224].mxu0 %v21286_v32 }
 0x715   :  { %v21832_v8 = vadd.f32 %v15383_v30, %v15247_v53  ;;  %11819 = vmatprep.mubr.bf16.mxu0 %v21353_v24  ;;  %16205 = vmatpush3.bf16.msra.mxu0 %v21790_v21  ;;  %v17482_v21 = vld [vmem:[#allocation4 + $0x218] sm:$0xff]  }
 0x716   :  { %16206 = vmatprep.subr.bf16.mxu0 %v17478_v3  ;;  %16273 = vmatmul.mubr.bf16.gmra.mrb[164].mxu1 %v17498_v54  ;;  %v17500_v54 = vld [vmem:[%s22393_s0 + $0xa8] sm:$0xff]  }
 0x717   :  { %v15248_v17 = vpop.f32.mrb[152].mxu0  ;;  %v15390_v58 = vpop.f32.mrb[124].mxu1 }
 0x718   :  { %v15249_v32 = vpop.f32.mrb[153].mxu0  ;;  %v15391_v59 = vpop.f32.mrb[125].mxu1 }
 0x719   :  { %v15250_v7 = vadd.f32 %v15249_v32, %v15248_v17  ;;  %v15392_v11 = vadd.f32 %v15391_v59, %v15390_v58  ;;  %v15251_v30 = vpop.f32.mrb[154].mxu0  ;;  %v15393_v31 = vpop.f32.mrb[126].mxu1  ;;  %16207 = vmatpush3.bf16.msra.mxu0 %v17478_v3  ;;  %v17499_v3 = vld [vmem:[%s22393_s0 + $0xa0] sm:$0xff]  }
 0x71a   :  { %v15252_v24 = vpop.f32.mrb[155].mxu0  ;;  %v15394_v45 = vpop.f32.mrb[127].mxu1  ;;  %16208 = vmatprep.subr.bf16.mxu0 %v17480_v42  ;;  %16276 = vmatprep.mubr.bf16.mxu1 %v17499_v3 }
 0x71b   :  { %v21839_v63 = vadd.f32 %v15386_v1, %v15250_v7  ;;  %v15253_v41 = vadd.f32 %v15252_v24, %v15251_v30  ;;  %v15395_v53 = vadd.f32 %v15394_v45, %v15393_v31  ;;  %v17484_v1 = vld [vmem:[#allocation4 + $0x220] sm:$0xff]  }
 0x71c   :  { %11820 = vmatmul.mubr.bf16.gmra.mrb[228].mxu0 %v21321_v16 }
 0x71d   :  { %v21845_v37 = vadd.f32 %v15389_v23, %v15253_v41  ;;  %11827 = vmatprep.mubr.bf16.mxu0 %v21421_v25  ;;  %16209 = vmatpush3.bf16.msra.mxu0 %v17480_v42  ;;  %v17486_v42 = vld [vmem:[#allocation4 + $0x228] sm:$0xff]  }
 0x71e   :  { %16210 = vmatprep.subr.bf16.mxu0 %v17482_v21  ;;  %16277 = vmatmul.mubr.bf16.gmra.mrb[168].mxu1 %v17500_v54  ;;  %v17502_v54 = vld [vmem:[%s22393_s0 + $0xb8] sm:$0xff]  }
 0x71f   :  { %v15254_v17 = vpop.f32.mrb[156].mxu0  ;;  %v15396_v58 = vpop.f32.mrb[32].mxu1 }
 0x720   :  { %v15255_v16 = vpop.f32.mrb[157].mxu0  ;;  %v15397_v32 = vpop.f32.mrb[33].mxu1 }
 0x721   :  { %v15256_v59 = vadd.f32 %v15255_v16, %v15254_v17  ;;  %v15398_v7 = vadd.f32 %v15397_v32, %v15396_v58  ;;  %v15257_v30 = vpop.f32.mrb[158].mxu0  ;;  %v15399_v23 = vpop.f32.mrb[34].mxu1  ;;  %16211 = vmatpush3.bf16.msra.mxu0 %v17482_v21  ;;  %v17501_v21 = vld [vmem:[%s22393_s0 + $0xb0] sm:$0xff]  }
 0x722   :  { %v15258_v31 = vpop.f32.mrb[159].mxu0  ;;  %v15400_v25 = vpop.f32.mrb[35].mxu1  ;;  %16212 = vmatprep.subr.bf16.mxu0 %v17484_v1  ;;  %16280 = vmatprep.mubr.bf16.mxu1 %v17501_v21 }
 0x723   :  { %v21851_v24 = vadd.f32 %v15392_v11, %v15256_v59  ;;  %v15259_v45 = vadd.f32 %v15258_v31, %v15257_v30  ;;  %v15401_v41 = vadd.f32 %v15400_v25, %v15399_v23  ;;  %v17488_v11 = vld [vmem:[#allocation4 + $0x230] sm:$0xff]  }
 0x724   :  { %11828 = vmatmul.mubr.bf16.gmra.mrb[232].mxu0 %v21390_v2 }
 0x725   :  { %v21857_v3 = vadd.f32 %v15395_v53, %v15259_v45  ;;  %11835 = vmatprep.mubr.bf16.mxu0 %v21461_v13  ;;  %16213 = vmatpush3.bf16.msra.mxu0 %v17484_v1  ;;  %v17490_v1 = vld [vmem:[#allocation4 + $0x238] sm:$0xff]  }
 0x726   :  { %16214 = vmatprep.subr.bf16.mxu0 %v17486_v42  ;;  %16281 = vmatmul.mubr.bf16.gmra.mrb[172].mxu1 %v17502_v54 }
 0x727   :  { %v15260_v17 = vpop.f32.mrb[160].mxu0  ;;  %v15402_v58 = vpop.f32.mrb[36].mxu1 }
 0x728   :  { %v15261_v2 = vpop.f32.mrb[161].mxu0  ;;  %v15403_v16 = vpop.f32.mrb[37].mxu1 }
 0x729   :  { %v15262_v32 = vadd.f32 %v15261_v2, %v15260_v17  ;;  %v15404_v59 = vadd.f32 %v15403_v16, %v15402_v58  ;;  %v15263_v30 = vpop.f32.mrb[162].mxu0  ;;  %v15405_v53 = vpop.f32.mrb[38].mxu1  ;;  %16215 = vmatpush3.bf16.msra.mxu0 %v17486_v42  ;;  %v17503_v42 = vld [vmem:[%s22393_s0 + $0xc0] sm:$0xff]  }
 0x72a   :  { %v15264_v23 = vpop.f32.mrb[163].mxu0  ;;  %v15406_v13 = vpop.f32.mrb[39].mxu1  ;;  %16216 = vmatprep.subr.bf16.mxu0 %v17488_v11  ;;  %16284 = vmatprep.mubr.bf16.mxu1 %v17503_v42 }
 0x72b   :  { %v21863_v31 = vadd.f32 %v15398_v7, %v15262_v32  ;;  %v15265_v25 = vadd.f32 %v15264_v23, %v15263_v30  ;;  %v15407_v45 = vadd.f32 %v15406_v13, %v15405_v53  ;;  %v17504_v13 = vld [vmem:[%s22393_s0 + $0xc8] sm:$0xff]  }
 0x72c   :  { %11836 = vmatmul.mubr.bf16.gmra.mrb[236].mxu0 %v21411_v49 }
 0x72d   :  { %v21869_v21 = vadd.f32 %v15401_v41, %v15265_v25  ;;  %11843 = vmatprep.mubr.bf16.mxu0 %v21490_v28  ;;  %16217 = vmatpush3.bf16.msra.mxu0 %v17488_v11 }
 0x72e   :  { %16218 = vmatprep.subr.bf16.mxu0 %v17490_v1  ;;  %16285 = vmatmul.mubr.bf16.gmra.mrb[176].mxu1 %v17504_v13 }
 0x72f   :  { %v15266_v7 = vpop.f32.mrb[164].mxu0  ;;  %v15408_v17 = vpop.f32.mrb[40].mxu1 }
 0x730   :  { %v15267_v58 = vpop.f32.mrb[165].mxu0  ;;  %v15409_v49 = vpop.f32.mrb[41].mxu1 }
 0x731   :  { %v15268_v2 = vadd.f32 %v15267_v58, %v15266_v7  ;;  %v15410_v16 = vadd.f32 %v15409_v49, %v15408_v17  ;;  %v15269_v32 = vpop.f32.mrb[166].mxu0  ;;  %v15411_v30 = vpop.f32.mrb[42].mxu1  ;;  %16219 = vmatpush3.bf16.msra.mxu0 %v17490_v1  ;;  %v17505_v1 = vld [vmem:[%s22393_s0 + $0xd0] sm:$0xff]  }
 0x732   :  { %v15270_v41 = vpop.f32.mrb[167].mxu0  ;;  %v15412_v53 = vpop.f32.mrb[43].mxu1  ;;  %16288 = vmatprep.mubr.bf16.mxu1 %v17505_v1 }
 0x733   :  { %v21875_v28 = vadd.f32 %v15404_v59, %v15268_v2  ;;  %v15271_v11 = vadd.f32 %v15270_v41, %v15269_v32  ;;  %v15413_v23 = vadd.f32 %v15412_v53, %v15411_v30  ;;  %v21890_v53 = vld [vmem:[#allocation3 + $0x1a8] sm:$0xf] }
 0x734   :  { %11844 = vmatmul.mubr.bf16.gmra.mrb[240].mxu0 %v21455_v0 }
 0x735   :  { %v21881_v25 = vadd.f32 %v15407_v45, %v15271_v11  ;;  %11851 = vmatprep.mubr.bf16.mxu0 %v21505_v12  ;;  %v10036_v45 = vld [vmem:[#allocation3 + $0x1a4] sm:$0xe]  ;;  %v17506_v11 = vld [vmem:[%s22393_s0 + $0xd8] sm:$0xff]  }
 0x736   :  { %v13432_v1 = vcombine.low %v10036_v45, %v21890_v53  ;;  %16289 = vmatmul.mubr.bf16.gmra.mrb[180].mxu1 %v17506_v11 }
 0x737   :  { %v15272_v54 = vpop.f32.mrb[168].mxu0  ;;  %v15414_v59 = vpop.f32.mrb[44].mxu1 }
 0x738   :  { %v15273_v42 = vpop.f32.mrb[169].mxu0  ;;  %v15415_v7 = vpop.f32.mrb[45].mxu1 }
 0x739   :  { %v15274_v17 = vadd.f32 %v15273_v42, %v15272_v54  ;;  %v15416_v0 = vadd.f32 %v15415_v7, %v15414_v59  ;;  %v15275_v58 = vpop.f32.mrb[170].mxu0  ;;  %v15417_v49 = vpop.f32.mrb[46].mxu1 }
 0x73a   :  { %v15276_v2 = vpop.f32.mrb[171].mxu0  ;;  %v15418_v32 = vpop.f32.mrb[47].mxu1 }
 0x73b   :  { %v21887_v30 = vadd.f32 %v15410_v16, %v15274_v17  ;;  %v15277_v12 = vadd.f32 %v15276_v2, %v15275_v58  ;;  %v15419_v41 = vadd.f32 %v15418_v32, %v15417_v49  ;;  %v17507_v16 = vld [vmem:[%s22393_s0 + $0xe0] sm:$0xff]   ;;  %v10538_v2 = vrot.slane %v13432_v1, 1  ;;  %v17509_v1 = vld [vmem:[%s22393_s0 + $0xf0] sm:$0xff]  }
 0x73c   :  { %11852 = vmatmul.mubr.bf16.gmra.mrb[244].mxu0 %v21472_v27  ;;  %v21902_v27 = vld [vmem:[#allocation3 + $0x1ac] ss:$0 sps:$4 sm:$0x11]   ;;  %16292 = vmatprep.mubr.bf16.mxu1 %v17507_v16  ;;  %v17508_v16 = vld [vmem:[%s22393_s0 + $0xe8] sm:$0xff]  }
 0x73d   :  { %22660 = vst [vmem:[#allocation14_spill] sm:$0xff] %v21887_v30  ;;  %v21895_v13 = vadd.f32 %v15413_v23, %v15277_v12  ;;  %11859 = vmatprep.mubr.bf16.mxu0 %v21533_v44  ;;  %v10539_v44 = vrot.slane %v21902_v27, 1 }
 0x73e   :  { %16293 = vmatmul.mubr.bf16.gmra.mrb[184].mxu1 %v17508_v16 }
 0x73f   :  { %22661 = vst [vmem:[#allocation33_spill] sm:$0xff] %v21895_v13  ;;  %v15278_v54 = vpop.f32.mrb[172].mxu0  ;;  %v15420_v59 = vpop.f32.mrb[48].mxu1  ;;  %16296 = vmatprep.mubr.bf16.mxu1 %v17509_v1 }
 0x740   :  { %v15279_v42 = vpop.f32.mrb[173].mxu0  ;;  %v15421_v7 = vpop.f32.mrb[49].mxu1 }
 0x741   :  { %v15280_v17 = vadd.f32 %v15279_v42, %v15278_v54  ;;  %v15422_v58 = vadd.f32 %v15421_v7, %v15420_v59  ;;  %v15281_v23 = vpop.f32.mrb[174].mxu0  ;;  %v15423_v49 = vpop.f32.mrb[50].mxu1  ;;  %v21918_v54 = vsel %vm1969_vm10, %v10538_v2, %v10539_v44  ;;  %v17510_v2 = vld [vmem:[%s22393_s0 + $0xf8] sm:$0xff]  }
 0x742   :  { %v15282_v32 = vpop.f32.mrb[175].mxu0  ;;  %v15424_v45 = vpop.f32.mrb[51].mxu1 }
 0x743   :  { %v21905_v12 = vadd.f32 %v15416_v0, %v15280_v17  ;;  %v15283_v13 = vadd.f32 %v15282_v32, %v15281_v23  ;;  %v15425_v11 = vadd.f32 %v15424_v45, %v15423_v49 }
 0x744   :  { %11860 = vmatmul.mubr.bf16.gmra.mrb[248].mxu0 %v21493_v33 }
 0x745   :  { %v21911_v30 = vadd.f32 %v15419_v41, %v15283_v13  ;;  %11867 = vmatprep.mubr.bf16.mxu0 %v21559_v36 }
 0x746   :  { %16297 = vmatmul.mubr.bf16.gmra.mrb[188].mxu1 %v17510_v2 }
 0x747   :  { %22662 = vst [vmem:[#allocation20_spill] sm:$0xff] %v21911_v30  ;;  %v15284_v0 = vpop.f32.mrb[176].mxu0  ;;  %v15426_v59 = vpop.f32.mrb[52].mxu1 }
 0x748   :  { %v15285_v33 = vpop.f32.mrb[177].mxu0  ;;  %v15427_v42 = vpop.f32.mrb[53].mxu1 }
 0x749   :  { %v15286_v7 = vadd.f32 %v15285_v33, %v15284_v0  ;;  %v15428_v17 = vadd.f32 %v15427_v42, %v15426_v59  ;;  %v15287_v23 = vpop.f32.mrb[178].mxu0  ;;  %v15429_v41 = vpop.f32.mrb[54].mxu1 }
 0x74a   :  { %v15288_v13 = vpop.f32.mrb[179].mxu0  ;;  %v15430_v49 = vpop.f32.mrb[55].mxu1 }
 0x74b   :  { %v21920_v36 = vadd.f32 %v15422_v58, %v15286_v7  ;;  %v15289_v32 = vadd.f32 %v15288_v13, %v15287_v23  ;;  %v15431_v45 = vadd.f32 %v15430_v49, %v15429_v41 }
 0x74c   :  { %11868 = vmatmul.mubr.bf16.gmra.mrb[252].mxu0 %v21508_v26 }
 0x74d   :  { %22663 = vst [vmem:[#allocation37_spill] sm:$0xff] %v21920_v36  ;;  %v21926_v44 = vadd.f32 %v15425_v11, %v15289_v32  ;;  %11875 = vmatprep.mubr.bf16.mxu0 %v21575_v55 }
 0x74f   :  { %22664 = vst [vmem:[#allocation35_spill] sm:$0xff] %v21926_v44  ;;  %v15290_v16 = vpop.f32.mrb[180].mxu0  ;;  %v15432_v1 = vpop.f32.mrb[56].mxu1 }
 0x750   :  { %v15291_v0 = vpop.f32.mrb[181].mxu0  ;;  %v15433_v59 = vpop.f32.mrb[57].mxu1 }
 0x751   :  { %v15292_v33 = vadd.f32 %v15291_v0, %v15290_v16  ;;  %v15434_v58 = vadd.f32 %v15433_v59, %v15432_v1  ;;  %v15293_v42 = vpop.f32.mrb[182].mxu0  ;;  %v15435_v7 = vpop.f32.mrb[58].mxu1 }
 0x752   :  { %v15294_v23 = vpop.f32.mrb[183].mxu0  ;;  %v15436_v41 = vpop.f32.mrb[59].mxu1 }
 0x753   :  { %v21929_v26 = vadd.f32 %v15428_v17, %v15292_v33  ;;  %v15295_v13 = vadd.f32 %v15294_v23, %v15293_v42  ;;  %v15437_v49 = vadd.f32 %v15436_v41, %v15435_v7 }
 0x754   :  { %11876 = vmatmul.mubr.bf16.gmra.mrb[0].mxu0 %v21517_v51 }
 0x755   :  { %v21932_v11 = vadd.f32 %v15431_v45, %v15295_v13  ;;  %11883 = vmatprep.mubr.bf16.mxu0 %v21663_v61 }
 0x757   :  { %v15296_v55 = vpop.f32.mrb[184].mxu0  ;;  %v15438_v32 = vpop.f32.mrb[60].mxu1 }
 0x758   :  { %v15297_v2 = vpop.f32.mrb[185].mxu0  ;;  %v15439_v44 = vpop.f32.mrb[61].mxu1 }
 0x759   :  { %v15298_v16 = vadd.f32 %v15297_v2, %v15296_v55  ;;  %v15440_v1 = vadd.f32 %v15439_v44, %v15438_v32  ;;  %v15299_v0 = vpop.f32.mrb[186].mxu0  ;;  %v15441_v59 = vpop.f32.mrb[62].mxu1 }
 0x75a   :  { %v15300_v36 = vpop.f32.mrb[187].mxu0  ;;  %v15442_v30 = vpop.f32.mrb[63].mxu1 }
 0x75b   :  { %v21935_v17 = vadd.f32 %v15434_v58, %v15298_v16  ;;  %v15301_v33 = vadd.f32 %v15300_v36, %v15299_v0  ;;  %v15443_v42 = vadd.f32 %v15442_v30, %v15441_v59 }
 0x75c   :  { %11884 = vmatmul.mubr.bf16.gmra.mrb[4].mxu0 %v21528_v34  ;;  %v9999_v34 = vld [vmem:[#allocation3 + $0x1a4] sm:$0xf] }
 0x75d   :  { %v21938_v51 = vadd.f32 %v15437_v49, %v15301_v33  ;;  %11891 = vmatprep.mubr.bf16.mxu0 %v21683_v35  ;;  %v13396_v35 = vcombine.low %v9999_v34, %v21890_v53  ;;  %v22667_v53 = vld [vmem:[#allocation22_spill] sm:$0xff] }
 0x75f   :  { %v15302_v61 = vpop.f32.mrb[188].mxu0  ;;  %v10406_v30 = vshll.u32 %v13396_v35, 16  ;;  %v10404_v36 = vshrl.u32 %v13396_v35, 16 }
 0x760   :  { %v15303_v45 = vpop.f32.mrb[189].mxu0 }
 0x761   :  { %v15304_v7 = vadd.f32 %v15303_v45, %v15302_v61  ;;  %v15305_v23 = vpop.f32.mrb[190].mxu0  ;;  %v10408_v49 = vrot.slane %v10406_v30, 1  ;;  %v22672_v30 = vld [vmem:[#allocation17_spill] sm:$0xff] }
 0x762   :  { %v15306_v41 = vpop.f32.mrb[191].mxu0 }
 0x763   :  { %v21941_v44 = vadd.f32 %v15440_v1, %v15304_v7  ;;  %v15307_v13 = vadd.f32 %v15306_v41, %v15305_v23 }
 0x764   :  { %11892 = vmatmul.mubr.bf16.gmra.mrb[8].mxu0 %v21548_v22  ;;  %v10411_v22 = vshll.u32 %v21902_v27, 16 }
 0x765   :  { %v21944_v58 = vadd.f32 %v15443_v42, %v15307_v13  ;;  %11899 = vmatprep.mubr.bf16.mxu0 %v21698_v43  ;;  %v10409_v43 = vor.u32 %v10408_v49, %v10404_v36 }
 0x76c   :  { %11900 = vmatmul.mubr.bf16.gmra.mrb[12].mxu0 %v21668_v18  ;;  %v10413_v18 = vrot.slane %v10411_v22, 1 }
 0x76d   :  { %11907 = vmatprep.mubr.bf16.mxu0 %v21711_v46 }
 0x76e   :  { %v10414_v46 = vsel %vm1680_vm9, %v10409_v43, %v10413_v18 }
 0x774   :  { %11908 = vmatmul.mubr.bf16.gmra.mrb[16].mxu0 %v21686_v40  ;;  %v22665_v40 = vld [vmem:[#allocation18_spill] sm:$0xff] }
 0x775   :  { %11915 = vmatprep.mubr.bf16.mxu0 %v21724_v15  ;;  %v22666_v15 = vld [vmem:[#allocation19_spill] sm:$0xff] }
 0x77c   :  { %11916 = vmatmul.mubr.bf16.gmra.mrb[20].mxu0 %v21701_v20 }
 0x77d   :  { %11923 = vmatprep.mubr.bf16.mxu0 %v21733_v9 }
 0x784   :  { %11924 = vmatmul.mubr.bf16.gmra.mrb[24].mxu0 %v21714_v5  ;;  %v22669_v5 = vld [vmem:[#allocation23_spill] sm:$0xff] }
 0x785   :  { %11931 = vmatprep.mubr.bf16.mxu0 %v10414_v46 }
 0x78c   :  { %11932 = vmatmul.mubr.bf16.gmra.mrb[28].mxu0 %v13396_v35  ;;  %v22671_v35 = vld [vmem:[#allocation27_spill] sm:$0xff] }
 0x78d   :  { %16220 = vmatprep.mubr.bf16.mxu0 %v21324_v10  ;;  %v22668_v10 = vld [vmem:[#allocation25_spill] sm:$0xff] }
 0x794   :  { %16221 = vmatmul.mubr.bf16.vlgmr.msra.gmra.mrb[192].mxu0 %v21584_v50 }
 0x795   :  { %16224 = vmatprep.mubr.bf16.mxu0 %v22665_v40 }
 0x79c   :  { %16225 = vmatmul.mubr.bf16.gmra.mrb[196].mxu0 %v22666_v15 }
 0x79d   :  { %16228 = vmatprep.mubr.bf16.mxu0 %v22667_v53 }
 0x7a4   :  { %16229 = vmatmul.mubr.bf16.gmra.mrb[200].mxu0 %v21609_v6 }
 0x7a5   :  { %16232 = vmatprep.mubr.bf16.mxu0 %v21626_v29 }
 0x7ac   :  { %16233 = vmatmul.mubr.bf16.gmra.mrb[204].mxu0 %v21631_v39 }
 0x7ad   :  { %16236 = vmatprep.mubr.bf16.mxu0 %v21636_v48 }
 0x7b4   :  { %16237 = vmatmul.mubr.bf16.gmra.mrb[208].mxu0 %v21639_v38 }
 0x7b5   :  { %16240 = vmatprep.mubr.bf16.mxu0 %v21645_v52 }
 0x7bc   :  { %16241 = vmatmul.mubr.bf16.gmra.mrb[212].mxu0 %v21648_v4  ;;  %v22670_v4 = vld [vmem:[#allocation21_spill] sm:$0xff] }
 0x7bd   :  { %16244 = vmatprep.mubr.bf16.mxu0 %v21652_v14 }
 0x7c4   :  { %16245 = vmatmul.mubr.bf16.gmra.mrb[216].mxu0 %v21657_v57 }
 0x7c5   :  { %16248 = vmatprep.mubr.bf16.mxu0 %v22668_v10 }
 0x7cc   :  { %16249 = vmatmul.mubr.bf16.gmra.mrb[220].mxu0 %v21918_v54 }
 0x7e0   :  { %v21976_v52 = vpop.f32.mrb[160].mxu1 }
 0x7e1   :  { %v21981_v27 = vpop.f32.mrb[161].mxu1 }
 0x7e2   :  { %v21983_v32 = vpop.f32.mrb[162].mxu1 }
 0x7e3   :  { %v21991_v59 = vpop.f32.mrb[163].mxu1 }
 0x7e7   :  { %v15484_v50 = vpop.f32.mrb[224].mxu0 }
 0x7e8   :  { %v15485_v6 = vpop.f32.mrb[225].mxu0 }
 0x7e9   :  { %v15486_v29 = vadd.f32 %v15485_v6, %v15484_v50  ;;  %v15487_v39 = vpop.f32.mrb[226].mxu0  ;;  %v21993_v42 = vpop.f32.mrb[164].mxu1  ;;  %v22673_v50 = vld [vmem:[#allocation30_spill] sm:$0xff] }
 0x7ea   :  { %v15488_v20 = vpop.f32.mrb[227].mxu0  ;;  %v21995_v45 = vpop.f32.mrb[165].mxu1 }
 0x7eb   :  { %v15489_v48 = vadd.f32 %v15488_v20, %v15487_v39  ;;  %v21974_v38 = vadd.f32 %v22669_v5, %v15486_v29  ;;  %v21997_v41 = vpop.f32.mrb[166].mxu1  ;;  %v22674_v29 = vld [vmem:[#allocation29_spill] sm:$0xff] }
 0x7ec   :  { %v22005_v36 = vpop.f32.mrb[167].mxu1 }
 0x7ed   :  { %v21979_v9 = vadd.f32 %v22670_v4, %v15489_v48 }
 0x7ef   :  { %v15490_v14 = vpop.f32.mrb[228].mxu0 }
 0x7f0   :  { %v15491_v57 = vpop.f32.mrb[229].mxu0 }
 0x7f1   :  { %v15492_v55 = vadd.f32 %v15491_v57, %v15490_v14  ;;  %v15493_v54 = vpop.f32.mrb[230].mxu0  ;;  %v22007_v22 = vpop.f32.mrb[168].mxu1 }
 0x7f2   :  { %v15494_v2 = vpop.f32.mrb[231].mxu0  ;;  %v22009_v18 = vpop.f32.mrb[169].mxu1 }
 0x7f3   :  { %v15495_v16 = vadd.f32 %v15494_v2, %v15493_v54  ;;  %v21986_v1 = vadd.f32 %v21784_v60, %v15492_v55  ;;  %v22011_v15 = vpop.f32.mrb[170].mxu1 }
 0x7f4   :  { %v22019_v20 = vpop.f32.mrb[171].mxu1 }
 0x7f5   :  { %v21989_v0 = vadd.f32 %v21788_v19, %v15495_v16 }
 0x7f7   :  { %v15496_v33 = vpop.f32.mrb[232].mxu0 }
 0x7f8   :  { %v15497_v61 = vpop.f32.mrb[233].mxu0 }
 0x7f9   :  { %v15498_v7 = vadd.f32 %v15497_v61, %v15496_v33  ;;  %v15499_v23 = vpop.f32.mrb[234].mxu0  ;;  %v22021_v5 = vpop.f32.mrb[172].mxu1 }
 0x7fa   :  { %v15500_v13 = vpop.f32.mrb[235].mxu0  ;;  %v22023_v14 = vpop.f32.mrb[173].mxu1 }
 0x7fb   :  { %v15501_v34 = vadd.f32 %v15500_v13, %v15499_v23  ;;  %v22000_v60 = vadd.f32 %v22671_v35, %v15498_v7  ;;  %v22025_v54 = vpop.f32.mrb[174].mxu1 }
 0x7fc   :  { %v22033_v7 = vpop.f32.mrb[175].mxu1 }
 0x7fd   :  { %v22003_v19 = vadd.f32 %v22672_v30, %v15501_v34 }
 0x7ff   :  { %v15502_v49 = vpop.f32.mrb[236].mxu0 }
 0x800   :  { %v15503_v43 = vpop.f32.mrb[237].mxu0 }
 0x801   :  { %v15504_v46 = vadd.f32 %v15503_v43, %v15502_v49  ;;  %v15505_v40 = vpop.f32.mrb[238].mxu0  ;;  %v22035_v13 = vpop.f32.mrb[176].mxu1 }
 0x802   :  { %v15506_v53 = vpop.f32.mrb[239].mxu0  ;;  %v22037_v35 = vpop.f32.mrb[177].mxu1 }
 0x803   :  { %v15507_v10 = vadd.f32 %v15506_v53, %v15505_v40  ;;  %v22014_v6 = vadd.f32 %v22673_v50, %v15504_v46  ;;  %v22039_v43 = vpop.f32.mrb[178].mxu1 }
 0x804   :  { %v22047_v53 = vpop.f32.mrb[179].mxu1 }
 0x805   :  { %v22017_v39 = vadd.f32 %v22674_v29, %v15507_v10 }
 0x807   :  { %v15508_v48 = vpop.f32.mrb[240].mxu0 }
 0x808   :  { %v15509_v4 = vpop.f32.mrb[241].mxu0 }
 0x809   :  { %v15510_v57 = vadd.f32 %v15509_v4, %v15508_v48  ;;  %v15511_v55 = vpop.f32.mrb[242].mxu0  ;;  %v22049_v50 = vpop.f32.mrb[180].mxu1 }
 0x80a   :  { %v15512_v2 = vpop.f32.mrb[243].mxu0  ;;  %22675 = vst [vmem:[#allocation39_spill] sm:$0xff] %v22049_v50  ;;  %v22051_v48 = vpop.f32.mrb[181].mxu1  ;;  %v22690_v50 = vld [vmem:[#allocation33_spill] sm:$0xff] }
 0x80b   :  { %v15513_v16 = vadd.f32 %v15512_v2, %v15511_v55  ;;  %v22028_v33 = vadd.f32 %v21817_v62, %v15510_v57  ;;  %22676 = vst [vmem:[#allocation24_spill] sm:$0xff] %v22051_v48  ;;  %v22053_v55 = vpop.f32.mrb[182].mxu1 }
 0x80c   :  { %22677 = vst [vmem:[#allocation43_spill] sm:$0xff] %v22053_v55 }
 0x80d   :  { %v22031_v61 = vadd.f32 %v21820_v47, %v15513_v16 }
 0x80f   :  { %v15514_v23 = vpop.f32.mrb[244].mxu0 }
 0x810   :  { %v15515_v34 = vpop.f32.mrb[245].mxu0 }
 0x811   :  { %v15516_v30 = vadd.f32 %v15515_v34, %v15514_v23  ;;  %v15517_v49 = vpop.f32.mrb[246].mxu0  ;;  %v22061_v23 = vpop.f32.mrb[183].mxu1 }
 0x812   :  { %v15518_v46 = vpop.f32.mrb[247].mxu0  ;;  %22678 = vst [vmem:[#allocation50_spill] sm:$0xff] %v22061_v23 }
 0x813   :  { %v15519_v40 = vadd.f32 %v15518_v46, %v15517_v49  ;;  %v22042_v62 = vadd.f32 %v21826_v56, %v15516_v30  ;;  %v22063_v30 = vpop.f32.mrb[184].mxu1 }
 0x814   :  { %22679 = vst [vmem:[#allocation45_spill] sm:$0xff] %v22063_v30  ;;  %v22065_v46 = vpop.f32.mrb[185].mxu1 }
 0x815   :  { %v22045_v47 = vadd.f32 %v21832_v8, %v15519_v40  ;;  %22680 = vst [vmem:[#allocation51_spill] sm:$0xff] %v22065_v46 }
 0x817   :  { %v15520_v10 = vpop.f32.mrb[248].mxu0 }
 0x818   :  { %v15521_v29 = vpop.f32.mrb[249].mxu0 }
 0x819   :  { %v15522_v4 = vadd.f32 %v15521_v29, %v15520_v10  ;;  %v15523_v57 = vpop.f32.mrb[250].mxu0  ;;  %v22067_v29 = vpop.f32.mrb[186].mxu1 }
 0x81a   :  { %v15524_v2 = vpop.f32.mrb[251].mxu0  ;;  %22681 = vst [vmem:[#allocation46_spill] sm:$0xff] %v22067_v29 }
 0x81b   :  { %v15525_v16 = vadd.f32 %v15524_v2, %v15523_v57  ;;  %v22056_v56 = vadd.f32 %v21839_v63, %v15522_v4  ;;  %v22075_v4 = vpop.f32.mrb[187].mxu1 }
 0x81c   :  { %22682 = vst [vmem:[#allocation31_spill] sm:$0xff] %v22075_v4 }
 0x81d   :  { %v22059_v8 = vadd.f32 %v21845_v37, %v15525_v16  ;;  %v22077_v16 = vpop.f32.mrb[188].mxu1 }
 0x81e   :  { %22683 = vst [vmem:[#allocation48_spill] sm:$0xff] %v22077_v16  ;;  %v22079_v23 = vpop.f32.mrb[189].mxu1 }
 0x81f   :  { %v15526_v34 = vpop.f32.mrb[252].mxu0  ;;  %22684 = vst [vmem:[#allocation55_spill] sm:$0xff] %v22079_v23  ;;  %v22081_v46 = vpop.f32.mrb[190].mxu1 }
 0x820   :  { %v15527_v49 = vpop.f32.mrb[253].mxu0  ;;  %22685 = vst [vmem:[#allocation60_spill] sm:$0xff] %v22081_v46  ;;  %v22688_v46 = vld [vmem:[#allocation14_spill] sm:$0xff] }
 0x821   :  { %v15528_v40 = vadd.f32 %v15527_v49, %v15526_v34  ;;  %v15529_v10 = vpop.f32.mrb[254].mxu0 }
 0x822   :  { %v15530_v55 = vpop.f32.mrb[255].mxu0 }
 0x823   :  { %v15531_v57 = vadd.f32 %v15530_v55, %v15529_v10  ;;  %v22070_v63 = vadd.f32 %v21851_v24, %v15528_v40  ;;  %v22089_v40 = vpop.f32.mrb[191].mxu1 }
 0x824   :  { %22687 = vst [vmem:[#allocation36_spill] sm:$0xff] %v22089_v40 }
 0x825   :  { %v22073_v37 = vadd.f32 %v21857_v3, %v15531_v57 }
 0x827   :  { %v15532_v2 = vpop.f32.mrb[0].mxu0 }
 0x828   :  { %v15533_v30 = vpop.f32.mrb[1].mxu0 }
 0x829   :  { %v15534_v34 = vadd.f32 %v15533_v30, %v15532_v2  ;;  %v15535_v49 = vpop.f32.mrb[2].mxu0 }
 0x82a   :  { %v15536_v29 = vpop.f32.mrb[3].mxu0 }
 0x82b   :  { %v15537_v55 = vadd.f32 %v15536_v29, %v15535_v49  ;;  %v22084_v24 = vadd.f32 %v21863_v31, %v15534_v34 }
 0x82d   :  { %v22087_v3 = vadd.f32 %v21869_v21, %v15537_v55 }
 0x82f   :  { %22686 = vst [vmem:[#allocation56_spill] sm:$0xff] %v22087_v3  ;;  %v15538_v10 = vpop.f32.mrb[4].mxu0 }
 0x830   :  { %v15539_v57 = vpop.f32.mrb[5].mxu0 }
 0x831   :  { %v15540_v16 = vadd.f32 %v15539_v57, %v15538_v10  ;;  %v15541_v4 = vpop.f32.mrb[6].mxu0 }
 0x832   :  { %v15542_v48 = vpop.f32.mrb[7].mxu0 }
 0x833   :  { %v15543_v23 = vadd.f32 %v15542_v48, %v15541_v4  ;;  %v22092_v30 = vadd.f32 %v21875_v28, %v15540_v16 }
 0x835   :  { %v22095_v2 = vadd.f32 %v21881_v25, %v15543_v23  ;;  %v22693_v23 = vld [vmem:[#allocation20_spill] sm:$0xff] }
 0x837   :  { %v15544_v29 = vpop.f32.mrb[8].mxu0 }
 0x838   :  { %v15545_v31 = vpop.f32.mrb[9].mxu0 }
 0x839   :  { %v15546_v34 = vadd.f32 %v15545_v31, %v15544_v29  ;;  %v15547_v49 = vpop.f32.mrb[10].mxu0 }
 0x83a   :  { %v15548_v21 = vpop.f32.mrb[11].mxu0 }
 0x83b   :  { %v15549_v55 = vadd.f32 %v15548_v21, %v15547_v49  ;;  %v22098_v40 = vadd.f32 %v22688_v46, %v15546_v34 }
 0x83d   :  { %22689 = vst [vmem:[#allocation52_spill] sm:$0xff] %v22098_v40  ;;  %v22101_v10 = vadd.f32 %v22690_v50, %v15549_v55  ;;  %v22694_v50 = vld [vmem:[#allocation37_spill] sm:$0xff] }
 0x83f   :  { %22691 = vst [vmem:[#allocation41_spill] sm:$0xff] %v22101_v10  ;;  %v15550_v57 = vpop.f32.mrb[12].mxu0  ;;  %v22695_v10 = vld [vmem:[#allocation35_spill] sm:$0xff] }
 0x840   :  { %v15551_v48 = vpop.f32.mrb[13].mxu0 }
 0x841   :  { %v15552_v4 = vadd.f32 %v15551_v48, %v15550_v57  ;;  %v15553_v28 = vpop.f32.mrb[14].mxu0 }
 0x842   :  { %v15554_v16 = vpop.f32.mrb[15].mxu0 }
 0x843   :  { %v15555_v3 = vadd.f32 %v15554_v16, %v15553_v28  ;;  %v22104_v25 = vadd.f32 %v21905_v12, %v15552_v4 }
 0x845   :  { %22692 = vst [vmem:[#allocation58_spill] sm:$0xff] %v22104_v25  ;;  %v22107_v29 = vadd.f32 %v22693_v23, %v15555_v3 }
 0x847   :  { %v15556_v31 = vpop.f32.mrb[16].mxu0 }
 0x848   :  { %v15557_v49 = vpop.f32.mrb[17].mxu0 }
 0x849   :  { %v15558_v21 = vadd.f32 %v15557_v49, %v15556_v31  ;;  %v15559_v46 = vpop.f32.mrb[18].mxu0 }
 0x84a   :  { %v15560_v34 = vpop.f32.mrb[19].mxu0 }
 0x84b   :  { %v15561_v40 = vadd.f32 %v15560_v34, %v15559_v46  ;;  %v22110_v55 = vadd.f32 %v22694_v50, %v15558_v21 }
 0x84d   :  { %v22113_v57 = vadd.f32 %v22695_v10, %v15561_v40 }
 0x84f   :  { %v15562_v48 = vpop.f32.mrb[20].mxu0 }
 0x850   :  { %v15563_v28 = vpop.f32.mrb[21].mxu0 }
 0x851   :  { %v15564_v16 = vadd.f32 %v15563_v28, %v15562_v48  ;;  %v15565_v12 = vpop.f32.mrb[22].mxu0 }
 0x852   :  { %v15566_v4 = vpop.f32.mrb[23].mxu0 }
 0x853   :  { %v15567_v25 = vadd.f32 %v15566_v4, %v15565_v12  ;;  %v22116_v3 = vadd.f32 %v21929_v26, %v15564_v16 }
 0x855   :  { %v22119_v23 = vadd.f32 %v21932_v11, %v15567_v25  ;;  %v22130_v11 = vld [vmem:[%s22401_s8] ss:$0 sm:$0xff] }
 0x857   :  { %v15568_v31 = vpop.f32.mrb[24].mxu0 }
 0x858   :  { %v15569_v49 = vpop.f32.mrb[25].mxu0 }
 0x859   :  { %v15570_v46 = vadd.f32 %v15569_v49, %v15568_v31  ;;  %v15571_v21 = vpop.f32.mrb[26].mxu0  ;;  %v22143_v49 = vld [vmem:[%s22398_s5] ss:$0 sm:$0xff] }
 0x85a   :  { %v15572_v34 = vpop.f32.mrb[27].mxu0 }
 0x85b   :  { %v15573_v50 = vadd.f32 %v15572_v34, %v15571_v21  ;;  %v22122_v40 = vadd.f32 %v21935_v17, %v15570_v46  ;;  %v22148_v46 = vld [vmem:[%s22402_s9] ss:$0 sm:$0xff] }
 0x85d   :  { %v22125_v10 = vadd.f32 %v21938_v51, %v15573_v50  ;;  %v12574_v51 = vmul.f32 %v21976_v52, %v22130_v11  ;;  %v22156_v52 = vld [vmem:[%s22399_s6] ss:$0 sm:$0xff] }
 0x85f   :  { %v15574_v48 = vpop.f32.mrb[28].mxu0 }
 0x860   :  { %v15575_v28 = vpop.f32.mrb[29].mxu0 }
 0x861   :  { %v15576_v12 = vadd.f32 %v15575_v28, %v15574_v48  ;;  %v15577_v26 = vpop.f32.mrb[30].mxu0  ;;  %v12613_v28 = vadd.f32 %v22148_v46, %v12574_v51 }
 0x862   :  { %v15578_v16 = vpop.f32.mrb[31].mxu0 }
 0x863   :  { %v15579_v4 = vadd.f32 %v15578_v16, %v15577_v26  ;;  %v22133_v25 = vadd.f32 %v21941_v44, %v15576_v12  ;;  %v12572_v44 = vmul.f32 %v22130_v11, %v21981_v27  ;;  %v12575_v27 = vmul.f32 %v21983_v32, %v22130_v11 }
 0x865   :  { %v22136_v17 = vadd.f32 %v21944_v58, %v15579_v4  ;;  %v12611_v16 = vadd.f32 %v22148_v46, %v12572_v44 }
 0x867   :  { %v16222_v31 = vpop.f32.mrb[192].mxu0 }
 0x868   :  { %v16606_v58 = vadd.f32 %v21986_v1, %v16222_v31  ;;  %v11974_v21 = vpop.f32.mrb[193].mxu0 }
 0x869   :  { %v16609_v34 = vadd.f32 %v21974_v38, %v11974_v21  ;;  %v16223_v50 = vpop.f32.mrb[194].mxu0  ;;  %v12573_v38 = vmul.f32 %v22130_v11, %v21991_v59  ;;  %v12576_v21 = vmul.f32 %v22130_v11, %v21995_v45  ;;  %v12579_v45 = vmul.f32 %v21997_v41, %v22130_v11 }
 0x86a   :  { %v12142_v48 = vmul.f32 %v16606_v58, %v22143_v49  ;;  %v16612_v12 = vadd.f32 %v21989_v0, %v16223_v50  ;;  %v11977_v26 = vpop.f32.mrb[195].mxu0  ;;  %v12578_v0 = vmul.f32 %v21993_v42, %v22130_v11 }
 0x86b   :  { %v12140_v1 = vmul.f32 %v16609_v34, %v22143_v49  ;;  %v16615_v4 = vadd.f32 %v21979_v9, %v11977_v26  ;;  %v12614_v34 = vadd.f32 %v22148_v46, %v12575_v27  ;;  %v12615_v27 = vadd.f32 %v22148_v46, %v12576_v21 }
 0x86c   :  { %v12181_v31 = vadd.f32 %v22156_v52, %v12142_v48  ;;  %v12143_v58 = vmul.f32 %v16612_v12, %v22143_v49  ;;  %v12612_v48 = vadd.f32 %v22148_v46, %v12573_v38 }
 0x86d   :  { %v12179_v51 = vadd.f32 %v22156_v52, %v12140_v1  ;;  %v12141_v32 = vmul.f32 %v16615_v4, %v22143_v49  ;;  %v12617_v1 = vadd.f32 %v22148_v46, %v12578_v0 }
 0x86e   :  { %v12645_v44 = vadd.f32 %v12613_v28, %v12181_v31  ;;  %v12182_v9 = vadd.f32 %v22156_v52, %v12143_v58  ;;  %v12577_v58 = vmul.f32 %v22130_v11, %v22005_v36  ;;  %v12582_v36 = vmul.f32 %v22007_v22, %v22130_v11 }
 0x86f   :  { %v12643_v59 = vadd.f32 %v12611_v16, %v12179_v51  ;;  %v12180_v50 = vadd.f32 %v22156_v52, %v12141_v32  ;;  %v16226_v12 = vpop.f32.mrb[196].mxu0 }
 0x870   :  { %v12646_v26 = vadd.f32 %v12614_v34, %v12182_v9  ;;  %v16618_v42 = vadd.f32 %v22014_v6, %v16226_v12  ;;  %v11990_v4 = vpop.f32.mrb[197].mxu0  ;;  %v12677_v38 = vmax.f32 %v12645_v44, 0.0 }
 0x871   :  { %v12644_v28 = vadd.f32 %v12612_v48, %v12180_v50  ;;  %v16621_v31 = vadd.f32 %v22000_v60, %v11990_v4  ;;  %v16227_v16 = vpop.f32.mrb[198].mxu0  ;;  %v12675_v9 = vmax.f32 %v12643_v59, 0.0  ;;  %v12580_v59 = vmul.f32 %v22130_v11, %v22009_v18 }
 0x872   :  { %v12678_v51 = vmax.f32 %v12646_v26, 0.0  ;;  %v12146_v32 = vmul.f32 %v16618_v42, %v22143_v49  ;;  %v16624_v6 = vadd.f32 %v22017_v39, %v16227_v16  ;;  %v11993_v0 = vpop.f32.mrb[199].mxu0  ;;  %v12618_v42 = vadd.f32 %v22148_v46, %v12579_v45 }
 0x873   :  { %v12676_v34 = vmax.f32 %v12644_v28, 0.0  ;;  %v12144_v41 = vmul.f32 %v16621_v31, %v22143_v49  ;;  %v16627_v50 = vadd.f32 %v22003_v19, %v11993_v0  ;;  %v12616_v28 = vadd.f32 %v22148_v46, %v12577_v58 }
 0x874   :  { %v13845_v60 = vpack.c.bf16 %v12678_v51, %v12677_v38  ;;  %v12185_v21 = vadd.f32 %v22156_v52, %v12146_v32  ;;  %v12147_v48 = vmul.f32 %v16624_v6, %v22143_v49  ;;  %v12621_v38 = vadd.f32 %v22148_v46, %v12582_v36 }
 0x875   :  { %v13840_v44 = vpack.c.bf16 %v12676_v34, %v12675_v9  ;;  %v12183_v12 = vadd.f32 %v22156_v52, %v12144_v41  ;;  %v12145_v39 = vmul.f32 %v16627_v50, %v22143_v49  ;;  %v12583_v51 = vmul.f32 %v22011_v15, %v22130_v11 }
 0x876   :  { %13933 = vst [vmem:[%s22403_s10 + $0x88] sm:$0xff] %v13845_v60   ;;  %v12649_v19 = vadd.f32 %v12617_v1, %v12185_v21  ;;  %v12186_v26 = vadd.f32 %v22156_v52, %v12147_v48  ;;  %v12619_v6 = vadd.f32 %v22148_v46, %v12580_v59  ;;  %v12581_v0 = vmul.f32 %v22130_v11, %v22019_v20 }
 0x877   :  { %13932 = vst [vmem:[%s22403_s10 + $0x80] sm:$0xff] %v13840_v44   ;;  %v12647_v22 = vadd.f32 %v12615_v27, %v12183_v12  ;;  %v12184_v4 = vadd.f32 %v22156_v52, %v12145_v39  ;;  %v16230_v31 = vpop.f32.mrb[200].mxu0  ;;  %v12586_v20 = vmul.f32 %v22021_v5, %v22130_v11  ;;  %v12584_v39 = vmul.f32 %v22130_v11, %v22023_v14 }
 0x878   :  { %v12650_v18 = vadd.f32 %v12618_v42, %v12186_v26  ;;  %v16630_v16 = vadd.f32 %v22042_v62, %v16230_v31  ;;  %v12006_v1 = vpop.f32.mrb[201].mxu0  ;;  %v12681_v58 = vmax.f32 %v12649_v19, 0.0  ;;  %v12622_v19 = vadd.f32 %v22148_v46, %v12583_v51 }
 0x879   :  { %v12648_v45 = vadd.f32 %v12616_v28, %v12184_v4  ;;  %v16633_v32 = vadd.f32 %v22028_v33, %v12006_v1  ;;  %v16231_v27 = vpop.f32.mrb[202].mxu0  ;;  %v12679_v50 = vmax.f32 %v12647_v22, 0.0  ;;  %v12620_v42 = vadd.f32 %v22148_v46, %v12581_v0 }
 0x87a   :  { %v12682_v9 = vmax.f32 %v12650_v18, 0.0  ;;  %v12150_v34 = vmul.f32 %v16630_v16, %v22143_v49  ;;  %v16636_v62 = vadd.f32 %v22045_v47, %v16231_v27  ;;  %v12009_v41 = vpop.f32.mrb[203].mxu0  ;;  %v12625_v28 = vadd.f32 %v22148_v46, %v12586_v20 }
 0x87b   :  { %v12680_v60 = vmax.f32 %v12648_v45, 0.0  ;;  %v12148_v15 = vmul.f32 %v16633_v32, %v22143_v49  ;;  %v16639_v21 = vadd.f32 %v22031_v61, %v12009_v41  ;;  %v12587_v18 = vmul.f32 %v22025_v54, %v22130_v11 }
 0x87c   :  { %v13855_v33 = vpack.c.bf16 %v12682_v9, %v12681_v58  ;;  %v12189_v48 = vadd.f32 %v22156_v52, %v12150_v34  ;;  %v12151_v36 = vmul.f32 %v16636_v62, %v22143_v49  ;;  %v12623_v1 = vadd.f32 %v22148_v46, %v12584_v39 }
 0x87d   :  { %v13850_v44 = vpack.c.bf16 %v12680_v60, %v12679_v50  ;;  %v12187_v12 = vadd.f32 %v22156_v52, %v12148_v15  ;;  %v12149_v47 = vmul.f32 %v16639_v21, %v22143_v49  ;;  %v12585_v45 = vmul.f32 %v22130_v11, %v22033_v7 }
 0x87e   :  { %13935 = vst [vmem:[%s22403_s10 + $0x98] sm:$0xff] %v13855_v33   ;;  %v12653_v61 = vadd.f32 %v12621_v38, %v12189_v48  ;;  %v12190_v59 = vadd.f32 %v22156_v52, %v12151_v36  ;;  %v12590_v7 = vmul.f32 %v22035_v13, %v22130_v11  ;;  %v12588_v15 = vmul.f32 %v22130_v11, %v22037_v35 }
 0x87f   :  { %13934 = vst [vmem:[%s22403_s10 + $0x90] sm:$0xff] %v13850_v44   ;;  %v12651_v5 = vadd.f32 %v12619_v6, %v12187_v12  ;;  %v12188_v26 = vadd.f32 %v22156_v52, %v12149_v47  ;;  %v16234_v22 = vpop.f32.mrb[204].mxu0  ;;  %v12626_v33 = vadd.f32 %v22148_v46, %v12587_v18  ;;  %v12624_v36 = vadd.f32 %v22148_v46, %v12585_v45  ;;  %v22696_v18 = vld [vmem:[#allocation56_spill] sm:$0xff] }
 0x880   :  { %v12654_v14 = vadd.f32 %v12622_v19, %v12190_v59  ;;  %v16642_v4 = vadd.f32 %v22070_v63, %v16234_v22  ;;  %v12022_v31 = vpop.f32.mrb[205].mxu0  ;;  %v12685_v32 = vmax.f32 %v12653_v61, 0.0  ;;  %v12629_v12 = vadd.f32 %v22148_v46, %v12590_v7 }
 0x881   :  { %v12652_v16 = vadd.f32 %v12620_v42, %v12188_v26  ;;  %v16645_v38 = vadd.f32 %v22056_v56, %v12022_v31  ;;  %v16235_v51 = vpop.f32.mrb[206].mxu0  ;;  %v12683_v58 = vmax.f32 %v12651_v5, 0.0  ;;  %v12591_v39 = vmul.f32 %v22039_v43, %v22130_v11 }
 0x882   :  { %v12686_v6 = vmax.f32 %v12654_v14, 0.0  ;;  %v12154_v27 = vmul.f32 %v16642_v4, %v22143_v49  ;;  %v16648_v63 = vadd.f32 %v22073_v37, %v16235_v51  ;;  %v12025_v0 = vpop.f32.mrb[207].mxu0  ;;  %v12627_v19 = vadd.f32 %v22148_v46, %v12588_v15 }
 0x883   :  { %v12684_v9 = vmax.f32 %v12652_v16, 0.0  ;;  %v12152_v54 = vmul.f32 %v16645_v38, %v22143_v49  ;;  %v16651_v34 = vadd.f32 %v22059_v8, %v12025_v0  ;;  %v12589_v26 = vmul.f32 %v22130_v11, %v22047_v53  ;;  %v22697_v53 = vld [vmem:[#allocation39_spill] sm:$0xff] }
 0x884   :  { %v13865_v56 = vpack.c.bf16 %v12686_v6, %v12685_v32  ;;  %v12193_v62 = vadd.f32 %v22156_v52, %v12154_v27  ;;  %v12155_v41 = vmul.f32 %v16648_v63, %v22143_v49  ;;  %v12594_v51 = vmul.f32 %v22697_v53, %v22130_v11  ;;  %v22698_v6 = vld [vmem:[#allocation24_spill] sm:$0xff] }
 0x885   :  { %v13860_v50 = vpack.c.bf16 %v12684_v9, %v12683_v58  ;;  %v12191_v60 = vadd.f32 %v22156_v52, %v12152_v54  ;;  %v12153_v37 = vmul.f32 %v16651_v34, %v22143_v49  ;;  %v12592_v27 = vmul.f32 %v22130_v11, %v22698_v6 }
 0x886   :  { %13937 = vst [vmem:[%s22403_s10 + $0xa8] sm:$0xff] %v13865_v56   ;;  %v12657_v8 = vadd.f32 %v12625_v28, %v12193_v62  ;;  %v12194_v21 = vadd.f32 %v22156_v52, %v12155_v41  ;;  %v12630_v58 = vadd.f32 %v22148_v46, %v12591_v39  ;;  %v12628_v34 = vadd.f32 %v22148_v46, %v12589_v26  ;;  %v22699_v41 = vld [vmem:[#allocation58_spill] sm:$0xff] }
 0x887   :  { %13936 = vst [vmem:[%s22403_s10 + $0xa0] sm:$0xff] %v13860_v50   ;;  %v12655_v13 = vadd.f32 %v12623_v1, %v12191_v60  ;;  %v12192_v48 = vadd.f32 %v22156_v52, %v12153_v37  ;;  %v16238_v20 = vpop.f32.mrb[208].mxu0  ;;  %v12633_v50 = vadd.f32 %v22148_v46, %v12594_v51  ;;  %v22700_v37 = vld [vmem:[#allocation43_spill] sm:$0xff] }
 0x888   :  { %v12658_v35 = vadd.f32 %v12626_v33, %v12194_v21  ;;  %v16654_v44 = vadd.f32 %v22092_v30, %v16238_v20  ;;  %v12038_v47 = vpop.f32.mrb[209].mxu0  ;;  %v12689_v42 = vmax.f32 %v12657_v8, 0.0  ;;  %v12595_v15 = vmul.f32 %v22700_v37, %v22130_v11  ;;  %v22701_v21 = vld [vmem:[#allocation52_spill] sm:$0xff] }
 0x889   :  { %v12656_v61 = vadd.f32 %v12624_v36, %v12192_v48  ;;  %v16657_v59 = vadd.f32 %v22084_v24, %v12038_v47  ;;  %v16239_v5 = vpop.f32.mrb[210].mxu0  ;;  %v12687_v28 = vmax.f32 %v12655_v13, 0.0  ;;  %v12631_v13 = vadd.f32 %v22148_v46, %v12592_v27  ;;  %v22702_v36 = vld [vmem:[#allocation50_spill] sm:$0xff] }
 0x88a   :  { %v12690_v22 = vmax.f32 %v12658_v35, 0.0  ;;  %v12158_v14 = vmul.f32 %v16654_v44, %v22143_v49  ;;  %v16660_v30 = vadd.f32 %v22095_v2, %v16239_v5  ;;  %v12041_v4 = vpop.f32.mrb[211].mxu0  ;;  %v12593_v20 = vmul.f32 %v22130_v11, %v22702_v36  ;;  %v22703_v5 = vld [vmem:[#allocation41_spill] sm:$0xff] }
 0x88b   :  { %v12688_v31 = vmax.f32 %v12656_v61, 0.0  ;;  %v12156_v43 = vmul.f32 %v16657_v59, %v22143_v49  ;;  %v16663_v16 = vadd.f32 %v22696_v18, %v12041_v4 }
 0x88c   :  { %v13875_v24 = vpack.c.bf16 %v12690_v22, %v12689_v42  ;;  %v12197_v38 = vadd.f32 %v22156_v52, %v12158_v14  ;;  %v12159_v1 = vmul.f32 %v16660_v30, %v22143_v49  ;;  %v22704_v30 = vld [vmem:[#allocation45_spill] sm:$0xff]  ;;  %v12632_v51 = vadd.f32 %v22148_v46, %v12593_v20 }
 0x88d   :  { %v13870_v45 = vpack.c.bf16 %v12688_v31, %v12687_v28  ;;  %v12195_v32 = vadd.f32 %v22156_v52, %v12156_v43  ;;  %v12157_v2 = vmul.f32 %v16663_v16, %v22143_v49  ;;  %v12598_v4 = vmul.f32 %v22704_v30, %v22130_v11  ;;  %v22705_v43 = vld [vmem:[#allocation51_spill] sm:$0xff]  ;;  %v22710_v30 = vld [vmem:[#allocation60_spill] sm:$0xff] }
 0x88e   :  { %13939 = vst [vmem:[%s22403_s10 + $0xb8] sm:$0xff] %v13875_v24   ;;  %v12661_v63 = vadd.f32 %v12629_v12, %v12197_v38  ;;  %v12198_v0 = vadd.f32 %v22156_v52, %v12159_v1  ;;  %v12596_v18 = vmul.f32 %v22130_v11, %v22705_v43  ;;  %v12634_v38 = vadd.f32 %v22148_v46, %v12595_v15 }
 0x88f   :  { %13938 = vst [vmem:[%s22403_s10 + $0xb0] sm:$0xff] %v13870_v45   ;;  %v12659_v9 = vadd.f32 %v12627_v19, %v12195_v32  ;;  %v12196_v54 = vadd.f32 %v22156_v52, %v12157_v2  ;;  %v16242_v56 = vpop.f32.mrb[212].mxu0  ;;  %v12637_v6 = vadd.f32 %v22148_v46, %v12598_v4  ;;  %v12603_v4 = vmul.f32 %v22710_v30, %v22130_v11 }
 0x890   :  { %v12662_v62 = vadd.f32 %v12630_v58, %v12198_v0  ;;  %v16666_v7 = vadd.f32 %v22699_v41, %v16242_v56  ;;  %v12054_v60 = vpop.f32.mrb[213].mxu0  ;;  %v12693_v35 = vmax.f32 %v12661_v63, 0.0  ;;  %v22706_v63 = vld [vmem:[#allocation46_spill] sm:$0xff]  ;;  %v22707_v56 = vld [vmem:[#allocation31_spill] sm:$0xff] }
 0x891   :  { %v12660_v8 = vadd.f32 %v12628_v34, %v12196_v54  ;;  %v16669_v33 = vadd.f32 %v22701_v21, %v12054_v60  ;;  %v16243_v48 = vpop.f32.mrb[214].mxu0  ;;  %v12691_v61 = vmax.f32 %v12659_v9, 0.0  ;;  %v12599_v0 = vmul.f32 %v22706_v63, %v22130_v11 }
 0x892   :  { %v12694_v44 = vmax.f32 %v12662_v62, 0.0  ;;  %v12162_v12 = vmul.f32 %v16666_v7, %v22143_v49  ;;  %v16672_v47 = vadd.f32 %v22107_v29, %v16243_v48  ;;  %v12057_v39 = vpop.f32.mrb[215].mxu0  ;;  %v12635_v54 = vadd.f32 %v22148_v46, %v12596_v18  ;;  %v22708_v48 = vld [vmem:[#allocation48_spill] sm:$0xff] }
 0x893   :  { %v12692_v59 = vmax.f32 %v12660_v8, 0.0  ;;  %v12160_v19 = vmul.f32 %v16669_v33, %v22143_v49  ;;  %v16675_v26 = vadd.f32 %v22703_v5, %v12057_v39  ;;  %v12597_v62 = vmul.f32 %v22130_v11, %v22707_v56  ;;  %v22711_v18 = vld [vmem:[#allocation36_spill] sm:$0xff] }
 0x894   :  { %v13885_v42 = vpack.c.bf16 %v12694_v44, %v12693_v35  ;;  %v12201_v22 = vadd.f32 %v22156_v52, %v12162_v12  ;;  %v12163_v14 = vmul.f32 %v16672_v47, %v22143_v49  ;;  %v12602_v36 = vmul.f32 %v22708_v48, %v22130_v11  ;;  %v22709_v44 = vld [vmem:[#allocation55_spill] sm:$0xff] }
 0x895   :  { %v13880_v28 = vpack.c.bf16 %v12692_v59, %v12691_v61  ;;  %v12199_v31 = vadd.f32 %v22156_v52, %v12160_v19  ;;  %v12161_v29 = vmul.f32 %v16675_v26, %v22143_v49  ;;  %v12600_v12 = vmul.f32 %v22130_v11, %v22709_v44 }
 0x896   :  { %13941 = vst [vmem:[%s22403_s10 + $0xc8] sm:$0xff] %v13885_v42   ;;  %v12665_v16 = vadd.f32 %v12633_v50, %v12201_v22  ;;  %v12202_v24 = vadd.f32 %v22156_v52, %v12163_v14  ;;  %v12638_v39 = vadd.f32 %v22148_v46, %v12599_v0  ;;  %v12636_v19 = vadd.f32 %v22148_v46, %v12597_v62 }
 0x897   :  { %13940 = vst [vmem:[%s22403_s10 + $0xc0] sm:$0xff] %v13880_v28   ;;  %v12663_v1 = vadd.f32 %v12631_v13, %v12199_v31  ;;  %v12200_v53 = vadd.f32 %v22156_v52, %v12161_v29  ;;  %v16246_v45 = vpop.f32.mrb[216].mxu0  ;;  %v12641_v22 = vadd.f32 %v22148_v46, %v12602_v36  ;;  %v12639_v29 = vadd.f32 %v22148_v46, %v12600_v12 }
 0x898   :  { %v12666_v32 = vadd.f32 %v12634_v38, %v12202_v24  ;;  %v16678_v2 = vadd.f32 %v22116_v3, %v16246_v45  ;;  %v12070_v27 = vpop.f32.mrb[217].mxu0  ;;  %v12697_v41 = vmax.f32 %v12665_v16, 0.0  ;;  %v12601_v16 = vmul.f32 %v22130_v11, %v22711_v18 }
 0x899   :  { %v12664_v58 = vadd.f32 %v12632_v51, %v12200_v53  ;;  %v16681_v9 = vadd.f32 %v22110_v55, %v12070_v27  ;;  %v16247_v34 = vpop.f32.mrb[218].mxu0  ;;  %v12695_v37 = vmax.f32 %v12663_v1, 0.0 }
 0x89a   :  { %v12698_v7 = vmax.f32 %v12666_v32, 0.0  ;;  %v12166_v50 = vmul.f32 %v16678_v2, %v22143_v49  ;;  %v16684_v3 = vadd.f32 %v22119_v23, %v16247_v34  ;;  %v12073_v60 = vpop.f32.mrb[219].mxu0  ;;  %v12640_v34 = vadd.f32 %v22148_v46, %v12601_v16 }
 0x89b   :  { %v12696_v15 = vmax.f32 %v12664_v58, 0.0  ;;  %v12164_v8 = vmul.f32 %v16681_v9, %v22143_v49  ;;  %v16687_v21 = vadd.f32 %v22113_v57, %v12073_v60  ;;  %v12642_v9 = vadd.f32 %v22148_v46, %v12603_v4 }
 0x89c   :  { %v13895_v55 = vpack.c.bf16 %v12698_v7, %v12697_v41  ;;  %v12205_v33 = vadd.f32 %v22156_v52, %v12166_v50  ;;  %v12167_v13 = vmul.f32 %v16684_v3, %v22143_v49 }
 0x89d   :  { %v13890_v20 = vpack.c.bf16 %v12696_v15, %v12695_v37  ;;  %v12203_v35 = vadd.f32 %v22156_v52, %v12164_v8  ;;  %v12165_v23 = vmul.f32 %v16687_v21, %v22143_v49 }
 0x89e   :  { %13943 = vst [vmem:[%s22403_s10 + $0xd8] sm:$0xff] %v13895_v55   ;;  %v12669_v57 = vadd.f32 %v12637_v6, %v12205_v33  ;;  %v12206_v47 = vadd.f32 %v22156_v52, %v12167_v13 }
 0x89f   :  { %13942 = vst [vmem:[%s22403_s10 + $0xd0] sm:$0xff] %v13890_v20   ;;  %v12667_v61 = vadd.f32 %v12635_v54, %v12203_v35  ;;  %v12204_v59 = vadd.f32 %v22156_v52, %v12165_v23  ;;  %v16250_v5 = vpop.f32.mrb[220].mxu0 }
 0x8a0   :  { %v12670_v26 = vadd.f32 %v12638_v39, %v12206_v47  ;;  %v16690_v42 = vadd.f32 %v22133_v25, %v16250_v5  ;;  %v12086_v14 = vpop.f32.mrb[221].mxu0  ;;  %v12701_v24 = vmax.f32 %v12669_v57, 0.0 }
 0x8a1   :  { %v12668_v28 = vadd.f32 %v12636_v19, %v12204_v59  ;;  %v16693_v31 = vadd.f32 %v22122_v40, %v12086_v14  ;;  %v16251_v43 = vpop.f32.mrb[222].mxu0  ;;  %v12699_v51 = vmax.f32 %v12667_v61, 0.0 }
 0x8a2   :  { %v12702_v38 = vmax.f32 %v12670_v26, 0.0  ;;  %v12170_v1 = vmul.f32 %v16690_v42, %v22143_v49  ;;  %v16696_v25 = vadd.f32 %v22136_v17, %v16251_v43  ;;  %v12089_v53 = vpop.f32.mrb[223].mxu0 }
 0x8a3   :  { %v12700_v45 = vmax.f32 %v12668_v28, 0.0  ;;  %v12168_v32 = vmul.f32 %v16693_v31, %v22143_v49  ;;  %v16699_v2 = vadd.f32 %v22125_v10, %v12089_v53 }
 0x8a4   :  { %v13905_v40 = vpack.c.bf16 %v12702_v38, %v12701_v24  ;;  %v12209_v6 = vadd.f32 %v22156_v52, %v12170_v1  ;;  %v12171_v27 = vmul.f32 %v16696_v25, %v22143_v49 }
 0x8a5   :  { %v13900_v63 = vpack.c.bf16 %v12700_v45, %v12699_v51  ;;  %v12207_v11 = vadd.f32 %v22156_v52, %v12168_v32  ;;  %v12169_v0 = vmul.f32 %v16699_v2, %v22143_v49 }
 0x8a6   :  { %13945 = vst [vmem:[%s22403_s10 + $0xe8] sm:$0xff] %v13905_v40   ;;  %v12673_v17 = vadd.f32 %v12641_v22, %v12209_v6  ;;  %v12210_v58 = vadd.f32 %v22156_v52, %v12171_v27 }
 0x8a7   :  { %13944 = vst [vmem:[%s22403_s10 + $0xe0] sm:$0xff] %v13900_v63   ;;  %v12671_v10 = vadd.f32 %v12639_v29, %v12207_v11  ;;  %v12208_v54 = vadd.f32 %v22156_v52, %v12169_v0 }
 0x8a8   :  { %v12674_v56 = vadd.f32 %v12642_v9, %v12210_v58  ;;  %v12705_v62 = vmax.f32 %v12673_v17, 0.0 }
 0x8a9   :  { %v12672_v49 = vadd.f32 %v12640_v34, %v12208_v54  ;;  %v12703_v7 = vmax.f32 %v12671_v10, 0.0 }
 0x8aa   :  { %v12706_v41 = vmax.f32 %v12674_v56, 0.0 }
 0x8ab   :  { %v12704_v50 = vmax.f32 %v12672_v49, 0.0 }
 0x8ac   :  { %v13915_v3 = vpack.c.bf16 %v12706_v41, %v12705_v62 }
 0x8ad   :  { %v13910_v60 = vpack.c.bf16 %v12704_v50, %v12703_v7 }
 0x8ae   :  { %13947 = vst [vmem:[%s22403_s10 + $0xf8] sm:$0xff] %v13915_v3  }
 0x8af   :  { %13946 = vst [vmem:[%s22403_s10 + $0xf0] sm:$0xff] %v13910_v60  }
 0x8b0   :  { %12872 = vsyncpa [#allocation5], 1 }

</bundles_post_ra>
